<compile_context>
chip_gen: v7x
topology: tpu7x:2x2x1
jax: 0.10.0
libtpu: 0.0.40
codegen_flags: <defaults>
</compile_context>

<pallas_src>
import numpy as np
import jax
import jax.numpy as jnp
from jax.experimental import pallas as pl
from jax.experimental.pallas import tpu as pltpu


# ----------------------------------------------------------------------------
# Pallas kernel: fused conv1x1 heads -> max_k -> LSTM gate math, per batch.
# ----------------------------------------------------------------------------
def motion_lstm_kernel(x_ref, f_ref, w_ref, wf_ref, b_ref, h1_ref, c1_ref):
    N, K, C = x_ref.shape          # x: [N, K, 4 + 2H]  (nn_group | nn_H0 | nn_C0)
    H = h1_ref.shape[0]            # hidden size
    H5 = w_ref.shape[1]            # 5*H, packed column order: I | F | O | C1_1 | C0

    # (1) One fused MXU matmul for all five 1x1-conv heads (block-diag weight).
    x = x_ref[...].reshape(N * K, C)                                    # bf16 [N*K, C]
    y = jnp.dot(x, w_ref[...], preferred_element_type=jnp.float32)     # f32  [N*K, 5H]

    # (2) Single max over the K neighbours (clean sublane-group reduce: K=8).
    y = jnp.max(y.reshape(N, K, H5), axis=1)                            # [N, 5H]

    # (3) Feature term + bias are constant over k -> added after the reduction.
    y = y + jnp.dot(f_ref[...], wf_ref[...], preferred_element_type=jnp.float32)
    y = y + b_ref[...]                                                  # [N, 5H]

    # (4) One transpose so the gate math and the stores are lane-dense over N
    #     and the outputs land directly in the PyTorch [B, H, N] layout.
    yt = jnp.transpose(y)                                               # [5H, N]

    gate_i = jax.nn.sigmoid(yt[0 * H:1 * H])                            # [H, N]
    gate_f = jax.nn.sigmoid(yt[1 * H:2 * H])
    gate_o = jax.nn.sigmoid(yt[2 * H:3 * H])
    c1_1 = jnp.tanh(yt[3 * H:4 * H])
    c1_0 = yt[4 * H:5 * H]                                              # no activation

    c1 = gate_f * c1_0 + gate_i * c1_1
    h1 = gate_o * jnp.tanh(c1)

    c1_ref[...] = c1.astype(c1_ref.dtype)
    h1_ref[...] = h1.astype(h1_ref.dtype)


def motion_lstm_pallas(x_all, feats, W_all, W_f, b_all, hidden_size,
                       compute_dtype=jnp.bfloat16):
    """x_all: [B,N,K,4+2H], feats: [B,N,F] -> (H1, C1) each [B,H,N] (f32)."""
    B, N, K, C = x_all.shape
    F = feats.shape[-1]
    H = hidden_size
    H5 = W_all.shape[-1]

    # bf16 matmul inputs (f32 accumulation inside the kernel): halves input DMA
    # bytes and doubles MXU throughput on v6e/v7x.
    x_all = x_all.astype(compute_dtype)
    feats = feats.astype(compute_dtype)
    W_all = W_all.astype(compute_dtype)
    W_f = W_f.astype(compute_dtype)
    b_all = b_all.astype(jnp.float32)

    in_specs = [
        pl.BlockSpec((None, N, K, C), lambda b: (b, 0, 0, 0)),   # neighbor tensor
        pl.BlockSpec((None, N, F), lambda b: (b, 0, 0)),         # per-point features
        pl.BlockSpec((C, H5), lambda b: (0, 0)),                 # packed weight
        pl.BlockSpec((F, H5), lambda b: (0, 0)),                 # packed feature weight
        pl.BlockSpec((1, H5), lambda b: (0, 0)),                 # packed bias
    ]
    out_specs = [
        pl.BlockSpec((None, H, N), lambda b: (b, 0, 0)),         # H1: [B, H, N]
        pl.BlockSpec((None, H, N), lambda b: (b, 0, 0)),         # C1: [B, H, N]
    ]
    out_shape = [
        jax.ShapeDtypeStruct((B, H, N), jnp.float32),
        jax.ShapeDtypeStruct((B, H, N), jnp.float32),
    ]
    # grid=(B,) parallel: lets v7x use both TensorCores; on 1-TC v5e/v6e the
    # extra grid step costs only the ~0.35us fixed per-step overhead.
    return pl.pallas_call(
        motion_lstm_kernel,
        grid=(B,),
        in_specs=in_specs,
        out_specs=out_specs,
        out_shape=out_shape,
        compiler_params=pltpu.CompilerParams(dimension_semantics=("parallel",)),
    )(x_all, feats, W_all, W_f, b_all)


# ----------------------------------------------------------------------------
# Weight packing: five torch Conv2d-1x1 heads -> one block-diag [4+2H, 5H]
# matrix (applied to [nn_group|nn_H0|nn_C0]), one [F, 5H] feature matrix and
# one [1, 5H] bias.  Column order: I | F | O | C1_1 | C0.
# ----------------------------------------------------------------------------
def pack_params(params, hidden_size):
    H = hidden_size
    Dg = 4 + H                                     # [nn_group | nn_H0] rows of x1
    w_gates = jnp.concatenate(
        [params["wI"], params["wF"], params["wO"], params["wC1"]], axis=1)   # [4+H+F, 4H]
    F = w_gates.shape[0] - Dg
    wc0 = params["wC0"]                            # [4+H, H], rows = [nn_group | nn_C0]

    C = 4 + 2 * H
    W_all = jnp.zeros((C, 5 * H), jnp.float32)
    W_all = W_all.at[:Dg, :4 * H].set(w_gates[:Dg])        # gates: nn_group + nn_H0 rows
    W_all = W_all.at[:4, 4 * H:].set(wc0[:4])              # C0 head: nn_group rows
    W_all = W_all.at[Dg:, 4 * H:].set(wc0[4:])             # C0 head: nn_C0 rows

    W_f = jnp.zeros((F, 5 * H), jnp.float32).at[:, :4 * H].set(w_gates[Dg:])
    b_all = jnp.concatenate([params["bI"], params["bF"], params["bO"],
                             params["bC1"], params["bC0"]], axis=1)          # [1, 5H]
    return W_all, W_f, b_all


# ----------------------------------------------------------------------------
# JAX glue: kNN grouping / gathering (data-dependent indexing).
# ----------------------------------------------------------------------------
def knn_group_jax(points1, points2, k):
    """points1: [B,3,M] anchors, points2: [B,3,N] query set.
    Returns nn_group: [B,M,k,4] (rel xyz + dist), nn_idx: [B,M,k]."""
    p1 = jnp.transpose(points1, (0, 2, 1))  # [B,M,3]
    p2 = jnp.transpose(points2, (0, 2, 1))  # [B,N,3]
    d2 = jnp.sum((p1[:, :, None, :] - p2[:, None, :, :]) ** 2, axis=-1)  # [B,M,N]
    _, nn_idx = jax.lax.top_k(-d2, k)                                    # [B,M,k]
    nn_points = jnp.take_along_axis(p2[:, None, :, :], nn_idx[..., None], axis=2)
    rela_nn = nn_points - p1[:, :, None, :]                              # [B,M,k,3]
    rela_dist = jnp.linalg.norm(rela_nn, axis=-1, keepdims=True)         # [B,M,k,1]
    nn_group = jnp.concatenate([rela_nn, rela_dist], axis=-1)            # [B,M,k,4]
    return nn_group, nn_idx


def knn_gather_jax(feats_bnc, nn_idx):
    """feats_bnc: [B,N,C], nn_idx: [B,M,k] -> [B,M,k,C]."""
    return jnp.take_along_axis(feats_bnc[:, None, :, :], nn_idx[..., None], axis=2)


def motion_lstm_forward(params, k, H0, C0, points0, points1, contents1, motions1):
    """PyTorch-layout interface: inputs [B,C,N]; returns H1, C1 as [B,H,N]."""
    hidden = H0.shape[1]
    feats1 = jnp.concatenate([contents1, motions1], axis=1)              # [B,F,N]
    nn_group, nn_idx = knn_group_jax(points1, points0, k)                # [B,N,k,4]
    H0_t = jnp.transpose(H0, (0, 2, 1))                                  # [B,N,H]
    C0_t = jnp.transpose(C0, (0, 2, 1))
    nn_H0 = knn_gather_jax(H0_t, nn_idx)                                 # [B,N,k,H]
    nn_C0 = knn_gather_jax(C0_t, nn_idx)                                 # [B,N,k,H]
    feats_t = jnp.transpose(feats1, (0, 2, 1))                           # [B,N,F]
    # Fused per-(n,k) kernel input; features stay [B,N,F] (constant over k,
    # folded in after the max inside the kernel) — no Kx duplicated slab.
    x_all = jnp.concatenate([nn_group, nn_H0, nn_C0], axis=-1)           # [B,N,k,4+2H]
    W_all, W_f, b_all = pack_params(params, hidden)
    h1, c1 = motion_lstm_pallas(x_all, feats_t, W_all, W_f, b_all, hidden)
    return h1, c1                                                        # [B,H,N] each


# ----------------------------------------------------------------------------
# Deterministic parameter init (same shapes as torch Conv2d 1x1 layers).
# ----------------------------------------------------------------------------
def init_params(key, content_size, motion_size, hidden_size):
    feat = content_size + motion_size
    d1 = hidden_size + feat + 4
    d2 = hidden_size + 4
    keys = jax.random.split(key, 10)

    def conv(kw, kb, din, dout):
        bound = 1.0 / np.sqrt(din)
        w = jax.random.uniform(kw, (din, dout), jnp.float32, -bound, bound)
        b = jax.random.uniform(kb, (1, dout), jnp.float32, -bound, bound)
        return w, b

    wI, bI = conv(keys[0], keys[1], d1, hidden_size)
    wF, bF = conv(keys[2], keys[3], d1, hidden_size)
    wO, bO = conv(keys[4], keys[5], d1, hidden_size)
    wC0, bC0 = conv(keys[6], keys[7], d2, hidden_size)
    wC1, bC1 = conv(keys[8], keys[9], d1, hidden_size)
    return dict(wI=wI, bI=bI, wF=wF, bF=bF, wO=wO, bO=bO,
                wC0=wC0, bC0=bC0, wC1=wC1, bC1=bC1)


# ----------------------------------------------------------------------------
# Pure-JAX reference of the original (unfused) module math, with the same
# bf16 rounding on matmul inputs as the kernel so the comparison is tight.
# ----------------------------------------------------------------------------
def ref_kernel_math(x1, x2, p, compute_dtype=jnp.bfloat16):
    def head(x, w, b):
        xq = x.astype(compute_dtype).astype(jnp.float32)
        wq = w.astype(compute_dtype).astype(jnp.float32)
        y = jnp.einsum("bnkd,dh->bnkh", xq, wq,
                       precision=jax.lax.Precision.HIGHEST) + b[0]
        return jnp.max(y, axis=2)
    gi = jax.nn.sigmoid(head(x1, p["wI"], p["bI"]))
    gf = jax.nn.sigmoid(head(x1, p["wF"], p["bF"]))
    go = jax.nn.sigmoid(head(x1, p["wO"], p["bO"]))
    c10 = head(x2, p["wC0"], p["bC0"])
    c11 = jnp.tanh(head(x1, p["wC1"], p["bC1"]))
    c1 = gf * c10 + gi * c11
    h1 = go * jnp.tanh(c1)
    return h1, c1


if __name__ == "__main__":
    B, N = 2, 128
    K = 8
    content_size, motion_size, hidden_size = 8, 8, 32

    key = jax.random.PRNGKey(0)
    k_par, k_h, k_c, k_p0, k_p1, k_ct, k_mo = jax.random.split(key, 7)

    params = init_params(k_par, content_size, motion_size, hidden_size)

    H0 = jax.random.normal(k_h, (B, hidden_size, N), jnp.float32)
    C0 = jax.random.normal(k_c, (B, hidden_size, N), jnp.float32)
    points0 = jax.random.normal(k_p0, (B, 3, N), jnp.float32)
    points1 = jax.random.normal(k_p1, (B, 3, N), jnp.float32)
    contents1 = jax.random.normal(k_ct, (B, content_size, N), jnp.float32)
    motions1 = jax.random.normal(k_mo, (B, motion_size, N), jnp.float32)

    H1, C1 = jax.jit(motion_lstm_forward, static_argnums=1)(
        params, K, H0, C0, points0, points1, contents1, motions1)
    jax.block_until_ready((H1, C1))
    assert H1.shape == (B, hidden_size, N) and C1.shape == (B, hidden_size, N)

    # sanity check against a pure-JAX reference of the original module math
    feats1 = jnp.concatenate([contents1, motions1], axis=1)
    nn_group, nn_idx = knn_group_jax(points1, points0, K)
    nn_H0 = knn_gather_jax(jnp.transpose(H0, (0, 2, 1)), nn_idx)
    nn_C0 = knn_gather_jax(jnp.transpose(C0, (0, 2, 1)), nn_idx)
    feats_t = jnp.transpose(feats1, (0, 2, 1))
    feats_tk = jnp.broadcast_to(feats_t[:, :, None, :], (B, N, K, feats_t.shape[-1]))
    x1 = jnp.concatenate([nn_group, nn_H0, feats_tk], axis=-1)
    x2 = jnp.concatenate([nn_group, nn_C0], axis=-1)
    h1_ref, c1_ref = ref_kernel_math(x1, x2, params)
    np.testing.assert_allclose(np.asarray(H1),
                               np.asarray(jnp.transpose(h1_ref, (0, 2, 1))),
                               rtol=1e-2, atol=1e-2)
    np.testing.assert_allclose(np.asarray(C1),
                               np.asarray(jnp.transpose(c1_ref, (0, 2, 1))),
                               rtol=1e-2, atol=1e-2)

    print("KERNEL_OK")
</pallas_src>

<mosaic_0001>
module attributes {stable_mosaic.version = 11 : i64} {
  func.func @motion_lstm_kernel(%arg0: i32, %arg1: memref<1x128x8x68xbf16, #tpu.memory_space<vmem>>, %arg2: memref<1x128x16xbf16, #tpu.memory_space<vmem>>, %arg3: memref<68x160xbf16, #tpu.memory_space<vmem>>, %arg4: memref<16x160xbf16, #tpu.memory_space<vmem>>, %arg5: memref<1x160xf32, #tpu.memory_space<vmem>>, %arg6: memref<1x32x128xf32, #tpu.memory_space<vmem>>, %arg7: memref<1x32x128xf32, #tpu.memory_space<vmem>>) attributes {dimension_semantics = [#tpu.dimension_semantics<parallel>], iteration_bounds = array<i64: 2>, scalar_prefetch = 0 : i64, scratch_operands = 0 : i64, tpu.core_type = #tpu.core_type<tc>, window_params = [{transform_indices = @transform_0, window_bounds = array<i64: 1, 128, 8, 68>}, {transform_indices = @transform_1, window_bounds = array<i64: 1, 128, 16>}, {pipeline_mode = #tpu.pipeline_mode<synchronous>, transform_indices = @transform_2, window_bounds = array<i64: 68, 160>}, {pipeline_mode = #tpu.pipeline_mode<synchronous>, transform_indices = @transform_3, window_bounds = array<i64: 16, 160>}, {pipeline_mode = #tpu.pipeline_mode<synchronous>, transform_indices = @transform_4, window_bounds = array<i64: 1, 160>}, {transform_indices = @transform_5, window_bounds = array<i64: 1, 32, 128>}, {transform_indices = @transform_6, window_bounds = array<i64: 1, 32, 128>}]} {
    %c0 = arith.constant 0 : index
    %c0_0 = arith.constant 0 : index
    %c0_1 = arith.constant 0 : index
    %c0_2 = arith.constant 0 : index
    %0 = vector.load %arg1[%c0, %c0_0, %c0_1, %c0_2] : memref<1x128x8x68xbf16, #tpu.memory_space<vmem>>, vector<1x128x8x68xbf16>
    %1 = vector.shape_cast %0 : vector<1x128x8x68xbf16> to vector<128x8x68xbf16>
    %2 = vector.shape_cast %1 : vector<128x8x68xbf16> to vector<1024x68xbf16>
    %c0_3 = arith.constant 0 : index
    %c0_4 = arith.constant 0 : index
    %3 = vector.load %arg3[%c0_3, %c0_4] : memref<68x160xbf16, #tpu.memory_space<vmem>>, vector<68x160xbf16>
    %cst = arith.constant dense<0.000000e+00> : vector<1024x160xf32>
    %4 = tpu.matmul %2, %3, %cst {dimension_numbers = #tpu.dot_dimension_numbers<[1], [0], [0], [1], [0, 0, 1, 1], [], []>} : vector<1024x68xbf16>, vector<68x160xbf16>, vector<1024x160xf32> -> vector<1024x160xf32>
    %5 = vector.shape_cast %4 : vector<1024x160xf32> to vector<128x8x160xf32>
    %cst_5 = arith.constant dense<0xFF800000> : vector<128x160xf32>
    %6 = vector.multi_reduction <maximumf>, %5, %cst_5 [1] : vector<128x8x160xf32> to vector<128x160xf32>
    %c0_6 = arith.constant 0 : index
    %c0_7 = arith.constant 0 : index
    %c0_8 = arith.constant 0 : index
    %7 = vector.load %arg2[%c0_6, %c0_7, %c0_8] : memref<1x128x16xbf16, #tpu.memory_space<vmem>>, vector<1x128x16xbf16>
    %8 = vector.shape_cast %7 : vector<1x128x16xbf16> to vector<128x16xbf16>
    %c0_9 = arith.constant 0 : index
    %c0_10 = arith.constant 0 : index
    %9 = vector.load %arg4[%c0_9, %c0_10] : memref<16x160xbf16, #tpu.memory_space<vmem>>, vector<16x160xbf16>
    %cst_11 = arith.constant dense<0.000000e+00> : vector<128x160xf32>
    %10 = tpu.matmul %8, %9, %cst_11 {dimension_numbers = #tpu.dot_dimension_numbers<[1], [0], [0], [1], [0, 0, 1, 1], [], []>} : vector<128x16xbf16>, vector<16x160xbf16>, vector<128x160xf32> -> vector<128x160xf32>
    %11 = arith.addf %6, %10 : vector<128x160xf32>
    %c0_12 = arith.constant 0 : index
    %c0_13 = arith.constant 0 : index
    %12 = vector.load %arg5[%c0_12, %c0_13] : memref<1x160xf32, #tpu.memory_space<vmem>>, vector<1x160xf32>
    %13 = vector.broadcast %12 : vector<1x160xf32> to vector<128x160xf32>
    %14 = arith.addf %11, %13 : vector<128x160xf32>
    %15 = tpu.transpose %14, [1, 0] : vector<128x160xf32> -> vector<160x128xf32>
    %16 = vector.extract_strided_slice %15 {offsets = [0, 0], sizes = [32, 128], strides = [1, 1]} : vector<160x128xf32> to vector<32x128xf32>
    %17 = arith.negf %16 : vector<32x128xf32>
    %18 = math.exp %17 : vector<32x128xf32>
    %cst_14 = arith.constant 1.000000e+00 : f32
    %19 = vector.broadcast %cst_14 : f32 to vector<32x128xf32>
    %20 = arith.addf %19, %18 : vector<32x128xf32>
    %21 = arith.divf %19, %20 : vector<32x128xf32>
    %22 = vector.extract_strided_slice %15 {offsets = [32, 0], sizes = [32, 128], strides = [1, 1]} : vector<160x128xf32> to vector<32x128xf32>
    %23 = arith.negf %22 : vector<32x128xf32>
    %24 = math.exp %23 : vector<32x128xf32>
    %cst_15 = arith.constant 1.000000e+00 : f32
    %25 = vector.broadcast %cst_15 : f32 to vector<32x128xf32>
    %26 = arith.addf %25, %24 : vector<32x128xf32>
    %27 = arith.divf %25, %26 : vector<32x128xf32>
    %28 = vector.extract_strided_slice %15 {offsets = [64, 0], sizes = [32, 128], strides = [1, 1]} : vector<160x128xf32> to vector<32x128xf32>
    %29 = arith.negf %28 : vector<32x128xf32>
    %30 = math.exp %29 : vector<32x128xf32>
    %cst_16 = arith.constant 1.000000e+00 : f32
    %31 = vector.broadcast %cst_16 : f32 to vector<32x128xf32>
    %32 = arith.addf %31, %30 : vector<32x128xf32>
    %33 = arith.divf %31, %32 : vector<32x128xf32>
    %34 = vector.extract_strided_slice %15 {offsets = [96, 0], sizes = [32, 128], strides = [1, 1]} : vector<160x128xf32> to vector<32x128xf32>
    %35 = math.tanh %34 : vector<32x128xf32>
    %36 = vector.extract_strided_slice %15 {offsets = [128, 0], sizes = [32, 128], strides = [1, 1]} : vector<160x128xf32> to vector<32x128xf32>
    %37 = arith.mulf %27, %36 : vector<32x128xf32>
    %38 = arith.mulf %21, %35 : vector<32x128xf32>
    %39 = arith.addf %37, %38 : vector<32x128xf32>
    %40 = math.tanh %39 : vector<32x128xf32>
    %41 = arith.mulf %33, %40 : vector<32x128xf32>
    %c0_17 = arith.constant 0 : index
    %c0_18 = arith.constant 0 : index
    %c0_19 = arith.constant 0 : index
    %42 = vector.load %arg7[%c0_17, %c0_18, %c0_19] : memref<1x32x128xf32, #tpu.memory_space<vmem>>, vector<1x32x128xf32>
    %43 = vector.shape_cast %42 : vector<1x32x128xf32> to vector<32x128xf32>
    %44 = vector.shape_cast %39 : vector<32x128xf32> to vector<1x32x128xf32>
    tpu.vector_store %arg7[%c0_17, %c0_18, %c0_19], %44 {strides = array<i32>} : memref<1x32x128xf32, #tpu.memory_space<vmem>>, vector<1x32x128xf32>,
    %c0_20 = arith.constant 0 : index
    %c0_21 = arith.constant 0 : index
    %c0_22 = arith.constant 0 : index
    %45 = vector.load %arg6[%c0_20, %c0_21, %c0_22] : memref<1x32x128xf32, #tpu.memory_space<vmem>>, vector<1x32x128xf32>
    %46 = vector.shape_cast %45 : vector<1x32x128xf32> to vector<32x128xf32>
    %47 = vector.shape_cast %41 : vector<32x128xf32> to vector<1x32x128xf32>
    tpu.vector_store %arg6[%c0_20, %c0_21, %c0_22], %47 {strides = array<i32>} : memref<1x32x128xf32, #tpu.memory_space<vmem>>, vector<1x32x128xf32>,
    return
  }
  func.func @transform_0(%arg0: i32) -> (i32, i32, i32, i32) {
    %c0_i32 = arith.constant 0 : i32
    %c0_i32_0 = arith.constant 0 : i32
    %c0_i32_1 = arith.constant 0 : i32
    %c0_i32_2 = arith.constant 0 : i32
    return %arg0, %c0_i32, %c0_i32_0, %c0_i32_1 : i32, i32, i32, i32
  }
  func.func @transform_1(%arg0: i32) -> (i32, i32, i32) {
    %c0_i32 = arith.constant 0 : i32
    %c0_i32_0 = arith.constant 0 : i32
    %c0_i32_1 = arith.constant 0 : i32
    return %arg0, %c0_i32, %c0_i32_0 : i32, i32, i32
  }
  func.func @transform_2(%arg0: i32) -> (i32, i32) {
    %c0_i32 = arith.constant 0 : i32
    %c0_i32_0 = arith.constant 0 : i32
    %c0_i32_1 = arith.constant 0 : i32
    return %c0_i32, %c0_i32_0 : i32, i32
  }
  func.func @transform_3(%arg0: i32) -> (i32, i32) {
    %c0_i32 = arith.constant 0 : i32
    %c0_i32_0 = arith.constant 0 : i32
    %c0_i32_1 = arith.constant 0 : i32
    return %c0_i32, %c0_i32_0 : i32, i32
  }
  func.func @transform_4(%arg0: i32) -> (i32, i32) {
    %c0_i32 = arith.constant 0 : i32
    %c0_i32_0 = arith.constant 0 : i32
    %c0_i32_1 = arith.constant 0 : i32
    return %c0_i32, %c0_i32_0 : i32, i32
  }
  func.func @transform_5(%arg0: i32) -> (i32, i32, i32) {
    %c0_i32 = arith.constant 0 : i32
    %c0_i32_0 = arith.constant 0 : i32
    %c0_i32_1 = arith.constant 0 : i32
    return %arg0, %c0_i32, %c0_i32_0 : i32, i32, i32
  }
  func.func @transform_6(%arg0: i32) -> (i32, i32, i32) {
    %c0_i32 = arith.constant 0 : i32
    %c0_i32_0 = arith.constant 0 : i32
    %c0_i32_1 = arith.constant 0 : i32
    return %arg0, %c0_i32, %c0_i32_0 : i32, i32, i32
  }
}

</mosaic_0001>

<bundles_post_ra>
// kernel: neg.1
= control target key start
LH: loop header
LB: loop body
LE: loop exit
PB: predicated region body
PF: predicated region fallthrough
CT: control target
= control target key end

     0   :  { %s520_s0 = inlined_call_operand.vmem [shape: f32[2,128,128], index: 0, kind: input, shape index: {}]   ;;  %s521_s1 = inlined_call_operand.vmem [shape: f32[2,128,128], index: 1, kind: output, shape index: {}]  }
   0x1   :  { %v2_v0 = vld [vmem:[%s520_s0] sm:$0xff]  ;;  %v258_v2 = vld [vmem:[%s520_s0 + $0x8] sm:$0xff]  ;;  %v262_v7 = vld [vmem:[%s520_s0 + $0x10] sm:$0xff] }
   0x2   :  { %v256_v1 = vld [vmem:[%s520_s0 + $0x80] sm:$0xff]  ;;  %v5_v3 = vxor.u32 2147483648, %v2_v0  ;;  %v20_v5 = vxor.u32 2147483648, %v258_v2  ;;  %v260_v6 = vld [vmem:[%s520_s0 + $0x88] sm:$0xff]  ;;  %v264_v8 = vld [vmem:[%s520_s0 + $0x90] sm:$0xff]  ;;  %v36_v10 = vxor.u32 2147483648, %v262_v7 }
   0x3   :  { %v12_v4 = vxor.u32 2147483648, %v256_v1  ;;  %v28_v9 = vxor.u32 2147483648, %v260_v6  ;;  %v44_v11 = vxor.u32 2147483648, %v264_v8  ;;  %v266_v12 = vld [vmem:[%s520_s0 + $0x18] sm:$0xff]  ;;  %v270_v14 = vld [vmem:[%s520_s0 + $0x20] sm:$0xff]  ;;  %v274_v19 = vld [vmem:[%s520_s0 + $0x28] sm:$0xff] }
   0x4   :  { %v268_v13 = vld [vmem:[%s520_s0 + $0x98] sm:$0xff]  ;;  %7 = vst [vmem:[%s521_s1] sm:$0xff] %v5_v3  ;;  %259 = vst [vmem:[%s521_s1 + $0x8] sm:$0xff] %v20_v5  ;;  %v52_v15 = vxor.u32 2147483648, %v266_v12  ;;  %v68_v17 = vxor.u32 2147483648, %v270_v14  ;;  %v272_v18 = vld [vmem:[%s520_s0 + $0xa0] sm:$0xff]  ;;  %v84_v22 = vxor.u32 2147483648, %v274_v19 }
   0x5   :  { %257 = vst [vmem:[%s521_s1 + $0x80] sm:$0xff] %v12_v4  ;;  %v60_v16 = vxor.u32 2147483648, %v268_v13  ;;  %v276_v20 = vld [vmem:[%s520_s0 + $0xa8] sm:$0xff]  ;;  %261 = vst [vmem:[%s521_s1 + $0x88] sm:$0xff] %v28_v9  ;;  %v76_v21 = vxor.u32 2147483648, %v272_v18  ;;  %v278_v24 = vld [vmem:[%s520_s0 + $0x30] sm:$0xff] }
   0x6   :  { %263 = vst [vmem:[%s521_s1 + $0x10] sm:$0xff] %v36_v10  ;;  %265 = vst [vmem:[%s521_s1 + $0x90] sm:$0xff] %v44_v11  ;;  %v92_v23 = vxor.u32 2147483648, %v276_v20  ;;  %v280_v25 = vld [vmem:[%s520_s0 + $0xb0] sm:$0xff]  ;;  %v282_v26 = vld [vmem:[%s520_s0 + $0x38] sm:$0xff]  ;;  %v100_v27 = vxor.u32 2147483648, %v278_v24 }
   0x7   :  { %267 = vst [vmem:[%s521_s1 + $0x18] sm:$0xff] %v52_v15  ;;  %269 = vst [vmem:[%s521_s1 + $0x98] sm:$0xff] %v60_v16  ;;  %v108_v28 = vxor.u32 2147483648, %v280_v25  ;;  %v116_v29 = vxor.u32 2147483648, %v282_v26  ;;  %v284_v30 = vld [vmem:[%s520_s0 + $0xb8] sm:$0xff]  ;;  %v286_v31 = vld [vmem:[%s520_s0 + $0x40] sm:$0xff] }
   0x8   :  { %271 = vst [vmem:[%s521_s1 + $0x20] sm:$0xff] %v68_v17  ;;  %v288_v32 = vld [vmem:[%s520_s0 + $0xc0] sm:$0xff]  ;;  %273 = vst [vmem:[%s521_s1 + $0xa0] sm:$0xff] %v76_v21  ;;  %v124_v33 = vxor.u32 2147483648, %v284_v30  ;;  %v132_v34 = vxor.u32 2147483648, %v286_v31  ;;  %v290_v36 = vld [vmem:[%s520_s0 + $0x48] sm:$0xff] }
   0x9   :  { %275 = vst [vmem:[%s521_s1 + $0x28] sm:$0xff] %v84_v22  ;;  %277 = vst [vmem:[%s521_s1 + $0xa8] sm:$0xff] %v92_v23  ;;  %v140_v35 = vxor.u32 2147483648, %v288_v32  ;;  %v292_v37 = vld [vmem:[%s520_s0 + $0xc8] sm:$0xff]  ;;  %v294_v38 = vld [vmem:[%s520_s0 + $0x50] sm:$0xff]  ;;  %v148_v39 = vxor.u32 2147483648, %v290_v36 }
   0xa   :  { %279 = vst [vmem:[%s521_s1 + $0x30] sm:$0xff] %v100_v27  ;;  %281 = vst [vmem:[%s521_s1 + $0xb0] sm:$0xff] %v108_v28  ;;  %v156_v40 = vxor.u32 2147483648, %v292_v37  ;;  %v164_v41 = vxor.u32 2147483648, %v294_v38  ;;  %v296_v42 = vld [vmem:[%s520_s0 + $0xd0] sm:$0xff]  ;;  %v298_v43 = vld [vmem:[%s520_s0 + $0x58] sm:$0xff] }
   0xb   :  { %283 = vst [vmem:[%s521_s1 + $0x38] sm:$0xff] %v116_v29  ;;  %v300_v44 = vld [vmem:[%s520_s0 + $0xd8] sm:$0xff]  ;;  %285 = vst [vmem:[%s521_s1 + $0xb8] sm:$0xff] %v124_v33  ;;  %v172_v45 = vxor.u32 2147483648, %v296_v42  ;;  %v180_v46 = vxor.u32 2147483648, %v298_v43  ;;  %v302_v48 = vld [vmem:[%s520_s0 + $0x60] sm:$0xff] }
   0xc   :  { %287 = vst [vmem:[%s521_s1 + $0x40] sm:$0xff] %v132_v34  ;;  %289 = vst [vmem:[%s521_s1 + $0xc0] sm:$0xff] %v140_v35  ;;  %v188_v47 = vxor.u32 2147483648, %v300_v44  ;;  %v304_v49 = vld [vmem:[%s520_s0 + $0xe0] sm:$0xff]  ;;  %v306_v50 = vld [vmem:[%s520_s0 + $0x68] sm:$0xff]  ;;  %v196_v51 = vxor.u32 2147483648, %v302_v48 }
   0xd   :  { %291 = vst [vmem:[%s521_s1 + $0x48] sm:$0xff] %v148_v39  ;;  %293 = vst [vmem:[%s521_s1 + $0xc8] sm:$0xff] %v156_v40  ;;  %v204_v52 = vxor.u32 2147483648, %v304_v49  ;;  %v212_v53 = vxor.u32 2147483648, %v306_v50  ;;  %v308_v54 = vld [vmem:[%s520_s0 + $0xe8] sm:$0xff]  ;;  %v310_v55 = vld [vmem:[%s520_s0 + $0x70] sm:$0xff] }
   0xe   :  { %295 = vst [vmem:[%s521_s1 + $0x50] sm:$0xff] %v164_v41  ;;  %v312_v56 = vld [vmem:[%s520_s0 + $0xf0] sm:$0xff]  ;;  %297 = vst [vmem:[%s521_s1 + $0xd0] sm:$0xff] %v172_v45  ;;  %v220_v57 = vxor.u32 2147483648, %v308_v54  ;;  %v228_v58 = vxor.u32 2147483648, %v310_v55  ;;  %v314_v60 = vld [vmem:[%s520_s0 + $0x78] sm:$0xff] }
   0xf   :  { %299 = vst [vmem:[%s521_s1 + $0x58] sm:$0xff] %v180_v46  ;;  %301 = vst [vmem:[%s521_s1 + $0xd8] sm:$0xff] %v188_v47  ;;  %v236_v59 = vxor.u32 2147483648, %v312_v56  ;;  %v316_v61 = vld [vmem:[%s520_s0 + $0xf8] sm:$0xff]  ;;  %v244_v62 = vxor.u32 2147483648, %v314_v60 }
  0x10   :  { %303 = vst [vmem:[%s521_s1 + $0x60] sm:$0xff] %v196_v51  ;;  %305 = vst [vmem:[%s521_s1 + $0xe0] sm:$0xff] %v204_v52  ;;  %v252_v63 = vxor.u32 2147483648, %v316_v61 }
  0x11   :  { %307 = vst [vmem:[%s521_s1 + $0x68] sm:$0xff] %v212_v53  ;;  %309 = vst [vmem:[%s521_s1 + $0xe8] sm:$0xff] %v220_v57 }
  0x12   :  { %311 = vst [vmem:[%s521_s1 + $0x70] sm:$0xff] %v228_v58  ;;  %313 = vst [vmem:[%s521_s1 + $0xf0] sm:$0xff] %v236_v59 }
  0x13   :  { %315 = vst [vmem:[%s521_s1 + $0x78] sm:$0xff] %v244_v62  ;;  %317 = vst [vmem:[%s521_s1 + $0xf8] sm:$0xff] %v252_v63 }

// kernel: motion_lstm_forward.1
= control target key start
LH: loop header
LB: loop body
LE: loop exit
PB: predicated region body
PF: predicated region fallthrough
CT: control target
= control target key end

     0   :  { %12 = vsyncpa [#allocation3], 0  ;;  %s9559_s0 = inlined_call_operand.vmem [shape: bf16[2,128,8,68], index: 0, kind: input, shape index: {}]   ;;  %s9560_s1 = inlined_call_operand.vmem [shape: bf16[2,128,16], index: 1, kind: input, shape index: {}]   ;;  %s9561_s2 = inlined_call_operand.vmem [shape: bf16[68,160], index: 2, kind: input, shape index: {}]   ;;  %s9562_s3 = inlined_call_operand.vmem [shape: bf16[16,160], index: 3, kind: input, shape index: {}]   ;;  %s9563_s4 = inlined_call_operand.vmem [shape: f32[1,160], index: 4, kind: input, shape index: {}]   ;;  %s9564_s5 = inlined_call_operand.hbm [shape: f32[2,32,128], index: 5, kind: output, shape index: {0}]   ;;  %s9565_s6 = inlined_call_operand.hbm [shape: f32[2,32,128], index: 6, kind: output, shape index: {1}]  }
   0x1   :  { %14 = vsyncpa [#allocation3 + $0x1], 0 }
   0x2   :  { %15 = vsyncpa [#allocation5], 0 }
   0x3   :  { %17 = vsyncpa [#allocation5 + $0x1], 0  ;;  %s6153_s21 = smov 0   ;;  %s6155_s22 = smov 0  }
   0x4   :  { %s6157_s23 = smov 0   ;;  %s6159_s24 = smov 0  }
   0x5 LB: > { %s6174_s25 = sadd.s32 4294967295, %s6111_s24   ;;  %s5616_s26 = sadd.s32 4294967294, %s6111_s24   ;;  %s6111_s24 = sphi %s6159_s24, %s10421_s24   ;;  %s6107_s23 = sphi %s6157_s23, %s10420_s23   ;;  %s6103_s22 = sphi %s6155_s22, %s10419_s22   ;;  %s6099_s21 = sphi %s6153_s21, %s10418_s21  }
   0x6   : > { %s6178_s27 = sadd.s32 1, %s6111_s24   ;;  %s145_s28 = sadd.s32 1, %s6107_s23 }
   0x7   : > { %s142_s29 = ssub.s32 %s6111_s24, %s6178_s27  ;;  %p155_p0 = scmp.ne.s32.totalorder %s6107_s23, %s6103_s22 }
   0x8   : > { %p143_p1 = scmp.eq.s32.totalorder %s142_s29, 0  ;;  %p156_p2 = scmp.eq.s32.totalorder %s6174_s25, 1 }
   0x9   : > { %p161_p3 = scmp.ne.s32.totalorder %s6103_s22, %s6099_s21  ;;  %p162_p4 = scmp.eq.s32.totalorder %s5616_s26, 1 }
   0xa   : > { %s6189_s30 = scalar_select %p143_p1, %s6107_s23, %s145_s28  }
   0xb   : > { %p6191_p5 = por %p156_p2, %p155_p0  ;;  %p6195_p6 = por %p162_p4, %p161_p3 }
   0xc   : > { %p5619_p7 = scmp.ge.s32.totalorder %s6111_s24, 1  ;;  %p231_p8 = scmp.lt.s32.totalorder %s6111_s24, 3 }
   0xe   : > { %p232_p9 = pnand %p5619_p7, %p231_p8 }
  0x10   : > { %235 = sbr.rel (%p232_p9) target bundleno = 1159 (0x487), region = 40 }
  0x17   : > { %v5864_v0 = vld [vmem:[%s9561_s2 + $0x4] ss:$8 sps:$4 sm:$0xff]   ;;  %v5866_v1 = vld [vmem:[%s9561_s2] ss:$8 sps:$4 sm:$0xff]   ;;  %v9566_v2 = vmov 0   ;;  %p271_p10 = scmp.lt.s32.totalorder %s6174_s25, 1 }
  0x18   : > { %1016 = vmatprep.mubr.bf16.mxu0 %v9566_v2  ;;  %1376 = vmatprep.mubr.bf16.mxu1 %v9566_v2  ;;  %v5867_v3 = vld [vmem:[%s9561_s2 + $0x14] ss:$8 sps:$4 sm:$0xff]   ;;  %v5869_v4 = vld [vmem:[%s9561_s2 + $0x10] ss:$8 sps:$4 sm:$0xff]   ;;  %v5870_v5 = vld [vmem:[%s9561_s2 + $0x24] ss:$8 sps:$4 sm:$0xff]  }
  0x19   : > { %984 = vmatprep.subr.bf16.mxu0 %v5864_v0  ;;  %5807 = vmatprep.subr.bf16.mxu1 %v5864_v0  ;;  %s6217_s17 = scalar_select %p271_p10, %s6174_s25, 1  ;;  %v5872_v6 = vld [vmem:[%s9561_s2 + $0x20] ss:$8 sps:$4 sm:$0xff]   ;;  %v5873_v7 = vld [vmem:[%s9561_s2 + $0x34] ss:$8 sps:$4 sm:$0xff]   ;;  %vm977_vm0 = vcmask 1041408  }
  0x1a   : > { %985 = vmatpush1.bf16.msra.mxu0 %v5866_v1  ;;  %5812 = vmatpush1.bf16.msra.mxu1 %v5866_v1  ;;  %v418_v8 = vld [vmem:[%s9561_s2 + $0x40] sm:$0x33]  ;;  %v5875_v9 = vld [vmem:[%s9561_s2 + $0x30] ss:$8 sps:$4 sm:$0xff]   ;;  %vm784_vm1 = vcmask 556032   ;;  %vm1663_vm2 = vcmask 261120  }
  0x1b   : > { %986 = vmatprep.subr.bf16.mxu0 %v5867_v3  ;;  %5808 = vmatprep.subr.bf16.mxu1 %v5867_v3  ;;  %s5803_s20 = sshll.u32 %s6217_s17, 9  ;;  %v5699_v10 = vcombine.high %v418_v8, %v418_v8  ;;  %v5698_v11 = vcombine.low %v418_v8, %v418_v8  ;;  %v5888_v12 = vld [vmem:[%s9562_s3 + $0x4] ss:$8 sps:$4 sm:$0xff]   ;;  %v5886_v16 = vld [vmem:[%s9562_s3] ss:$8 sps:$4 sm:$0xff]   ;;  %s5804_s28 = sshll.u32 %s6217_s17, 6 }
  0x1c   : > { %s6226_s29 = scalar_lea.vmem %s9559_s0, %s5803_s20  ;;  %s6324_s11 = scalar_lea.vmem %s9560_s1, %s5804_s28  ;;  %vm3390_vm3 = vcmask 130048   ;;  %vm4821_vm4 = vcmask 1041409   ;;  %vm4824_vm5 = vcmask 1042434   ;;  %vm4827_vm6 = vcmask 1043459  }
  0x1d   : > { %v979_v13 = vsel %vm977_vm0, %v5698_v11, 0  ;;  %v5878_v14 = vld [vmem:[%s6226_s29] sm:$0xff]   ;;  %v5880_v17 = vld [vmem:[%s6226_s29 + $0x8] sm:$0xff]   ;;  %v5882_v19 = vld [vmem:[%s6226_s29 + $0x10] sm:$0xff]   ;;  %vm4830_vm7 = vcmask 1044484   ;;  %vm4833_vm8 = vcmask 1045509  }
  0x1e   : > { %987 = vmatpush1.bf16.msra.mxu0 %v5869_v4  ;;  %5813 = vmatpush1.bf16.msra.mxu1 %v5869_v4  ;;  %v5879_v15 = vld [vmem:[%s6226_s29 + $0x120] sm:$0xff]   ;;  %v5881_v18 = vld [vmem:[%s6226_s29 + $0x128] sm:$0xff]   ;;  %v5883_v20 = vld [vmem:[%s6226_s29 + $0x130] sm:$0xff]   ;;  %vm4836_vm9 = vcmask 1046534   ;;  %vm4839_vm10 = vcmask 1047559   ;;  %s9448_s12 = sand.u32 1, %s6103_s22  }
  0x1f   : > { %988 = vmatprep.subr.bf16.mxu0 %v5870_v5  ;;  %5809 = vmatprep.subr.bf16.mxu1 %v5870_v5  ;;  %v5884_v21 = vld [vmem:[%s6226_s29 + $0x18] sm:$0xff]   ;;  %v5889_v23 = vld [vmem:[%s6226_s29 + $0x20] sm:$0xff]   ;;  %v5891_v25 = vld [vmem:[%s6226_s29 + $0x28] sm:$0xff]   ;;  %s5620_s13 = sshll.u32 %s9448_s12, 5  ;;  %s5805_s15 = sshll.u32 %s6174_s25, 9 }
  0x20   : > { %v5885_v22 = vld [vmem:[%s6226_s29 + $0x138] sm:$0xff]   ;;  %v5890_v24 = vld [vmem:[%s6226_s29 + $0x140] sm:$0xff]   ;;  %v5892_v26 = vld [vmem:[%s6226_s29 + $0x148] sm:$0xff]   ;;  %s9453_s14 = scalar_lea.vmem [#allocation4], %s5620_s13  ;;  %s9465_s20 = scalar_lea.hbm %s9565_s6, %s5805_s15 }
  0x21   : > { %v5893_v27 = vld [vmem:[%s6226_s29 + $0x30] sm:$0xff]   ;;  %v5895_v29 = vld [vmem:[%s6226_s29 + $0x38] sm:$0xff]   ;;  %v5897_v31 = vld [vmem:[%s6226_s29 + $0x40] sm:$0xff]   ;;  %s5510_s16 = sshll.u32 %s9453_s14, 4  ;;  %s9472_s26 = scalar_lea.vmem [#allocation2], %s5620_s13  ;;  %s9467_s16 = int_to_ptr.vmem [resolvable:$true] %s5510_s16 }
  0x22   : > { %989 = vmatpush1.bf16.msra.mxu0 %v5872_v6  ;;  %5814 = vmatpush1.bf16.msra.mxu1 %v5872_v6  ;;  %v5894_v28 = vld [vmem:[%s6226_s29 + $0x150] sm:$0xff]   ;;  %v5896_v30 = vld [vmem:[%s6226_s29 + $0x158] sm:$0xff]   ;;  %v5898_v32 = vld [vmem:[%s6226_s29 + $0x160] sm:$0xff]   ;;  %s5481_s28 = scalar_lea.sflag [#allocation5], %s9448_s12  ;;  %s6017_s9 = scalar_lea.vmem %s9467_s16, 512 }
  0x23   : > { %990 = vmatprep.subr.bf16.mxu0 %v5873_v7  ;;  %5810 = vmatprep.subr.bf16.mxu1 %v5873_v7  ;;  %v5899_v33 = vld [vmem:[%s6226_s29 + $0x48] sm:$0xff]   ;;  %v5901_v35 = vld [vmem:[%s6226_s29 + $0x50] sm:$0xff]   ;;  %v5903_v37 = vld [vmem:[%s6226_s29 + $0x58] sm:$0xff]   ;;  %p6018_p11 = scmp.ne.s32.totalorder %s9467_s16, %s6017_s9  ;;  %s6114_s10 = smov [#allocation4]  }
  0x24   : > { %v5900_v34 = vld [vmem:[%s6226_s29 + $0x168] sm:$0xff]   ;;  %v5902_v36 = vld [vmem:[%s6226_s29 + $0x170] sm:$0xff]   ;;  %v5904_v38 = vld [vmem:[%s6226_s29 + $0x178] sm:$0xff]  }
  0x25   : > { %v5905_v39 = vld [vmem:[%s6226_s29 + $0x60] sm:$0xff]   ;;  %v5907_v41 = vld [vmem:[%s6226_s29 + $0x68] sm:$0xff]   ;;  %v5909_v43 = vld [vmem:[%s6226_s29 + $0x70] sm:$0xff]   ;;  %p6019_p12 = pnand %p6018_p11, %p6191_p5 }
  0x26   : > { %991 = vmatpush1.bf16.msra.mxu0 %v5875_v9  ;;  %5815 = vmatpush1.bf16.msra.mxu1 %v5875_v9  ;;  %v5906_v40 = vld [vmem:[%s6226_s29 + $0x180] sm:$0xff]   ;;  %v5908_v42 = vld [vmem:[%s6226_s29 + $0x188] sm:$0xff]   ;;  %v5910_v44 = vld [vmem:[%s6226_s29 + $0x190] sm:$0xff]  }
  0x27   : > { %5700 = vmatprep.subr.msk.bf16.mxu0 %vm977_vm0, %v5699_v10  ;;  %5811 = vmatprep.subr.msk.bf16.mxu1 %vm977_vm0, %v5699_v10  ;;  %v5911_v45 = vld [vmem:[%s6226_s29 + $0x78] sm:$0xff]   ;;  %v5913_v47 = vld [vmem:[%s6226_s29 + $0x80] sm:$0xff]   ;;  %v5915_v49 = vld [vmem:[%s6226_s29 + $0x88] sm:$0xff]   ;;  %p6020_p13 = pneg %p6019_p12 }
  0x28   : > { %v5912_v46 = vld [vmem:[%s6226_s29 + $0x198] sm:$0xff]   ;;  %v5914_v48 = vld [vmem:[%s6226_s29 + $0x1a0] sm:$0xff]   ;;  %v5916_v50 = vld [vmem:[%s6226_s29 + $0x1a8] sm:$0xff]  }
  0x29   : > { %v5917_v51 = vld [vmem:[%s6226_s29 + $0x90] sm:$0xff]   ;;  %v5919_v53 = vld [vmem:[%s6226_s29 + $0x98] sm:$0xff]   ;;  %v5921_v55 = vld [vmem:[%s6226_s29 + $0xa0] sm:$0xff]  }
  0x2a   : > { %993 = vmatpush1.bf16.msra.mxu0 %v979_v13  ;;  %5816 = vmatpush1.bf16.msra.mxu1 %v979_v13  ;;  %v5918_v52 = vld [vmem:[%s6226_s29 + $0x1b0] sm:$0xff]   ;;  %v5920_v54 = vld [vmem:[%s6226_s29 + $0x1b8] sm:$0xff]   ;;  %v5922_v56 = vld [vmem:[%s6226_s29 + $0x1c0] sm:$0xff]  }
  0x2b   : > { %3415 = vmatprep.subr.bf16.mxu1 %v5888_v12  ;;  %v5923_v57 = vld [vmem:[%s6226_s29 + $0xa8] sm:$0xff]   ;;  %v5925_v59 = vld [vmem:[%s6226_s29 + $0xb0] sm:$0xff]   ;;  %v5927_v61 = vld [vmem:[%s6226_s29 + $0xb8] sm:$0xff]  }
  0x2c   : > { %v5924_v58 = vld [vmem:[%s6226_s29 + $0x1c8] sm:$0xff]   ;;  %v5926_v60 = vld [vmem:[%s6226_s29 + $0x1d0] sm:$0xff]   ;;  %v5928_v62 = vld [vmem:[%s6226_s29 + $0x1d8] sm:$0xff]  }
  0x2d   : > { %5701 = vmatmul.mubr.msk.bf16.vlgmr.msra.gmra.mrb[0].mxu0 %vm784_vm1, %v5878_v14  ;;  %5737 = vmatmul.mubr.msk.bf16.vlgmr.msra.gmra.mrb[0].mxu1 %vm784_vm1, %v5879_v15  ;;  %v5929_v63 = vld [vmem:[%s6226_s29 + $0xc0] sm:$0xff]   ;;  %v5931_v1 = vld [vmem:[%s6226_s29 + $0xc8] sm:$0xff]   ;;  %v5933_v4 = vld [vmem:[%s6226_s29 + $0xd0] sm:$0xff]  }
  0x2e   : > { %1026 = vmatprep.mubr.bf16.mxu0 %v9566_v2  ;;  %1386 = vmatprep.mubr.bf16.mxu1 %v9566_v2  ;;  %v5930_v0 = vld [vmem:[%s6226_s29 + $0x1e0] sm:$0xff]   ;;  %v5932_v3 = vld [vmem:[%s6226_s29 + $0x1e8] sm:$0xff]   ;;  %v5934_v5 = vld [vmem:[%s6226_s29 + $0x1f0] sm:$0xff]  }
  0x2f   : > { %3416 = vmatpush1.bf16.msra.mxu1 %v5886_v16  ;;  %v5935_v10 = vld [vmem:[%s6226_s29 + $0xd8] sm:$0xff]  }
  0x30   : > { %v5936_v11 = vld [vmem:[%s6226_s29 + $0x1f8] sm:$0xff]  }
  0x35   : > { %5702 = vmatmul.mubr.msk.bf16.gmra.mrb[4].mxu0 %vm784_vm1, %v5880_v17  ;;  %5738 = vmatmul.mubr.msk.bf16.gmra.mrb[4].mxu1 %vm784_vm1, %v5881_v18 }
  0x36   : > { %1036 = vmatprep.mubr.bf16.mxu0 %v9566_v2  ;;  %1396 = vmatprep.mubr.bf16.mxu1 %v9566_v2 }
  0x3d   : > { %5703 = vmatmul.mubr.msk.bf16.gmra.mrb[8].mxu0 %vm784_vm1, %v5882_v19  ;;  %5739 = vmatmul.mubr.msk.bf16.gmra.mrb[8].mxu1 %vm784_vm1, %v5883_v20 }
  0x3e   : > { %1046 = vmatprep.mubr.bf16.mxu0 %v9566_v2  ;;  %1406 = vmatprep.mubr.bf16.mxu1 %v9566_v2 }
  0x45   : > { %5704 = vmatmul.mubr.msk.bf16.gmra.mrb[12].mxu0 %vm784_vm1, %v5884_v21  ;;  %5740 = vmatmul.mubr.msk.bf16.gmra.mrb[12].mxu1 %vm784_vm1, %v5885_v22 }
  0x46   : > { %1056 = vmatprep.mubr.bf16.mxu0 %v9566_v2  ;;  %1416 = vmatprep.mubr.bf16.mxu1 %v9566_v2 }
  0x4d   : > { %5705 = vmatmul.mubr.msk.bf16.gmra.mrb[16].mxu0 %vm784_vm1, %v5889_v23  ;;  %5741 = vmatmul.mubr.msk.bf16.gmra.mrb[16].mxu1 %vm784_vm1, %v5890_v24 }
  0x4e   : > { %1066 = vmatprep.mubr.bf16.mxu0 %v9566_v2  ;;  %1426 = vmatprep.mubr.bf16.mxu1 %v9566_v2 }
  0x55   : > { %5706 = vmatmul.mubr.msk.bf16.gmra.mrb[20].mxu0 %vm784_vm1, %v5891_v25  ;;  %5742 = vmatmul.mubr.msk.bf16.gmra.mrb[20].mxu1 %vm784_vm1, %v5892_v26 }
  0x56   : > { %1076 = vmatprep.mubr.bf16.mxu0 %v9566_v2  ;;  %1436 = vmatprep.mubr.bf16.mxu1 %v9566_v2 }
  0x5d   : > { %5707 = vmatmul.mubr.msk.bf16.gmra.mrb[24].mxu0 %vm784_vm1, %v5893_v27  ;;  %5743 = vmatmul.mubr.msk.bf16.gmra.mrb[24].mxu1 %vm784_vm1, %v5894_v28 }
  0x5e   : > { %1086 = vmatprep.mubr.bf16.mxu0 %v9566_v2  ;;  %1446 = vmatprep.mubr.bf16.mxu1 %v9566_v2 }
  0x65   : > { %5708 = vmatmul.mubr.msk.bf16.gmra.mrb[28].mxu0 %vm784_vm1, %v5895_v29  ;;  %5744 = vmatmul.mubr.msk.bf16.gmra.mrb[28].mxu1 %vm784_vm1, %v5896_v30 }
  0x66   : > { %1096 = vmatprep.mubr.bf16.mxu0 %v9566_v2  ;;  %1456 = vmatprep.mubr.bf16.mxu1 %v9566_v2 }
  0x6d   : > { %5709 = vmatmul.mubr.msk.bf16.gmra.mrb[32].mxu0 %vm784_vm1, %v5897_v31  ;;  %5745 = vmatmul.mubr.msk.bf16.gmra.mrb[32].mxu1 %vm784_vm1, %v5898_v32 }
  0x6e   : > { %1106 = vmatprep.mubr.bf16.mxu0 %v9566_v2  ;;  %1466 = vmatprep.mubr.bf16.mxu1 %v9566_v2 }
  0x75   : > { %5710 = vmatmul.mubr.msk.bf16.gmra.mrb[36].mxu0 %vm784_vm1, %v5899_v33  ;;  %5746 = vmatmul.mubr.msk.bf16.gmra.mrb[36].mxu1 %vm784_vm1, %v5900_v34 }
  0x76   : > { %1116 = vmatprep.mubr.bf16.mxu0 %v9566_v2  ;;  %1476 = vmatprep.mubr.bf16.mxu1 %v9566_v2 }
  0x7d   : > { %5711 = vmatmul.mubr.msk.bf16.gmra.mrb[40].mxu0 %vm784_vm1, %v5901_v35  ;;  %5747 = vmatmul.mubr.msk.bf16.gmra.mrb[40].mxu1 %vm784_vm1, %v5902_v36 }
  0x7e   : > { %1126 = vmatprep.mubr.bf16.mxu0 %v9566_v2  ;;  %1486 = vmatprep.mubr.bf16.mxu1 %v9566_v2 }
  0x85   : > { %5712 = vmatmul.mubr.msk.bf16.gmra.mrb[44].mxu0 %vm784_vm1, %v5903_v37  ;;  %5748 = vmatmul.mubr.msk.bf16.gmra.mrb[44].mxu1 %vm784_vm1, %v5904_v38 }
  0x86   : > { %1136 = vmatprep.mubr.bf16.mxu0 %v9566_v2  ;;  %1496 = vmatprep.mubr.bf16.mxu1 %v9566_v2 }
  0x8d   : > { %5713 = vmatmul.mubr.msk.bf16.gmra.mrb[48].mxu0 %vm784_vm1, %v5905_v39  ;;  %5749 = vmatmul.mubr.msk.bf16.gmra.mrb[48].mxu1 %vm784_vm1, %v5906_v40  ;;  %v5937_v39 = vld [vmem:[%s6226_s29 + $0xe0] sm:$0xff]  }
  0x8e   : > { %1146 = vmatprep.mubr.bf16.mxu0 %v9566_v2  ;;  %1506 = vmatprep.mubr.bf16.mxu1 %v9566_v2 }
  0x95   : > { %5714 = vmatmul.mubr.msk.bf16.gmra.mrb[52].mxu0 %vm784_vm1, %v5907_v41  ;;  %5750 = vmatmul.mubr.msk.bf16.gmra.mrb[52].mxu1 %vm784_vm1, %v5908_v42 }
  0x96   : > { %1156 = vmatprep.mubr.bf16.mxu0 %v9566_v2  ;;  %1516 = vmatprep.mubr.bf16.mxu1 %v9566_v2 }
  0x9d   : > { %5715 = vmatmul.mubr.msk.bf16.gmra.mrb[56].mxu0 %vm784_vm1, %v5909_v43  ;;  %5751 = vmatmul.mubr.msk.bf16.gmra.mrb[56].mxu1 %vm784_vm1, %v5910_v44 }
  0x9e   : > { %1166 = vmatprep.mubr.bf16.mxu0 %v9566_v2  ;;  %1526 = vmatprep.mubr.bf16.mxu1 %v9566_v2 }
  0xa5   : > { %5716 = vmatmul.mubr.msk.bf16.gmra.mrb[60].mxu0 %vm784_vm1, %v5911_v45  ;;  %5752 = vmatmul.mubr.msk.bf16.gmra.mrb[60].mxu1 %vm784_vm1, %v5912_v46  ;;  %v5938_v45 = vld [vmem:[%s6324_s11] sm:$0xff]  }
  0xa6   : > { %1176 = vmatprep.mubr.bf16.mxu0 %v9566_v2  ;;  %1536 = vmatprep.mubr.bf16.mxu1 %v9566_v2 }
  0xad   : > { %5717 = vmatmul.mubr.msk.bf16.gmra.mrb[64].mxu0 %vm784_vm1, %v5913_v47  ;;  %5753 = vmatmul.mubr.msk.bf16.gmra.mrb[64].mxu1 %vm784_vm1, %v5914_v48 }
  0xae   : > { %1186 = vmatprep.mubr.bf16.mxu0 %v9566_v2  ;;  %1546 = vmatprep.mubr.bf16.mxu1 %v9566_v2 }
  0xb5   : > { %5718 = vmatmul.mubr.msk.bf16.gmra.mrb[68].mxu0 %vm784_vm1, %v5915_v49  ;;  %5754 = vmatmul.mubr.msk.bf16.gmra.mrb[68].mxu1 %vm784_vm1, %v5916_v50 }
  0xb6   : > { %1196 = vmatprep.mubr.bf16.mxu0 %v9566_v2  ;;  %1556 = vmatprep.mubr.bf16.mxu1 %v9566_v2 }
  0xbd   : > { %5719 = vmatmul.mubr.msk.bf16.gmra.mrb[72].mxu0 %vm784_vm1, %v5917_v51  ;;  %5755 = vmatmul.mubr.msk.bf16.gmra.mrb[72].mxu1 %vm784_vm1, %v5918_v52 }
  0xbe   : > { %1206 = vmatprep.mubr.bf16.mxu0 %v9566_v2  ;;  %1566 = vmatprep.mubr.bf16.mxu1 %v9566_v2 }
  0xc5   : > { %5720 = vmatmul.mubr.msk.bf16.gmra.mrb[76].mxu0 %vm784_vm1, %v5919_v53  ;;  %5756 = vmatmul.mubr.msk.bf16.gmra.mrb[76].mxu1 %vm784_vm1, %v5920_v54 }
  0xc6   : > { %1216 = vmatprep.mubr.bf16.mxu0 %v9566_v2  ;;  %1576 = vmatprep.mubr.bf16.mxu1 %v9566_v2 }
  0xcd   : > { %5721 = vmatmul.mubr.msk.bf16.gmra.mrb[80].mxu0 %vm784_vm1, %v5921_v55  ;;  %5757 = vmatmul.mubr.msk.bf16.gmra.mrb[80].mxu1 %vm784_vm1, %v5922_v56 }
  0xce   : > { %1226 = vmatprep.mubr.bf16.mxu0 %v9566_v2  ;;  %1586 = vmatprep.mubr.bf16.mxu1 %v9566_v2 }
  0xd5   : > { %5722 = vmatmul.mubr.msk.bf16.gmra.mrb[84].mxu0 %vm784_vm1, %v5923_v57  ;;  %5758 = vmatmul.mubr.msk.bf16.gmra.mrb[84].mxu1 %vm784_vm1, %v5924_v58 }
  0xd6   : > { %1236 = vmatprep.mubr.bf16.mxu0 %v9566_v2  ;;  %1596 = vmatprep.mubr.bf16.mxu1 %v9566_v2 }
  0xdd   : > { %5723 = vmatmul.mubr.msk.bf16.gmra.mrb[88].mxu0 %vm784_vm1, %v5925_v59  ;;  %5759 = vmatmul.mubr.msk.bf16.gmra.mrb[88].mxu1 %vm784_vm1, %v5926_v60 }
  0xde   : > { %1246 = vmatprep.mubr.bf16.mxu0 %v9566_v2  ;;  %1606 = vmatprep.mubr.bf16.mxu1 %v9566_v2 }
  0xe5   : > { %5724 = vmatmul.mubr.msk.bf16.gmra.mrb[92].mxu0 %vm784_vm1, %v5927_v61  ;;  %5760 = vmatmul.mubr.msk.bf16.gmra.mrb[92].mxu1 %vm784_vm1, %v5928_v62 }
  0xe6   : > { %1256 = vmatprep.mubr.bf16.mxu0 %v9566_v2  ;;  %1616 = vmatprep.mubr.bf16.mxu1 %v9566_v2 }
  0xed   : > { %5725 = vmatmul.mubr.msk.bf16.gmra.mrb[96].mxu0 %vm784_vm1, %v5929_v63  ;;  %5761 = vmatmul.mubr.msk.bf16.gmra.mrb[96].mxu1 %vm784_vm1, %v5930_v0 }
  0xee   : > { %1266 = vmatprep.mubr.bf16.mxu0 %v9566_v2  ;;  %1626 = vmatprep.mubr.bf16.mxu1 %v9566_v2 }
  0xf5   : > { %5726 = vmatmul.mubr.msk.bf16.gmra.mrb[100].mxu0 %vm784_vm1, %v5931_v1  ;;  %5762 = vmatmul.mubr.msk.bf16.gmra.mrb[100].mxu1 %vm784_vm1, %v5932_v3 }
  0xf6   : > { %1276 = vmatprep.mubr.bf16.mxu0 %v9566_v2  ;;  %1636 = vmatprep.mubr.bf16.mxu1 %v9566_v2 }
  0xfd   : > { %5727 = vmatmul.mubr.msk.bf16.gmra.mrb[104].mxu0 %vm784_vm1, %v5933_v4  ;;  %5763 = vmatmul.mubr.msk.bf16.gmra.mrb[104].mxu1 %vm784_vm1, %v5934_v5 }
  0xfe   : > { %1286 = vmatprep.mubr.bf16.mxu0 %v9566_v2  ;;  %1646 = vmatprep.mubr.bf16.mxu1 %v9566_v2 }
 0x100   : > { %v1018_v6 = vpop.f32.mrb[0].mxu0  ;;  %v1378_v7 = vpop.f32.mrb[0].mxu1 }
 0x101   : > { %v1657_v8 = vrot.slane %v1018_v6, 4  ;;  %v1020_v9 = vpop.f32.mrb[1].mxu0  ;;  %v2594_v12 = vrot.slane %v1378_v7, 4  ;;  %v1380_v13 = vpop.f32.mrb[1].mxu1 }
 0x102   : > { %v1664_v14 = vsel %vm1663_vm2, %v1020_v9, -inf  ;;  %v1022_v15 = vpop.f32.mrb[2].mxu0  ;;  %v2600_v16 = vsel %vm1663_vm2, %v1380_v13, -inf  ;;  %v1382_v17 = vpop.f32.mrb[2].mxu1 }
 0x103   : > { %v1658_v18 = vmax.f32 %v1018_v6, %v1657_v8  ;;  %v1665_v19 = vrot.slane %v1664_v14, 4  ;;  %v1671_v20 = vrot.slane %v1022_v15, 4  ;;  %v1024_v21 = vpop.f32.mrb[3].mxu0  ;;  %v2595_v22 = vmax.f32 %v1378_v7, %v2594_v12  ;;  %v1384_v23 = vpop.f32.mrb[3].mxu1 }
 0x104   : > { %v1677_v24 = vsel %vm1663_vm2, %v1024_v21, -inf  ;;  %v2601_v25 = vrot.slane %v2600_v16, 4  ;;  %v2607_v26 = vrot.slane %v1382_v17, 4  ;;  %v2613_v33 = vsel %vm1663_vm2, %v1384_v23, -inf  ;;  %v5940_v23 = vld [vmem:[%s6324_s11 + $0x8] sm:$0xff]  }
 0x105   : > { %v1659_v27 = vrot.slane %v1658_v18, 2  ;;  %v1666_v28 = vmax.f32 %v1664_v14, %v1665_v19  ;;  %v1672_v29 = vmax.f32 %v1022_v15, %v1671_v20  ;;  %v1678_v30 = vrot.slane %v1677_v24, 4  ;;  %5728 = vmatmul.mubr.msk.bf16.gmra.mrb[108].mxu0 %vm784_vm1, %v5935_v10  ;;  %5764 = vmatmul.mubr.msk.bf16.gmra.mrb[108].mxu1 %vm784_vm1, %v5936_v11 }
 0x106   : > { %1296 = vmatprep.mubr.bf16.mxu0 %v9566_v2  ;;  %3447 = vmatprep.mubr.bf16.mxu1 %v9566_v2  ;;  %v2596_v31 = vrot.slane %v2595_v22, 2  ;;  %v2602_v32 = vmax.f32 %v2600_v16, %v2601_v25  ;;  %v2608_v40 = vmax.f32 %v1382_v17, %v2607_v26  ;;  %v2614_v47 = vrot.slane %v2613_v33, 4 }
 0x107   : > { %v1660_v34 = vmax.f32 %v1658_v18, %v1659_v27  ;;  %v1667_v35 = vrot.slane %v1666_v28, 2  ;;  %v1673_v36 = vrot.slane %v1672_v29, 2  ;;  %v1679_v37 = vmax.f32 %v1677_v24, %v1678_v30  ;;  %v5939_v18 = vld [vmem:[%s6226_s29 + $0xe8] sm:$0xff]  }
 0x108   : > { %v1028_v38 = vpop.f32.mrb[4].mxu0  ;;  %v6425_v41 = vpop.f32.mrb[4].mxu1  ;;  %v2603_v46 = vrot.slane %v2602_v32, 2  ;;  %v2597_v52 = vmax.f32 %v2595_v22, %v2596_v31  ;;  %v2609_v3 = vrot.slane %v2608_v40, 2  ;;  %v6438_v4 = vmax.f32 %v2613_v33, %v2614_v47 }
 0x109   : > { %v1668_v42 = vmax.f32 %v1666_v28, %v1667_v35  ;;  %v1680_v43 = vrot.slane %v1679_v37, 2  ;;  %v1030_v44 = vpop.f32.mrb[5].mxu0  ;;  %v6428_v48 = vpop.f32.mrb[5].mxu1  ;;  %v1684_v49 = vrot.slane %v1028_v38, 4  ;;  %v1661_v54 = vrot.slane %v1660_v34, 1 }
 0x10a   : > { %v1690_v50 = vsel %vm1663_vm2, %v1030_v44, -inf  ;;  %v1032_v51 = vpop.f32.mrb[6].mxu0  ;;  %v6431_v53 = vpop.f32.mrb[6].mxu1  ;;  %v1674_v56 = vmax.f32 %v1672_v29, %v1673_v36  ;;  %v2604_v1 = vmax.f32 %v2602_v32, %v2603_v46  ;;  %v2598_v8 = vrot.slane %v2597_v52, 1 }
 0x10b   : > { %v1669_v55 = vrot.slane %v1668_v42, 1  ;;  %v1681_v57 = vmax.f32 %v1679_v37, %v1680_v43  ;;  %v1034_v58 = vpop.f32.mrb[7].mxu0  ;;  %v6433_v59 = vpop.f32.mrb[7].mxu1  ;;  %v1685_v60 = vmax.f32 %v1028_v38, %v1684_v49  ;;  %v1691_v61 = vrot.slane %v1690_v50, 4 }
 0x10c   : > { %v1697_v62 = vrot.slane %v1032_v51, 4  ;;  %v1703_v63 = vsel %vm1663_vm2, %v1034_v58, -inf  ;;  %v6442_v9 = vmax.f32 %v1660_v34, %v1661_v54  ;;  %v1675_v11 = vrot.slane %v1674_v56, 1 }
 0x10d   : > { %v1704_v0 = vrot.slane %v1703_v63, 4  ;;  %5729 = vmatmul.mubr.msk.bf16.gmra.mrb[112].mxu0 %vm784_vm1, %v5937_v39  ;;  %5775 = vmatmul.mubr.msk.bf16.vlgmr.msra.gmra.mrb[112].mxu1 %vm3390_vm3, %v5938_v45  ;;  %v1686_v5 = vrot.slane %v1685_v60, 2  ;;  %v1692_v6 = vmax.f32 %v1690_v50, %v1691_v61  ;;  %v6444_v10 = vmax.f32 %v1668_v42, %v1669_v55 }
 0x10e   : > { %v1698_v7 = vmax.f32 %v1032_v51, %v1697_v62  ;;  %1306 = vmatprep.mubr.bf16.mxu0 %v9566_v2  ;;  %3457 = vmatprep.mubr.bf16.mxu1 %v9566_v2  ;;  %9638 = vst [vmem:[#allocation8_spill] sm:$0xff] %v6442_v9  ;;  %v1682_v13 = vrot.slane %v1681_v57, 1  ;;  %v2605_v24 = vrot.slane %v2604_v1, 1  ;;  %v2610_v25 = vmax.f32 %v2608_v40, %v2609_v3 }
 0x10f   : > { %9639 = vst [vmem:[#allocation9_spill] sm:$0xff] %v6444_v10  ;;  %v1705_v12 = vmax.f32 %v1703_v63, %v1704_v0  ;;  %v1687_v14 = vmax.f32 %v1685_v60, %v1686_v5  ;;  %v1693_v15 = vrot.slane %v1692_v6, 2  ;;  %v6457_v39 = vmax.f32 %v1674_v56, %v1675_v11  ;;  %v5941_v11 = vld [vmem:[%s6226_s29 + $0xf0] sm:$0xff]  }
 0x110   : > { %v1699_v16 = vrot.slane %v1698_v7, 2  ;;  %v1038_v17 = vpop.f32.mrb[8].mxu0  ;;  %v6447_v19 = vpop.f32.mrb[8].mxu1  ;;  %v6460_v42 = vmax.f32 %v2597_v52, %v2598_v8  ;;  %v2616_v43 = vrot.slane %v6438_v4, 2  ;;  %v6465_v49 = vmax.f32 %v1681_v57, %v1682_v13 }
 0x111   : > { %v1706_v20 = vrot.slane %v1705_v12, 2  ;;  %v1710_v21 = vrot.slane %v1038_v17, 4  ;;  %v1040_v22 = vpop.f32.mrb[9].mxu0  ;;  %v6450_v26 = vpop.f32.mrb[9].mxu1  ;;  %v1688_v27 = vrot.slane %v1687_v14, 1  ;;  %v1694_v28 = vmax.f32 %v1692_v6, %v1693_v15  ;;  %9640 = vst [vmem:[#allocation10_spill] sm:$0xff] %v6457_v39 }
 0x112   : > { %v1700_v29 = vmax.f32 %v1698_v7, %v1699_v16  ;;  %v1716_v30 = vsel %vm1663_vm2, %v1040_v22, -inf  ;;  %v1042_v31 = vpop.f32.mrb[10].mxu0  ;;  %v6453_v32 = vpop.f32.mrb[10].mxu1  ;;  %9641 = vst [vmem:[#allocation11_spill] sm:$0xff] %v6460_v42  ;;  %9642 = vst [vmem:[#allocation12_spill] sm:$0xff] %v6465_v49  ;;  %v2611_v54 = vrot.slane %v2610_v25, 1  ;;  %v6471_v58 = vmax.f32 %v2604_v1, %v2605_v24 }
 0x113   : > { %v1707_v33 = vmax.f32 %v1705_v12, %v1706_v20  ;;  %v1711_v34 = vmax.f32 %v1038_v17, %v1710_v21  ;;  %v1717_v35 = vrot.slane %v1716_v30, 4  ;;  %v1723_v36 = vrot.slane %v1042_v31, 4  ;;  %v1044_v37 = vpop.f32.mrb[11].mxu0  ;;  %v6455_v38 = vpop.f32.mrb[11].mxu1  ;;  %v5942_v12 = vld [vmem:[%s6324_s11 + $0x10] sm:$0xff]  }
 0x114   : > { %v1729_v40 = vsel %vm1663_vm2, %v1044_v37, -inf  ;;  %v1695_v44 = vrot.slane %v1694_v28, 1  ;;  %v1701_v50 = vrot.slane %v1700_v29, 1  ;;  %v6469_v52 = vmax.f32 %v1687_v14, %v1688_v27  ;;  %9644 = vst [vmem:[#allocation14_spill] sm:$0xff] %v6471_v58 }
 0x115   : > { %v1712_v45 = vrot.slane %v1711_v34, 2  ;;  %v1718_v46 = vmax.f32 %v1716_v30, %v1717_v35  ;;  %v1724_v47 = vmax.f32 %v1042_v31, %v1723_v36  ;;  %5730 = vmatmul.mubr.msk.bf16.gmra.mrb[116].mxu0 %vm784_vm1, %v5939_v18  ;;  %5776 = vmatmul.mubr.msk.bf16.gmra.mrb[116].mxu1 %vm3390_vm3, %v5940_v23  ;;  %v1730_v51 = vrot.slane %v1729_v40, 4 }
 0x116   : > { %1316 = vmatprep.mubr.bf16.mxu0 %v9566_v2  ;;  %3467 = vmatprep.mubr.bf16.mxu1 %v9566_v2  ;;  %9643 = vst [vmem:[#allocation13_spill] sm:$0xff] %v6469_v52  ;;  %v1708_v55 = vrot.slane %v1707_v33, 1  ;;  %v2620_v63 = vrot.slane %v6425_v41, 4  ;;  %v6476_v3 = vmax.f32 %v1694_v28, %v1695_v44  ;;  %v6479_v7 = vmax.f32 %v6438_v4, %v2616_v43 }
 0x117   : > { %v1713_v56 = vmax.f32 %v1711_v34, %v1712_v45  ;;  %v1719_v60 = vrot.slane %v1718_v46, 2  ;;  %v1725_v61 = vrot.slane %v1724_v47, 2  ;;  %v1731_v62 = vmax.f32 %v1729_v40, %v1730_v51 }
 0x118   : > { %v1048_v57 = vpop.f32.mrb[12].mxu0  ;;  %v6474_v0 = vpop.f32.mrb[12].mxu1  ;;  %9645 = vst [vmem:[#allocation15_spill] sm:$0xff] %v6476_v3  ;;  %v6485_v13 = vmax.f32 %v1700_v29, %v1701_v50  ;;  %v6487_v15 = vmax.f32 %v2610_v25, %v2611_v54  ;;  %v6492_v20 = vmax.f32 %v1707_v33, %v1708_v55  ;;  %v2621_v22 = vmax.f32 %v6425_v41, %v2620_v63  ;;  %v5944_v63 = vld [vmem:[%s6324_s11 + $0x18] sm:$0xff]  }
 0x119   : > { %v1714_v5 = vrot.slane %v1713_v56, 1  ;;  %v1736_v6 = vrot.slane %v1048_v57, 4  ;;  %v1050_v8 = vpop.f32.mrb[13].mxu0  ;;  %v6483_v1 = vpop.f32.mrb[13].mxu1  ;;  %v1732_v14 = vrot.slane %v1731_v62, 2  ;;  %v2626_v23 = vsel %vm1663_vm2, %v6428_v48, -inf }
 0x11a   : > { %9646 = vst [vmem:[#allocation16_spill] sm:$0xff] %v6485_v13  ;;  %9647 = vst [vmem:[#allocation17_spill] sm:$0xff] %v6487_v15  ;;  %v1742_v16 = vsel %vm1663_vm2, %v1050_v8, -inf  ;;  %v1052_v17 = vpop.f32.mrb[14].mxu0  ;;  %v6490_v18 = vpop.f32.mrb[14].mxu1  ;;  %v1720_v27 = vmax.f32 %v1718_v46, %v1719_v60  ;;  %v1726_v28 = vmax.f32 %v1724_v47, %v1725_v61  ;;  %v2618_v34 = vrot.slane %v6479_v7, 1 }
 0x11b   : > { %9648 = vst [vmem:[#allocation18_spill] sm:$0xff] %v6492_v20  ;;  %v1737_v21 = vmax.f32 %v1048_v57, %v1736_v6  ;;  %v1054_v4 = vpop.f32.mrb[15].mxu0  ;;  %v6497_v24 = vpop.f32.mrb[15].mxu1  ;;  %v1743_v25 = vrot.slane %v1742_v16, 4  ;;  %v1749_v29 = vrot.slane %v1052_v17, 4  ;;  %v6499_v30 = vmax.f32 %v1713_v56, %v1714_v5  ;;  %v5943_v57 = vld [vmem:[%s6226_s29 + $0xf8] sm:$0xff]  }
 0x11c   : > { %v1755_v33 = vsel %vm1663_vm2, %v1054_v4, -inf  ;;  %v1733_v41 = vmax.f32 %v1731_v62, %v1732_v14  ;;  %v2622_v40 = vrot.slane %v2621_v22, 2  ;;  %v2627_v43 = vrot.slane %v2626_v23, 4 }
 0x11d   : > { %9649 = vst [vmem:[#allocation19_spill] sm:$0xff] %v6499_v30  ;;  %v1738_v31 = vrot.slane %v1737_v21, 2  ;;  %5731 = vmatmul.mubr.msk.bf16.gmra.mrb[120].mxu0 %vm784_vm1, %v5941_v11  ;;  %5777 = vmatmul.mubr.msk.bf16.gmra.mrb[120].mxu1 %vm3390_vm3, %v5942_v12  ;;  %v1744_v35 = vmax.f32 %v1742_v16, %v1743_v25  ;;  %v1750_v48 = vmax.f32 %v1052_v17, %v1749_v29  ;;  %v1756_v36 = vrot.slane %v1755_v33, 4 }
 0x11e   : > { %1326 = vmatprep.mubr.bf16.mxu0 %v9566_v2  ;;  %3477 = vmatprep.mubr.bf16.mxu1 %v9566_v2  ;;  %v2633_v44 = vrot.slane %v6431_v53, 4  ;;  %v1721_v45 = vrot.slane %v1720_v27, 1  ;;  %v1727_v55 = vrot.slane %v1726_v28, 1  ;;  %v2623_v56 = vmax.f32 %v2621_v22, %v2622_v40 }
 0x11f   : > { %v1739_v37 = vmax.f32 %v1737_v21, %v1738_v31  ;;  %v1745_v46 = vrot.slane %v1744_v35, 2  ;;  %v1751_v47 = vrot.slane %v1750_v48, 2  ;;  %v1757_v50 = vmax.f32 %v1755_v33, %v1756_v36 }
 0x120   : > { %v1058_v51 = vpop.f32.mrb[16].mxu0  ;;  %v6508_v54 = vpop.f32.mrb[16].mxu1  ;;  %v2628_v60 = vmax.f32 %v2626_v23, %v2627_v43  ;;  %v2634_v61 = vmax.f32 %v6431_v53, %v2633_v44  ;;  %v1734_v6 = vrot.slane %v1733_v41, 1  ;;  %v6523_v25 = vmax.f32 %v1720_v27, %v1721_v45 }
 0x121   : > { %v1060_v62 = vpop.f32.mrb[17].mxu0  ;;  %v6513_v5 = vpop.f32.mrb[17].mxu1  ;;  %v1740_v8 = vrot.slane %v1739_v37, 1  ;;  %v1758_v11 = vrot.slane %v1757_v50, 2  ;;  %v1762_v12 = vrot.slane %v1058_v51, 4  ;;  %v6517_v17 = vmax.f32 %v1744_v35, %v1745_v46 }
 0x122   : > { %v1062_v14 = vpop.f32.mrb[18].mxu0  ;;  %v6515_v16 = vpop.f32.mrb[18].mxu1  ;;  %v6519_v21 = vmax.f32 %v1750_v48, %v1751_v47  ;;  %v2629_v4 = vrot.slane %v2628_v60, 2  ;;  %v2635_v22 = vrot.slane %v2634_v61, 2  ;;  %9650 = vst [vmem:[#allocation20_spill] sm:$0xff] %v6523_v25  ;;  %v6526_v29 = vmax.f32 %v6479_v7, %v2618_v34 }
 0x123   : > { %v1064_v23 = vpop.f32.mrb[19].mxu0  ;;  %v6521_v53 = vpop.f32.mrb[19].mxu1  ;;  %v2624_v31 = vrot.slane %v2623_v56, 1  ;;  %v1763_v33 = vmax.f32 %v1058_v51, %v1762_v12  ;;  %v6528_v36 = vmax.f32 %v1726_v28, %v1727_v55  ;;  %v6530_v40 = vmax.f32 %v1757_v50, %v1758_v11  ;;  %v5945_v51 = vld [vmem:[%s6226_s29 + $0x100] sm:$0xff]  }
 0x124   : > { %9651 = vst [vmem:[#allocation21_spill] sm:$0xff] %v6526_v29  ;;  %v6532_v35 = vmax.f32 %v2628_v60, %v2629_v4  ;;  %v2639_v48 = vsel %vm1663_vm2, %v6433_v59, -inf  ;;  %v6538_v27 = vmax.f32 %v1733_v41, %v1734_v6  ;;  %v6540_v7 = vmax.f32 %v1739_v37, %v1740_v8 }
 0x125   : > { %9652 = vst [vmem:[#allocation22_spill] sm:$0xff] %v6528_v36  ;;  %5732 = vmatmul.mubr.msk.bf16.gmra.mrb[124].mxu0 %vm784_vm1, %v5943_v57  ;;  %5778 = vmatmul.mubr.msk.bf16.gmra.mrb[124].mxu1 %vm3390_vm3, %v5944_v63  ;;  %v6542_v34 = vmax.f32 %v2634_v61, %v2635_v22  ;;  %v1764_v28 = vrot.slane %v1763_v33, 2  ;;  %v1747_v43 = vrot.slane %v6517_v17, 1  ;;  %v1753_v59 = vrot.slane %v6519_v21, 1 }
 0x126   : > { %9653 = vst [vmem:[#allocation23_spill] sm:$0xff] %v6538_v27  ;;  %9654 = vst [vmem:[#allocation24_spill] sm:$0xff] %v6540_v7  ;;  %1336 = vmatprep.mubr.bf16.mxu0 %v9566_v2  ;;  %3487 = vmatprep.mubr.bf16.mxu1 %v9566_v2  ;;  %v2640_v44 = vrot.slane %v2639_v48, 4  ;;  %v1768_v45 = vsel %vm1663_vm2, %v1060_v62, -inf  ;;  %v6549_v46 = vmax.f32 %v2623_v56, %v2624_v31  ;;  %v1775_v47 = vrot.slane %v1062_v14, 4  ;;  %v5946_v62 = vld [vmem:[%s6324_s11 + $0x20] sm:$0xff]  }
 0x127   : > { %v6551_v41 = vmax.f32 %v1763_v33, %v1764_v28  ;;  %v1769_v37 = vrot.slane %v1768_v45, 4  ;;  %v1760_v60 = vrot.slane %v6530_v40, 1  ;;  %v2631_v61 = vrot.slane %v6532_v35, 1 }
 0x128   : > { %9655 = vst [vmem:[#allocation25_spill] sm:$0xff] %v6549_v46  ;;  %v1068_v50 = vpop.f32.mrb[20].mxu0  ;;  %v6554_v55 = vpop.f32.mrb[20].mxu1  ;;  %v2641_v57 = vmax.f32 %v2639_v48, %v2640_v44  ;;  %v1781_v63 = vsel %vm1663_vm2, %v1064_v23, -inf  ;;  %v2637_v8 = vrot.slane %v6542_v34, 1  ;;  %v1776_v12 = vmax.f32 %v1062_v14, %v1775_v47 }
 0x129   : > { %v6559_v6 = vpop.f32.mrb[21].mxu0  ;;  %v6562_v56 = vpop.f32.mrb[21].mxu1  ;;  %v1770_v11 = vmax.f32 %v1768_v45, %v1769_v37  ;;  %v1782_v4 = vrot.slane %v1781_v63, 4  ;;  %v2646_v28 = vrot.slane %v6447_v19, 4  ;;  %v2652_v23 = vsel %vm1663_vm2, %v6450_v26, -inf }
 0x12a   : > { %v6565_v22 = vpop.f32.mrb[22].mxu0  ;;  %v6567_v31 = vpop.f32.mrb[22].mxu1  ;;  %v2642_v33 = vrot.slane %v2641_v57, 2  ;;  %v2659_v48 = vrot.slane %v6453_v32, 4  ;;  %v1766_v29 = vrot.slane %v6551_v41, 1  ;;  %v1777_v14 = vrot.slane %v1776_v12, 2 }
 0x12b   : > { %v1074_v44 = vpop.f32.mrb[23].mxu0  ;;  %v6573_v2 = vpop.f32.mrb[23].mxu1  ;;  %v1771_v45 = vrot.slane %v1770_v11, 2  ;;  %v1783_v37 = vmax.f32 %v1781_v63, %v1782_v4  ;;  %v2647_v46 = vmax.f32 %v6447_v19, %v2646_v28  ;;  %v2653_v15 = vrot.slane %v2652_v23, 4 }
 0x12c   : > { %v2643_v47 = vmax.f32 %v2641_v57, %v2642_v33  ;;  %v2660_v58 = vmax.f32 %v6453_v32, %v2659_v48  ;;  %v1778_v42 = vmax.f32 %v1776_v12, %v1777_v14  ;;  %v1788_v25 = vrot.slane %v1068_v50, 4 }
 0x12d   : > { %5733 = vmatmul.mubr.msk.bf16.gmra.mrb[128].mxu0 %vm784_vm1, %v5945_v51  ;;  %5779 = vmatmul.mubr.msk.bf16.gmra.mrb[128].mxu1 %vm3390_vm3, %v5946_v62  ;;  %v1772_v26 = vmax.f32 %v1770_v11, %v1771_v45  ;;  %v1784_v27 = vrot.slane %v1783_v37, 2  ;;  %v9656_v20 = vmov 0   ;;  %v2648_v57 = vrot.slane %v2647_v46, 2 }
 0x12e   : > { %1346 = vmatprep.mubr.bf16.mxu0 %v9656_v20  ;;  %3497 = vmatprep.mubr.bf16.mxu1 %v9656_v20  ;;  %v2644_v63 = vrot.slane %v2643_v47, 1  ;;  %v2654_v19 = vmax.f32 %v2652_v23, %v2653_v15  ;;  %v2661_v4 = vrot.slane %v2660_v58, 2  ;;  %v6583_v32 = vmax.f32 %v6517_v17, %v1747_v43  ;;  %v5947_v23 = vld [vmem:[%s6226_s29 + $0x108] sm:$0xff]  }
 0x12f   : > { %v6586_v51 = vmax.f32 %v6519_v21, %v1753_v59  ;;  %v1773_v62 = vrot.slane %v1772_v26, 1  ;;  %v1789_v11 = vmax.f32 %v1068_v50, %v1788_v25  ;;  %v1779_v28 = vrot.slane %v1778_v42, 1  ;;  %v5948_v17 = vld [vmem:[%s6324_s11 + $0x28] sm:$0xff]  }
 0x130   : > { %9657 = vst [vmem:[#allocation26_spill] sm:$0xff] %v6583_v32  ;;  %v6588_v12 = vpop.f32.mrb[24].mxu0  ;;  %v6590_v33 = vpop.f32.mrb[24].mxu1  ;;  %v6592_v48 = vmax.f32 %v1783_v37, %v1784_v27  ;;  %v6594_v45 = vmax.f32 %v2647_v46, %v2648_v57  ;;  %v2655_v14 = vrot.slane %v2654_v19, 2  ;;  %v6603_v21 = vmax.f32 %v6530_v40, %v1760_v60 }
 0x131   : > { %9658 = vst [vmem:[#allocation27_spill] sm:$0xff] %v6586_v51  ;;  %v6596_v15 = vpop.f32.mrb[25].mxu0  ;;  %v6600_v43 = vpop.f32.mrb[25].mxu1  ;;  %v6606_v25 = vmax.f32 %v6532_v35, %v2631_v61  ;;  %v6609_v59 = vmax.f32 %v6542_v34, %v2637_v8  ;;  %v6611_v27 = vmax.f32 %v2660_v58, %v2661_v4  ;;  %v6618_v37 = vmax.f32 %v6551_v41, %v1766_v29 }
 0x132   : > { %9659 = vst [vmem:[#allocation28_spill] sm:$0xff] %v6603_v21  ;;  %v6613_v46 = vpop.f32.mrb[26].mxu0  ;;  %v6615_v50 = vpop.f32.mrb[26].mxu1  ;;  %v6620_v57 = vmax.f32 %v2643_v47, %v2644_v63  ;;  %v1790_v32 = vrot.slane %v1789_v11, 2  ;;  %v2665_v40 = vsel %vm1663_vm2, %v6455_v38, -inf  ;;  %v6628_v34 = vmax.f32 %v1772_v26, %v1773_v62 }
 0x133   : > { %9660 = vst [vmem:[#allocation29_spill] sm:$0xff] %v6606_v25  ;;  %9661 = vst [vmem:[#allocation30_spill] sm:$0xff] %v6609_v59  ;;  %v6624_v35 = vpop.f32.mrb[27].mxu0  ;;  %v6626_v60 = vpop.f32.mrb[27].mxu1  ;;  %v2656_v58 = vmax.f32 %v2654_v19, %v2655_v14  ;;  %v2666_v61 = vrot.slane %v2665_v40, 4  ;;  %v1794_v8 = vsel %vm1663_vm2, %v6559_v6, -inf  ;;  %v6632_v4 = vmax.f32 %v1778_v42, %v1779_v28 }
 0x134   : > { %9662 = vst [vmem:[#allocation31_spill] sm:$0xff] %v6618_v37  ;;  %9663 = vst [vmem:[#allocation32_spill] sm:$0xff] %v6620_v57  ;;  %v1786_v29 = vrot.slane %v6592_v48, 1  ;;  %v2650_v41 = vrot.slane %v6594_v45, 1  ;;  %v1795_v47 = vrot.slane %v1794_v8, 4  ;;  %v2663_v38 = vrot.slane %v6611_v27, 1 }
 0x135   : > { %9664 = vst [vmem:[#allocation33_spill] sm:$0xff] %v6628_v34  ;;  %9665 = vst [vmem:[#allocation34_spill] sm:$0xff] %v6632_v4  ;;  %5734 = vmatmul.mubr.msk.bf16.gmra.mrb[132].mxu0 %vm784_vm1, %v5947_v23  ;;  %5780 = vmatmul.mubr.msk.bf16.gmra.mrb[132].mxu1 %vm3390_vm3, %v5948_v17  ;;  %v2667_v26 = vmax.f32 %v2665_v40, %v2666_v61  ;;  %v1801_v63 = vrot.slane %v6565_v22, 4  ;;  %v1807_v19 = vsel %vm1663_vm2, %v1074_v44, -inf  ;;  %v2672_v28 = vrot.slane %v6474_v0, 4  ;;  %v5950_v59 = vld [vmem:[%s6324_s11 + $0x30] sm:$0xff]  }
 0x136   : > { %1356 = vmatprep.mubr.bf16.mxu0 %v9656_v20  ;;  %3507 = vmatprep.mubr.bf16.mxu1 %v9656_v20  ;;  %v1791_v42 = vmax.f32 %v1789_v11, %v1790_v32  ;;  %v1796_v6 = vmax.f32 %v1794_v8, %v1795_v47  ;;  %v1808_v62 = vrot.slane %v1807_v19, 4  ;;  %v2657_v14 = vrot.slane %v2656_v58, 1  ;;  %v5949_v47 = vld [vmem:[%s6226_s29 + $0x110] sm:$0xff]  }
 0x137   : > { %v2668_v23 = vrot.slane %v2667_v26, 2  ;;  %v1802_v17 = vmax.f32 %v6565_v22, %v1801_v63  ;;  %v2678_v40 = vsel %vm1663_vm2, %v6483_v1, -inf  ;;  %v2673_v32 = vmax.f32 %v6474_v0, %v2672_v28 }
 0x138   : > { %v6647_v61 = vpop.f32.mrb[28].mxu0  ;;  %v6649_v44 = vpop.f32.mrb[28].mxu1  ;;  %v1797_v57 = vrot.slane %v1796_v6, 2  ;;  %v1809_v25 = vmax.f32 %v1807_v19, %v1808_v62  ;;  %v2679_v11 = vrot.slane %v2678_v40, 4  ;;  %v2685_v63 = vrot.slane %v6490_v18, 4 }
 0x139   : > { %v6652_v8 = vpop.f32.mrb[29].mxu0  ;;  %v6656_v4 = vpop.f32.mrb[29].mxu1  ;;  %v2669_v21 = vmax.f32 %v2667_v26, %v2668_v23  ;;  %v1803_v22 = vrot.slane %v1802_v17, 2  ;;  %v1814_v1 = vrot.slane %v6588_v12, 4  ;;  %v2674_v0 = vrot.slane %v2673_v32, 2 }
 0x13a   : > { %v6660_v3 = vpop.f32.mrb[30].mxu0  ;;  %v6662_v49 = vpop.f32.mrb[30].mxu1  ;;  %v1798_v19 = vmax.f32 %v1796_v6, %v1797_v57  ;;  %v1810_v62 = vrot.slane %v1809_v25, 2  ;;  %v2680_v28 = vmax.f32 %v2678_v40, %v2679_v11  ;;  %v6669_v7 = vmax.f32 %v6592_v48, %v1786_v29 }
 0x13b   : > { %v6664_v10 = vpop.f32.mrb[31].mxu0  ;;  %v6666_v51 = vpop.f32.mrb[31].mxu1  ;;  %v1792_v26 = vrot.slane %v1791_v42, 1  ;;  %v2686_v23 = vmax.f32 %v6490_v18, %v2685_v63  ;;  %v1815_v36 = vmax.f32 %v6588_v12, %v1814_v1  ;;  %v2670_v30 = vrot.slane %v2669_v21, 1 }
 0x13c   : > { %9666 = vst [vmem:[#allocation35_spill] sm:$0xff] %v6669_v7  ;;  %v1799_v13 = vrot.slane %v1798_v19, 1  ;;  %v6673_v52 = vmax.f32 %v1802_v17, %v1803_v22  ;;  %v2681_v57 = vrot.slane %v2680_v28, 2  ;;  %v6677_v6 = vmax.f32 %v1809_v25, %v1810_v62  ;;  %v5952_v22 = vld [vmem:[%s6324_s11 + $0x38] sm:$0xff]   ;;  %s6021_s11 = sshll.u32 %s6114_s10, 4  ;;  %s6022_s11 = int_to_ptr.vmem [resolvable:$false] %s6021_s11 }
 0x13d   : > { %5735 = vmatmul.mubr.msk.bf16.gmra.mrb[136].mxu0 %vm784_vm1, %v5949_v47  ;;  %5781 = vmatmul.mubr.msk.bf16.gmra.mrb[136].mxu1 %vm3390_vm3, %v5950_v59  ;;  %v6679_v40 = vmax.f32 %v2673_v32, %v2674_v0  ;;  %v2687_v48 = vrot.slane %v2686_v23, 2  ;;  %v1816_v29 = vrot.slane %v1815_v36, 2  ;;  %v6684_v18 = vmax.f32 %v6594_v45, %v2650_v41  ;;  %s6023_s17 = scalar_lea.vmem %s6022_s11, 1024  ;;  %p6024_p0 = scmp.lt.s32.totalorder %s9467_s16, %s6022_s11 }
 0x13e   : > { %1366 = vmatprep.mubr.bf16.mxu0 %v9656_v20  ;;  %3517 = vmatprep.mubr.bf16.mxu1 %v9656_v20  ;;  %v6686_v12 = vmax.f32 %v2656_v58, %v2657_v14  ;;  %v6689_v17 = vmax.f32 %v6611_v27, %v2663_v38  ;;  %v6691_v25 = vmax.f32 %v2680_v28, %v2681_v57  ;;  %v2691_v20 = vsel %vm1663_vm2, %v6497_v24, -inf  ;;  %v5951_v14 = vld [vmem:[%s6226_s29 + $0x118] sm:$0xff]   ;;  %p6025_p1 = scmp.lt.s32.totalorder %s6023_s17, %s6017_s9 }
 0x13f   : > { %9667 = vst [vmem:[#allocation36_spill] sm:$0xff] %v6684_v18  ;;  %v6693_v59 = vmax.f32 %v1791_v42, %v1792_v26  ;;  %v6695_v32 = vmax.f32 %v2686_v23, %v2687_v48  ;;  %v6697_v11 = vmax.f32 %v1815_v36, %v1816_v29  ;;  %v6705_v58 = vmax.f32 %v2669_v21, %v2670_v30 }
 0x140   : > { %9668 = vst [vmem:[#allocation37_spill] sm:$0xff] %v6686_v12  ;;  %9669 = vst [vmem:[#allocation38_spill] sm:$0xff] %v6689_v17  ;;  %v6701_v47 = vpop.f32.mrb[32].mxu0  ;;  %v6703_v45 = vpop.f32.mrb[32].mxu1  ;;  %v6707_v41 = vmax.f32 %v1798_v19, %v1799_v13  ;;  %v1805_v27 = vrot.slane %v6673_v52, 1  ;;  %v2692_v38 = vrot.slane %v2691_v20, 4  ;;  %p6026_p2 = por %p6025_p1, %p6024_p0 }
 0x141   : > { %9670 = vst [vmem:[#allocation39_spill] sm:$0xff] %v6693_v59  ;;  %9671 = vst [vmem:[#allocation40_spill] sm:$0xff] %v6705_v58  ;;  %v6710_v42 = vpop.f32.mrb[33].mxu0  ;;  %v6714_v36 = vpop.f32.mrb[33].mxu1  ;;  %v1812_v63 = vrot.slane %v6677_v6, 1  ;;  %v2676_v24 = vrot.slane %v6679_v40, 1 }
 0x142   : > { %9672 = vst [vmem:[#allocation41_spill] sm:$0xff] %v6707_v41  ;;  %v1820_v1 = vsel %vm1663_vm2, %v6596_v15, -inf  ;;  %v1827_v30 = vrot.slane %v6613_v46, 4  ;;  %v6721_v13 = vpop.f32.mrb[34].mxu0  ;;  %v6723_v21 = vpop.f32.mrb[34].mxu1  ;;  %v2683_v19 = vrot.slane %v6691_v25, 1  ;;  %v2693_v62 = vmax.f32 %v2691_v20, %v2692_v38  ;;  %p6027_p3 = pnand %p6026_p2, %p6020_p13 }
 0x143   : > { %v1821_v0 = vrot.slane %v1820_v1, 4  ;;  %v1833_v28 = vsel %vm1663_vm2, %v6624_v35, -inf  ;;  %v6728_v26 = vpop.f32.mrb[35].mxu0  ;;  %v6730_v23 = vpop.f32.mrb[35].mxu1  ;;  %v2689_v57 = vrot.slane %v6695_v32, 1  ;;  %v1818_v15 = vrot.slane %v6697_v11, 1 }
 0x144   : > { %v1828_v48 = vmax.f32 %v6613_v46, %v1827_v30  ;;  %v1834_v29 = vrot.slane %v1833_v28, 4  ;;  %v2694_v58 = vrot.slane %v2693_v62, 2  ;;  %v2698_v17 = vrot.slane %v6508_v54, 4 }
 0x145   : > { %v1822_v12 = vmax.f32 %v1820_v1, %v1821_v0  ;;  %v2704_v20 = vsel %vm1663_vm2, %v6513_v5, -inf  ;;  %5736 = vmatmul.mubr.msk.bf16.gmra.mrb[140].mxu0 %vm784_vm1, %v5951_v14  ;;  %5782 = vmatmul.mubr.msk.bf16.gmra.mrb[140].mxu1 %vm3390_vm3, %v5952_v22  ;;  %v2711_v41 = vrot.slane %v6515_v16, 4  ;;  %v1840_v1 = vrot.slane %v6647_v61, 4 }
 0x146   : > { %v1829_v35 = vrot.slane %v1828_v48, 2  ;;  %v1835_v38 = vmax.f32 %v1833_v28, %v1834_v29  ;;  %v2705_v18 = vrot.slane %v2704_v20, 4  ;;  %v2695_v7 = vmax.f32 %v2693_v62, %v2694_v58 }
 0x147   : > { %v1823_v59 = vrot.slane %v1822_v12, 2  ;;  %v2699_v46 = vmax.f32 %v6508_v54, %v2698_v17  ;;  %v2712_v5 = vmax.f32 %v6515_v16, %v2711_v41  ;;  %v1841_v34 = vmax.f32 %v6647_v61, %v1840_v1 }
 0x148   : > { %v1830_v30 = vmax.f32 %v1828_v48, %v1829_v35  ;;  %v1836_v0 = vrot.slane %v1835_v38, 2  ;;  %v2706_v39 = vmax.f32 %v2704_v20, %v2705_v18  ;;  %v6744_v9 = vpop.f32.mrb[36].mxu0  ;;  %v6746_v14 = vpop.f32.mrb[36].mxu1  ;;  %v2696_v22 = vrot.slane %v2695_v7, 1 }
 0x149   : > { %v1824_v28 = vmax.f32 %v1822_v12, %v1823_v59  ;;  %v2700_v29 = vrot.slane %v2699_v46, 2  ;;  %v6749_v58 = vpop.f32.mrb[37].mxu0  ;;  %v6751_v62 = vpop.f32.mrb[37].mxu1  ;;  %v2713_v18 = vrot.slane %v2712_v5, 2  ;;  %v6760_v41 = vmax.f32 %v6673_v52, %v1805_v27 }
 0x14a   : > { %v1831_v54 = vrot.slane %v1830_v30, 1  ;;  %v6753_v17 = vmax.f32 %v1835_v38, %v1836_v0  ;;  %v2707_v48 = vrot.slane %v2706_v39, 2  ;;  %v6755_v20 = vpop.f32.mrb[38].mxu0  ;;  %v6757_v16 = vpop.f32.mrb[38].mxu1  ;;  %v6763_v12 = vmax.f32 %v6677_v6, %v1812_v63 }
 0x14b   : > { %9673 = vst [vmem:[#allocation42_spill] sm:$0xff] %v6757_v16  ;;  %9674 = vst [vmem:[#allocation43_spill] sm:$0xff] %v6760_v41  ;;  %v1825_v61 = vrot.slane %v1824_v28, 1  ;;  %v6765_v59 = vmax.f32 %v2699_v46, %v2700_v29  ;;  %v6767_v35 = vpop.f32.mrb[39].mxu0  ;;  %v6769_v1 = vpop.f32.mrb[39].mxu1  ;;  %v6772_v38 = vmax.f32 %v6679_v40, %v2676_v24  ;;  %v6775_v0 = vmax.f32 %v6691_v25, %v2683_v19 }
 0x14c   : > { %9675 = vst [vmem:[#allocation44_spill] sm:$0xff] %v6763_v12  ;;  %9676 = vst [vmem:[#allocation45_spill] sm:$0xff] %v6769_v1  ;;  %v2708_v37 = vmax.f32 %v2706_v39, %v2707_v48  ;;  %v1842_v16 = vrot.slane %v1841_v34, 2  ;;  %v6778_v52 = vmax.f32 %v6695_v32, %v2689_v57  ;;  %v6781_v6 = vmax.f32 %v6697_v11, %v1818_v15 }
 0x14d   : > { %9677 = vst [vmem:[#allocation46_spill] sm:$0xff] %v6772_v38  ;;  %9678 = vst [vmem:[#allocation47_spill] sm:$0xff] %v6775_v0  ;;  %v2714_v27 = vmax.f32 %v2712_v5, %v2713_v18  ;;  %v2717_v63 = vsel %vm1663_vm2, %v6521_v53, -inf  ;;  %v6785_v46 = vmax.f32 %v2695_v7, %v2696_v22  ;;  %v6787_v29 = vmax.f32 %v1830_v30, %v1831_v54 }
 0x14e   : > { %9679 = vst [vmem:[#allocation48_spill] sm:$0xff] %v6778_v52  ;;  %9680 = vst [vmem:[#allocation49_spill] sm:$0xff] %v6781_v6  ;;  %v1838_v40 = vrot.slane %v6753_v17, 1  ;;  %v2718_v25 = vrot.slane %v2717_v63, 4  ;;  %v6790_v24 = vmax.f32 %v1824_v28, %v1825_v61  ;;  %v2702_v39 = vrot.slane %v6765_v59, 1 }
 0x14f   : > { %9681 = vst [vmem:[#allocation50_spill] sm:$0xff] %v6785_v46  ;;  %9682 = vst [vmem:[#allocation51_spill] sm:$0xff] %v6787_v29  ;;  %v1846_v32 = vsel %vm1663_vm2, %v6652_v8, -inf  ;;  %v1853_v11 = vrot.slane %v6660_v3, 4  ;;  %v2709_v19 = vrot.slane %v2708_v37, 1  ;;  %v1843_v57 = vmax.f32 %v1841_v34, %v1842_v16 }
 0x150   : > { %9683 = vst [vmem:[#allocation52_spill] sm:$0xff] %v6790_v24  ;;  %v2719_v15 = vmax.f32 %v2717_v63, %v2718_v25  ;;  %v1847_v53 = vrot.slane %v1846_v32, 4  ;;  %v6796_v7 = vpop.f32.mrb[40].mxu0  ;;  %v6798_v30 = vpop.f32.mrb[40].mxu1  ;;  %v2715_v5 = vrot.slane %v2714_v27, 1  ;;  %v1859_v28 = vsel %vm1663_vm2, %v6664_v10, -inf }
 0x151   : > { %9684 = vst [vmem:[#allocation53_spill] sm:$0xff] %v6798_v30  ;;  %v1854_v22 = vmax.f32 %v6660_v3, %v1853_v11  ;;  %v2724_v54 = vrot.slane %v6554_v55, 4  ;;  %v6804_v48 = vpop.f32.mrb[41].mxu0  ;;  %v6806_v8 = vpop.f32.mrb[41].mxu1  ;;  %v1860_v16 = vrot.slane %v1859_v28, 4  ;;  %v2730_v61 = vsel %vm1663_vm2, %v6562_v56, -inf }
 0x152   : > { %9685 = vst [vmem:[#allocation54_spill] sm:$0xff] %v6806_v8  ;;  %v2720_v18 = vrot.slane %v2719_v15, 2  ;;  %v1848_v34 = vmax.f32 %v1846_v32, %v1847_v53  ;;  %v6810_v63 = vpop.f32.mrb[42].mxu0  ;;  %v6812_v25 = vpop.f32.mrb[42].mxu1  ;;  %v2731_v10 = vrot.slane %v2730_v61, 4  ;;  %v2737_v46 = vrot.slane %v6567_v31, 4 }
 0x153   : > { %9686 = vst [vmem:[#allocation55_spill] sm:$0xff] %v6812_v25  ;;  %v1855_v3 = vrot.slane %v1854_v22, 2  ;;  %v2725_v11 = vmax.f32 %v6554_v55, %v2724_v54  ;;  %v6816_v0 = vpop.f32.mrb[43].mxu0  ;;  %v6818_v52 = vpop.f32.mrb[43].mxu1  ;;  %v1861_v53 = vmax.f32 %v1859_v28, %v1860_v16  ;;  %v1866_v24 = vrot.slane %v6701_v47, 4 }
 0x154   : > { %9687 = vst [vmem:[#allocation56_spill] sm:$0xff] %v6818_v52  ;;  %v2721_v38 = vmax.f32 %v2719_v15, %v2720_v18  ;;  %v1849_v32 = vrot.slane %v1848_v34, 2  ;;  %v2732_v29 = vmax.f32 %v2730_v61, %v2731_v10  ;;  %v2738_v6 = vmax.f32 %v6567_v31, %v2737_v46 }
 0x155   : > { %v1856_v56 = vmax.f32 %v1854_v22, %v1855_v3  ;;  %v2726_v12 = vrot.slane %v2725_v11, 2  ;;  %v1844_v41 = vrot.slane %v1843_v57, 1  ;;  %v1862_v55 = vrot.slane %v1861_v53, 2 }
 0x156   : > { %v2722_v25 = vrot.slane %v2721_v38, 1  ;;  %v1867_v54 = vmax.f32 %v6701_v47, %v1866_v24  ;;  %v6823_v8 = vmax.f32 %v1848_v34, %v1849_v32  ;;  %v2733_v1 = vrot.slane %v2732_v29, 2 }
 0x157   : > { %v1857_v30 = vrot.slane %v1856_v56, 1  ;;  %v2739_v52 = vrot.slane %v2738_v6, 2  ;;  %v6826_v15 = vmax.f32 %v6753_v17, %v1838_v40  ;;  %v6828_v28 = vmax.f32 %v1861_v53, %v1862_v55 }
 0x158   : > { %v6830_v22 = vmax.f32 %v2725_v11, %v2726_v12  ;;  %v1868_v18 = vrot.slane %v1867_v54, 2  ;;  %v6832_v16 = vpop.f32.mrb[44].mxu0  ;;  %v6834_v31 = vpop.f32.mrb[44].mxu1  ;;  %v6837_v46 = vmax.f32 %v6765_v59, %v2702_v39  ;;  %v6839_v47 = vmax.f32 %v2708_v37, %v2709_v19 }
 0x159   : > { %9688 = vst [vmem:[#allocation57_spill] sm:$0xff] %v6826_v15  ;;  %v6841_v24 = vmax.f32 %v2732_v29, %v2733_v1  ;;  %v6843_v34 = vmax.f32 %v2738_v6, %v2739_v52  ;;  %v6845_v17 = vpop.f32.mrb[45].mxu0  ;;  %v6847_v40 = vpop.f32.mrb[45].mxu1  ;;  %v6849_v12 = vmax.f32 %v2714_v27, %v2715_v5  ;;  %v6851_v61 = vmax.f32 %v1843_v57, %v1844_v41 }
 0x15a   : > { %9689 = vst [vmem:[#allocation58_spill] sm:$0xff] %v6837_v46  ;;  %9690 = vst [vmem:[#allocation59_spill] sm:$0xff] %v6839_v47  ;;  %v6853_v3 = vmax.f32 %v1867_v54, %v1868_v18  ;;  %v2743_v59 = vsel %vm1663_vm2, %v6573_v2, -inf  ;;  %v6857_v39 = vpop.f32.mrb[46].mxu0  ;;  %v6859_v37 = vpop.f32.mrb[46].mxu1  ;;  %v6861_v1 = vmax.f32 %v2721_v38, %v2722_v25  ;;  %v1851_v52 = vrot.slane %v6823_v8, 1 }
 0x15b   : > { %9691 = vst [vmem:[#allocation60_spill] sm:$0xff] %v6847_v40  ;;  %9692 = vst [vmem:[#allocation61_spill] sm:$0xff] %v6849_v12  ;;  %v6864_v6 = vmax.f32 %v1856_v56, %v1857_v30  ;;  %v2744_v29 = vrot.slane %v2743_v59, 4  ;;  %v6866_v27 = vpop.f32.mrb[47].mxu0  ;;  %v6868_v41 = vpop.f32.mrb[47].mxu1  ;;  %v1864_v19 = vrot.slane %v6828_v28, 1 }
 0x15c   : > { %9693 = vst [vmem:[#allocation62_spill] sm:$0xff] %v6851_v61  ;;  %9694 = vst [vmem:[#allocation63_spill] sm:$0xff] %v6859_v37  ;;  %v2728_v57 = vrot.slane %v6830_v22, 1  ;;  %v1872_v2 = vsel %vm1663_vm2, %v6710_v42, -inf  ;;  %v1879_v5 = vrot.slane %v6721_v13, 4  ;;  %v2735_v38 = vrot.slane %v6841_v24, 1 }
 0x15d   : > { %9695 = vst [vmem:[#allocation64_spill] sm:$0xff] %v6861_v1  ;;  %9696 = vst [vmem:[#allocation65_spill] sm:$0xff] %v6864_v6  ;;  %v2741_v25 = vrot.slane %v6843_v34, 1  ;;  %v2745_v30 = vmax.f32 %v2743_v59, %v2744_v29  ;;  %v1873_v11 = vrot.slane %v1872_v2, 4  ;;  %v1870_v10 = vrot.slane %v6853_v3, 1 }
 0x15e   : > { %9697 = vst [vmem:[#allocation66_spill] sm:$0xff] %v6868_v41  ;;  %v1880_v32 = vmax.f32 %v6721_v13, %v1879_v5  ;;  %v1885_v53 = vsel %vm1663_vm2, %v6728_v26, -inf  ;;  %v2750_v56 = vrot.slane %v6590_v33, 4  ;;  %v2756_v18 = vsel %vm1663_vm2, %v6600_v43, -inf }
 0x15f   : > { %v2746_v55 = vrot.slane %v2745_v30, 2  ;;  %v1874_v54 = vmax.f32 %v1872_v2, %v1873_v11  ;;  %v1886_v42 = vrot.slane %v1885_v53, 4  ;;  %v2757_v59 = vrot.slane %v2756_v18, 4 }
 0x160   : > { %v1881_v1 = vrot.slane %v1880_v32, 2  ;;  %v2751_v12 = vmax.f32 %v6590_v33, %v2750_v56  ;;  %v2763_v29 = vrot.slane %v6615_v50, 4  ;;  %v6886_v47 = vpop.f32.mrb[48].mxu0  ;;  %v6888_v13 = vpop.f32.mrb[48].mxu1  ;;  %v1892_v15 = vrot.slane %v6744_v9, 4 }
 0x161   : > { %9698 = vst [vmem:[#allocation67_spill] sm:$0xff] %v6888_v13  ;;  %v2747_v5 = vmax.f32 %v2745_v30, %v2746_v55  ;;  %v1875_v26 = vrot.slane %v1874_v54, 2  ;;  %v1887_v46 = vmax.f32 %v1885_v53, %v1886_v42  ;;  %v6891_v2 = vpop.f32.mrb[49].mxu0  ;;  %v6893_v11 = vpop.f32.mrb[49].mxu1  ;;  %v2758_v61 = vmax.f32 %v2756_v18, %v2757_v59 }
 0x162   : > { %9699 = vst [vmem:[#allocation68_spill] sm:$0xff] %v6893_v11  ;;  %v1882_v43 = vmax.f32 %v1880_v32, %v1881_v1  ;;  %v2752_v6 = vrot.slane %v2751_v12, 2  ;;  %v2764_v33 = vmax.f32 %v6615_v50, %v2763_v29  ;;  %v6896_v56 = vpop.f32.mrb[50].mxu0  ;;  %v6898_v41 = vpop.f32.mrb[50].mxu1  ;;  %v1893_v53 = vmax.f32 %v6744_v9, %v1892_v15 }
 0x163   : > { %v2748_v37 = vrot.slane %v2747_v5, 1  ;;  %v1876_v13 = vmax.f32 %v1874_v54, %v1875_v26  ;;  %v1888_v30 = vrot.slane %v1887_v46, 2  ;;  %v6901_v55 = vpop.f32.mrb[51].mxu0  ;;  %v6903_v42 = vpop.f32.mrb[51].mxu1  ;;  %v2759_v1 = vrot.slane %v2758_v61, 2 }
 0x164   : > { %v1883_v40 = vrot.slane %v1882_v43, 1  ;;  %v6905_v11 = vmax.f32 %v2751_v12, %v2752_v6  ;;  %v2765_v32 = vrot.slane %v2764_v33, 2  ;;  %v6908_v50 = vmax.f32 %v6823_v8, %v1851_v52 }
 0x165   : > { %v6911_v18 = vmax.f32 %v6830_v22, %v2728_v57  ;;  %v1877_v59 = vrot.slane %v1876_v13, 1  ;;  %v6913_v54 = vmax.f32 %v1887_v46, %v1888_v30  ;;  %v6916_v9 = vmax.f32 %v6828_v28, %v1864_v19 }
 0x166   : > { %9700 = vst [vmem:[#allocation69_spill] sm:$0xff] %v6908_v50  ;;  %v6919_v15 = vmax.f32 %v6841_v24, %v2735_v38  ;;  %v6921_v29 = vmax.f32 %v2758_v61, %v2759_v1  ;;  %v1894_v12 = vrot.slane %v1893_v53, 2  ;;  %v6924_v6 = vmax.f32 %v6843_v34, %v2741_v25 }
 0x167   : > { %9701 = vst [vmem:[#allocation70_spill] sm:$0xff] %v6911_v18  ;;  %9702 = vst [vmem:[#allocation71_spill] sm:$0xff] %v6916_v9  ;;  %v6927_v8 = vmax.f32 %v6853_v3, %v1870_v10  ;;  %v6929_v22 = vmax.f32 %v2764_v33, %v2765_v32  ;;  %v2769_v46 = vsel %vm1663_vm2, %v6626_v60, -inf  ;;  %v6933_v52 = vmax.f32 %v2747_v5, %v2748_v37 }
 0x168   : > { %9703 = vst [vmem:[#allocation72_spill] sm:$0xff] %v6919_v15  ;;  %9704 = vst [vmem:[#allocation73_spill] sm:$0xff] %v6924_v6  ;;  %v6935_v28 = vmax.f32 %v1882_v43, %v1883_v40  ;;  %v2754_v24 = vrot.slane %v6905_v11, 1  ;;  %v2770_v61 = vrot.slane %v2769_v46, 4  ;;  %v6938_v19 = vpop.f32.mrb[52].mxu0  ;;  %v6940_v57 = vpop.f32.mrb[52].mxu1  ;;  %v6942_v34 = vmax.f32 %v1876_v13, %v1877_v59 }
 0x169   : > { %9705 = vst [vmem:[#allocation74_spill] sm:$0xff] %v6927_v8  ;;  %9706 = vst [vmem:[#allocation75_spill] sm:$0xff] %v6933_v52  ;;  %v1890_v3 = vrot.slane %v6913_v54, 1  ;;  %v1898_v38 = vsel %vm1663_vm2, %v6749_v58, -inf  ;;  %v1905_v60 = vrot.slane %v6755_v20, 4  ;;  %v6948_v37 = vpop.f32.mrb[53].mxu0  ;;  %v1895_v10 = vmax.f32 %v1893_v53, %v1894_v12 }
 0x16a   : > { %9707 = vst [vmem:[#allocation76_spill] sm:$0xff] %v6935_v28  ;;  %9708 = vst [vmem:[#allocation77_spill] sm:$0xff] %v6940_v57  ;;  %v6950_v40 = vpop.f32.mrb[53].mxu1  ;;  %v2761_v25 = vrot.slane %v6921_v29, 1  ;;  %v2771_v5 = vmax.f32 %v2769_v46, %v2770_v61  ;;  %v1899_v26 = vrot.slane %v1898_v38, 4  ;;  %v6953_v43 = vpop.f32.mrb[54].mxu0 }
 0x16b   : > { %9709 = vst [vmem:[#allocation78_spill] sm:$0xff] %v6942_v34  ;;  %9710 = vst [vmem:[#allocation79_spill] sm:$0xff] %v6950_v40  ;;  %v6955_v13 = vpop.f32.mrb[54].mxu1  ;;  %v2767_v33 = vrot.slane %v6929_v22, 1  ;;  %v1906_v30 = vmax.f32 %v6755_v20, %v1905_v60  ;;  %v1911_v58 = vsel %vm1663_vm2, %v6767_v35, -inf  ;;  %v2776_v1 = vrot.slane %v6649_v44, 4 }
 0x16c   : > { %9711 = vst [vmem:[#allocation80_spill] sm:$0xff] %v6955_v13  ;;  %v6962_v32 = vpop.f32.mrb[55].mxu0  ;;  %v6964_v59 = vpop.f32.mrb[55].mxu1  ;;  %v2772_v53 = vrot.slane %v2771_v5, 2  ;;  %v1900_v12 = vmax.f32 %v1898_v38, %v1899_v26  ;;  %v1912_v46 = vrot.slane %v1911_v58, 4  ;;  %v2782_v61 = vsel %vm1663_vm2, %v6656_v4, -inf }
 0x16d   : > { %9712 = vst [vmem:[#allocation81_spill] sm:$0xff] %v6964_v59  ;;  %v1907_v52 = vrot.slane %v1906_v30, 2  ;;  %v2777_v15 = vmax.f32 %v6649_v44, %v2776_v1  ;;  %v2783_v6 = vrot.slane %v2782_v61, 4  ;;  %v2789_v20 = vrot.slane %v6662_v49, 4 }
 0x16e   : > { %v2773_v60 = vmax.f32 %v2771_v5, %v2772_v53  ;;  %v1901_v35 = vrot.slane %v1900_v12, 2  ;;  %v1913_v18 = vmax.f32 %v1911_v58, %v1912_v46  ;;  %v1918_v28 = vrot.slane %v6796_v7, 4 }
 0x16f   : > { %v1908_v9 = vmax.f32 %v1906_v30, %v1907_v52  ;;  %v2778_v50 = vrot.slane %v2777_v15, 2  ;;  %v2784_v34 = vmax.f32 %v2782_v61, %v2783_v6  ;;  %v2790_v38 = vmax.f32 %v6662_v49, %v2789_v20 }
 0x170   : > { %v1896_v26 = vrot.slane %v1895_v10, 1  ;;  %v2774_v8 = vrot.slane %v2773_v60, 1  ;;  %v1914_v59 = vrot.slane %v1913_v18, 2  ;;  %v1919_v4 = vmax.f32 %v6796_v7, %v1918_v28  ;;  %v6973_v13 = vpop.f32.mrb[56].mxu0  ;;  %v6975_v44 = vpop.f32.mrb[56].mxu1 }
 0x171   : > { %9713 = vst [vmem:[#allocation82_spill] sm:$0xff] %v6975_v44  ;;  %v6977_v1 = vmax.f32 %v1900_v12, %v1901_v35  ;;  %v1909_v5 = vrot.slane %v1908_v9, 1  ;;  %v2785_v58 = vrot.slane %v2784_v34, 2  ;;  %v2791_v53 = vrot.slane %v2790_v38, 2  ;;  %v6979_v46 = vpop.f32.mrb[57].mxu0  ;;  %v6981_v52 = vpop.f32.mrb[57].mxu1 }
 0x172   : > { %9714 = vst [vmem:[#allocation83_spill] sm:$0xff] %v6981_v52  ;;  %v6984_v49 = vmax.f32 %v6905_v11, %v2754_v24  ;;  %v6986_v6 = vmax.f32 %v1913_v18, %v1914_v59  ;;  %v6988_v30 = vmax.f32 %v2777_v15, %v2778_v50  ;;  %v1920_v7 = vrot.slane %v1919_v4, 2  ;;  %v6990_v28 = vpop.f32.mrb[58].mxu0  ;;  %v6992_v61 = vpop.f32.mrb[58].mxu1 }
 0x173   : > { %9716 = vst [vmem:[#allocation85_spill] sm:$0xff] %v6992_v61  ;;  %v6995_v12 = vmax.f32 %v6913_v54, %v1890_v3  ;;  %v6998_v20 = vmax.f32 %v6921_v29, %v2761_v25  ;;  %v2786_v35 = vmax.f32 %v2784_v34, %v2785_v58  ;;  %v7000_v52 = vmax.f32 %v2790_v38, %v2791_v53  ;;  %v7002_v11 = vpop.f32.mrb[59].mxu0  ;;  %v7004_v18 = vpop.f32.mrb[59].mxu1 }
 0x174   : > { %9715 = vst [vmem:[#allocation84_spill] sm:$0xff] %v6984_v49  ;;  %9719 = vst [vmem:[#allocation88_spill] sm:$0xff] %v7004_v18  ;;  %v7007_v50 = vmax.f32 %v6929_v22, %v2767_v33  ;;  %v7009_v15 = vmax.f32 %v1895_v10, %v1896_v26  ;;  %v1921_v24 = vmax.f32 %v1919_v4, %v1920_v7  ;;  %v2795_v54 = vsel %vm1663_vm2, %v6666_v51, -inf }
 0x175   : > { %9717 = vst [vmem:[#allocation86_spill] sm:$0xff] %v6995_v12  ;;  %9718 = vst [vmem:[#allocation87_spill] sm:$0xff] %v6998_v20  ;;  %v7013_v3 = vmax.f32 %v2773_v60, %v2774_v8  ;;  %v1903_v29 = vrot.slane %v6977_v1, 1  ;;  %v7016_v34 = vmax.f32 %v1908_v9, %v1909_v5  ;;  %v2796_v25 = vrot.slane %v2795_v54, 4 }
 0x176   : > { %9720 = vst [vmem:[#allocation89_spill] sm:$0xff] %v7007_v50  ;;  %9721 = vst [vmem:[#allocation90_spill] sm:$0xff] %v7009_v15  ;;  %v1916_v59 = vrot.slane %v6986_v6, 1  ;;  %v2780_v38 = vrot.slane %v6988_v30, 1  ;;  %v1924_v22 = vsel %vm1663_vm2, %v6804_v48, -inf  ;;  %v1931_v10 = vrot.slane %v6810_v63, 4 }
 0x177   : > { %9722 = vst [vmem:[#allocation91_spill] sm:$0xff] %v7013_v3  ;;  %9723 = vst [vmem:[#allocation92_spill] sm:$0xff] %v7016_v34  ;;  %v2787_v33 = vrot.slane %v2786_v35, 1  ;;  %v2793_v26 = vrot.slane %v7000_v52, 1  ;;  %v2797_v51 = vmax.f32 %v2795_v54, %v2796_v25  ;;  %v1925_v8 = vrot.slane %v1924_v22, 4 }
 0x178   : > { %v1922_v60 = vrot.slane %v1921_v24, 1  ;;  %v1932_v4 = vmax.f32 %v6810_v63, %v1931_v10  ;;  %v1937_v9 = vsel %vm1663_vm2, %v6816_v0, -inf  ;;  %v2802_v5 = vrot.slane %v6703_v45, 4  ;;  %v7028_v58 = vpop.f32.mrb[60].mxu0  ;;  %v7030_v53 = vpop.f32.mrb[60].mxu1 }
 0x179   : > { %9724 = vst [vmem:[#allocation93_spill] sm:$0xff] %v7030_v53  ;;  %v2798_v48 = vrot.slane %v2797_v51, 2  ;;  %v1926_v7 = vmax.f32 %v1924_v22, %v1925_v8  ;;  %v1938_v3 = vrot.slane %v1937_v9, 4  ;;  %v2808_v20 = vsel %vm1663_vm2, %v6714_v36, -inf  ;;  %v7034_v54 = vpop.f32.mrb[61].mxu0  ;;  %v7036_v25 = vpop.f32.mrb[61].mxu1 }
 0x17a   : > { %9725 = vst [vmem:[#allocation94_spill] sm:$0xff] %v7036_v25  ;;  %v1933_v63 = vrot.slane %v1932_v4, 2  ;;  %v2803_v10 = vmax.f32 %v6703_v45, %v2802_v5  ;;  %v2809_v0 = vrot.slane %v2808_v20, 4  ;;  %v2815_v50 = vrot.slane %v6723_v21, 4  ;;  %v7040_v49 = vpop.f32.mrb[62].mxu0  ;;  %v7042_v12 = vpop.f32.mrb[62].mxu1 }
 0x17b   : > { %9726 = vst [vmem:[#allocation95_spill] sm:$0xff] %v7042_v12  ;;  %v2799_v34 = vmax.f32 %v2797_v51, %v2798_v48  ;;  %v1927_v22 = vrot.slane %v1926_v7, 2  ;;  %v1939_v8 = vmax.f32 %v1937_v9, %v1938_v3  ;;  %v1944_v15 = vrot.slane %v6832_v16, 4  ;;  %v7045_v36 = vpop.f32.mrb[63].mxu0  ;;  %v7047_v53 = vpop.f32.mrb[63].mxu1 }
 0x17c   : > { %9727 = vst [vmem:[#allocation96_spill] sm:$0xff] %v7047_v53  ;;  %v1934_v25 = vmax.f32 %v1932_v4, %v1933_v63  ;;  %v2804_v18 = vrot.slane %v2803_v10, 2  ;;  %v2810_v61 = vmax.f32 %v2808_v20, %v2809_v0  ;;  %v2816_v45 = vmax.f32 %v6723_v21, %v2815_v50 }
 0x17d   : > { %v2800_v5 = vrot.slane %v2799_v34, 1  ;;  %v1928_v44 = vmax.f32 %v1926_v7, %v1927_v22  ;;  %v1940_v40 = vrot.slane %v1939_v8, 2  ;;  %v1945_v57 = vmax.f32 %v6832_v16, %v1944_v15 }
 0x17e   : > { %v1935_v12 = vrot.slane %v1934_v25, 1  ;;  %v7051_v51 = vmax.f32 %v2803_v10, %v2804_v18  ;;  %v2811_v3 = vrot.slane %v2810_v61, 2  ;;  %v2817_v9 = vrot.slane %v2816_v45, 2 }
 0x17f   : > { %v7054_v48 = vmax.f32 %v6977_v1, %v1903_v29  ;;  %v7057_v53 = vmax.f32 %v6988_v30, %v2780_v38  ;;  %v1929_v4 = vrot.slane %v1928_v44, 1  ;;  %v7059_v20 = vmax.f32 %v1939_v8, %v1940_v40 }
 0x180   : > { %v7062_v21 = vmax.f32 %v6986_v6, %v1916_v59  ;;  %v7064_v50 = vmax.f32 %v2786_v35, %v2787_v33  ;;  %v7066_v16 = vmax.f32 %v2810_v61, %v2811_v3  ;;  %v1946_v18 = vrot.slane %v1945_v57, 2  ;;  %v7068_v15 = vpop.f32.mrb[64].mxu0  ;;  %v7070_v7 = vpop.f32.mrb[64].mxu1 }
 0x181   : > { %9728 = vst [vmem:[#allocation97_spill] sm:$0xff] %v7054_v48  ;;  %9729 = vst [vmem:[#allocation98_spill] sm:$0xff] %v7057_v53  ;;  %v7073_v1 = vmax.f32 %v7000_v52, %v2793_v26  ;;  %v7075_v30 = vmax.f32 %v1921_v24, %v1922_v60  ;;  %v7077_v29 = vmax.f32 %v2816_v45, %v2817_v9  ;;  %v2821_v40 = vsel %vm1663_vm2, %v6730_v23, -inf  ;;  %v7081_v6 = vpop.f32.mrb[65].mxu0  ;;  %v7083_v35 = vpop.f32.mrb[65].mxu1 }
 0x182   : > { %9730 = vst [vmem:[#allocation99_spill] sm:$0xff] %v7062_v21  ;;  %9731 = vst [vmem:[#allocation100_spill] sm:$0xff] %v7064_v50  ;;  %v7085_v61 = vmax.f32 %v2799_v34, %v2800_v5  ;;  %v7087_v59 = vmax.f32 %v1934_v25, %v1935_v12  ;;  %v2806_v38 = vrot.slane %v7051_v51, 1  ;;  %v2822_v33 = vrot.slane %v2821_v40, 4  ;;  %v7090_v52 = vpop.f32.mrb[66].mxu0  ;;  %v7092_v24 = vpop.f32.mrb[66].mxu1 }
 0x183   : > { %9732 = vst [vmem:[#allocation101_spill] sm:$0xff] %v7070_v7  ;;  %9733 = vst [vmem:[#allocation102_spill] sm:$0xff] %v7073_v1  ;;  %v7094_v26 = vmax.f32 %v1928_v44, %v1929_v4  ;;  %v1942_v60 = vrot.slane %v7059_v20, 1  ;;  %v1950_v23 = vsel %vm1663_vm2, %v6845_v17, -inf  ;;  %v1957_v63 = vrot.slane %v6857_v39, 4  ;;  %v7100_v34 = vpop.f32.mrb[67].mxu0 }
 0x184   : > { %9734 = vst [vmem:[#allocation103_spill] sm:$0xff] %v7075_v30  ;;  %9735 = vst [vmem:[#allocation104_spill] sm:$0xff] %v7083_v35  ;;  %v7102_v12 = vpop.f32.mrb[67].mxu1  ;;  %v2813_v25 = vrot.slane %v7066_v16, 1  ;;  %v1947_v10 = vmax.f32 %v1945_v57, %v1946_v18  ;;  %v2823_v0 = vmax.f32 %v2821_v40, %v2822_v33  ;;  %v1951_v22 = vrot.slane %v1950_v23, 4  ;;  %v9741_v40 = vld [vmem:[#allocation42_spill] sm:$0xff] }
 0x185   : > { %9736 = vst [vmem:[#allocation105_spill] sm:$0xff] %v7085_v61  ;;  %9737 = vst [vmem:[#allocation106_spill] sm:$0xff] %v7087_v59  ;;  %v2819_v8 = vrot.slane %v7077_v29, 1  ;;  %v1958_v44 = vmax.f32 %v6857_v39, %v1957_v63  ;;  %v1963_v45 = vsel %vm1663_vm2, %v6866_v27, -inf  ;;  %v2828_v17 = vrot.slane %v6746_v14, 4 }
 0x186   : > { %9738 = vst [vmem:[#allocation107_spill] sm:$0xff] %v7092_v24  ;;  %9739 = vst [vmem:[#allocation108_spill] sm:$0xff] %v7094_v26  ;;  %v2824_v5 = vrot.slane %v2823_v0, 2  ;;  %v1952_v3 = vmax.f32 %v1950_v23, %v1951_v22  ;;  %v1964_v9 = vrot.slane %v1963_v45, 4  ;;  %v2834_v4 = vsel %vm1663_vm2, %v6751_v62, -inf }
 0x187   : > { %9740 = vst [vmem:[#allocation109_spill] sm:$0xff] %v7102_v12  ;;  %v1959_v61 = vrot.slane %v1958_v44, 2  ;;  %v2829_v57 = vmax.f32 %v6746_v14, %v2828_v17  ;;  %v2835_v18 = vrot.slane %v2834_v4, 4  ;;  %v2841_v33 = vrot.slane %v9741_v40, 4 }
 0x188   : > { %v2825_v50 = vmax.f32 %v2823_v0, %v2824_v5  ;;  %v1953_v1 = vrot.slane %v1952_v3, 2  ;;  %v1965_v39 = vmax.f32 %v1963_v45, %v1964_v9  ;;  %v1970_v63 = vrot.slane %v6886_v47, 4  ;;  %v7115_v27 = vpop.f32.mrb[68].mxu0  ;;  %v7117_v53 = vpop.f32.mrb[68].mxu1 }
 0x189   : > { %9742 = vst [vmem:[#allocation42_spill] sm:$0xff] %v7117_v53  ;;  %v1960_v23 = vmax.f32 %v1958_v44, %v1959_v61  ;;  %v2830_v22 = vrot.slane %v2829_v57, 2  ;;  %v2836_v26 = vmax.f32 %v2834_v4, %v2835_v18  ;;  %v2842_v62 = vmax.f32 %v9741_v40, %v2841_v33  ;;  %v7120_v21 = vpop.f32.mrb[69].mxu0  ;;  %v7122_v14 = vpop.f32.mrb[69].mxu1 }
 0x18a   : > { %9743 = vst [vmem:[#allocation110_spill] sm:$0xff] %v7122_v14  ;;  %v1948_v17 = vrot.slane %v1947_v10, 1  ;;  %v2826_v48 = vrot.slane %v2825_v50, 1  ;;  %v1966_v0 = vrot.slane %v1965_v39, 2  ;;  %v1971_v45 = vmax.f32 %v6886_v47, %v1970_v63  ;;  %v7125_v5 = vpop.f32.mrb[70].mxu0  ;;  %v7127_v9 = vpop.f32.mrb[70].mxu1 }
 0x18b   : > { %9744 = vst [vmem:[#allocation111_spill] sm:$0xff] %v7127_v9  ;;  %v7129_v59 = vmax.f32 %v1952_v3, %v1953_v1  ;;  %v1961_v61 = vrot.slane %v1960_v23, 1  ;;  %v2837_v44 = vrot.slane %v2836_v26, 2  ;;  %v2843_v4 = vrot.slane %v2842_v62, 2  ;;  %v7131_v18 = vpop.f32.mrb[71].mxu0  ;;  %v7133_v40 = vpop.f32.mrb[71].mxu1 }
 0x18c   : > { %9745 = vst [vmem:[#allocation112_spill] sm:$0xff] %v7133_v40  ;;  %v7136_v33 = vmax.f32 %v7051_v51, %v2806_v38  ;;  %v7138_v30 = vmax.f32 %v1965_v39, %v1966_v0  ;;  %v2831_v14 = vmax.f32 %v2829_v57, %v2830_v22  ;;  %v1972_v47 = vrot.slane %v1971_v45, 2  ;;  %v9751_v38 = vld [vmem:[#allocation45_spill] sm:$0xff] }
 0x18d   : > { %v7141_v63 = vmax.f32 %v7059_v20, %v1942_v60  ;;  %v7144_v1 = vmax.f32 %v7066_v16, %v2813_v25  ;;  %v7146_v3 = vmax.f32 %v2836_v26, %v2837_v44  ;;  %v7148_v9 = vmax.f32 %v2842_v62, %v2843_v4  ;;  %v9757_v44 = vld [vmem:[#allocation53_spill] sm:$0xff] }
 0x18e   : > { %9746 = vst [vmem:[#allocation113_spill] sm:$0xff] %v7136_v33  ;;  %v7151_v53 = vmax.f32 %v7077_v29, %v2819_v8  ;;  %v7153_v40 = vmax.f32 %v1947_v10, %v1948_v17  ;;  %v7155_v51 = vmax.f32 %v1971_v45, %v1972_v47  ;;  %v2847_v57 = vsel %vm1663_vm2, %v9751_v38, -inf }
 0x18f   : > { %9747 = vst [vmem:[#allocation114_spill] sm:$0xff] %v7141_v63  ;;  %9748 = vst [vmem:[#allocation115_spill] sm:$0xff] %v7144_v1  ;;  %v7159_v39 = vmax.f32 %v2825_v50, %v2826_v48  ;;  %v1955_v20 = vrot.slane %v7129_v59, 1  ;;  %v7162_v16 = vmax.f32 %v1960_v23, %v1961_v61  ;;  %v2848_v26 = vrot.slane %v2847_v57, 4 }
 0x190   : > { %9749 = vst [vmem:[#allocation116_spill] sm:$0xff] %v7151_v53  ;;  %9750 = vst [vmem:[#allocation117_spill] sm:$0xff] %v7153_v40  ;;  %v1968_v60 = vrot.slane %v7138_v30, 1  ;;  %v2832_v25 = vrot.slane %v2831_v14, 1  ;;  %v1976_v29 = vsel %vm1663_vm2, %v6891_v2, -inf  ;;  %v1983_v10 = vrot.slane %v6896_v56, 4 }
 0x191   : > { %9752 = vst [vmem:[#allocation45_spill] sm:$0xff] %v7159_v39  ;;  %9753 = vst [vmem:[#allocation118_spill] sm:$0xff] %v7162_v16  ;;  %v7168_v8 = vpop.f32.mrb[72].mxu0  ;;  %v7170_v22 = vpop.f32.mrb[72].mxu1  ;;  %v2839_v48 = vrot.slane %v7146_v3, 1  ;;  %v2845_v50 = vrot.slane %v7148_v9, 1  ;;  %v2849_v62 = vmax.f32 %v2847_v57, %v2848_v26 }
 0x192   : > { %9754 = vst [vmem:[#allocation119_spill] sm:$0xff] %v7170_v22  ;;  %v1977_v23 = vrot.slane %v1976_v29, 4  ;;  %v7174_v17 = vpop.f32.mrb[73].mxu0  ;;  %v7176_v0 = vpop.f32.mrb[73].mxu1  ;;  %v1974_v45 = vrot.slane %v7155_v51, 1  ;;  %v1984_v2 = vmax.f32 %v6896_v56, %v1983_v10  ;;  %v1989_v61 = vsel %vm1663_vm2, %v6901_v55, -inf }
 0x193   : > { %9755 = vst [vmem:[#allocation120_spill] sm:$0xff] %v7174_v17  ;;  %9756 = vst [vmem:[#allocation121_spill] sm:$0xff] %v7176_v0  ;;  %v2854_v4 = vrot.slane %v9757_v44, 4  ;;  %v7183_v47 = vpop.f32.mrb[74].mxu0  ;;  %v7185_v38 = vpop.f32.mrb[74].mxu1  ;;  %v2850_v39 = vrot.slane %v2849_v62, 2 }
 0x194   : > { %9758 = vst [vmem:[#allocation53_spill] sm:$0xff] %v7183_v47  ;;  %9759 = vst [vmem:[#allocation122_spill] sm:$0xff] %v7185_v38  ;;  %v1978_v57 = vmax.f32 %v1976_v29, %v1977_v23  ;;  %v1990_v26 = vrot.slane %v1989_v61, 4  ;;  %v9760_v53 = vld [vmem:[#allocation54_spill] sm:$0xff]  ;;  %v7189_v33 = vpop.f32.mrb[75].mxu0  ;;  %v7191_v63 = vpop.f32.mrb[75].mxu1 }
 0x195   : > { %v2860_v1 = vsel %vm1663_vm2, %v9760_v53, -inf  ;;  %9761 = vst [vmem:[#allocation54_spill] sm:$0xff] %v7189_v33  ;;  %9762 = vst [vmem:[#allocation123_spill] sm:$0xff] %v7191_v63  ;;  %v1985_v56 = vrot.slane %v1984_v2, 2  ;;  %v2855_v10 = vmax.f32 %v9757_v44, %v2854_v4  ;;  %v9763_v16 = vld [vmem:[#allocation55_spill] sm:$0xff]  ;;  %v2851_v0 = vmax.f32 %v2849_v62, %v2850_v39 }
 0x196   : > { %v2861_v55 = vrot.slane %v2860_v1, 4  ;;  %v2867_v40 = vrot.slane %v9763_v16, 4  ;;  %v1979_v22 = vrot.slane %v1978_v57, 2  ;;  %v1991_v12 = vmax.f32 %v1989_v61, %v1990_v26 }
 0x197   : > { %v1996_v38 = vrot.slane %v6938_v19, 4  ;;  %v1986_v29 = vmax.f32 %v1984_v2, %v1985_v56  ;;  %v2856_v23 = vrot.slane %v2855_v10, 2  ;;  %v2852_v35 = vrot.slane %v2851_v0, 1 }
 0x198   : > { %v2862_v24 = vmax.f32 %v2860_v1, %v2861_v55  ;;  %v2868_v53 = vmax.f32 %v9763_v16, %v2867_v40  ;;  %v1980_v7 = vmax.f32 %v1978_v57, %v1979_v22  ;;  %v1992_v33 = vrot.slane %v1991_v12, 2  ;;  %v7200_v39 = vpop.f32.mrb[76].mxu0  ;;  %v7202_v62 = vpop.f32.mrb[76].mxu1 }
 0x199   : > { %v1997_v63 = vmax.f32 %v6938_v19, %v1996_v38  ;;  %v1987_v47 = vrot.slane %v1986_v29, 1  ;;  %v7198_v44 = vmax.f32 %v2855_v10, %v2856_v23  ;;  %9764 = vst [vmem:[#allocation55_spill] sm:$0xff] %v7202_v62  ;;  %v7205_v2 = vmax.f32 %v7129_v59, %v1955_v20  ;;  %v7211_v22 = vpop.f32.mrb[77].mxu0  ;;  %v7213_v19 = vpop.f32.mrb[77].mxu1 }
 0x19a   : > { %v2863_v4 = vrot.slane %v2862_v24, 2  ;;  %v2869_v17 = vrot.slane %v2868_v53, 2  ;;  %v7207_v1 = vmax.f32 %v2831_v14, %v2832_v25  ;;  %v1981_v40 = vrot.slane %v1980_v7, 1  ;;  %9767 = vst [vmem:[#allocation126_spill] sm:$0xff] %v7213_v19  ;;  %v7223_v59 = vpop.f32.mrb[78].mxu0  ;;  %v7225_v14 = vpop.f32.mrb[78].mxu1 }
 0x19b   : > { %9765 = vst [vmem:[#allocation124_spill] sm:$0xff] %v7205_v2  ;;  %v7209_v16 = vmax.f32 %v1991_v12, %v1992_v33  ;;  %v7216_v61 = vmax.f32 %v7138_v30, %v1968_v60  ;;  %v7219_v38 = vmax.f32 %v7146_v3, %v2839_v48  ;;  %v1998_v26 = vrot.slane %v1997_v63, 2  ;;  %9770 = vst [vmem:[#allocation129_spill] sm:$0xff] %v7225_v14  ;;  %v9773_v25 = vld [vmem:[#allocation56_spill] sm:$0xff]  ;;  %v7235_v60 = vpop.f32.mrb[79].mxu0  ;;  %v7237_v3 = vpop.f32.mrb[79].mxu1 }
 0x19c   : > { %9766 = vst [vmem:[#allocation125_spill] sm:$0xff] %v7207_v1  ;;  %v7221_v57 = vmax.f32 %v2862_v24, %v2863_v4  ;;  %v7228_v12 = vmax.f32 %v7148_v9, %v2845_v50  ;;  %v7231_v33 = vmax.f32 %v7155_v51, %v1974_v45  ;;  %v2870_v20 = vmax.f32 %v2868_v53, %v2869_v17 }
 0x19d   : > { %9768 = vst [vmem:[#allocation127_spill] sm:$0xff] %v7216_v61  ;;  %9769 = vst [vmem:[#allocation128_spill] sm:$0xff] %v7219_v38  ;;  %v2873_v30 = vsel %vm1663_vm2, %v9773_v25, -inf  ;;  %v7239_v24 = vmax.f32 %v2851_v0, %v2852_v35  ;;  %v7241_v48 = vmax.f32 %v1986_v29, %v1987_v47  ;;  %v2858_v56 = vrot.slane %v7198_v44, 1  ;;  %v9778_v25 = vld [vmem:[#allocation60_spill] sm:$0xff] }
 0x19e   : > { %9771 = vst [vmem:[#allocation130_spill] sm:$0xff] %v7228_v12  ;;  %9772 = vst [vmem:[#allocation131_spill] sm:$0xff] %v7231_v33  ;;  %v2874_v10 = vrot.slane %v2873_v30, 4  ;;  %v7244_v9 = vmax.f32 %v1980_v7, %v1981_v40  ;;  %v1994_v51 = vrot.slane %v7209_v16, 1  ;;  %v2002_v50 = vsel %vm1663_vm2, %v6948_v37, -inf }
 0x19f   : > { %9774 = vst [vmem:[#allocation56_spill] sm:$0xff] %v7237_v3  ;;  %9775 = vst [vmem:[#allocation132_spill] sm:$0xff] %v7239_v24  ;;  %v2009_v17 = vrot.slane %v6953_v43, 4  ;;  %v2865_v45 = vrot.slane %v7221_v57, 1  ;;  %v1999_v55 = vmax.f32 %v1997_v63, %v1998_v26  ;;  %v2003_v35 = vrot.slane %v2002_v50, 4 }
 0x1a0   : > { %9776 = vst [vmem:[#allocation133_spill] sm:$0xff] %v7241_v48  ;;  %9777 = vst [vmem:[#allocation134_spill] sm:$0xff] %v7244_v9  ;;  %v2875_v23 = vmax.f32 %v2873_v30, %v2874_v10  ;;  %v2871_v0 = vrot.slane %v2870_v20, 1  ;;  %v2015_v29 = vsel %vm1663_vm2, %v6962_v32, -inf  ;;  %v2880_v7 = vrot.slane %v6834_v31, 4  ;;  %v7257_v24 = vpop.f32.mrb[80].mxu0 }
 0x1a1   : > { %v2010_v47 = vmax.f32 %v6953_v43, %v2009_v17  ;;  %v2004_v4 = vmax.f32 %v2002_v50, %v2003_v35  ;;  %v2016_v40 = vrot.slane %v2015_v29, 4  ;;  %v2886_v37 = vsel %vm1663_vm2, %v9778_v25, -inf  ;;  %v7259_v38 = vpop.f32.mrb[80].mxu1  ;;  %v9780_v43 = vld [vmem:[#allocation63_spill] sm:$0xff]  ;;  %v7263_v17 = vpop.f32.mrb[81].mxu0 }
 0x1a2   : > { %v2876_v53 = vrot.slane %v2875_v23, 2  ;;  %9779 = vst [vmem:[#allocation60_spill] sm:$0xff] %v7259_v38  ;;  %v2881_v26 = vmax.f32 %v6834_v31, %v2880_v7  ;;  %v2887_v30 = vrot.slane %v2886_v37, 4  ;;  %v2893_v10 = vrot.slane %v9780_v43, 4  ;;  %v7265_v32 = vpop.f32.mrb[81].mxu1  ;;  %v7268_v25 = vpop.f32.mrb[82].mxu0 }
 0x1a3   : > { %v2011_v63 = vrot.slane %v2010_v47, 2  ;;  %9781 = vst [vmem:[#allocation63_spill] sm:$0xff] %v7265_v32  ;;  %v2005_v50 = vrot.slane %v2004_v4, 2  ;;  %v2017_v35 = vmax.f32 %v2015_v29, %v2016_v40  ;;  %v2022_v1 = vrot.slane %v6973_v13, 4  ;;  %v7270_v48 = vpop.f32.mrb[82].mxu1  ;;  %v7273_v7 = vpop.f32.mrb[83].mxu0 }
 0x1a4   : > { %v2877_v12 = vmax.f32 %v2875_v23, %v2876_v53  ;;  %9782 = vst [vmem:[#allocation135_spill] sm:$0xff] %v7270_v48  ;;  %v2882_v2 = vrot.slane %v2881_v26, 2  ;;  %v2888_v9 = vmax.f32 %v2886_v37, %v2887_v30  ;;  %v2894_v31 = vmax.f32 %v9780_v43, %v2893_v10  ;;  %v7275_v33 = vpop.f32.mrb[83].mxu1 }
 0x1a5   : > { %v2012_v61 = vmax.f32 %v2010_v47, %v2011_v63  ;;  %9783 = vst [vmem:[#allocation136_spill] sm:$0xff] %v7275_v33  ;;  %v2000_v38 = vrot.slane %v1999_v55, 1  ;;  %v2018_v23 = vrot.slane %v2017_v35, 2  ;;  %v2023_v29 = vmax.f32 %v6973_v13, %v2022_v1 }
 0x1a6   : > { %v2878_v32 = vrot.slane %v2877_v12, 1  ;;  %v7278_v53 = vmax.f32 %v2004_v4, %v2005_v50  ;;  %v2889_v3 = vrot.slane %v2888_v9, 2  ;;  %v2895_v14 = vrot.slane %v2894_v31, 2 }
 0x1a7   : > { %v2013_v40 = vrot.slane %v2012_v61, 1  ;;  %v7281_v47 = vmax.f32 %v7198_v44, %v2858_v56  ;;  %v7283_v37 = vmax.f32 %v2017_v35, %v2018_v23  ;;  %v7285_v63 = vmax.f32 %v2881_v26, %v2882_v2  ;;  %v9789_v56 = vld [vmem:[#allocation66_spill] sm:$0xff] }
 0x1a8   : > { %v2024_v30 = vrot.slane %v2023_v29, 2  ;;  %v7288_v43 = vmax.f32 %v7209_v16, %v1994_v51  ;;  %v7291_v10 = vmax.f32 %v7221_v57, %v2865_v45  ;;  %v7293_v13 = vmax.f32 %v2888_v9, %v2889_v3  ;;  %v7305_v26 = vpop.f32.mrb[84].mxu0  ;;  %v7307_v16 = vpop.f32.mrb[84].mxu1 }
 0x1a9   : > { %9784 = vst [vmem:[#allocation137_spill] sm:$0xff] %v7281_v47  ;;  %v7295_v1 = vmax.f32 %v2894_v31, %v2895_v14  ;;  %v7297_v4 = vmax.f32 %v2870_v20, %v2871_v0  ;;  %v7299_v50 = vmax.f32 %v1999_v55, %v2000_v38  ;;  %v2899_v2 = vsel %vm1663_vm2, %v9789_v56, -inf  ;;  %9790 = vst [vmem:[#allocation66_spill] sm:$0xff] %v7307_v16  ;;  %v7314_v20 = vpop.f32.mrb[85].mxu0  ;;  %v7316_v38 = vpop.f32.mrb[85].mxu1 }
 0x1aa   : > { %9785 = vst [vmem:[#allocation138_spill] sm:$0xff] %v7288_v43  ;;  %9786 = vst [vmem:[#allocation139_spill] sm:$0xff] %v7291_v10  ;;  %v7301_v44 = vmax.f32 %v2023_v29, %v2024_v30  ;;  %v7309_v51 = vmax.f32 %v2877_v12, %v2878_v32  ;;  %v2007_v57 = vrot.slane %v7278_v53, 1  ;;  %v7312_v3 = vmax.f32 %v2012_v61, %v2013_v40  ;;  %v7323_v12 = vpop.f32.mrb[86].mxu0  ;;  %v7325_v32 = vpop.f32.mrb[86].mxu1 }
 0x1ab   : > { %9787 = vst [vmem:[#allocation140_spill] sm:$0xff] %v7297_v4  ;;  %9788 = vst [vmem:[#allocation141_spill] sm:$0xff] %v7299_v50  ;;  %v2900_v14 = vrot.slane %v2899_v2, 4  ;;  %v2020_v9 = vrot.slane %v7283_v37, 1  ;;  %v2884_v45 = vrot.slane %v7285_v63, 1  ;;  %v2028_v55 = vsel %vm1663_vm2, %v6979_v46, -inf }
 0x1ac   : > { %9791 = vst [vmem:[#allocation142_spill] sm:$0xff] %v7309_v51  ;;  %9792 = vst [vmem:[#allocation143_spill] sm:$0xff] %v7312_v3  ;;  %v2035_v0 = vrot.slane %v6990_v28, 4  ;;  %v2891_v61 = vrot.slane %v7293_v13, 1  ;;  %v2897_v35 = vrot.slane %v7295_v1, 1  ;;  %v2029_v23 = vrot.slane %v2028_v55, 4 }
 0x1ad   : > { %9793 = vst [vmem:[#allocation144_spill] sm:$0xff] %v7316_v38  ;;  %9794 = vst [vmem:[#allocation145_spill] sm:$0xff] %v7325_v32  ;;  %v2901_v31 = vmax.f32 %v2899_v2, %v2900_v14  ;;  %v7329_v29 = vpop.f32.mrb[87].mxu0  ;;  %v7331_v40 = vpop.f32.mrb[87].mxu1  ;;  %v2026_v30 = vrot.slane %v7301_v44, 1  ;;  %v2041_v56 = vsel %vm1663_vm2, %v7002_v11, -inf }
 0x1ae   : > { %9795 = vst [vmem:[#allocation146_spill] sm:$0xff] %v7329_v29  ;;  %9796 = vst [vmem:[#allocation147_spill] sm:$0xff] %v7331_v40  ;;  %v2036_v46 = vmax.f32 %v6990_v28, %v2035_v0  ;;  %v9797_v51 = vld [vmem:[#allocation67_spill] sm:$0xff]  ;;  %v2030_v47 = vmax.f32 %v2028_v55, %v2029_v23  ;;  %v2042_v43 = vrot.slane %v2041_v56, 4  ;;  %v9798_v3 = vld [vmem:[#allocation68_spill] sm:$0xff]  ;;  %v2919_v40 = vrot.slane %v6898_v41, 4 }
 0x1af   : > { %v2906_v10 = vrot.slane %v9797_v51, 4  ;;  %v2902_v4 = vrot.slane %v2901_v31, 2  ;;  %v2912_v2 = vsel %vm1663_vm2, %v9798_v3, -inf  ;;  %v2048_v0 = vrot.slane %v7028_v58, 4 }
 0x1b0   : > { %v2037_v14 = vrot.slane %v2036_v46, 2  ;;  %v2913_v32 = vrot.slane %v2912_v2, 4  ;;  %v2031_v16 = vrot.slane %v2030_v47, 2  ;;  %v2043_v28 = vmax.f32 %v2041_v56, %v2042_v43  ;;  %v7344_v23 = vpop.f32.mrb[88].mxu0  ;;  %v7346_v19 = vpop.f32.mrb[88].mxu1 }
 0x1b1   : > { %v2907_v50 = vmax.f32 %v9797_v51, %v2906_v10  ;;  %v2903_v38 = vmax.f32 %v2901_v31, %v2902_v4  ;;  %v2920_v55 = vmax.f32 %v6898_v41, %v2919_v40  ;;  %9799 = vst [vmem:[#allocation67_spill] sm:$0xff] %v7346_v19  ;;  %v2049_v51 = vmax.f32 %v7028_v58, %v2048_v0  ;;  %v7349_v29 = vpop.f32.mrb[89].mxu0  ;;  %v7351_v4 = vpop.f32.mrb[89].mxu1 }
 0x1b2   : > { %v2038_v11 = vmax.f32 %v2036_v46, %v2037_v14  ;;  %v2914_v48 = vmax.f32 %v2912_v2, %v2913_v32  ;;  %v2032_v62 = vmax.f32 %v2030_v47, %v2031_v16  ;;  %v2044_v10 = vrot.slane %v2043_v28, 2  ;;  %9800 = vst [vmem:[#allocation68_spill] sm:$0xff] %v7351_v4  ;;  %v7355_v56 = vpop.f32.mrb[90].mxu0  ;;  %v7357_v41 = vpop.f32.mrb[90].mxu1 }
 0x1b3   : > { %v2908_v33 = vrot.slane %v2907_v50, 2  ;;  %v2904_v3 = vrot.slane %v2903_v38, 1  ;;  %v2921_v32 = vrot.slane %v2920_v55, 2  ;;  %9801 = vst [vmem:[#allocation148_spill] sm:$0xff] %v7357_v41  ;;  %v7360_v40 = vmax.f32 %v7278_v53, %v2007_v57  ;;  %v7367_v2 = vpop.f32.mrb[91].mxu0  ;;  %v7369_v14 = vpop.f32.mrb[91].mxu1 }
 0x1b4   : > { %v2039_v43 = vrot.slane %v2038_v11, 1  ;;  %v2915_v46 = vrot.slane %v2914_v48, 2  ;;  %v7363_v47 = vmax.f32 %v7285_v63, %v2884_v45  ;;  %v2033_v58 = vrot.slane %v2032_v62, 1  ;;  %9804 = vst [vmem:[#allocation151_spill] sm:$0xff] %v7369_v14 }
 0x1b5   : > { %v7353_v31 = vmax.f32 %v2907_v50, %v2908_v33  ;;  %9802 = vst [vmem:[#allocation149_spill] sm:$0xff] %v7360_v40  ;;  %v7365_v16 = vmax.f32 %v2043_v28, %v2044_v10  ;;  %v7372_v33 = vmax.f32 %v7283_v37, %v2020_v9  ;;  %v7375_v50 = vmax.f32 %v7293_v13, %v2891_v61 }
 0x1b6   : > { %9803 = vst [vmem:[#allocation150_spill] sm:$0xff] %v7363_v47  ;;  %v2916_v0 = vmax.f32 %v2914_v48, %v2915_v46  ;;  %v2050_v41 = vrot.slane %v2049_v51, 2  ;;  %v7378_v53 = vmax.f32 %v7295_v1, %v2897_v35  ;;  %v7381_v63 = vmax.f32 %v7301_v44, %v2026_v30 }
 0x1b7   : > { %9805 = vst [vmem:[#allocation152_spill] sm:$0xff] %v7372_v33  ;;  %9806 = vst [vmem:[#allocation153_spill] sm:$0xff] %v7375_v50  ;;  %v2922_v57 = vmax.f32 %v2920_v55, %v2921_v32  ;;  %v2925_v45 = vsel %vm1663_vm2, %v6903_v42, -inf  ;;  %v7385_v28 = vmax.f32 %v2903_v38, %v2904_v3  ;;  %v7387_v10 = vmax.f32 %v2038_v11, %v2039_v43  ;;  %v9812_v3 = vld [vmem:[#allocation77_spill] sm:$0xff] }
 0x1b8   : > { %9807 = vst [vmem:[#allocation154_spill] sm:$0xff] %v7378_v53  ;;  %9808 = vst [vmem:[#allocation155_spill] sm:$0xff] %v7381_v63  ;;  %v2910_v37 = vrot.slane %v7353_v31, 1  ;;  %v2926_v13 = vrot.slane %v2925_v45, 4  ;;  %v7390_v9 = vmax.f32 %v2032_v62, %v2033_v58  ;;  %v2046_v48 = vrot.slane %v7365_v16, 1  ;;  %v7396_v38 = vpop.f32.mrb[92].mxu0 }
 0x1b9   : > { %9809 = vst [vmem:[#allocation156_spill] sm:$0xff] %v7385_v28  ;;  %9810 = vst [vmem:[#allocation157_spill] sm:$0xff] %v7387_v10  ;;  %v2054_v1 = vsel %vm1663_vm2, %v7034_v54, -inf  ;;  %v2061_v44 = vrot.slane %v7040_v49, 4  ;;  %v2917_v61 = vrot.slane %v2916_v0, 1  ;;  %v2051_v35 = vmax.f32 %v2049_v51, %v2050_v41  ;;  %v7402_v46 = vpop.f32.mrb[93].mxu0 }
 0x1ba   : > { %9811 = vst [vmem:[#allocation158_spill] sm:$0xff] %v7390_v9  ;;  %v2927_v30 = vmax.f32 %v2925_v45, %v2926_v13  ;;  %v2055_v42 = vrot.slane %v2054_v1, 4  ;;  %v2923_v11 = vrot.slane %v2922_v57, 1  ;;  %v2067_v62 = vsel %vm1663_vm2, %v7045_v36, -inf  ;;  %v9813_v28 = vld [vmem:[#allocation79_spill] sm:$0xff]  ;;  %v7406_v41 = vpop.f32.mrb[94].mxu0 }
 0x1bb   : > { %v2062_v55 = vmax.f32 %v7040_v49, %v2061_v44  ;;  %v2932_v43 = vrot.slane %v9812_v3, 4  ;;  %v2068_v58 = vrot.slane %v2067_v62, 4  ;;  %v2938_v51 = vsel %vm1663_vm2, %v9813_v28, -inf  ;;  %v9814_v49 = vld [vmem:[#allocation80_spill] sm:$0xff]  ;;  %v7410_v53 = vpop.f32.mrb[95].mxu0  ;;  %v7412_v36 = vpop.f32.mrb[92].mxu1 }
 0x1bc   : > { %v2928_v32 = vrot.slane %v2927_v30, 2  ;;  %v2056_v54 = vmax.f32 %v2054_v1, %v2055_v42  ;;  %v2939_v50 = vrot.slane %v2938_v51, 4  ;;  %v2945_v44 = vrot.slane %v9814_v49, 4  ;;  %9815 = vst [vmem:[#allocation77_spill] sm:$0xff] %v7412_v36  ;;  %v7415_v42 = vpop.f32.mrb[93].mxu1 }
 0x1bd   : > { %v2063_v45 = vrot.slane %v2062_v55, 2  ;;  %v2933_v13 = vmax.f32 %v9812_v3, %v2932_v43  ;;  %v2069_v33 = vmax.f32 %v2067_v62, %v2068_v58  ;;  %v2074_v1 = vrot.slane %v7068_v15, 4  ;;  %9816 = vst [vmem:[#allocation79_spill] sm:$0xff] %v7415_v42  ;;  %v7418_v3 = vpop.f32.mrb[94].mxu1 }
 0x1be   : > { %v2929_v47 = vmax.f32 %v2927_v30, %v2928_v32  ;;  %v2057_v9 = vrot.slane %v2056_v54, 2  ;;  %v2940_v10 = vmax.f32 %v2938_v51, %v2939_v50  ;;  %v2946_v63 = vmax.f32 %v9814_v49, %v2945_v44  ;;  %9817 = vst [vmem:[#allocation80_spill] sm:$0xff] %v7418_v3  ;;  %v7421_v36 = vpop.f32.mrb[95].mxu1 }
 0x1bf   : > { %v2064_v28 = vmax.f32 %v2062_v55, %v2063_v45  ;;  %v2934_v40 = vrot.slane %v2933_v13, 2  ;;  %v2052_v43 = vrot.slane %v2051_v35, 1  ;;  %v2070_v4 = vrot.slane %v2069_v33, 2  ;;  %9818 = vst [vmem:[#allocation159_spill] sm:$0xff] %v7421_v36 }
 0x1c0   : > { %v2930_v14 = vrot.slane %v2929_v47, 1  ;;  %v2075_v19 = vmax.f32 %v7068_v15, %v2074_v1  ;;  %v7423_v30 = vmax.f32 %v2056_v54, %v2057_v9  ;;  %v2941_v32 = vrot.slane %v2940_v10, 2  ;;  %v7432_v49 = vpop.f32.mrb[96].mxu0 }
 0x1c1   : > { %v2065_v62 = vrot.slane %v2064_v28, 1  ;;  %v2947_v58 = vrot.slane %v2946_v63, 2  ;;  %v7426_v55 = vmax.f32 %v7353_v31, %v2910_v37  ;;  %v7428_v50 = vmax.f32 %v2069_v33, %v2070_v4  ;;  %v7443_v1 = vpop.f32.mrb[97].mxu0  ;;  %v9825_v33 = vld [vmem:[#allocation81_spill] sm:$0xff] }
 0x1c2   : > { %v7430_v51 = vmax.f32 %v2933_v13, %v2934_v40  ;;  %v2076_v45 = vrot.slane %v2075_v19, 2  ;;  %v7435_v44 = vmax.f32 %v7365_v16, %v2046_v48  ;;  %v7437_v15 = vmax.f32 %v2916_v0, %v2917_v61  ;;  %9822 = vst [vmem:[#allocation163_spill] sm:$0xff] %v7443_v1  ;;  %v7453_v13 = vpop.f32.mrb[98].mxu0 }
 0x1c3   : > { %9819 = vst [vmem:[#allocation160_spill] sm:$0xff] %v7426_v55  ;;  %v7439_v9 = vmax.f32 %v2940_v10, %v2941_v32  ;;  %v7441_v54 = vmax.f32 %v2946_v63, %v2947_v58  ;;  %v7445_v31 = vmax.f32 %v2922_v57, %v2923_v11  ;;  %v7447_v4 = vmax.f32 %v2051_v35, %v2052_v43  ;;  %v7460_v48 = vpop.f32.mrb[99].mxu0  ;;  %v7462_v57 = vpop.f32.mrb[96].mxu1  ;;  %v9833_v55 = vld [vmem:[#allocation83_spill] sm:$0xff] }
 0x1c4   : > { %9820 = vst [vmem:[#allocation161_spill] sm:$0xff] %v7435_v44  ;;  %9821 = vst [vmem:[#allocation162_spill] sm:$0xff] %v7437_v15  ;;  %v7449_v40 = vmax.f32 %v2075_v19, %v2076_v45  ;;  %v2951_v37 = vsel %vm1663_vm2, %v9825_v33, -inf  ;;  %v7455_v16 = vmax.f32 %v2929_v47, %v2930_v14  ;;  %v2059_v0 = vrot.slane %v7423_v30, 1  ;;  %v9832_v33 = vld [vmem:[#allocation82_spill] sm:$0xff] }
 0x1c5   : > { %9823 = vst [vmem:[#allocation164_spill] sm:$0xff] %v7445_v31  ;;  %9824 = vst [vmem:[#allocation165_spill] sm:$0xff] %v7447_v4  ;;  %v7458_v10 = vmax.f32 %v2064_v28, %v2065_v62  ;;  %v2952_v63 = vrot.slane %v2951_v37, 4  ;;  %v2072_v61 = vrot.slane %v7428_v50, 1  ;;  %v2936_v19 = vrot.slane %v7430_v51, 1  ;;  %v7471_v62 = vpop.f32.mrb[97].mxu1 }
 0x1c6   : > { %9826 = vst [vmem:[#allocation81_spill] sm:$0xff] %v7453_v13  ;;  %9827 = vst [vmem:[#allocation166_spill] sm:$0xff] %v7455_v16  ;;  %v2080_v35 = vsel %vm1663_vm2, %v7081_v6, -inf  ;;  %v2087_v11 = vrot.slane %v7090_v52, 4  ;;  %v2943_v47 = vrot.slane %v7439_v9, 1  ;;  %v2949_v14 = vrot.slane %v7441_v54, 1 }
 0x1c7   : > { %9828 = vst [vmem:[#allocation167_spill] sm:$0xff] %v7458_v10  ;;  %9829 = vst [vmem:[#allocation168_spill] sm:$0xff] %v7460_v48  ;;  %v2953_v28 = vmax.f32 %v2951_v37, %v2952_v63  ;;  %v2081_v43 = vrot.slane %v2080_v35, 4  ;;  %v2078_v32 = vrot.slane %v7449_v40, 1  ;;  %v2093_v45 = vsel %vm1663_vm2, %v7100_v34, -inf  ;;  %v7480_v10 = vpop.f32.mrb[98].mxu1 }
 0x1c8   : > { %9830 = vst [vmem:[#allocation169_spill] sm:$0xff] %v7462_v57  ;;  %9831 = vst [vmem:[#allocation170_spill] sm:$0xff] %v7471_v62  ;;  %v2088_v58 = vmax.f32 %v7090_v52, %v2087_v11  ;;  %v2958_v16 = vrot.slane %v9832_v33, 4  ;;  %v2094_v15 = vrot.slane %v2093_v45, 4  ;;  %v2964_v44 = vsel %vm1663_vm2, %v9833_v55, -inf  ;;  %v9835_v62 = vld [vmem:[#allocation85_spill] sm:$0xff] }
 0x1c9   : > { %v2954_v6 = vrot.slane %v2953_v28, 2  ;;  %v2082_v31 = vmax.f32 %v2080_v35, %v2081_v43  ;;  %9834 = vst [vmem:[#allocation82_spill] sm:$0xff] %v7480_v10  ;;  %v2965_v4 = vrot.slane %v2964_v44, 4  ;;  %v2971_v57 = vrot.slane %v9835_v62, 4  ;;  %v7484_v52 = vpop.f32.mrb[100].mxu0 }
 0x1ca   : > { %v2089_v37 = vrot.slane %v2088_v58, 2  ;;  %v2959_v63 = vmax.f32 %v9832_v33, %v2958_v16  ;;  %v2095_v36 = vmax.f32 %v2093_v45, %v2094_v15  ;;  %v2100_v3 = vrot.slane %v7115_v27, 4  ;;  %v7487_v35 = vpop.f32.mrb[101].mxu0  ;;  %v7492_v16 = vpop.f32.mrb[99].mxu1 }
 0x1cb   : > { %v2955_v11 = vmax.f32 %v2953_v28, %v2954_v6  ;;  %v2083_v34 = vrot.slane %v2082_v31, 2  ;;  %9836 = vst [vmem:[#allocation83_spill] sm:$0xff] %v7487_v35  ;;  %v2966_v55 = vmax.f32 %v2964_v44, %v2965_v4  ;;  %v2972_v10 = vmax.f32 %v9835_v62, %v2971_v57  ;;  %v7490_v48 = vpop.f32.mrb[102].mxu0  ;;  %9837 = vst [vmem:[#allocation85_spill] sm:$0xff] %v7492_v16  ;;  %v7497_v15 = vpop.f32.mrb[100].mxu1 }
 0x1cc   : > { %v2090_v43 = vmax.f32 %v2088_v58, %v2089_v37  ;;  %v2960_v42 = vrot.slane %v2959_v63, 2  ;;  %v2096_v1 = vrot.slane %v2095_v36, 2  ;;  %v2101_v28 = vmax.f32 %v7115_v27, %v2100_v3  ;;  %v7495_v6 = vpop.f32.mrb[103].mxu0  ;;  %9838 = vst [vmem:[#allocation171_spill] sm:$0xff] %v7497_v15  ;;  %v7501_v4 = vpop.f32.mrb[101].mxu1 }
 0x1cd   : > { %v2956_v33 = vrot.slane %v2955_v11, 1  ;;  %v2084_v13 = vmax.f32 %v2082_v31, %v2083_v34  ;;  %v2967_v58 = vrot.slane %v2966_v55, 2  ;;  %v2973_v44 = vrot.slane %v2972_v10, 2  ;;  %9839 = vst [vmem:[#allocation172_spill] sm:$0xff] %v7501_v4  ;;  %v7511_v27 = vpop.f32.mrb[102].mxu1 }
 0x1ce   : > { %v2091_v45 = vrot.slane %v2090_v43, 1  ;;  %v7499_v35 = vmax.f32 %v2959_v63, %v2960_v42  ;;  %v7504_v57 = vmax.f32 %v7423_v30, %v2059_v0  ;;  %v7507_v62 = vmax.f32 %v7430_v51, %v2936_v19  ;;  %9842 = vst [vmem:[#allocation175_spill] sm:$0xff] %v7511_v27  ;;  %v7519_v4 = vpop.f32.mrb[103].mxu1 }
 0x1cf   : > { %v2085_v31 = vrot.slane %v2084_v13, 1  ;;  %v7509_v37 = vmax.f32 %v2095_v36, %v2096_v1  ;;  %v7514_v3 = vmax.f32 %v7428_v50, %v2072_v61  ;;  %v7517_v42 = vmax.f32 %v7439_v9, %v2943_v47  ;;  %9845 = vst [vmem:[#allocation178_spill] sm:$0xff] %v7519_v4  ;;  %v9848_v1 = vld [vmem:[#allocation88_spill] sm:$0xff] }
 0x1d0   : > { %9840 = vst [vmem:[#allocation173_spill] sm:$0xff] %v7504_v57  ;;  %9841 = vst [vmem:[#allocation174_spill] sm:$0xff] %v7507_v62  ;;  %v2968_v63 = vmax.f32 %v2966_v55, %v2967_v58  ;;  %v2102_v34 = vrot.slane %v2101_v28, 2  ;;  %v7522_v30 = vmax.f32 %v7441_v54, %v2949_v14  ;;  %v7525_v51 = vmax.f32 %v7449_v40, %v2078_v32  ;;  %v7534_v47 = vpop.f32.mrb[104].mxu0  ;;  %v9855_v62 = vld [vmem:[#allocation94_spill] sm:$0xff] }
 0x1d1   : > { %9843 = vst [vmem:[#allocation176_spill] sm:$0xff] %v7514_v3  ;;  %9844 = vst [vmem:[#allocation177_spill] sm:$0xff] %v7517_v42  ;;  %v2974_v36 = vmax.f32 %v2972_v10, %v2973_v44  ;;  %v2977_v0 = vsel %vm1663_vm2, %v9848_v1, -inf  ;;  %v7529_v19 = vmax.f32 %v2955_v11, %v2956_v33  ;;  %v7531_v50 = vmax.f32 %v2090_v43, %v2091_v45  ;;  %v7542_v14 = vpop.f32.mrb[105].mxu0 }
 0x1d2   : > { %9846 = vst [vmem:[#allocation179_spill] sm:$0xff] %v7522_v30  ;;  %9847 = vst [vmem:[#allocation180_spill] sm:$0xff] %v7525_v51  ;;  %v2962_v9 = vrot.slane %v7499_v35, 1  ;;  %v2978_v61 = vrot.slane %v2977_v0, 4  ;;  %v7536_v55 = vmax.f32 %v2084_v13, %v2085_v31  ;;  %v2098_v54 = vrot.slane %v7509_v37, 1  ;;  %v7544_v45 = vpop.f32.mrb[106].mxu0 }
 0x1d3   : > { %9849 = vst [vmem:[#allocation88_spill] sm:$0xff] %v7529_v19  ;;  %9850 = vst [vmem:[#allocation181_spill] sm:$0xff] %v7531_v50  ;;  %v2106_v40 = vsel %vm1663_vm2, %v7120_v21, -inf  ;;  %v2113_v10 = vrot.slane %v7125_v5, 4  ;;  %v2969_v32 = vrot.slane %v2968_v63, 1  ;;  %v2103_v11 = vmax.f32 %v2101_v28, %v2102_v34  ;;  %v9853_v31 = vld [vmem:[#allocation93_spill] sm:$0xff] }
 0x1d4   : > { %9851 = vst [vmem:[#allocation182_spill] sm:$0xff] %v7536_v55  ;;  %v2979_v43 = vmax.f32 %v2977_v0, %v2978_v61  ;;  %v2107_v33 = vrot.slane %v2106_v40, 4  ;;  %9852 = vst [vmem:[#allocation183_spill] sm:$0xff] %v7544_v45  ;;  %v2975_v58 = vrot.slane %v2974_v36, 1  ;;  %v2119_v13 = vsel %vm1663_vm2, %v7131_v18, -inf  ;;  %v7550_v19 = vpop.f32.mrb[107].mxu0 }
 0x1d5   : > { %v2114_v44 = vmax.f32 %v7125_v5, %v2113_v10  ;;  %v2984_v1 = vrot.slane %v9853_v31, 4  ;;  %9854 = vst [vmem:[#allocation93_spill] sm:$0xff] %v7550_v19  ;;  %v2120_v30 = vrot.slane %v2119_v13, 4  ;;  %v2990_v28 = vsel %vm1663_vm2, %v9855_v62, -inf  ;;  %v7554_v34 = vpop.f32.mrb[104].mxu1  ;;  %v9857_v5 = vld [vmem:[#allocation95_spill] sm:$0xff] }
 0x1d6   : > { %v2980_v21 = vrot.slane %v2979_v43, 2  ;;  %v2108_v42 = vmax.f32 %v2106_v40, %v2107_v33  ;;  %9856 = vst [vmem:[#allocation94_spill] sm:$0xff] %v7554_v34  ;;  %v2991_v50 = vrot.slane %v2990_v28, 4  ;;  %v2997_v10 = vrot.slane %v9857_v5, 4 }
 0x1d7   : > { %v2115_v0 = vrot.slane %v2114_v44, 2  ;;  %v2985_v61 = vmax.f32 %v9853_v31, %v2984_v1  ;;  %v2121_v57 = vmax.f32 %v2119_v13, %v2120_v30  ;;  %v2126_v55 = vrot.slane %v7168_v8, 4  ;;  %v7563_v31 = vpop.f32.mrb[105].mxu1 }
 0x1d8   : > { %v2981_v3 = vmax.f32 %v2979_v43, %v2980_v21  ;;  %v2109_v18 = vrot.slane %v2108_v42, 2  ;;  %v2992_v40 = vmax.f32 %v2990_v28, %v2991_v50  ;;  %v2998_v33 = vmax.f32 %v9857_v5, %v2997_v10  ;;  %v7561_v16 = vpop.f32.mrb[108].mxu0  ;;  %9859 = vst [vmem:[#allocation184_spill] sm:$0xff] %v7563_v31 }
 0x1d9   : > { %v2116_v51 = vmax.f32 %v2114_v44, %v2115_v0  ;;  %v2986_v4 = vrot.slane %v2985_v61, 2  ;;  %v2104_v27 = vrot.slane %v2103_v11, 1  ;;  %v2122_v15 = vrot.slane %v2121_v57, 2  ;;  %9858 = vst [vmem:[#allocation95_spill] sm:$0xff] %v7561_v16  ;;  %v7567_v21 = vpop.f32.mrb[109].mxu0 }
 0x1da   : > { %v2982_v62 = vrot.slane %v2981_v3, 1  ;;  %v2127_v34 = vmax.f32 %v7168_v8, %v2126_v55  ;;  %v7565_v1 = vmax.f32 %v2108_v42, %v2109_v18  ;;  %v2993_v30 = vrot.slane %v2992_v40, 2  ;;  %9860 = vst [vmem:[#allocation185_spill] sm:$0xff] %v7567_v21  ;;  %v7574_v5 = vpop.f32.mrb[110].mxu0  ;;  %v7581_v18 = vpop.f32.mrb[106].mxu1 }
 0x1db   : > { %v2117_v43 = vrot.slane %v2116_v51, 1  ;;  %v2999_v13 = vrot.slane %v2998_v33, 2  ;;  %v7570_v50 = vmax.f32 %v7499_v35, %v2962_v9  ;;  %v7572_v44 = vmax.f32 %v2121_v57, %v2122_v15  ;;  %9862 = vst [vmem:[#allocation187_spill] sm:$0xff] %v7574_v5  ;;  %9865 = vst [vmem:[#allocation190_spill] sm:$0xff] %v7581_v18  ;;  %v9868_v15 = vld [vmem:[#allocation96_spill] sm:$0xff]  ;;  %v7589_v57 = vpop.f32.mrb[111].mxu0 }
 0x1dc   : > { %v2987_v28 = vmax.f32 %v2985_v61, %v2986_v4  ;;  %v2128_v0 = vrot.slane %v2127_v34, 2  ;;  %v7577_v8 = vmax.f32 %v7509_v37, %v2098_v54  ;;  %v7579_v55 = vmax.f32 %v2968_v63, %v2969_v32  ;;  %9869 = vst [vmem:[#allocation96_spill] sm:$0xff] %v7589_v57 }
 0x1dd   : > { %9861 = vst [vmem:[#allocation186_spill] sm:$0xff] %v7570_v50  ;;  %v2994_v42 = vmax.f32 %v2992_v40, %v2993_v30  ;;  %v3000_v10 = vmax.f32 %v2998_v33, %v2999_v13  ;;  %v7583_v31 = vmax.f32 %v2974_v36, %v2975_v58  ;;  %v7585_v21 = vmax.f32 %v2103_v11, %v2104_v27  ;;  %v9872_v36 = vld [vmem:[#allocation120_spill] sm:$0xff]  ;;  %v9873_v11 = vld [vmem:[#allocation53_spill] sm:$0xff]  ;;  %v7600_v13 = vpop.f32.mrb[107].mxu1 }
 0x1de   : > { %9863 = vst [vmem:[#allocation188_spill] sm:$0xff] %v7577_v8  ;;  %9864 = vst [vmem:[#allocation189_spill] sm:$0xff] %v7579_v55  ;;  %v2129_v35 = vmax.f32 %v2127_v34, %v2128_v0  ;;  %v3003_v4 = vsel %vm1663_vm2, %v9868_v15, -inf  ;;  %v7591_v9 = vmax.f32 %v2981_v3, %v2982_v62  ;;  %v2111_v37 = vrot.slane %v7565_v1, 1  ;;  %v9876_v0 = vld [vmem:[#allocation101_spill] sm:$0xff]  ;;  %v9878_v50 = vld [vmem:[#allocation104_spill] sm:$0xff] }
 0x1df   : > { %9866 = vst [vmem:[#allocation191_spill] sm:$0xff] %v7583_v31  ;;  %9867 = vst [vmem:[#allocation192_spill] sm:$0xff] %v7585_v21  ;;  %v7594_v63 = vmax.f32 %v2116_v51, %v2117_v43  ;;  %v3004_v54 = vrot.slane %v3003_v4, 4  ;;  %v2124_v32 = vrot.slane %v7572_v44, 1  ;;  %v2988_v61 = vrot.slane %v2987_v28, 1  ;;  %v9875_v51 = vld [vmem:[#allocation54_spill] sm:$0xff] }
 0x1e0   : > { %9870 = vst [vmem:[#allocation193_spill] sm:$0xff] %v7591_v9  ;;  %v2132_v27 = vsel %vm1663_vm2, %v9872_v36, -inf  ;;  %v2139_v58 = vrot.slane %v9873_v11, 4  ;;  %v2995_v34 = vrot.slane %v2994_v42, 1  ;;  %v3001_v40 = vrot.slane %v3000_v10, 1  ;;  %9874 = vst [vmem:[#allocation120_spill] sm:$0xff] %v7600_v13 }
 0x1e1   : > { %9871 = vst [vmem:[#allocation194_spill] sm:$0xff] %v7594_v63  ;;  %v3005_v33 = vmax.f32 %v3003_v4, %v3004_v54  ;;  %v2133_v30 = vrot.slane %v2132_v27, 4  ;;  %v2130_v3 = vrot.slane %v2129_v35, 1  ;;  %v2145_v43 = vsel %vm1663_vm2, %v9875_v51, -inf  ;;  %v7606_v9 = vpop.f32.mrb[108].mxu1  ;;  %v7620_v16 = vpop.f32.mrb[112].mxu0 }
 0x1e2   : > { %v2140_v62 = vmax.f32 %v9873_v11, %v2139_v58  ;;  %v3010_v15 = vrot.slane %v9876_v0, 4  ;;  %9877 = vst [vmem:[#allocation53_spill] sm:$0xff] %v7606_v9  ;;  %v2146_v31 = vrot.slane %v2145_v43, 4  ;;  %v3016_v8 = vsel %vm1663_vm2, %v9878_v50, -inf  ;;  %v7610_v4 = vpop.f32.mrb[109].mxu1  ;;  %v9880_v11 = vld [vmem:[#allocation107_spill] sm:$0xff] }
 0x1e3   : > { %v3006_v55 = vrot.slane %v3005_v33, 2  ;;  %v2134_v36 = vmax.f32 %v2132_v27, %v2133_v30  ;;  %9879 = vst [vmem:[#allocation54_spill] sm:$0xff] %v7610_v4  ;;  %v3017_v21 = vrot.slane %v3016_v8, 4  ;;  %v3023_v58 = vrot.slane %v9880_v11, 4  ;;  %v7614_v13 = vpop.f32.mrb[110].mxu1 }
 0x1e4   : > { %v2141_v54 = vrot.slane %v2140_v62, 2  ;;  %v3011_v63 = vmax.f32 %v9876_v0, %v3010_v15  ;;  %9881 = vst [vmem:[#allocation101_spill] sm:$0xff] %v7614_v13  ;;  %v2147_v18 = vmax.f32 %v2145_v43, %v2146_v31  ;;  %v2152_v9 = vrot.slane %v7200_v39, 4  ;;  %v7617_v27 = vpop.f32.mrb[111].mxu1 }
 0x1e5   : > { %v3007_v51 = vmax.f32 %v3005_v33, %v3006_v55  ;;  %v2135_v57 = vrot.slane %v2134_v36, 2  ;;  %9882 = vst [vmem:[#allocation104_spill] sm:$0xff] %v7617_v27  ;;  %v3018_v50 = vmax.f32 %v3016_v8, %v3017_v21  ;;  %v3024_v4 = vmax.f32 %v9880_v11, %v3023_v58  ;;  %v7628_v8 = vpop.f32.mrb[112].mxu1  ;;  %v9893_v58 = vld [vmem:[#allocation42_spill] sm:$0xff] }
 0x1e6   : > { %v2142_v30 = vmax.f32 %v2140_v62, %v2141_v54  ;;  %v3012_v5 = vrot.slane %v3011_v63, 2  ;;  %v2148_v19 = vrot.slane %v2147_v18, 2  ;;  %v2153_v45 = vmax.f32 %v7200_v39, %v2152_v9 }
 0x1e7   : > { %v3008_v0 = vrot.slane %v3007_v51, 1  ;;  %v2136_v15 = vmax.f32 %v2134_v36, %v2135_v57  ;;  %v3019_v33 = vrot.slane %v3018_v50, 2  ;;  %v3025_v31 = vrot.slane %v3024_v4, 2 }
 0x1e8   : > { %v2143_v13 = vrot.slane %v2142_v30, 1  ;;  %v3013_v55 = vmax.f32 %v3011_v63, %v3012_v5  ;;  %v7624_v43 = vmax.f32 %v7565_v1, %v2111_v37  ;;  %v7626_v27 = vmax.f32 %v2987_v28, %v2988_v61  ;;  %v9889_v1 = vld [vmem:[#allocation109_spill] sm:$0xff] }
 0x1e9   : > { %v2137_v62 = vrot.slane %v2136_v15, 1  ;;  %v2149_v21 = vmax.f32 %v2147_v18, %v2148_v19  ;;  %v7631_v54 = vmax.f32 %v7572_v44, %v2124_v32  ;;  %v7633_v57 = vmax.f32 %v2994_v42, %v2995_v34 }
 0x1ea   : > { %9883 = vst [vmem:[#allocation107_spill] sm:$0xff] %v7624_v43  ;;  %9884 = vst [vmem:[#allocation195_spill] sm:$0xff] %v7626_v27  ;;  %v3020_v36 = vmax.f32 %v3018_v50, %v3019_v33  ;;  %v2154_v39 = vrot.slane %v2153_v45, 2  ;;  %v7635_v9 = vmax.f32 %v3000_v10, %v3001_v40  ;;  %v7637_v5 = vmax.f32 %v2129_v35, %v2130_v3  ;;  %v7656_v50 = vpop.f32.mrb[113].mxu1  ;;  %v9894_v33 = vld [vmem:[#allocation110_spill] sm:$0xff] }
 0x1eb   : > { %9885 = vst [vmem:[#allocation196_spill] sm:$0xff] %v7631_v54  ;;  %9886 = vst [vmem:[#allocation197_spill] sm:$0xff] %v7633_v57  ;;  %v3026_v63 = vmax.f32 %v3024_v4, %v3025_v31  ;;  %v3029_v28 = vsel %vm1663_vm2, %v9889_v1, -inf  ;;  %v7641_v37 = vmax.f32 %v3007_v51, %v3008_v0  ;;  %v7643_v19 = vmax.f32 %v2142_v30, %v2143_v13  ;;  %v7654_v30 = vpop.f32.mrb[113].mxu0 }
 0x1ec   : > { %9887 = vst [vmem:[#allocation198_spill] sm:$0xff] %v7635_v9  ;;  %9888 = vst [vmem:[#allocation199_spill] sm:$0xff] %v7637_v5  ;;  %v3014_v18 = vrot.slane %v3013_v55, 1  ;;  %v3030_v61 = vrot.slane %v3029_v28, 4  ;;  %v7645_v44 = vmax.f32 %v2136_v15, %v2137_v62  ;;  %v2150_v42 = vrot.slane %v2149_v21, 1 }
 0x1ed   : > { %9890 = vst [vmem:[#allocation109_spill] sm:$0xff] %v7641_v37  ;;  %9891 = vst [vmem:[#allocation200_spill] sm:$0xff] %v7643_v19  ;;  %v2158_v32 = vsel %vm1663_vm2, %v7211_v22, -inf  ;;  %v2165_v10 = vrot.slane %v7223_v59, 4  ;;  %v3021_v35 = vrot.slane %v3020_v36, 1  ;;  %v2155_v34 = vmax.f32 %v2153_v45, %v2154_v39 }
 0x1ee   : > { %9892 = vst [vmem:[#allocation201_spill] sm:$0xff] %v7645_v44  ;;  %v3031_v40 = vmax.f32 %v3029_v28, %v3030_v61  ;;  %v2159_v3 = vrot.slane %v2158_v32, 4  ;;  %v3027_v4 = vrot.slane %v3026_v63, 1  ;;  %v2171_v13 = vsel %vm1663_vm2, %v7235_v60, -inf  ;;  %v7662_v28 = vpop.f32.mrb[114].mxu0  ;;  %v7664_v60 = vpop.f32.mrb[114].mxu1 }
 0x1ef   : > { %v2166_v11 = vmax.f32 %v7223_v59, %v2165_v10  ;;  %v3036_v51 = vrot.slane %v9893_v58, 4  ;;  %v2172_v15 = vrot.slane %v2171_v13, 4  ;;  %v3042_v45 = vsel %vm1663_vm2, %v9894_v33, -inf  ;;  %v9895_v59 = vld [vmem:[#allocation111_spill] sm:$0xff]  ;;  %v7668_v27 = vpop.f32.mrb[115].mxu0 }
 0x1f0   : > { %v3032_v0 = vrot.slane %v3031_v40, 2  ;;  %v2160_v22 = vmax.f32 %v2158_v32, %v2159_v3  ;;  %v3043_v39 = vrot.slane %v3042_v45, 4  ;;  %v3049_v1 = vrot.slane %v9895_v59, 4 }
 0x1f1   : > { %v2167_v31 = vrot.slane %v2166_v11, 2  ;;  %v3037_v62 = vmax.f32 %v9893_v58, %v3036_v51  ;;  %v2173_v37 = vmax.f32 %v2171_v13, %v2172_v15  ;;  %v2178_v57 = vrot.slane %v7257_v24, 4  ;;  %v7670_v58 = vpop.f32.mrb[115].mxu1 }
 0x1f2   : > { %v3033_v61 = vmax.f32 %v3031_v40, %v3032_v0  ;;  %v2161_v10 = vrot.slane %v2160_v22, 2  ;;  %v3044_v9 = vmax.f32 %v3042_v45, %v3043_v39  ;;  %v3050_v33 = vmax.f32 %v9895_v59, %v3049_v1  ;;  %9896 = vst [vmem:[#allocation42_spill] sm:$0xff] %v7670_v58 }
 0x1f3   : > { %v2168_v32 = vmax.f32 %v2166_v11, %v2167_v31  ;;  %v3038_v3 = vrot.slane %v3037_v62, 2  ;;  %v2156_v51 = vrot.slane %v2155_v34, 1  ;;  %v2174_v54 = vrot.slane %v2173_v37, 2 }
 0x1f4   : > { %v3034_v44 = vrot.slane %v3033_v61, 1  ;;  %v2179_v43 = vmax.f32 %v7257_v24, %v2178_v57  ;;  %v7673_v19 = vmax.f32 %v2160_v22, %v2161_v10  ;;  %v3045_v13 = vrot.slane %v3044_v9, 2  ;;  %v9902_v22 = vld [vmem:[#allocation112_spill] sm:$0xff] }
 0x1f5   : > { %v2169_v40 = vrot.slane %v2168_v32, 1  ;;  %v3051_v0 = vrot.slane %v3050_v33, 2  ;;  %v7675_v15 = vmax.f32 %v3013_v55, %v3014_v18  ;;  %v7677_v11 = vmax.f32 %v2173_v37, %v2174_v54  ;;  %v7694_v18 = vpop.f32.mrb[116].mxu0 }
 0x1f6   : > { %v3039_v45 = vmax.f32 %v3037_v62, %v3038_v3  ;;  %v2180_v31 = vrot.slane %v2179_v43, 2  ;;  %v7679_v39 = vmax.f32 %v2149_v21, %v2150_v42  ;;  %v7681_v59 = vmax.f32 %v3020_v36, %v3021_v35  ;;  %9905 = vst [vmem:[#allocation206_spill] sm:$0xff] %v7694_v18  ;;  %v7696_v36 = vpop.f32.mrb[116].mxu1  ;;  %v7702_v35 = vpop.f32.mrb[117].mxu0 }
 0x1f7   : > { %9897 = vst [vmem:[#allocation110_spill] sm:$0xff] %v7675_v15  ;;  %v3046_v1 = vmax.f32 %v3044_v9, %v3045_v13  ;;  %v3052_v5 = vmax.f32 %v3050_v33, %v3051_v0  ;;  %v7683_v58 = vmax.f32 %v3026_v63, %v3027_v4  ;;  %v7685_v24 = vmax.f32 %v2155_v34, %v2156_v51 }
 0x1f8   : > { %9898 = vst [vmem:[#allocation111_spill] sm:$0xff] %v7679_v39  ;;  %9899 = vst [vmem:[#allocation202_spill] sm:$0xff] %v7681_v59  ;;  %v2181_v57 = vmax.f32 %v2179_v43, %v2180_v31  ;;  %v3055_v10 = vsel %vm1663_vm2, %v9902_v22, -inf  ;;  %v7689_v55 = vmax.f32 %v3033_v61, %v3034_v44  ;;  %v2163_v54 = vrot.slane %v7673_v19, 1  ;;  %v7704_v44 = vpop.f32.mrb[117].mxu1 }
 0x1f9   : > { %9900 = vst [vmem:[#allocation203_spill] sm:$0xff] %v7683_v58  ;;  %9901 = vst [vmem:[#allocation204_spill] sm:$0xff] %v7685_v24  ;;  %v7692_v37 = vmax.f32 %v2168_v32, %v2169_v40  ;;  %v3056_v21 = vrot.slane %v3055_v10, 4  ;;  %v2176_v9 = vrot.slane %v7677_v11, 1  ;;  %v3040_v63 = vrot.slane %v3039_v45, 1  ;;  %v7706_v32 = vpop.f32.mrb[118].mxu0 }
 0x1fa   : > { %9903 = vst [vmem:[#allocation112_spill] sm:$0xff] %v7689_v55  ;;  %9906 = vst [vmem:[#allocation207_spill] sm:$0xff] %v7696_v36  ;;  %v2184_v43 = vsel %vm1663_vm2, %v7263_v17, -inf  ;;  %v2191_v42 = vrot.slane %v7268_v25, 4  ;;  %v3047_v34 = vrot.slane %v3046_v1, 1  ;;  %v3053_v4 = vrot.slane %v3052_v5, 1 }
 0x1fb   : > { %9904 = vst [vmem:[#allocation205_spill] sm:$0xff] %v7692_v37  ;;  %9907 = vst [vmem:[#allocation208_spill] sm:$0xff] %v7702_v35  ;;  %v3057_v62 = vmax.f32 %v3055_v10, %v3056_v21  ;;  %v2185_v61 = vrot.slane %v2184_v43, 4  ;;  %v7708_v3 = vpop.f32.mrb[118].mxu1  ;;  %v2182_v33 = vrot.slane %v2181_v57, 1  ;;  %v2197_v17 = vsel %vm1663_vm2, %v7273_v7, -inf }
 0x1fc   : > { %9908 = vst [vmem:[#allocation209_spill] sm:$0xff] %v7704_v44  ;;  %9909 = vst [vmem:[#allocation210_spill] sm:$0xff] %v7706_v32  ;;  %v2192_v51 = vmax.f32 %v7268_v25, %v2191_v42  ;;  %v9911_v40 = vld [vmem:[#allocation119_spill] sm:$0xff]  ;;  %v7714_v0 = vpop.f32.mrb[119].mxu0  ;;  %v7716_v31 = vpop.f32.mrb[119].mxu1  ;;  %v2198_v10 = vrot.slane %v2197_v17, 4 }
 0x1fd   : > { %9910 = vst [vmem:[#allocation211_spill] sm:$0xff] %v7708_v3  ;;  %v3062_v13 = vrot.slane %v9911_v40, 4  ;;  %9912 = vst [vmem:[#allocation119_spill] sm:$0xff] %v7714_v0  ;;  %v3058_v22 = vrot.slane %v3057_v62, 2  ;;  %v2186_v55 = vmax.f32 %v2184_v43, %v2185_v61  ;;  %v9914_v21 = vld [vmem:[#allocation121_spill] sm:$0xff]  ;;  %v9915_v25 = vld [vmem:[#allocation122_spill] sm:$0xff] }
 0x1fe   : > { %9913 = vst [vmem:[#allocation212_spill] sm:$0xff] %v7716_v31  ;;  %v3068_v58 = vsel %vm1663_vm2, %v9914_v21, -inf  ;;  %v2193_v59 = vrot.slane %v2192_v51, 2  ;;  %v3075_v42 = vrot.slane %v9915_v25, 4  ;;  %v2199_v24 = vmax.f32 %v2197_v17, %v2198_v10 }
 0x1ff   : > { %v3063_v15 = vmax.f32 %v9911_v40, %v3062_v13  ;;  %v3069_v39 = vrot.slane %v3068_v58, 4  ;;  %v3059_v37 = vmax.f32 %v3057_v62, %v3058_v22  ;;  %v2187_v7 = vrot.slane %v2186_v55, 2 }
 0x200   : > { %v2204_v3 = vrot.slane %v7305_v26, 4  ;;  %v2194_v0 = vmax.f32 %v2192_v51, %v2193_v59  ;;  %v3076_v43 = vmax.f32 %v9915_v25, %v3075_v42  ;;  %v2200_v35 = vrot.slane %v2199_v24, 2  ;;  %v7730_v51 = vpop.f32.mrb[120].mxu1 }
 0x201   : > { %v3064_v32 = vrot.slane %v3063_v15, 2  ;;  %v3070_v31 = vmax.f32 %v3068_v58, %v3069_v39  ;;  %v3060_v61 = vrot.slane %v3059_v37, 1  ;;  %v2188_v44 = vmax.f32 %v2186_v55, %v2187_v7  ;;  %v9926_v7 = vld [vmem:[#allocation126_spill] sm:$0xff] }
 0x202   : > { %v2205_v21 = vmax.f32 %v7305_v26, %v2204_v3  ;;  %v2195_v36 = vrot.slane %v2194_v0, 1  ;;  %v3077_v18 = vrot.slane %v3076_v43, 2  ;;  %v7726_v62 = vmax.f32 %v7673_v19, %v2163_v54  ;;  %v9921_v19 = vld [vmem:[#allocation123_spill] sm:$0xff] }
 0x203   : > { %v3065_v40 = vmax.f32 %v3063_v15, %v3064_v32  ;;  %v3071_v13 = vrot.slane %v3070_v31, 2  ;;  %v7728_v17 = vmax.f32 %v3039_v45, %v3040_v63  ;;  %v2189_v22 = vrot.slane %v2188_v44, 1 }
 0x204   : > { %9916 = vst [vmem:[#allocation121_spill] sm:$0xff] %v7726_v62  ;;  %v2201_v59 = vmax.f32 %v2199_v24, %v2200_v35  ;;  %v7733_v58 = vmax.f32 %v7677_v11, %v2176_v9  ;;  %v7735_v39 = vmax.f32 %v3046_v1, %v3047_v34  ;;  %v2206_v26 = vrot.slane %v2205_v21, 2 }
 0x205   : > { %9917 = vst [vmem:[#allocation122_spill] sm:$0xff] %v7728_v17  ;;  %v3072_v55 = vmax.f32 %v3070_v31, %v3071_v13  ;;  %v7737_v3 = vmax.f32 %v3052_v5, %v3053_v4  ;;  %v7739_v15 = vmax.f32 %v2181_v57, %v2182_v33  ;;  %v3078_v32 = vmax.f32 %v3076_v43, %v3077_v18  ;;  %v9924_v31 = vld [vmem:[#allocation146_spill] sm:$0xff]  ;;  %v9927_v13 = vld [vmem:[#allocation129_spill] sm:$0xff] }
 0x206   : > { %9918 = vst [vmem:[#allocation213_spill] sm:$0xff] %v7733_v58  ;;  %9919 = vst [vmem:[#allocation214_spill] sm:$0xff] %v7735_v39  ;;  %v3081_v45 = vsel %vm1663_vm2, %v9921_v19, -inf  ;;  %v7743_v54 = vmax.f32 %v3059_v37, %v3060_v61  ;;  %v7745_v24 = vmax.f32 %v2194_v0, %v2195_v36  ;;  %v3066_v63 = vrot.slane %v3065_v40, 1  ;;  %v9925_v0 = vld [vmem:[#allocation55_spill] sm:$0xff] }
 0x207   : > { %9920 = vst [vmem:[#allocation215_spill] sm:$0xff] %v7737_v3  ;;  %v3082_v35 = vrot.slane %v3081_v45, 4  ;;  %v7747_v11 = vmax.f32 %v2188_v44, %v2189_v22  ;;  %v2202_v1 = vrot.slane %v2201_v59, 1  ;;  %v2210_v9 = vsel %vm1663_vm2, %v7314_v20, -inf }
 0x208   : > { %9922 = vst [vmem:[#allocation123_spill] sm:$0xff] %v7743_v54  ;;  %9923 = vst [vmem:[#allocation216_spill] sm:$0xff] %v7745_v24  ;;  %v2217_v5 = vrot.slane %v7323_v12, 4  ;;  %v3073_v57 = vrot.slane %v3072_v55, 1  ;;  %v2207_v34 = vmax.f32 %v2205_v21, %v2206_v26  ;;  %v2211_v4 = vrot.slane %v2210_v9, 4 }
 0x209   : > { %v3083_v18 = vmax.f32 %v3081_v45, %v3082_v35  ;;  %v3079_v33 = vrot.slane %v3078_v32, 1  ;;  %v2223_v36 = vsel %vm1663_vm2, %v9924_v31, -inf  ;;  %v3088_v10 = vrot.slane %v9925_v0, 4 }
 0x20a   : > { %v2218_v37 = vmax.f32 %v7323_v12, %v2217_v5  ;;  %v2212_v25 = vmax.f32 %v2210_v9, %v2211_v4  ;;  %v2224_v42 = vrot.slane %v2223_v36, 4  ;;  %v3094_v20 = vsel %vm1663_vm2, %v9926_v7, -inf }
 0x20b   : > { %v3084_v44 = vrot.slane %v3083_v18, 2  ;;  %v3089_v61 = vmax.f32 %v9925_v0, %v3088_v10  ;;  %v3095_v21 = vrot.slane %v3094_v20, 4  ;;  %v3101_v22 = vrot.slane %v9927_v13, 4 }
 0x20c   : > { %v2219_v43 = vrot.slane %v2218_v37, 2  ;;  %v2213_v19 = vrot.slane %v2212_v25, 2  ;;  %v2225_v12 = vmax.f32 %v2223_v36, %v2224_v42  ;;  %v2230_v45 = vrot.slane %v7344_v23, 4 }
 0x20d   : > { %v3085_v26 = vmax.f32 %v3083_v18, %v3084_v44  ;;  %v3090_v5 = vrot.slane %v3089_v61, 2  ;;  %v3096_v31 = vmax.f32 %v3094_v20, %v3095_v21  ;;  %v3102_v9 = vmax.f32 %v9927_v13, %v3101_v22 }
 0x20e   : > { %v2220_v35 = vmax.f32 %v2218_v37, %v2219_v43  ;;  %v2208_v4 = vrot.slane %v2207_v34, 1  ;;  %v2226_v39 = vrot.slane %v2225_v12, 2  ;;  %v2231_v7 = vmax.f32 %v7344_v23, %v2230_v45 }
 0x20f   : > { %v3086_v54 = vrot.slane %v3085_v26, 1  ;;  %v2214_v3 = vmax.f32 %v2212_v25, %v2213_v19  ;;  %v3097_v10 = vrot.slane %v3096_v31, 2  ;;  %v3103_v17 = vrot.slane %v3102_v9, 2  ;;  %v9933_v25 = vld [vmem:[#allocation56_spill] sm:$0xff] }
 0x210   : > { %v2221_v0 = vrot.slane %v2220_v35, 1  ;;  %v7763_v24 = vmax.f32 %v3065_v40, %v3066_v63  ;;  %v2227_v18 = vmax.f32 %v2225_v12, %v2226_v39  ;;  %v3091_v36 = vmax.f32 %v3089_v61, %v3090_v5 }
 0x211   : > { %v2232_v44 = vrot.slane %v2231_v7, 2  ;;  %v7765_v42 = vmax.f32 %v2201_v59, %v2202_v1  ;;  %v7767_v37 = vmax.f32 %v3072_v55, %v3073_v57  ;;  %v3098_v20 = vmax.f32 %v3096_v31, %v3097_v10  ;;  %v9938_v10 = vld [vmem:[#allocation135_spill] sm:$0xff] }
 0x212   : > { %9928 = vst [vmem:[#allocation146_spill] sm:$0xff] %v7763_v24  ;;  %v3104_v43 = vmax.f32 %v3102_v9, %v3103_v17  ;;  %v7769_v21 = vmax.f32 %v3078_v32, %v3079_v33  ;;  %v7771_v13 = vmax.f32 %v2207_v34, %v2208_v4  ;;  %v3107_v22 = vsel %vm1663_vm2, %v9933_v25, -inf  ;;  %v9937_v9 = vld [vmem:[#allocation63_spill] sm:$0xff] }
 0x213   : > { %9929 = vst [vmem:[#allocation55_spill] sm:$0xff] %v7765_v42  ;;  %9930 = vst [vmem:[#allocation126_spill] sm:$0xff] %v7767_v37  ;;  %v2233_v23 = vmax.f32 %v2231_v7, %v2232_v44  ;;  %v7775_v19 = vmax.f32 %v3085_v26, %v3086_v54  ;;  %v2215_v40 = vrot.slane %v2214_v3, 1  ;;  %v7777_v39 = vmax.f32 %v2220_v35, %v2221_v0  ;;  %v9936_v26 = vld [vmem:[#allocation60_spill] sm:$0xff] }
 0x214   : > { %9931 = vst [vmem:[#allocation129_spill] sm:$0xff] %v7769_v21  ;;  %9932 = vst [vmem:[#allocation217_spill] sm:$0xff] %v7771_v13  ;;  %v3108_v63 = vrot.slane %v3107_v22, 4  ;;  %v2228_v59 = vrot.slane %v2227_v18, 1  ;;  %v3092_v1 = vrot.slane %v3091_v36, 1  ;;  %v2236_v55 = vsel %vm1663_vm2, %v7349_v29, -inf }
 0x215   : > { %9934 = vst [vmem:[#allocation56_spill] sm:$0xff] %v7775_v19  ;;  %9935 = vst [vmem:[#allocation218_spill] sm:$0xff] %v7777_v39  ;;  %v2243_v17 = vrot.slane %v7355_v56, 4  ;;  %v3099_v32 = vrot.slane %v3098_v20, 1  ;;  %v3105_v57 = vrot.slane %v3104_v43, 1  ;;  %v2237_v33 = vrot.slane %v2236_v55, 4 }
 0x216   : > { %v3109_v34 = vmax.f32 %v3107_v22, %v3108_v63  ;;  %v2234_v61 = vrot.slane %v2233_v23, 1  ;;  %v2249_v54 = vsel %vm1663_vm2, %v7367_v2, -inf  ;;  %v3114_v45 = vrot.slane %v9936_v26, 4  ;;  %v7791_v2 = vpop.f32.mrb[120].mxu0 }
 0x217   : > { %v2244_v12 = vmax.f32 %v7355_v56, %v2243_v17  ;;  %v2238_v5 = vmax.f32 %v2236_v55, %v2237_v33  ;;  %v2250_v31 = vrot.slane %v2249_v54, 4  ;;  %v3120_v29 = vsel %vm1663_vm2, %v9937_v9, -inf  ;;  %v7793_v17 = vpop.f32.mrb[121].mxu1 }
 0x218   : > { %v3110_v35 = vrot.slane %v3109_v34, 2  ;;  %v3115_v7 = vmax.f32 %v9936_v26, %v3114_v45  ;;  %v3121_v0 = vrot.slane %v3120_v29, 4  ;;  %v3127_v44 = vrot.slane %v9938_v10, 4 }
 0x219   : > { %v2245_v4 = vrot.slane %v2244_v12, 2  ;;  %v2239_v22 = vrot.slane %v2238_v5, 2  ;;  %v2251_v56 = vmax.f32 %v2249_v54, %v2250_v31  ;;  %v2256_v63 = vrot.slane %v7396_v38, 4 }
 0x21a   : > { %v3111_v25 = vmax.f32 %v3109_v34, %v3110_v35  ;;  %v3116_v33 = vrot.slane %v3115_v7, 2  ;;  %v3122_v19 = vmax.f32 %v3120_v29, %v3121_v0  ;;  %v3128_v9 = vmax.f32 %v9938_v10, %v3127_v44 }
 0x21b   : > { %v2246_v55 = vmax.f32 %v2244_v12, %v2245_v4  ;;  %v2240_v21 = vmax.f32 %v2238_v5, %v2239_v22  ;;  %v2252_v26 = vrot.slane %v2251_v56, 2  ;;  %v2257_v45 = vmax.f32 %v7396_v38, %v2256_v63  ;;  %v9949_v22 = vld [vmem:[#allocation66_spill] sm:$0xff] }
 0x21c   : > { %v3112_v37 = vrot.slane %v3111_v25, 1  ;;  %v3117_v34 = vmax.f32 %v3115_v7, %v3116_v33  ;;  %v3123_v35 = vrot.slane %v3122_v19, 2  ;;  %v3129_v54 = vrot.slane %v3128_v9, 2  ;;  %v9945_v7 = vld [vmem:[#allocation136_spill] sm:$0xff] }
 0x21d   : > { %v2247_v24 = vrot.slane %v2246_v55, 1  ;;  %v7797_v31 = vmax.f32 %v2214_v3, %v2215_v40  ;;  %v7799_v42 = vmax.f32 %v3091_v36, %v3092_v1  ;;  %v2241_v39 = vrot.slane %v2240_v21, 1 }
 0x21e   : > { %v2253_v13 = vmax.f32 %v2251_v56, %v2252_v26  ;;  %v7801_v12 = vmax.f32 %v2227_v18, %v2228_v59  ;;  %v7803_v29 = vmax.f32 %v3098_v20, %v3099_v32  ;;  %v3124_v4 = vmax.f32 %v3122_v19, %v3123_v35  ;;  %v7822_v59 = vpop.f32.mrb[122].mxu1 }
 0x21f   : > { %9939 = vst [vmem:[#allocation60_spill] sm:$0xff] %v7797_v31  ;;  %9940 = vst [vmem:[#allocation63_spill] sm:$0xff] %v7799_v42  ;;  %v2258_v0 = vrot.slane %v2257_v45, 2  ;;  %v7805_v5 = vmax.f32 %v3104_v43, %v3105_v57  ;;  %v7807_v10 = vmax.f32 %v2233_v23, %v2234_v61  ;;  %v3130_v38 = vmax.f32 %v3128_v9, %v3129_v54  ;;  %v7820_v23 = vpop.f32.mrb[121].mxu0  ;;  %v9950_v9 = vld [vmem:[#allocation144_spill] sm:$0xff] }
 0x220   : > { %9941 = vst [vmem:[#allocation135_spill] sm:$0xff] %v7801_v12  ;;  %9942 = vst [vmem:[#allocation219_spill] sm:$0xff] %v7803_v29  ;;  %v3133_v44 = vsel %vm1663_vm2, %v9945_v7, -inf  ;;  %v7811_v3 = vmax.f32 %v3111_v25, %v3112_v37  ;;  %v7813_v36 = vmax.f32 %v2246_v55, %v2247_v24  ;;  %v3118_v40 = vrot.slane %v3117_v34, 1  ;;  %v7824_v24 = vpop.f32.mrb[122].mxu0 }
 0x221   : > { %9943 = vst [vmem:[#allocation220_spill] sm:$0xff] %v7805_v5  ;;  %9944 = vst [vmem:[#allocation221_spill] sm:$0xff] %v7807_v10  ;;  %v3134_v1 = vrot.slane %v3133_v44, 4  ;;  %v7815_v18 = vmax.f32 %v2240_v21, %v2241_v39  ;;  %v2254_v20 = vrot.slane %v2253_v13, 1  ;;  %v2262_v19 = vsel %vm1663_vm2, %v7402_v46, -inf  ;;  %v7830_v56 = vpop.f32.mrb[123].mxu0 }
 0x222   : > { %9946 = vst [vmem:[#allocation136_spill] sm:$0xff] %v7811_v3  ;;  %9947 = vst [vmem:[#allocation222_spill] sm:$0xff] %v7813_v36  ;;  %v2269_v43 = vrot.slane %v7406_v41, 4  ;;  %v3125_v32 = vrot.slane %v3124_v4, 1  ;;  %v2259_v57 = vmax.f32 %v2257_v45, %v2258_v0  ;;  %v2263_v61 = vrot.slane %v2262_v19, 4  ;;  %v9951_v0 = vld [vmem:[#allocation145_spill] sm:$0xff] }
 0x223   : > { %9948 = vst [vmem:[#allocation223_spill] sm:$0xff] %v7815_v18  ;;  %v3135_v37 = vmax.f32 %v3133_v44, %v3134_v1  ;;  %v3131_v25 = vrot.slane %v3130_v38, 1  ;;  %v2275_v39 = vsel %vm1663_vm2, %v7410_v53, -inf  ;;  %v3140_v46 = vrot.slane %v9949_v22, 4 }
 0x224   : > { %v2270_v21 = vmax.f32 %v7406_v41, %v2269_v43  ;;  %v2264_v55 = vmax.f32 %v2262_v19, %v2263_v61  ;;  %v2276_v33 = vrot.slane %v2275_v39, 4  ;;  %v3146_v26 = vsel %vm1663_vm2, %v9950_v9, -inf  ;;  %v7836_v41 = vpop.f32.mrb[123].mxu1 }
 0x225   : > { %v3136_v63 = vrot.slane %v3135_v37, 2  ;;  %v3141_v35 = vmax.f32 %v9949_v22, %v3140_v46  ;;  %v3147_v54 = vrot.slane %v3146_v26, 4  ;;  %v3153_v7 = vrot.slane %v9951_v0, 4 }
 0x226   : > { %v2271_v45 = vrot.slane %v2270_v21, 2  ;;  %v2265_v53 = vrot.slane %v2264_v55, 2  ;;  %v2277_v1 = vmax.f32 %v2275_v39, %v2276_v33  ;;  %v2282_v43 = vrot.slane %v7432_v49, 4 }
 0x227   : > { %v3137_v44 = vmax.f32 %v3135_v37, %v3136_v63  ;;  %v3142_v29 = vrot.slane %v3141_v35, 2  ;;  %v3148_v19 = vmax.f32 %v3146_v26, %v3147_v54  ;;  %v3154_v61 = vmax.f32 %v9951_v0, %v3153_v7 }
 0x228   : > { %v2272_v3 = vmax.f32 %v2270_v21, %v2271_v45  ;;  %v2260_v5 = vrot.slane %v2259_v57, 1  ;;  %v2278_v42 = vrot.slane %v2277_v1, 2  ;;  %v2283_v22 = vmax.f32 %v7432_v49, %v2282_v43 }
 0x229   : > { %v3138_v9 = vrot.slane %v3137_v44, 1  ;;  %v2266_v46 = vmax.f32 %v2264_v55, %v2265_v53  ;;  %v3149_v12 = vrot.slane %v3148_v19, 2  ;;  %v3155_v31 = vrot.slane %v3154_v61, 2  ;;  %v9957_v55 = vld [vmem:[#allocation147_spill] sm:$0xff] }
 0x22a   : > { %v2273_v18 = vrot.slane %v2272_v3, 1  ;;  %v7841_v36 = vmax.f32 %v3117_v34, %v3118_v40  ;;  %v2279_v37 = vmax.f32 %v2277_v1, %v2278_v42  ;;  %v3143_v39 = vmax.f32 %v3141_v35, %v3142_v29 }
 0x22b   : > { %v2284_v63 = vrot.slane %v2283_v22, 2  ;;  %v7843_v33 = vmax.f32 %v2253_v13, %v2254_v20  ;;  %v7845_v21 = vmax.f32 %v3124_v4, %v3125_v32  ;;  %v3150_v26 = vmax.f32 %v3148_v19, %v3149_v12  ;;  %v9960_v4 = vld [vmem:[#allocation163_spill] sm:$0xff] }
 0x22c   : > { %9952 = vst [vmem:[#allocation66_spill] sm:$0xff] %v7841_v36  ;;  %v3156_v45 = vmax.f32 %v3154_v61, %v3155_v31  ;;  %v7847_v54 = vmax.f32 %v3130_v38, %v3131_v25  ;;  %v7849_v0 = vmax.f32 %v2259_v57, %v2260_v5  ;;  %v3159_v7 = vsel %vm1663_vm2, %v9957_v55, -inf  ;;  %v9961_v31 = vld [vmem:[#allocation81_spill] sm:$0xff] }
 0x22d   : > { %9953 = vst [vmem:[#allocation144_spill] sm:$0xff] %v7843_v33  ;;  %9954 = vst [vmem:[#allocation145_spill] sm:$0xff] %v7845_v21  ;;  %v2285_v49 = vmax.f32 %v2283_v22, %v2284_v63  ;;  %v7853_v53 = vmax.f32 %v3137_v44, %v3138_v9  ;;  %v2267_v34 = vrot.slane %v2266_v46, 1  ;;  %v7855_v42 = vmax.f32 %v2272_v3, %v2273_v18  ;;  %v9962_v44 = vld [vmem:[#allocation168_spill] sm:$0xff]  ;;  %v9963_v3 = vld [vmem:[#allocation67_spill] sm:$0xff] }
 0x22e   : > { %9955 = vst [vmem:[#allocation224_spill] sm:$0xff] %v7847_v54  ;;  %9956 = vst [vmem:[#allocation225_spill] sm:$0xff] %v7849_v0  ;;  %v3160_v29 = vrot.slane %v3159_v7, 4  ;;  %v2280_v13 = vrot.slane %v2279_v37, 1  ;;  %v3144_v40 = vrot.slane %v3143_v39, 1  ;;  %v2288_v12 = vsel %vm1663_vm2, %v9960_v4, -inf }
 0x22f   : > { %9958 = vst [vmem:[#allocation147_spill] sm:$0xff] %v7853_v53  ;;  %9959 = vst [vmem:[#allocation226_spill] sm:$0xff] %v7855_v42  ;;  %v2295_v38 = vrot.slane %v9961_v31, 4  ;;  %v3151_v20 = vrot.slane %v3150_v26, 1  ;;  %v3157_v5 = vrot.slane %v3156_v45, 1  ;;  %v2289_v57 = vrot.slane %v2288_v12, 4 }
 0x230   : > { %v3161_v32 = vmax.f32 %v3159_v7, %v3160_v29  ;;  %v2286_v25 = vrot.slane %v2285_v49, 1  ;;  %v2301_v1 = vsel %vm1663_vm2, %v9962_v44, -inf  ;;  %v3166_v18 = vrot.slane %v9963_v3, 4  ;;  %v9964_v9 = vld [vmem:[#allocation68_spill] sm:$0xff] }
 0x231   : > { %v2296_v35 = vmax.f32 %v9961_v31, %v2295_v38  ;;  %v2290_v19 = vmax.f32 %v2288_v12, %v2289_v57  ;;  %v2302_v61 = vrot.slane %v2301_v1, 4  ;;  %v3172_v22 = vsel %vm1663_vm2, %v9964_v9, -inf  ;;  %v9965_v7 = vld [vmem:[#allocation148_spill] sm:$0xff] }
 0x232   : > { %v3162_v43 = vrot.slane %v3161_v32, 2  ;;  %v3167_v55 = vmax.f32 %v9963_v3, %v3166_v18  ;;  %v3173_v4 = vrot.slane %v3172_v22, 4  ;;  %v3179_v29 = vrot.slane %v9965_v7, 4 }
 0x233   : > { %v2297_v63 = vrot.slane %v2296_v35, 2  ;;  %v2291_v54 = vrot.slane %v2290_v19, 2  ;;  %v2303_v31 = vmax.f32 %v2301_v1, %v2302_v61  ;;  %v2308_v38 = vrot.slane %v7484_v52, 4 }
 0x234   : > { %v3163_v53 = vmax.f32 %v3161_v32, %v3162_v43  ;;  %v3168_v21 = vrot.slane %v3167_v55, 2  ;;  %v3174_v36 = vmax.f32 %v3172_v22, %v3173_v4  ;;  %v3180_v12 = vmax.f32 %v9965_v7, %v3179_v29  ;;  %v9975_v4 = vld [vmem:[#allocation77_spill] sm:$0xff] }
 0x235   : > { %v2298_v44 = vmax.f32 %v2296_v35, %v2297_v63  ;;  %v2292_v33 = vmax.f32 %v2290_v19, %v2291_v54  ;;  %v2304_v42 = vrot.slane %v2303_v31, 2  ;;  %v2309_v9 = vmax.f32 %v7484_v52, %v2308_v38  ;;  %v7875_v35 = vpop.f32.mrb[124].mxu1  ;;  %v9976_v38 = vld [vmem:[#allocation79_spill] sm:$0xff] }
 0x236   : > { %v3164_v57 = vrot.slane %v3163_v53, 1  ;;  %v3169_v3 = vmax.f32 %v3167_v55, %v3168_v21  ;;  %v3175_v18 = vrot.slane %v3174_v36, 2  ;;  %v3181_v10 = vrot.slane %v3180_v12, 2  ;;  %v9971_v55 = vld [vmem:[#allocation151_spill] sm:$0xff] }
 0x237   : > { %v2299_v0 = vrot.slane %v2298_v44, 1  ;;  %v7871_v58 = vmax.f32 %v2266_v46, %v2267_v34  ;;  %v7873_v32 = vmax.f32 %v3143_v39, %v3144_v40  ;;  %v2293_v1 = vrot.slane %v2292_v33, 1 }
 0x238   : > { %v2305_v43 = vmax.f32 %v2303_v31, %v2304_v42  ;;  %v7877_v61 = vmax.f32 %v2279_v37, %v2280_v13  ;;  %v7879_v22 = vmax.f32 %v3150_v26, %v3151_v20  ;;  %v3176_v54 = vmax.f32 %v3174_v36, %v3175_v18  ;;  %v9974_v13 = vld [vmem:[#allocation83_spill] sm:$0xff]  ;;  %v9977_v18 = vld [vmem:[#allocation80_spill] sm:$0xff] }
 0x239   : > { %9966 = vst [vmem:[#allocation163_spill] sm:$0xff] %v7871_v58  ;;  %9967 = vst [vmem:[#allocation81_spill] sm:$0xff] %v7873_v32  ;;  %v2310_v19 = vrot.slane %v2309_v9, 2  ;;  %v7881_v63 = vmax.f32 %v3156_v45, %v3157_v5  ;;  %v7883_v52 = vmax.f32 %v2285_v49, %v2286_v25  ;;  %v3182_v21 = vmax.f32 %v3180_v12, %v3181_v10 }
 0x23a   : > { %9968 = vst [vmem:[#allocation168_spill] sm:$0xff] %v7877_v61  ;;  %9969 = vst [vmem:[#allocation67_spill] sm:$0xff] %v7879_v22  ;;  %v3185_v46 = vsel %vm1663_vm2, %v9971_v55, -inf  ;;  %v7887_v39 = vmax.f32 %v3163_v53, %v3164_v57  ;;  %v7889_v34 = vmax.f32 %v2298_v44, %v2299_v0  ;;  %v3170_v42 = vrot.slane %v3169_v3, 1 }
 0x23b   : > { %9970 = vst [vmem:[#allocation68_spill] sm:$0xff] %v7881_v63  ;;  %v3186_v40 = vrot.slane %v3185_v46, 4  ;;  %v7891_v37 = vmax.f32 %v2292_v33, %v2293_v1  ;;  %v2306_v26 = vrot.slane %v2305_v43, 1  ;;  %v2314_v36 = vsel %vm1663_vm2, %v9974_v13, -inf }
 0x23c   : > { %9972 = vst [vmem:[#allocation148_spill] sm:$0xff] %v7887_v39  ;;  %9973 = vst [vmem:[#allocation151_spill] sm:$0xff] %v7889_v34  ;;  %v2321_v45 = vrot.slane %v7490_v48, 4  ;;  %v3177_v49 = vrot.slane %v3176_v54, 1  ;;  %v2311_v20 = vmax.f32 %v2309_v9, %v2310_v19  ;;  %v2315_v5 = vrot.slane %v2314_v36, 4 }
 0x23d   : > { %v3187_v10 = vmax.f32 %v3185_v46, %v3186_v40  ;;  %v3183_v25 = vrot.slane %v3182_v21, 1  ;;  %v2327_v0 = vsel %vm1663_vm2, %v7495_v6, -inf  ;;  %v3192_v7 = vrot.slane %v9975_v4, 4  ;;  %v9978_v46 = vld [vmem:[#allocation159_spill] sm:$0xff]  ;;  %v7906_v40 = vpop.f32.mrb[124].mxu0 }
 0x23e   : > { %v2322_v53 = vmax.f32 %v7490_v48, %v2321_v45  ;;  %v2316_v29 = vmax.f32 %v2314_v36, %v2315_v5  ;;  %v2328_v31 = vrot.slane %v2327_v0, 4  ;;  %v3198_v44 = vsel %vm1663_vm2, %v9976_v38, -inf }
 0x23f   : > { %v3188_v33 = vrot.slane %v3187_v10, 2  ;;  %v3193_v57 = vmax.f32 %v9975_v4, %v3192_v7  ;;  %v3199_v9 = vrot.slane %v3198_v44, 4  ;;  %v3205_v1 = vrot.slane %v9977_v18, 4  ;;  %v7909_v7 = vpop.f32.mrb[125].mxu1 }
 0x240   : > { %v2323_v12 = vrot.slane %v2322_v53, 2  ;;  %v2317_v55 = vrot.slane %v2316_v29, 2  ;;  %v2329_v48 = vmax.f32 %v2327_v0, %v2328_v31  ;;  %v3211_v6 = vsel %vm1663_vm2, %v9978_v46, -inf }
 0x241   : > { %v3189_v19 = vmax.f32 %v3187_v10, %v3188_v33  ;;  %v3194_v36 = vrot.slane %v3193_v57, 2  ;;  %v3200_v45 = vmax.f32 %v3198_v44, %v3199_v9  ;;  %v3206_v5 = vmax.f32 %v9977_v18, %v3205_v1 }
 0x242   : > { %v2324_v13 = vmax.f32 %v2322_v53, %v2323_v12  ;;  %v2312_v38 = vrot.slane %v2311_v20, 1  ;;  %v2318_v39 = vmax.f32 %v2316_v29, %v2317_v55  ;;  %v2330_v22 = vrot.slane %v2329_v48, 2 }
 0x243   : > { %v3212_v4 = vrot.slane %v3211_v6, 4  ;;  %v3190_v63 = vrot.slane %v3189_v19, 1  ;;  %v3195_v33 = vmax.f32 %v3193_v57, %v3194_v36  ;;  %v3201_v0 = vrot.slane %v3200_v45, 2  ;;  %v9986_v36 = vld [vmem:[#allocation169_spill] sm:$0xff] }
 0x244   : > { %v2325_v10 = vrot.slane %v2324_v13, 1  ;;  %v7911_v31 = vmax.f32 %v3169_v3, %v3170_v42  ;;  %v2319_v46 = vrot.slane %v2318_v39, 1  ;;  %v3207_v32 = vrot.slane %v3206_v5, 2 }
 0x245   : > { %v3213_v34 = vmax.f32 %v3211_v6, %v3212_v4  ;;  %v7913_v53 = vmax.f32 %v2305_v43, %v2306_v26  ;;  %v7915_v44 = vmax.f32 %v3176_v54, %v3177_v49  ;;  %v2331_v12 = vmax.f32 %v2329_v48, %v2330_v22  ;;  %v9989_v48 = vld [vmem:[#allocation170_spill] sm:$0xff] }
 0x246   : > { %9979 = vst [vmem:[#allocation83_spill] sm:$0xff] %v7911_v31  ;;  %v3196_v9 = vrot.slane %v3195_v33, 1  ;;  %v7917_v29 = vmax.f32 %v3182_v21, %v3183_v25  ;;  %v7919_v18 = vmax.f32 %v2311_v20, %v2312_v38  ;;  %v2334_v55 = vrot.slane %v7534_v47, 4 }
 0x247   : > { %9980 = vst [vmem:[#allocation77_spill] sm:$0xff] %v7913_v53  ;;  %9981 = vst [vmem:[#allocation79_spill] sm:$0xff] %v7915_v44  ;;  %v3214_v1 = vrot.slane %v3213_v34, 2  ;;  %v7922_v57 = vmax.f32 %v3189_v19, %v3190_v63  ;;  %v7924_v3 = vmax.f32 %v2324_v13, %v2325_v10  ;;  %v3202_v42 = vmax.f32 %v3200_v45, %v3201_v0  ;;  %v9990_v45 = vld [vmem:[#allocation183_spill] sm:$0xff]  ;;  %v7939_v10 = vpop.f32.mrb[125].mxu0  ;;  %v9994_v44 = vld [vmem:[#allocation85_spill] sm:$0xff] }
 0x248   : > { %9982 = vst [vmem:[#allocation80_spill] sm:$0xff] %v7917_v29  ;;  %9983 = vst [vmem:[#allocation159_spill] sm:$0xff] %v7919_v18  ;;  %v3218_v6 = vrot.slane %v9986_v36, 4  ;;  %v7927_v43 = vmax.f32 %v2318_v39, %v2319_v46  ;;  %v3208_v54 = vmax.f32 %v3206_v5, %v3207_v32  ;;  %v2335_v22 = vmax.f32 %v7534_v47, %v2334_v55  ;;  %v9991_v47 = vld [vmem:[#allocation82_spill] sm:$0xff]  ;;  %v9992_v46 = vld [vmem:[#allocation93_spill] sm:$0xff] }
 0x249   : > { %9984 = vst [vmem:[#allocation227_spill] sm:$0xff] %v7922_v57  ;;  %9985 = vst [vmem:[#allocation228_spill] sm:$0xff] %v7924_v3  ;;  %v2340_v21 = vsel %vm1663_vm2, %v7542_v14, -inf  ;;  %v2332_v26 = vrot.slane %v2331_v12, 1  ;;  %v7932_v49 = vmax.f32 %v3195_v33, %v3196_v9  ;;  %v3215_v25 = vmax.f32 %v3213_v34, %v3214_v1  ;;  %v10000_v18 = vld [vmem:[#allocation171_spill] sm:$0xff] }
 0x24a   : > { %9987 = vst [vmem:[#allocation169_spill] sm:$0xff] %v7927_v43  ;;  %v3219_v20 = vmax.f32 %v9986_v36, %v3218_v6  ;;  %v2341_v63 = vrot.slane %v2340_v21, 4  ;;  %v2336_v19 = vrot.slane %v2335_v22, 2  ;;  %v3224_v13 = vsel %vm1663_vm2, %v9989_v48, -inf  ;;  %v7945_v6 = vpop.f32.mrb[126].mxu0 }
 0x24b   : > { %9988 = vst [vmem:[#allocation229_spill] sm:$0xff] %v7932_v49  ;;  %v2347_v39 = vrot.slane %v9990_v45, 4  ;;  %v3225_v5 = vrot.slane %v3224_v13, 4  ;;  %v3231_v4 = vrot.slane %v9991_v47, 4  ;;  %v3203_v14 = vrot.slane %v3202_v42, 1 }
 0x24c   : > { %v3220_v38 = vrot.slane %v3219_v20, 2  ;;  %v2342_v32 = vmax.f32 %v2340_v21, %v2341_v63  ;;  %v2337_v33 = vmax.f32 %v2335_v22, %v2336_v19  ;;  %v2353_v34 = vsel %vm1663_vm2, %v9992_v46, -inf  ;;  %v7947_v21 = vpop.f32.mrb[126].mxu1  ;;  %v7951_v19 = vpop.f32.mrb[127].mxu0 }
 0x24d   : > { %v2348_v0 = vmax.f32 %v9990_v45, %v2347_v39  ;;  %v3226_v55 = vmax.f32 %v3224_v13, %v3225_v5  ;;  %v3232_v36 = vmax.f32 %v9991_v47, %v3231_v4  ;;  %9993 = vst [vmem:[#allocation170_spill] sm:$0xff] %v7947_v21  ;;  %v3209_v63 = vrot.slane %v3208_v54, 1  ;;  %9995 = vst [vmem:[#allocation183_spill] sm:$0xff] %v7951_v19  ;;  %v7953_v45 = vpop.f32.mrb[127].mxu1 }
 0x24e   : > { %v3221_v9 = vmax.f32 %v3219_v20, %v3220_v38  ;;  %v2343_v1 = vrot.slane %v2342_v32, 2  ;;  %v2354_v57 = vrot.slane %v2353_v34, 4  ;;  %v3237_v22 = vsel %vm1663_vm2, %v9994_v44, -inf  ;;  %9996 = vst [vmem:[#allocation82_spill] sm:$0xff] %v7953_v45  ;;  %v10079_v45 = vld [vmem:[#allocation24_spill] sm:$0xff] }
 0x24f   : > { %v2349_v48 = vrot.slane %v2348_v0, 2  ;;  %v3216_v39 = vrot.slane %v3215_v25, 1  ;;  %v2338_v20 = vrot.slane %v2337_v33, 1  ;;  %v3227_v5 = vrot.slane %v3226_v55, 2 }
 0x250   : > { %v3222_v38 = vrot.slane %v3221_v9, 1  ;;  %v2344_v13 = vmax.f32 %v2342_v32, %v2343_v1  ;;  %v3233_v47 = vrot.slane %v3232_v36, 2  ;;  %v2355_v4 = vmax.f32 %v2353_v34, %v2354_v57  ;;  %v10004_v57 = vld [vmem:[#allocation172_spill] sm:$0xff] }
 0x251   : > { %v3238_v46 = vrot.slane %v3237_v22, 4  ;;  %v7955_v49 = vmax.f32 %v2331_v12, %v2332_v26  ;;  %v7957_v29 = vmax.f32 %v3202_v42, %v3203_v14  ;;  %v2350_v43 = vmax.f32 %v2348_v0, %v2349_v48 }
 0x252   : > { %v2345_v31 = vrot.slane %v2344_v13, 1  ;;  %v7959_v53 = vmax.f32 %v3208_v54, %v3209_v63  ;;  %v2356_v44 = vrot.slane %v2355_v4, 2  ;;  %v3244_v61 = vrot.slane %v10000_v18, 4  ;;  %v10006_v63 = vld [vmem:[#allocation175_spill] sm:$0xff] }
 0x253   : > { %9997 = vst [vmem:[#allocation93_spill] sm:$0xff] %v7955_v49  ;;  %9998 = vst [vmem:[#allocation85_spill] sm:$0xff] %v7957_v29  ;;  %v3239_v3 = vmax.f32 %v3237_v22, %v3238_v46  ;;  %v7962_v58 = vmax.f32 %v3215_v25, %v3216_v39  ;;  %v7964_v62 = vmax.f32 %v2337_v33, %v2338_v20  ;;  %v3250_v12 = vsel %vm1663_vm2, %v10004_v57, -inf  ;;  %v10007_v39 = vld [vmem:[#allocation178_spill] sm:$0xff] }
 0x254   : > { %9999 = vst [vmem:[#allocation230_spill] sm:$0xff] %v7959_v53  ;;  %v7966_v32 = vmax.f32 %v3221_v9, %v3222_v38  ;;  %v3228_v26 = vmax.f32 %v3226_v55, %v3227_v5  ;;  %v3234_v42 = vmax.f32 %v3232_v36, %v3233_v47  ;;  %v3245_v0 = vmax.f32 %v10000_v18, %v3244_v61  ;;  %v10008_v36 = vld [vmem:[#allocation95_spill] sm:$0xff]  ;;  %v10009_v18 = vld [vmem:[#allocation94_spill] sm:$0xff] }
 0x255   : > { %10001 = vst [vmem:[#allocation171_spill] sm:$0xff] %v7962_v58  ;;  %10002 = vst [vmem:[#allocation231_spill] sm:$0xff] %v7964_v62  ;;  %v3240_v14 = vrot.slane %v3239_v3, 2  ;;  %v7971_v54 = vmax.f32 %v2344_v13, %v2345_v31  ;;  %v2351_v34 = vrot.slane %v2350_v43, 1  ;;  %v3251_v1 = vrot.slane %v3250_v12, 4 }
 0x256   : > { %10003 = vst [vmem:[#allocation232_spill] sm:$0xff] %v7966_v32  ;;  %v3257_v48 = vrot.slane %v10006_v63, 4  ;;  %v2357_v25 = vmax.f32 %v2355_v4, %v2356_v44  ;;  %v3246_v33 = vrot.slane %v3245_v0, 2  ;;  %v3263_v9 = vsel %vm1663_vm2, %v10007_v39, -inf  ;;  %v10012_v32 = vld [vmem:[#allocation184_spill] sm:$0xff] }
 0x257   : > { %10005 = vst [vmem:[#allocation172_spill] sm:$0xff] %v7971_v54  ;;  %v3241_v22 = vmax.f32 %v3239_v3, %v3240_v14  ;;  %v3252_v20 = vmax.f32 %v3250_v12, %v3251_v1  ;;  %v3264_v55 = vrot.slane %v3263_v9, 4  ;;  %v2360_v5 = vrot.slane %v10008_v36, 4  ;;  %v10010_v12 = vld [vmem:[#allocation185_spill] sm:$0xff] }
 0x258   : > { %v3258_v38 = vmax.f32 %v10006_v63, %v3257_v48  ;;  %v3229_v47 = vrot.slane %v3228_v26, 1  ;;  %v3235_v61 = vrot.slane %v3234_v42, 1  ;;  %v3247_v31 = vmax.f32 %v3245_v0, %v3246_v33 }
 0x259   : > { %v3270_v13 = vrot.slane %v10009_v18, 4  ;;  %v3253_v46 = vrot.slane %v3252_v20, 2  ;;  %v3265_v58 = vmax.f32 %v3263_v9, %v3264_v55  ;;  %v2361_v3 = vmax.f32 %v10008_v36, %v2360_v5 }
 0x25a   : > { %v3259_v57 = vrot.slane %v3258_v38, 2  ;;  %v2358_v4 = vrot.slane %v2357_v25, 1  ;;  %v3242_v44 = vrot.slane %v3241_v22, 1  ;;  %v2366_v1 = vsel %vm1663_vm2, %v10010_v12, -inf  ;;  %v10014_v12 = vld [vmem:[#allocation187_spill] sm:$0xff] }
 0x25b   : > { %v3271_v14 = vmax.f32 %v10009_v18, %v3270_v13  ;;  %v3248_v63 = vrot.slane %v3247_v31, 1  ;;  %v3254_v48 = vmax.f32 %v3252_v20, %v3253_v46  ;;  %v3266_v29 = vrot.slane %v3265_v58, 2 }
 0x25c   : > { %v3260_v39 = vmax.f32 %v3258_v38, %v3259_v57  ;;  %v7983_v53 = vmax.f32 %v2350_v43, %v2351_v34  ;;  %v2362_v0 = vrot.slane %v2361_v3, 2  ;;  %v2367_v33 = vrot.slane %v2366_v1, 4 }
 0x25d   : > { %v3276_v9 = vsel %vm1663_vm2, %v10012_v32, -inf  ;;  %v7987_v55 = vmax.f32 %v3228_v26, %v3229_v47  ;;  %v3255_v36 = vrot.slane %v3254_v48, 1  ;;  %v3272_v54 = vrot.slane %v3271_v14, 2 }
 0x25e   : > { %10011 = vst [vmem:[#allocation175_spill] sm:$0xff] %v7983_v53  ;;  %v3261_v5 = vrot.slane %v3260_v39, 1  ;;  %v3267_v18 = vmax.f32 %v3265_v58, %v3266_v29  ;;  %v2368_v13 = vmax.f32 %v2366_v1, %v2367_v33  ;;  %v3277_v49 = vrot.slane %v3276_v9, 4  ;;  %v10020_v29 = vld [vmem:[#allocation190_spill] sm:$0xff]  ;;  %v10021_v33 = vld [vmem:[#allocation96_spill] sm:$0xff] }
 0x25f   : > { %10013 = vst [vmem:[#allocation178_spill] sm:$0xff] %v7987_v55  ;;  %v2373_v62 = vrot.slane %v10014_v12, 4  ;;  %v7990_v20 = vmax.f32 %v3234_v42, %v3235_v61  ;;  %v7992_v38 = vmax.f32 %v2357_v25, %v2358_v4  ;;  %v7994_v43 = vmax.f32 %v3241_v22, %v3242_v44  ;;  %v10024_v44 = vld [vmem:[#allocation120_spill] sm:$0xff]  ;;  %v8024_v55 = vpop.f32.mrb[128].mxu0 }
 0x260   : > { %v7996_v34 = vmax.f32 %v3247_v31, %v3248_v63  ;;  %v2363_v46 = vmax.f32 %v2361_v3, %v2362_v0  ;;  %v2369_v32 = vrot.slane %v2368_v13, 2  ;;  %v3278_v26 = vmax.f32 %v3276_v9, %v3277_v49  ;;  %v8006_v31 = vpop.f32.mrb[128].mxu1  ;;  %v10025_v63 = vld [vmem:[#allocation53_spill] sm:$0xff] }
 0x261   : > { %10015 = vst [vmem:[#allocation95_spill] sm:$0xff] %v7990_v20  ;;  %10016 = vst [vmem:[#allocation94_spill] sm:$0xff] %v7992_v38  ;;  %v2374_v47 = vmax.f32 %v10014_v12, %v2373_v62  ;;  %v7999_v57 = vmax.f32 %v3254_v48, %v3255_v36  ;;  %v3273_v58 = vmax.f32 %v3271_v14, %v3272_v54  ;;  %v3283_v1 = vrot.slane %v10020_v29, 4  ;;  %v10026_v12 = vld [vmem:[#allocation54_spill] sm:$0xff] }
 0x262   : > { %10017 = vst [vmem:[#allocation185_spill] sm:$0xff] %v7994_v43  ;;  %10018 = vst [vmem:[#allocation184_spill] sm:$0xff] %v7996_v34  ;;  %v2379_v42 = vsel %vm1663_vm2, %v10021_v33, -inf  ;;  %v8004_v61 = vmax.f32 %v3260_v39, %v3261_v5  ;;  %v3268_v25 = vrot.slane %v3267_v18, 1  ;;  %v3279_v22 = vrot.slane %v3278_v26, 2 }
 0x263   : > { %10019 = vst [vmem:[#allocation187_spill] sm:$0xff] %v7999_v57  ;;  %v2375_v4 = vrot.slane %v2374_v47, 2  ;;  %10023 = vst [vmem:[#allocation96_spill] sm:$0xff] %v8006_v31  ;;  %v3284_v3 = vmax.f32 %v10020_v29, %v3283_v1  ;;  %v2380_v49 = vrot.slane %v2379_v42, 4  ;;  %v3289_v62 = vsel %vm1663_vm2, %v10024_v44, -inf }
 0x264   : > { %10022 = vst [vmem:[#allocation190_spill] sm:$0xff] %v8004_v61  ;;  %v3296_v54 = vrot.slane %v10025_v63, 4  ;;  %v2370_v14 = vmax.f32 %v2368_v13, %v2369_v32  ;;  %v3280_v48 = vmax.f32 %v3278_v26, %v3279_v22  ;;  %v3290_v9 = vrot.slane %v3289_v62, 4  ;;  %10031 = vst [vmem:[#allocation54_spill] sm:$0xff] %v8024_v55  ;;  %v10076_v55 = vld [vmem:[#allocation19_spill] sm:$0xff] }
 0x265   : > { %v2376_v0 = vmax.f32 %v2374_v47, %v2375_v4  ;;  %v3285_v36 = vrot.slane %v3284_v3, 2  ;;  %v2381_v39 = vmax.f32 %v2379_v42, %v2380_v49  ;;  %v3302_v33 = vsel %vm1663_vm2, %v10026_v12, -inf  ;;  %v10028_v47 = vld [vmem:[#allocation101_spill] sm:$0xff] }
 0x266   : > { %v3297_v5 = vmax.f32 %v10025_v63, %v3296_v54  ;;  %v8015_v61 = vmax.f32 %v3267_v18, %v3268_v25  ;;  %v2364_v29 = vrot.slane %v2363_v46, 1  ;;  %v3274_v1 = vrot.slane %v3273_v58, 1  ;;  %v10029_v25 = vld [vmem:[#allocation104_spill] sm:$0xff] }
 0x267   : > { %v3291_v34 = vmax.f32 %v3289_v62, %v3290_v9  ;;  %v3286_v20 = vmax.f32 %v3284_v3, %v3285_v36  ;;  %v2382_v44 = vrot.slane %v2381_v39, 2  ;;  %v3303_v43 = vrot.slane %v3302_v33, 4 }
 0x268   : > { %10027 = vst [vmem:[#allocation120_spill] sm:$0xff] %v8015_v61  ;;  %v3298_v57 = vrot.slane %v3297_v5, 2  ;;  %v2371_v13 = vrot.slane %v2370_v14, 1  ;;  %v3281_v32 = vrot.slane %v3280_v48, 1  ;;  %v3309_v22 = vrot.slane %v10028_v47, 4 }
 0x269   : > { %v3292_v26 = vrot.slane %v3291_v34, 2  ;;  %v2377_v42 = vrot.slane %v2376_v0, 1  ;;  %v2383_v4 = vmax.f32 %v2381_v39, %v2382_v44  ;;  %v3304_v63 = vmax.f32 %v3302_v33, %v3303_v43 }
 0x26a   : > { %v3299_v49 = vmax.f32 %v3297_v5, %v3298_v57  ;;  %v3310_v18 = vmax.f32 %v10028_v47, %v3309_v22  ;;  %v3315_v12 = vsel %vm1663_vm2, %v10029_v25, -inf  ;;  %v2386_v3 = vrot.slane %v7620_v16, 4  ;;  %v8035_v22 = vpop.f32.mrb[129].mxu1 }
 0x26b   : > { %v3293_v54 = vmax.f32 %v3291_v34, %v3292_v26  ;;  %v8022_v62 = vmax.f32 %v2363_v46, %v2364_v29  ;;  %v3287_v9 = vrot.slane %v3286_v20, 1  ;;  %v2384_v36 = vrot.slane %v2383_v4, 1  ;;  %10036 = vst [vmem:[#allocation235_spill] sm:$0xff] %v8035_v22 }
 0x26c   : > { %v3305_v61 = vrot.slane %v3304_v63, 2  ;;  %v8026_v38 = vmax.f32 %v3273_v58, %v3274_v1  ;;  %v3311_v39 = vrot.slane %v3310_v18, 2  ;;  %v3316_v57 = vrot.slane %v3315_v12, 4 }
 0x26d   : > { %10030 = vst [vmem:[#allocation53_spill] sm:$0xff] %v8022_v62  ;;  %v2387_v43 = vmax.f32 %v7620_v16, %v2386_v3  ;;  %v8029_v34 = vmax.f32 %v2370_v14, %v2371_v13  ;;  %v3294_v5 = vrot.slane %v3293_v54, 1  ;;  %v3300_v33 = vrot.slane %v3299_v49, 1 }
 0x26e   : > { %10032 = vst [vmem:[#allocation101_spill] sm:$0xff] %v8026_v38  ;;  %v3306_v44 = vmax.f32 %v3304_v63, %v3305_v61  ;;  %v8031_v26 = vmax.f32 %v3280_v48, %v3281_v32  ;;  %v8033_v46 = vmax.f32 %v2376_v0, %v2377_v42  ;;  %v3317_v29 = vmax.f32 %v3315_v12, %v3316_v57  ;;  %v10048_v32 = vld [vmem:[#allocation74_spill] sm:$0xff] }
 0x26f   : > { %10033 = vst [vmem:[#allocation104_spill] sm:$0xff] %v8029_v34  ;;  %v2388_v47 = vrot.slane %v2387_v43, 2  ;;  %v8037_v25 = vmax.f32 %v3286_v20, %v3287_v9  ;;  %v8039_v58 = vmax.f32 %v2383_v4, %v2384_v36  ;;  %v3312_v1 = vmax.f32 %v3310_v18, %v3311_v39  ;;  %v10041_v9 = vld [vmem:[#allocation31_spill] sm:$0xff]  ;;  %v10058_v38 = vld [vmem:[#allocation210_spill] sm:$0xff] }
 0x270   : > { %10034 = vst [vmem:[#allocation233_spill] sm:$0xff] %v8031_v26  ;;  %10035 = vst [vmem:[#allocation234_spill] sm:$0xff] %v8033_v46  ;;  %v2392_v16 = vsel %vm1663_vm2, %v7654_v30, -inf  ;;  %v3307_v14 = vrot.slane %v3306_v44, 1  ;;  %v3318_v13 = vrot.slane %v3317_v29, 2  ;;  %v8043_v48 = vmax.f32 %v3293_v54, %v3294_v5 }
 0x271   : > { %10037 = vst [vmem:[#allocation236_spill] sm:$0xff] %v8037_v25  ;;  %10038 = vst [vmem:[#allocation237_spill] sm:$0xff] %v8039_v58  ;;  %v2389_v3 = vmax.f32 %v2387_v43, %v2388_v47  ;;  %v2393_v61 = vrot.slane %v2392_v16, 4  ;;  %v8045_v0 = vmax.f32 %v3299_v49, %v3300_v33  ;;  %v2399_v42 = vrot.slane %v7662_v28, 4  ;;  %v10043_v47 = vld [vmem:[#allocation33_spill] sm:$0xff]  ;;  %v10049_v33 = vld [vmem:[#allocation207_spill] sm:$0xff] }
 0x272   : > { %10039 = vst [vmem:[#allocation238_spill] sm:$0xff] %v8043_v48  ;;  %v3319_v20 = vmax.f32 %v3317_v29, %v3318_v13  ;;  %v3313_v12 = vrot.slane %v3312_v1, 1  ;;  %v8054_v36 = vadd.f32 %v7664_v60, %v10041_v9  ;;  %v2405_v49 = vsel %vm1663_vm2, %v7668_v27, -inf  ;;  %v10046_v27 = vld [vmem:[#allocation206_spill] sm:$0xff] }
 0x273   : > { %10040 = vst [vmem:[#allocation239_spill] sm:$0xff] %v8045_v0  ;;  %v2394_v63 = vmax.f32 %v2392_v16, %v2393_v61  ;;  %v2400_v30 = vmax.f32 %v7662_v28, %v2399_v42  ;;  %v8058_v54 = vmax.f32 %v3306_v44, %v3307_v14  ;;  %v2390_v39 = vrot.slane %v2389_v3, 1  ;;  %v10044_v16 = vld [vmem:[#allocation42_spill] sm:$0xff]  ;;  %v8065_v28 = vpop.f32.mrb[129].mxu0  ;;  %v10057_v0 = vld [vmem:[#allocation209_spill] sm:$0xff] }
 0x274   : > { %v2406_v43 = vrot.slane %v2405_v49, 4  ;;  %v3320_v5 = vrot.slane %v3319_v20, 1  ;;  %v8063_v13 = vadd.f32 %v10044_v16, %v10043_v47  ;;  %10045 = vst [vmem:[#allocation33_spill] sm:$0xff] %v8065_v28  ;;  %v2412_v44 = vrot.slane %v10046_v27, 4  ;;  %v8076_v48 = vpop.f32.mrb[130].mxu0  ;;  %v8078_v47 = vpop.f32.mrb[130].mxu1 }
 0x275   : > { %10042 = vst [vmem:[#allocation31_spill] sm:$0xff] %v8058_v54  ;;  %v2395_v57 = vrot.slane %v2394_v63, 2  ;;  %v2401_v29 = vrot.slane %v2400_v30, 2  ;;  %v8069_v14 = vmax.f32 %v3312_v1, %v3313_v12  ;;  %v8074_v54 = vadd.f32 %v10049_v33, %v10048_v32  ;;  %10050 = vst [vmem:[#allocation206_spill] sm:$0xff] %v8076_v48  ;;  %v8085_v12 = vpop.f32.mrb[131].mxu0  ;;  %v10059_v32 = vld [vmem:[#allocation131_spill] sm:$0xff] }
 0x276   : > { %v2407_v9 = vmax.f32 %v2405_v49, %v2406_v43  ;;  %10051 = vst [vmem:[#allocation74_spill] sm:$0xff] %v8078_v47  ;;  %v8080_v26 = vmax.f32 %v2389_v3, %v2390_v39  ;;  %v2413_v49 = vmax.f32 %v10046_v27, %v2412_v44  ;;  %10053 = vst [vmem:[#allocation207_spill] sm:$0xff] %v8085_v12  ;;  %v2425_v58 = vrot.slane %v10058_v38, 4  ;;  %v10073_v12 = vld [vmem:[#allocation13_spill] sm:$0xff]  ;;  %v10075_v48 = vld [vmem:[#allocation16_spill] sm:$0xff] }
 0x277   : > { %v2396_v61 = vmax.f32 %v2394_v63, %v2395_v57  ;;  %10047 = vst [vmem:[#allocation42_spill] sm:$0xff] %v8069_v14  ;;  %v2402_v18 = vmax.f32 %v2400_v30, %v2401_v29  ;;  %v10052_v57 = vld [vmem:[#allocation208_spill] sm:$0xff]  ;;  %v8087_v30 = vpop.f32.mrb[131].mxu1  ;;  %v8089_v43 = vmax.f32 %v3319_v20, %v3320_v5  ;;  %v10056_v14 = vld [vmem:[#allocation78_spill] sm:$0xff]  ;;  %v10074_v47 = vrot.slane %v7628_v8, 2 }
 0x278   : > { %v2408_v63 = vrot.slane %v2407_v9, 2  ;;  %v2418_v1 = vsel %vm1663_vm2, %v10052_v57, -inf  ;;  %10054 = vst [vmem:[#allocation208_spill] sm:$0xff] %v8087_v30  ;;  %v2414_v39 = vrot.slane %v2413_v49, 2  ;;  %v8095_v27 = vadd.f32 %v10057_v0, %v10056_v14  ;;  %v10065_v30 = vld [vmem:[#allocation134_spill] sm:$0xff] }
 0x279   : > { %10055 = vst [vmem:[#allocation240_spill] sm:$0xff] %v8089_v43  ;;  %v2419_v4 = vrot.slane %v2418_v1, 4  ;;  %v2397_v42 = vrot.slane %v2396_v61, 1  ;;  %v2403_v3 = vrot.slane %v2402_v18, 1  ;;  %v10060_v43 = vld [vmem:[#allocation211_spill] sm:$0xff]  ;;  %v2426_v14 = vmax.f32 %v10058_v38, %v2425_v58  ;;  %v10070_v58 = vld [vmem:[#allocation8_spill] sm:$0xff] }
 0x27a   : > { %v2409_v44 = vmax.f32 %v2407_v9, %v2408_v63  ;;  %v8104_v34 = vadd.f32 %v10060_v43, %v10059_v32  ;;  %v2415_v46 = vmax.f32 %v2413_v49, %v2414_v39  ;;  %v10062_v9 = vld [vmem:[#allocation119_spill] sm:$0xff]  ;;  %v10066_v32 = vld [vmem:[#allocation212_spill] sm:$0xff]  ;;  %v3572_v49 = vrot.slane %v7628_v8, 7 }
 0x27b   : > { %v2420_v25 = vmax.f32 %v2418_v1, %v2419_v4  ;;  %v2431_v63 = vsel %vm1663_vm2, %v10062_v9, -inf  ;;  %v8109_v4 = vmax.f32 %v2396_v61, %v2397_v42  ;;  %v8111_v1 = vmax.f32 %v2402_v18, %v2403_v3  ;;  %v10068_v39 = vld [vmem:[#allocation180_spill] sm:$0xff] }
 0x27c   : > { %10061 = vst [vmem:[#allocation78_spill] sm:$0xff] %v8104_v34  ;;  %v2432_v5 = vrot.slane %v2431_v63, 4  ;;  %v2410_v57 = vrot.slane %v2409_v44, 1  ;;  %v2427_v53 = vrot.slane %v2426_v14, 2  ;;  %v8116_v22 = vadd.f32 %v10066_v32, %v10065_v30  ;;  %v10078_v34 = vld [vmem:[#allocation22_spill] sm:$0xff] }
 0x27d   : > { %v2421_v62 = vrot.slane %v2420_v25, 2  ;;  %10063 = vst [vmem:[#allocation209_spill] sm:$0xff] %v8109_v4  ;;  %10064 = vst [vmem:[#allocation210_spill] sm:$0xff] %v8111_v1  ;;  %v8122_v61 = vadd.f32 %v7730_v51, %v10068_v39  ;;  %v2416_v18 = vrot.slane %v2415_v46, 1  ;;  %v3564_v3 = vrot.slane %v7628_v8, 3  ;;  %v10071_v39 = vld [vmem:[#allocation10_spill] sm:$0xff] }
 0x27e   : > { %10067 = vst [vmem:[#allocation131_spill] sm:$0xff] %v8116_v22  ;;  %v2433_v38 = vmax.f32 %v2431_v63, %v2432_v5  ;;  %v2428_v42 = vmax.f32 %v2426_v14, %v2427_v53  ;;  %v3568_v9 = vrot.slane %v7628_v8, 5  ;;  %v3570_v30 = vrot.slane %v7628_v8, 6 }
 0x27f   : > { %v2422_v29 = vmax.f32 %v2420_v25, %v2421_v62  ;;  %10069 = vst [vmem:[#allocation119_spill] sm:$0xff] %v8122_v61  ;;  %v3566_v62 = vrot.slane %v7628_v8, 4  ;;  %v4040_v20 = vadd.f32 %v7628_v8, %v10070_v58  ;;  %v10072_v1 = vrot.slane %v7628_v8, 1  ;;  %v10080_v58 = vld [vmem:[#allocation27_spill] sm:$0xff] }
 0x280   : > { %v2434_v25 = vrot.slane %v2433_v38, 2  ;;  %v2429_v63 = vrot.slane %v2428_v42, 1  ;;  %v4044_v31 = vadd.f32 %v10074_v47, %v10073_v12  ;;  %v4046_v28 = vadd.f32 %v3564_v3, %v10075_v48 }
 0x281   : > { %v2423_v5 = vrot.slane %v2422_v29, 1  ;;  %v4042_v53 = vadd.f32 %v10072_v1, %v10071_v39  ;;  %v4048_v61 = vadd.f32 %v3566_v62, %v10076_v55  ;;  %v8139_v22 = vmax.f32 %v2409_v44, %v2410_v57  ;;  %v4296_v44 = vld [vmem:[%s9563_s4] sm:$0x3] }
 0x282   : > { %v2435_v14 = vmax.f32 %v2433_v38, %v2434_v25  ;;  %v4050_v43 = vadd.f32 %v3568_v9, %v10078_v34  ;;  %v4052_v4 = vadd.f32 %v3570_v30, %v10079_v45  ;;  %v4054_v19 = vadd.f32 %v3572_v49, %v10080_v58  ;;  %v10086_v9 = vld [vmem:[#allocation9_spill] sm:$0xff]  ;;  %v10089_v58 = vld [vmem:[#allocation15_spill] sm:$0xff]  ;;  %v10092_v38 = vld [vmem:[#allocation20_spill] sm:$0xff] }
 0x283   : > { %10077 = vst [vmem:[#allocation134_spill] sm:$0xff] %v8139_v22  ;;  %v4298_v25 = vlaneseq  ;;  %v8146_v8 = vmax.f32 %v2415_v46, %v2416_v18  ;;  %v8148_v47 = vmax.f32 %v2422_v29, %v2423_v5  ;;  %v8150_v48 = vmax.f32 %v2428_v42, %v2429_v63  ;;  %v10085_v46 = vld [vmem:[#allocation182_spill] sm:$0xff]  ;;  %v10087_v5 = vld [vmem:[#allocation12_spill] sm:$0xff] }
 0x284   : > { %v2436_v21 = vrot.slane %v2435_v14, 1  ;;  %v2438_v45 = vrot.slane %v7791_v2, 4  ;;  %v8161_v29 = vadd.f32 %v7793_v17, %v10085_v46  ;;  %v3565_v57 = vrot.slane %v7656_v50, 3  ;;  %v10091_v46 = vld [vmem:[#allocation18_spill] sm:$0xff] }
 0x285   : > { %10081 = vst [vmem:[#allocation212_spill] sm:$0xff] %v8146_v8  ;;  %10082 = vst [vmem:[#allocation180_spill] sm:$0xff] %v8148_v47  ;;  %v4299_v12 = vshrl.u32 %v4298_v25, 7  ;;  %v3567_v42 = vrot.slane %v7656_v50, 4  ;;  %v3571_v3 = vrot.slane %v7656_v50, 6  ;;  %v3573_v62 = vrot.slane %v7656_v50, 7 }
 0x286   : > { %10083 = vst [vmem:[#allocation8_spill] sm:$0xff] %v8150_v48  ;;  %v8154_v34 = vmax.f32 %v2435_v14, %v2436_v21  ;;  %v2439_v18 = vmax.f32 %v7791_v2, %v2438_v45  ;;  %v3569_v21 = vrot.slane %v7656_v50, 5  ;;  %v4041_v30 = vadd.f32 %v7656_v50, %v10086_v9  ;;  %v10094_v9 = vld [vmem:[#allocation26_spill] sm:$0xff]  ;;  %v10095_v48 = vld [vmem:[#allocation28_spill] sm:$0xff] }
 0x287   : > { %v4300_v49 = vsub.s32 0, %v4299_v12  ;;  %v10088_v63 = vrot.slane %v7656_v50, 1  ;;  %v10090_v25 = vrot.slane %v7656_v50, 2  ;;  %v4047_v55 = vadd.f32 %v3565_v57, %v10091_v46 }
 0x288   : > { %10084 = vst [vmem:[#allocation10_spill] sm:$0xff] %v8154_v34  ;;  %v2440_v2 = vrot.slane %v2439_v18, 2  ;;  %v4049_v1 = vadd.f32 %v3567_v42, %v10092_v38  ;;  %v10093_v34 = vld [vmem:[#allocation23_spill] sm:$0xff]  ;;  %v4053_v22 = vadd.f32 %v3571_v3, %v10094_v9  ;;  %v4055_v8 = vadd.f32 %v3573_v62, %v10095_v48  ;;  %v8192_v42 = vpop.f32.mrb[132].mxu1 }
 0x289   : > { %v4043_v39 = vadd.f32 %v10088_v63, %v10087_v5  ;;  %v8174_v14 = vrot.slane %v4296_v44, %v4300_v49  ;;  %v4045_v45 = vadd.f32 %v10090_v25, %v10089_v58  ;;  %v4051_v47 = vadd.f32 %v3569_v21, %v10093_v34 }
 0x28a   : > { %v2441_v3 = vmax.f32 %v2439_v18, %v2440_v2 }
 0x28b   : > { %v4310_v49 = vadd.f32 %v8174_v14, %v4042_v53  ;;  %v4312_v5 = vadd.f32 %v8174_v14, %v4044_v31  ;;  %v4314_v63 = vadd.f32 %v8174_v14, %v4046_v28  ;;  %v4316_v58 = vadd.f32 %v8174_v14, %v4048_v61 }
 0x28c   : > { %v4318_v57 = vadd.f32 %v8174_v14, %v4050_v43  ;;  %v4320_v38 = vadd.f32 %v8174_v14, %v4052_v4  ;;  %v4322_v34 = vadd.f32 %v8174_v14, %v4054_v19  ;;  %v4308_v48 = vadd.f32 %v8174_v14, %v4040_v20 }
 0x28d   : > { %v4820_v21 = vrot.slane %v4310_v49, 7  ;;  %v4823_v53 = vrot.slane %v4312_v5, 6  ;;  %v4826_v31 = vrot.slane %v4314_v63, 5  ;;  %v4829_v62 = vrot.slane %v4316_v58, 4  ;;  %v10114_v5 = vld [vmem:[#allocation69_spill] sm:$0xff] }
 0x28e   : > { %v4832_v28 = vrot.slane %v4318_v57, 3  ;;  %v4835_v46 = vrot.slane %v4320_v38, 2  ;;  %v4304_v43 = vsub.s32 1, %v4299_v12  ;;  %v2444_v4 = vsel %vm1663_vm2, %v7820_v23, -inf }
 0x28f   : > { %v4822_v61 = vsel %vm4821_vm4, %v4820_v21, %v4308_v48  ;;  %v4838_v9 = vrot.slane %v4322_v34, 1  ;;  %v2445_v50 = vrot.slane %v2444_v4, 4  ;;  %v2451_v20 = vrot.slane %v7824_v24, 4 }
 0x290   : > { %v4825_v19 = vsel %vm4824_vm5, %v4823_v53, %v4822_v61  ;;  %v2442_v2 = vrot.slane %v2441_v3, 1  ;;  %v8202_v49 = vrot.slane %v4296_v44, %v4304_v43  ;;  %v8209_v23 = vadd.f32 %v7822_v59, %v7739_v15  ;;  %v8225_v61 = vpop.f32.mrb[132].mxu0 }
 0x291   : > { %v4828_v18 = vsel %vm4827_vm6, %v4826_v31, %v4825_v19  ;;  %v2446_v58 = vmax.f32 %v2444_v4, %v2445_v50  ;;  %v2452_v12 = vmax.f32 %v7824_v24, %v2451_v20 }
 0x292   : > { %v4831_v63 = vsel %vm4830_vm7, %v4829_v62, %v4828_v18  ;;  %v4309_v38 = vadd.f32 %v8202_v49, %v4041_v30  ;;  %v4311_v34 = vadd.f32 %v8202_v49, %v4043_v39  ;;  %v4313_v44 = vadd.f32 %v8202_v49, %v4045_v45 }
 0x293   : > { %v4834_v57 = vsel %vm4833_vm8, %v4832_v28, %v4831_v63  ;;  %v4315_v21 = vadd.f32 %v8202_v49, %v4047_v55  ;;  %v4317_v50 = vadd.f32 %v8202_v49, %v4049_v1  ;;  %v4319_v24 = vadd.f32 %v8202_v49, %v4051_v47 }
 0x294   : > { %v4837_v48 = vsel %vm4836_vm9, %v4835_v46, %v4834_v57  ;;  %v4321_v15 = vadd.f32 %v8202_v49, %v4053_v22  ;;  %v4323_v31 = vadd.f32 %v8202_v49, %v4055_v8  ;;  %v4841_v62 = vrot.slane %v4311_v34, 7 }
 0x295   : > { %v4840_v53 = vsel %vm4839_vm10, %v4838_v9, %v4837_v48  ;;  %v8222_v30 = vmax.f32 %v2441_v3, %v2442_v2  ;;  %v4843_v39 = vrot.slane %v4313_v44, 6  ;;  %v4845_v45 = vrot.slane %v4315_v21, 5  ;;  %v8231_v3 = vpop.f32.mrb[133].mxu1 }
 0x296   : > { %5307 = vxpose.xlu0.b32.start [1/16] %v4840_v53, 128  ;;  %v4842_v1 = vsel %vm4821_vm4, %v4841_v62, %v4309_v38  ;;  %v4847_v55 = vrot.slane %v4317_v50, 4  ;;  %v4849_v47 = vrot.slane %v4319_v24, 3  ;;  %v2447_v46 = vrot.slane %v2446_v58, 2  ;;  %v10096_v62 = vld [vmem:[#allocation34_spill] sm:$0xff] }
 0x297   : > { %v4844_v43 = vsel %vm4824_vm5, %v4843_v39, %v4842_v1  ;;  %v4851_v22 = vrot.slane %v4321_v15, 2  ;;  %v2453_v4 = vrot.slane %v2452_v12, 2  ;;  %v2457_v8 = vsel %vm1663_vm2, %v7830_v56, -inf  ;;  %v10098_v1 = vld [vmem:[#allocation39_spill] sm:$0xff]  ;;  %v10113_v56 = vld [vmem:[#allocation57_spill] sm:$0xff] }
 0x298   : > { %v4846_v19 = vsel %vm4827_vm6, %v4845_v45, %v4844_v43  ;;  %v4853_v9 = vrot.slane %v4323_v31, 1  ;;  %v2448_v20 = vmax.f32 %v2446_v58, %v2447_v46  ;;  %v2458_v18 = vrot.slane %v2457_v8, 4  ;;  %v10100_v46 = vld [vmem:[#allocation43_spill] sm:$0xff] }
 0x299   : > { %v4848_v2 = vsel %vm4830_vm7, %v4847_v55, %v4846_v19  ;;  %v2454_v63 = vmax.f32 %v2452_v12, %v2453_v4  ;;  %v8237_v57 = vadd.f32 %v7836_v41, %v7747_v11  ;;  %v3578_v38 = vrot.slane %v7664_v60, 3  ;;  %v10101_v4 = vld [vmem:[#allocation49_spill] sm:$0xff]  ;;  %v10102_v19 = vld [vmem:[#allocation51_spill] sm:$0xff] }
 0x29a   : > { %v4850_v34 = vsel %vm4833_vm8, %v4849_v47, %v4848_v2  ;;  %v2459_v44 = vmax.f32 %v2457_v8, %v2458_v18  ;;  %v3580_v48 = vrot.slane %v7664_v60, 4  ;;  %v2449_v58 = vrot.slane %v2448_v20, 1  ;;  %v10103_v18 = vld [vmem:[#allocation62_spill] sm:$0xff] }
 0x29b   : > { %v4852_v21 = vsel %vm4836_vm9, %v4851_v22, %v4850_v34  ;;  %v3582_v50 = vrot.slane %v7664_v60, 5  ;;  %v3584_v12 = vrot.slane %v7664_v60, 6  ;;  %v2455_v11 = vrot.slane %v2454_v63, 1 }
 0x29c   : > { %v4854_v24 = vsel %vm4839_vm10, %v4853_v9, %v4852_v21  ;;  %v2460_v53 = vrot.slane %v2459_v44, 2  ;;  %v3586_v15 = vrot.slane %v7664_v60, 7  ;;  %v10097_v39 = vrot.slane %v7664_v60, 1  ;;  %v10105_v21 = vld [vmem:[#allocation65_spill] sm:$0xff] }
 0x29d   : > { %5339 = vxpose.xlu1.b32.start [1/16] (narrow) %v4854_v24, 32  ;;  %v10099_v55 = vrot.slane %v7664_v60, 2  ;;  %v4062_v43 = vadd.f32 %v3578_v38, %v10100_v46  ;;  %v4064_v8 = vadd.f32 %v3580_v48, %v10101_v4  ;;  %v4066_v9 = vadd.f32 %v3582_v50, %v10102_v19  ;;  %v8269_v48 = vpop.f32.mrb[133].mxu0 }
 0x29e   : > { %v4058_v45 = vadd.f32 %v10097_v39, %v10096_v62  ;;  %v2461_v22 = vmax.f32 %v2459_v44, %v2460_v53  ;;  %v4068_v2 = vadd.f32 %v3584_v12, %v10103_v18  ;;  %v8259_v34 = vmax.f32 %v2448_v20, %v2449_v58 }
 0x29f   : > { %v4060_v47 = vadd.f32 %v10099_v55, %v10098_v1  ;;  %v4070_v24 = vadd.f32 %v3586_v15, %v10105_v21  ;;  %v8264_v39 = vmax.f32 %v2454_v63, %v2455_v11  ;;  %v4330_v60 = vadd.f32 %v8174_v14, %v4062_v43  ;;  %v8277_v1 = vpop.f32.mrb[134].mxu1  ;;  %v10107_v21 = vld [vmem:[#allocation35_spill] sm:$0xff] }
 0x2a0   : > { %10104 = vst [vmem:[#allocation13_spill] sm:$0xff] %v8259_v34  ;;  %v4326_v31 = vadd.f32 %v8174_v14, %v4058_v45  ;;  %v4332_v38 = vadd.f32 %v8174_v14, %v4064_v8  ;;  %v4334_v44 = vadd.f32 %v8174_v14, %v4066_v9  ;;  %v4324_v20 = vadd.f32 %v8174_v14, %v8054_v36  ;;  %v8275_v45 = vpop.f32.mrb[134].mxu0  ;;  %v8283_v4 = vpop.f32.mrb[135].mxu1  ;;  %v10115_v34 = vld [vmem:[#allocation71_spill] sm:$0xff] }
 0x2a1   : > { %v4328_v62 = vadd.f32 %v8174_v14, %v4060_v47  ;;  %10106 = vst [vmem:[#allocation16_spill] sm:$0xff] %v8264_v39  ;;  %v4336_v58 = vadd.f32 %v8174_v14, %v4068_v2  ;;  %v2462_v53 = vrot.slane %v2461_v22, 1  ;;  %v4338_v15 = vadd.f32 %v8174_v14, %v4070_v24  ;;  %v8281_v36 = vpop.f32.mrb[135].mxu0 }
 0x2a2   : > { %v4855_v50 = vrot.slane %v4326_v31, 7  ;;  %v4859_v63 = vrot.slane %v4330_v60, 5  ;;  %v4861_v11 = vrot.slane %v4332_v38, 4  ;;  %v4863_v47 = vrot.slane %v4334_v44, 3  ;;  %v10109_v60 = vld [vmem:[#allocation41_spill] sm:$0xff] }
 0x2a3   : > { %v4857_v12 = vrot.slane %v4328_v62, 6  ;;  %v4865_v46 = vrot.slane %v4336_v58, 2  ;;  %v3579_v43 = vrot.slane %v10044_v16, 3  ;;  %v3581_v8 = vrot.slane %v10044_v16, 4  ;;  %v10111_v58 = vld [vmem:[#allocation44_spill] sm:$0xff] }
 0x2a4   : > { %v4856_v55 = vsel %vm4821_vm4, %v4855_v50, %v4324_v20  ;;  %v3583_v19 = vrot.slane %v10044_v16, 5  ;;  %v3585_v9 = vrot.slane %v10044_v16, 6  ;;  %v3587_v2 = vrot.slane %v10044_v16, 7 }
 0x2a5   : > { %v4858_v31 = vsel %vm4824_vm5, %v4857_v12, %v4856_v55  ;;  %v10108_v24 = vrot.slane %v10044_v16, 1  ;;  %v10110_v38 = vrot.slane %v10044_v16, 2  ;;  %v4063_v50 = vadd.f32 %v3579_v43, %v10111_v58  ;;  %v10112_v12 = vld [vmem:[#allocation52_spill] sm:$0xff] }
 0x2a6   : > { %v4860_v18 = vsel %vm4827_vm6, %v4859_v63, %v4858_v31  ;;  %v4065_v55 = vadd.f32 %v3581_v8, %v10112_v12  ;;  %v4067_v28 = vadd.f32 %v3583_v19, %v10113_v56  ;;  %v4867_v31 = vrot.slane %v4338_v15, 1  ;;  %v10116_v58 = vld [vmem:[#allocation76_spill] sm:$0xff] }
 0x2a7   : > { %v4059_v62 = vadd.f32 %v10108_v24, %v10107_v21  ;;  %v4061_v44 = vadd.f32 %v10110_v38, %v10109_v60  ;;  %v4862_v20 = vsel %vm4830_vm7, %v4861_v11, %v4860_v18  ;;  %v4069_v25 = vadd.f32 %v3585_v9, %v10114_v5 }
 0x2a8   : > { %v4864_v63 = vsel %vm4833_vm8, %v4863_v47, %v4862_v20  ;;  %v4071_v39 = vadd.f32 %v3587_v2, %v10115_v34  ;;  %v4331_v11 = vadd.f32 %v8202_v49, %v4063_v50  ;;  %v4333_v8 = vadd.f32 %v8202_v49, %v4065_v55  ;;  %v10118_v55 = vld [vmem:[#allocation90_spill] sm:$0xff] }
 0x2a9   : > { %v4866_v21 = vsel %vm4836_vm9, %v4865_v46, %v4864_v63  ;;  %v4327_v16 = vadd.f32 %v8202_v49, %v4059_v62  ;;  %v4329_v24 = vadd.f32 %v8202_v49, %v4061_v44  ;;  %v4335_v56 = vadd.f32 %v8202_v49, %v4067_v28 }
 0x2aa   : > { %v4868_v43 = vsel %vm4839_vm10, %v4867_v31, %v4866_v21  ;;  %v4337_v15 = vadd.f32 %v8202_v49, %v4069_v25  ;;  %v4325_v5 = vadd.f32 %v8202_v49, %v8063_v13  ;;  %v4339_v34 = vadd.f32 %v8202_v49, %v4071_v39  ;;  %v10120_v21 = vld [vmem:[#allocation92_spill] sm:$0xff] }
 0x2ab   : > { %5308 = vxpose.xlu0.b32.cont [2/16] %v4868_v43, 128  ;;  %v4869_v47 = vrot.slane %v4327_v16, 7  ;;  %v4871_v46 = vrot.slane %v4329_v24, 6  ;;  %v8315_v19 = vmax.f32 %v2461_v22, %v2462_v53  ;;  %v4873_v9 = vrot.slane %v4331_v11, 5  ;;  %v10121_v24 = vld [vmem:[#allocation103_spill] sm:$0xff] }
 0x2ac   : > { %v4875_v18 = vrot.slane %v4333_v8, 4  ;;  %v4877_v2 = vrot.slane %v4335_v56, 3  ;;  %v4879_v60 = vrot.slane %v4337_v15, 2  ;;  %v4881_v38 = vrot.slane %v4339_v34, 1  ;;  %v10122_v8 = vld [vmem:[#allocation106_spill] sm:$0xff]  ;;  %v10123_v15 = vld [vmem:[#allocation117_spill] sm:$0xff] }
 0x2ad   : > { %v4870_v62 = vsel %vm4821_vm4, %v4869_v47, %v4325_v5  ;;  %v8320_v25 = vadd.f32 %v7875_v35, %v7883_v52  ;;  %v3592_v13 = vrot.slane %v10049_v33, 3  ;;  %v3594_v39 = vrot.slane %v10049_v33, 4  ;;  %v10124_v34 = vld [vmem:[#allocation118_spill] sm:$0xff] }
 0x2ae   : > { %v4872_v28 = vsel %vm4824_vm5, %v4871_v46, %v4870_v62  ;;  %v3596_v22 = vrot.slane %v10049_v33, 5  ;;  %v3598_v44 = vrot.slane %v10049_v33, 6  ;;  %v3600_v20 = vrot.slane %v10049_v33, 7  ;;  %v8347_v62 = vpop.f32.mrb[136].mxu1 }
 0x2af   : > { %v4874_v53 = vsel %vm4827_vm6, %v4873_v9, %v4872_v28  ;;  %v10117_v50 = vrot.slane %v10049_v33, 1  ;;  %v10119_v63 = vrot.slane %v10049_v33, 2  ;;  %v4078_v16 = vadd.f32 %v3592_v13, %v10120_v21 }
 0x2b0   : > { %v4876_v52 = vsel %vm4830_vm7, %v4875_v18, %v4874_v53  ;;  %v4080_v11 = vadd.f32 %v3594_v39, %v10121_v24  ;;  %v4082_v56 = vadd.f32 %v3596_v22, %v10122_v8  ;;  %v4084_v5 = vadd.f32 %v3598_v44, %v10123_v15 }
 0x2b1   : > { %v4074_v12 = vadd.f32 %v10117_v50, %v10116_v58  ;;  %v4076_v31 = vadd.f32 %v10119_v63, %v10118_v55  ;;  %v4878_v43 = vsel %vm4833_vm8, %v4877_v2, %v4876_v52  ;;  %v4086_v47 = vadd.f32 %v3600_v20, %v10124_v34  ;;  %v10154_v20 = vld [vmem:[#allocation165_spill] sm:$0xff] }
 0x2b2   : > { %v4880_v46 = vsel %vm4836_vm9, %v4879_v60, %v4878_v43  ;;  %v4340_v9 = vadd.f32 %v8174_v14, %v8074_v54  ;;  %v4346_v2 = vadd.f32 %v8174_v14, %v4078_v16  ;;  %v4348_v13 = vadd.f32 %v8174_v14, %v4080_v11 }
 0x2b3   : > { %v4342_v33 = vadd.f32 %v8174_v14, %v4074_v12  ;;  %v4344_v18 = vadd.f32 %v8174_v14, %v4076_v31  ;;  %v4882_v28 = vsel %vm4839_vm10, %v4881_v38, %v4880_v46  ;;  %v4350_v39 = vadd.f32 %v8174_v14, %v4082_v56 }
 0x2b4   : > { %5340 = vxpose.xlu1.b32.cont [2/16] (narrow) %v4882_v28, 32  ;;  %v4352_v60 = vadd.f32 %v8174_v14, %v4084_v5  ;;  %v4354_v22 = vadd.f32 %v8174_v14, %v4086_v47  ;;  %v4887_v58 = vrot.slane %v4346_v2, 5  ;;  %v2464_v38 = vrot.slane %v7906_v40, 4  ;;  %v10125_v47 = vld [vmem:[#allocation86_spill] sm:$0xff]  ;;  %v10129_v28 = vld [vmem:[#allocation99_spill] sm:$0xff] }
 0x2b5   : > { %v4883_v54 = vrot.slane %v4342_v33, 7  ;;  %v4885_v53 = vrot.slane %v4344_v18, 6  ;;  %v4889_v12 = vrot.slane %v4348_v13, 4  ;;  %v4891_v52 = vrot.slane %v4350_v39, 3 }
 0x2b6   : > { %v4893_v55 = vrot.slane %v4352_v60, 2  ;;  %v4895_v31 = vrot.slane %v4354_v22, 1  ;;  %v2465_v21 = vmax.f32 %v7906_v40, %v2464_v38  ;;  %v8363_v16 = vadd.f32 %v7909_v7, %v7891_v37  ;;  %v10130_v60 = vld [vmem:[#allocation108_spill] sm:$0xff] }
 0x2b7   : > { %v4884_v50 = vsel %vm4821_vm4, %v4883_v54, %v4340_v9  ;;  %v3593_v11 = vrot.slane %v10057_v0, 3  ;;  %v3595_v43 = vrot.slane %v10057_v0, 4  ;;  %v3597_v8 = vrot.slane %v10057_v0, 5  ;;  %v10127_v9 = vld [vmem:[#allocation97_spill] sm:$0xff]  ;;  %v10131_v54 = vld [vmem:[#allocation114_spill] sm:$0xff] }
 0x2b8   : > { %v4886_v63 = vsel %vm4824_vm5, %v4885_v53, %v4884_v50  ;;  %v2466_v15 = vrot.slane %v2465_v21, 2  ;;  %v3599_v5 = vrot.slane %v10057_v0, 6  ;;  %v3601_v34 = vrot.slane %v10057_v0, 7  ;;  %v10132_v50 = vld [vmem:[#allocation124_spill] sm:$0xff] }
 0x2b9   : > { %v4888_v24 = vsel %vm4827_vm6, %v4887_v58, %v4886_v63  ;;  %v10126_v37 = vrot.slane %v10057_v0, 1  ;;  %v10128_v33 = vrot.slane %v10057_v0, 2  ;;  %v4079_v2 = vadd.f32 %v3593_v11, %v10129_v28 }
 0x2ba   : > { %v4890_v56 = vsel %vm4830_vm7, %v4889_v12, %v4888_v24  ;;  %v2467_v39 = vmax.f32 %v2465_v21, %v2466_v15  ;;  %v4081_v22 = vadd.f32 %v3595_v43, %v10130_v60  ;;  %v4083_v53 = vadd.f32 %v3597_v8, %v10131_v54  ;;  %v8390_v21 = vpop.f32.mrb[136].mxu0 }
 0x2bb   : > { %v4892_v40 = vsel %vm4833_vm8, %v4891_v52, %v4890_v56  ;;  %v4075_v46 = vadd.f32 %v10126_v37, %v10125_v47  ;;  %v4077_v18 = vadd.f32 %v10128_v33, %v10127_v9  ;;  %v4085_v12 = vadd.f32 %v3599_v5, %v10132_v50  ;;  %v10133_v52 = vld [vmem:[#allocation127_spill] sm:$0xff]  ;;  %10134 = vst [vmem:[#allocation19_spill] sm:$0xff] %v8390_v21  ;;  %v10217_v21 = vld [vmem:[#allocation226_spill] sm:$0xff] }
 0x2bc   : > { %v4894_v13 = vsel %vm4836_vm9, %v4893_v55, %v4892_v40  ;;  %v4087_v63 = vadd.f32 %v3601_v34, %v10133_v52  ;;  %v2468_v0 = vrot.slane %v2467_v39, 1  ;;  %v4347_v55 = vadd.f32 %v8202_v49, %v4079_v2  ;;  %v10136_v50 = vld [vmem:[#allocation183_spill] sm:$0xff] }
 0x2bd   : > { %v4896_v58 = vsel %vm4839_vm10, %v4895_v31, %v4894_v13  ;;  %v4343_v24 = vadd.f32 %v8202_v49, %v4075_v46  ;;  %v4345_v11 = vadd.f32 %v8202_v49, %v4077_v18  ;;  %v4349_v43 = vadd.f32 %v8202_v49, %v4081_v22 }
 0x2be   : > { %5309 = vxpose.xlu0.b32.cont [3/16] %v4896_v58, 128  ;;  %v4351_v31 = vadd.f32 %v8202_v49, %v4083_v53  ;;  %v4353_v8 = vadd.f32 %v8202_v49, %v4085_v12  ;;  %v4355_v56 = vadd.f32 %v8202_v49, %v4087_v63  ;;  %v4341_v5 = vadd.f32 %v8202_v49, %v8095_v27  ;;  %v10135_v27 = vld [vmem:[#allocation170_spill] sm:$0xff]  ;;  %v10152_v58 = vld [vmem:[#allocation155_spill] sm:$0xff] }
 0x2bf   : > { %v4897_v34 = vrot.slane %v4343_v24, 7  ;;  %v4899_v40 = vrot.slane %v4345_v11, 6  ;;  %v8399_v47 = vmax.f32 %v2467_v39, %v2468_v0  ;;  %v4901_v37 = vrot.slane %v4347_v55, 5  ;;  %v8417_v24 = vpop.f32.mrb[137].mxu0  ;;  %v10138_v55 = vld [vmem:[#allocation209_spill] sm:$0xff] }
 0x2c0   : > { %v4903_v46 = vrot.slane %v4349_v43, 4  ;;  %v4905_v9 = vrot.slane %v4351_v31, 3  ;;  %v4907_v18 = vrot.slane %v4353_v8, 2  ;;  %v2470_v28 = vsel %vm1663_vm2, %v7939_v10, -inf  ;;  %10137 = vst [vmem:[#allocation22_spill] sm:$0xff] %v8417_v24  ;;  %v10139_v43 = vld [vmem:[#allocation82_spill] sm:$0xff] }
 0x2c1   : > { %v4898_v33 = vsel %vm4821_vm4, %v4897_v34, %v4341_v5  ;;  %v2477_v2 = vrot.slane %v7945_v6, 4  ;;  %v4909_v60 = vrot.slane %v4355_v56, 1  ;;  %v2471_v22 = vrot.slane %v2470_v28, 4  ;;  %v8425_v56 = vpop.f32.mrb[137].mxu1 }
 0x2c2   : > { %v4900_v13 = vsel %vm4824_vm5, %v4899_v40, %v4898_v33  ;;  %v8408_v54 = vadd.f32 %v10135_v27, %v8080_v26  ;;  %v2483_v12 = vsel %vm1663_vm2, %v10136_v50, -inf  ;;  %v8422_v31 = vadd.f32 %v10139_v43, %v10138_v55  ;;  %10142 = vst [vmem:[#allocation27_spill] sm:$0xff] %v8425_v56  ;;  %v8431_v33 = vpop.f32.mrb[138].mxu1 }
 0x2c3   : > { %v4902_v39 = vsel %vm4827_vm6, %v4901_v37, %v4900_v13  ;;  %v2478_v53 = vmax.f32 %v7945_v6, %v2477_v2  ;;  %v2472_v52 = vmax.f32 %v2470_v28, %v2471_v22  ;;  %v2484_v0 = vrot.slane %v2483_v12, 4  ;;  %v10141_v6 = vld [vmem:[#allocation211_spill] sm:$0xff]  ;;  %10144 = vst [vmem:[#allocation9_spill] sm:$0xff] %v8431_v33 }
 0x2c4   : > { %v4904_v10 = vsel %vm4830_vm7, %v4903_v46, %v4902_v39  ;;  %10140 = vst [vmem:[#allocation24_spill] sm:$0xff] %v8422_v31  ;;  %v3606_v8 = vrot.slane %v10141_v6, 3  ;;  %v3608_v37 = vrot.slane %v10141_v6, 4  ;;  %v8429_v46 = vpop.f32.mrb[138].mxu0  ;;  %v3610_v2 = vrot.slane %v10141_v6, 5  ;;  %v8438_v39 = vpop.f32.mrb[139].mxu1 }
 0x2c5   : > { %v4906_v26 = vsel %vm4833_vm8, %v4905_v9, %v4904_v10  ;;  %v2479_v11 = vrot.slane %v2478_v53, 2  ;;  %v2473_v34 = vrot.slane %v2472_v52, 2  ;;  %v2485_v40 = vmax.f32 %v2483_v12, %v2484_v0  ;;  %10143 = vst [vmem:[#allocation182_spill] sm:$0xff] %v8429_v46  ;;  %v8436_v22 = vpop.f32.mrb[139].mxu0  ;;  %10146 = vst [vmem:[#allocation15_spill] sm:$0xff] %v8438_v39  ;;  %v10147_v10 = vld [vmem:[#allocation133_spill] sm:$0xff] }
 0x2c6   : > { %v4908_v5 = vsel %vm4836_vm9, %v4907_v18, %v4906_v26  ;;  %v3612_v13 = vrot.slane %v10141_v6, 6  ;;  %10145 = vst [vmem:[#allocation12_spill] sm:$0xff] %v8436_v22  ;;  %v3614_v12 = vrot.slane %v10141_v6, 7  ;;  %v10148_v0 = vrot.slane %v10141_v6, 1  ;;  %v10173_v46 = vld [vmem:[#allocation176_spill] sm:$0xff] }
 0x2c7   : > { %v4910_v9 = vsel %vm4839_vm10, %v4909_v60, %v4908_v5  ;;  %v2480_v28 = vmax.f32 %v2478_v53, %v2479_v11  ;;  %v8440_v18 = vmax.f32 %v2472_v52, %v2473_v34  ;;  %v2486_v50 = vrot.slane %v2485_v40, 2  ;;  %v10149_v53 = vld [vmem:[#allocation141_spill] sm:$0xff]  ;;  %v10151_v5 = vld [vmem:[#allocation143_spill] sm:$0xff] }
 0x2c8   : > { %5341 = vxpose.xlu1.b32.cont [3/16] (narrow) %v4910_v9, 32  ;;  %v4090_v26 = vadd.f32 %v10148_v0, %v10147_v10  ;;  %v10150_v11 = vrot.slane %v10141_v6, 2  ;;  %v4094_v63 = vadd.f32 %v3606_v8, %v10151_v5  ;;  %v4096_v15 = vadd.f32 %v3608_v37, %v10152_v58  ;;  %v10153_v34 = vld [vmem:[#allocation157_spill] sm:$0xff]  ;;  %v10155_v0 = vld [vmem:[#allocation167_spill] sm:$0xff]  ;;  %v8462_v8 = vpop.f32.mrb[140].mxu1 }
 0x2c9   : > { %v2481_v60 = vrot.slane %v2480_v28, 1  ;;  %v8451_v38 = vmax.f32 %v2485_v40, %v2486_v50  ;;  %v4098_v9 = vadd.f32 %v3610_v2, %v10153_v34  ;;  %v4100_v44 = vadd.f32 %v3612_v13, %v10154_v20  ;;  %10157 = vst [vmem:[#allocation20_spill] sm:$0xff] %v8462_v8  ;;  %v10158_v40 = vld [vmem:[#allocation78_spill] sm:$0xff]  ;;  %v8476_v5 = vpop.f32.mrb[141].mxu1 }
 0x2ca   : > { %v4092_v55 = vadd.f32 %v10150_v11, %v10149_v53  ;;  %v4102_v22 = vadd.f32 %v3614_v12, %v10155_v0  ;;  %v4358_v6 = vadd.f32 %v8174_v14, %v4090_v26  ;;  %v8460_v53 = vpop.f32.mrb[140].mxu0  ;;  %v4356_v37 = vadd.f32 %v8174_v14, %v10158_v40  ;;  %10160 = vst [vmem:[#allocation26_spill] sm:$0xff] %v8476_v5  ;;  %v10170_v5 = vld [vmem:[#allocation158_spill] sm:$0xff] }
 0x2cb   : > { %10156 = vst [vmem:[#allocation18_spill] sm:$0xff] %v8460_v53  ;;  %v8464_v58 = vmax.f32 %v2480_v28, %v2481_v60  ;;  %v4362_v20 = vadd.f32 %v8174_v14, %v4094_v63  ;;  %v8470_v13 = vpop.f32.mrb[141].mxu0  ;;  %v4364_v50 = vadd.f32 %v8174_v14, %v4096_v15  ;;  %v4366_v12 = vadd.f32 %v8174_v14, %v4098_v9  ;;  %v8481_v63 = vpop.f32.mrb[142].mxu1  ;;  %v10172_v53 = vld [vmem:[#allocation173_spill] sm:$0xff] }
 0x2cc   : > { %v4360_v2 = vadd.f32 %v8174_v14, %v4092_v55  ;;  %10159 = vst [vmem:[#allocation23_spill] sm:$0xff] %v8470_v13  ;;  %v4368_v26 = vadd.f32 %v8174_v14, %v4100_v44  ;;  %v4370_v11 = vadd.f32 %v8174_v14, %v4102_v22  ;;  %v4911_v60 = vrot.slane %v4358_v6, 7  ;;  %v8479_v55 = vpop.f32.mrb[142].mxu0  ;;  %10162 = vst [vmem:[#allocation34_spill] sm:$0xff] %v8481_v63  ;;  %v8485_v44 = vpop.f32.mrb[143].mxu1  ;;  %v10169_v63 = vld [vmem:[#allocation152_spill] sm:$0xff] }
 0x2cd   : > { %v4915_v0 = vrot.slane %v4362_v20, 5  ;;  %10161 = vst [vmem:[#allocation28_spill] sm:$0xff] %v8479_v55  ;;  %v4917_v40 = vrot.slane %v4364_v50, 4  ;;  %v4919_v10 = vrot.slane %v4366_v12, 3  ;;  %v8483_v9 = vpop.f32.mrb[143].mxu0  ;;  %10164 = vst [vmem:[#allocation43_spill] sm:$0xff] %v8485_v44 }
 0x2ce   : > { %v4913_v34 = vrot.slane %v4360_v2, 6  ;;  %v4921_v15 = vrot.slane %v4368_v26, 2  ;;  %v4923_v52 = vrot.slane %v4370_v11, 1  ;;  %10163 = vst [vmem:[#allocation39_spill] sm:$0xff] %v8483_v9  ;;  %v4912_v22 = vsel %vm4821_vm4, %v4911_v60, %v4356_v37  ;;  %v10165_v12 = vld [vmem:[#allocation138_spill] sm:$0xff]  ;;  %v10167_v9 = vld [vmem:[#allocation149_spill] sm:$0xff] }
 0x2cf   : > { %v3607_v39 = vrot.slane %v10066_v32, 3  ;;  %v3609_v6 = vrot.slane %v10066_v32, 4  ;;  %v3611_v2 = vrot.slane %v10066_v32, 5  ;;  %v3613_v28 = vrot.slane %v10066_v32, 6 }
 0x2d0   : > { %v4914_v20 = vsel %vm4824_vm5, %v4913_v34, %v4912_v22  ;;  %v3615_v50 = vrot.slane %v10066_v32, 7  ;;  %v10166_v26 = vrot.slane %v10066_v32, 1  ;;  %v10168_v37 = vrot.slane %v10066_v32, 2  ;;  %v10171_v22 = vld [vmem:[#allocation161_spill] sm:$0xff] }
 0x2d1   : > { %v4916_v44 = vsel %vm4827_vm6, %v4915_v0, %v4914_v20  ;;  %v4095_v55 = vadd.f32 %v3607_v39, %v10169_v63  ;;  %v4097_v13 = vadd.f32 %v3609_v6, %v10170_v5  ;;  %v4099_v8 = vadd.f32 %v3611_v2, %v10171_v22 }
 0x2d2   : > { %v4091_v11 = vadd.f32 %v10166_v26, %v10165_v12  ;;  %v4093_v60 = vadd.f32 %v10168_v37, %v10167_v9  ;;  %v4918_v34 = vsel %vm4830_vm7, %v4917_v40, %v4916_v44  ;;  %v4101_v33 = vadd.f32 %v3613_v28, %v10172_v53  ;;  %v10174_v26 = vld [vmem:[#allocation131_spill] sm:$0xff] }
 0x2d3   : > { %v4103_v56 = vadd.f32 %v3615_v50, %v10173_v46  ;;  %v4920_v12 = vsel %vm4833_vm8, %v4919_v10, %v4918_v34  ;;  %v4357_v0 = vadd.f32 %v8202_v49, %v10174_v26  ;;  %v4363_v5 = vadd.f32 %v8202_v49, %v4095_v55 }
 0x2d4   : > { %v4359_v32 = vadd.f32 %v8202_v49, %v4091_v11  ;;  %v4361_v9 = vadd.f32 %v8202_v49, %v4093_v60  ;;  %v4922_v39 = vsel %vm4836_vm9, %v4921_v15, %v4920_v12  ;;  %v4365_v63 = vadd.f32 %v8202_v49, %v4097_v13  ;;  %v10175_v60 = vld [vmem:[#allocation181_spill] sm:$0xff]  ;;  %v10177_v12 = vld [vmem:[#allocation192_spill] sm:$0xff] }
 0x2d5   : > { %v4367_v40 = vadd.f32 %v8202_v49, %v4099_v8  ;;  %v4924_v53 = vsel %vm4839_vm10, %v4923_v52, %v4922_v39  ;;  %v4369_v46 = vadd.f32 %v8202_v49, %v4101_v33  ;;  %v4371_v10 = vadd.f32 %v8202_v49, %v4103_v56 }
 0x2d6   : > { %v4925_v28 = vrot.slane %v4359_v32, 7  ;;  %5310 = vxpose.xlu0.b32.cont [4/16] %v4924_v53, 128  ;;  %v4927_v44 = vrot.slane %v4361_v9, 6  ;;  %v4929_v6 = vrot.slane %v4363_v5, 5  ;;  %v4931_v2 = vrot.slane %v4365_v63, 4  ;;  %v10179_v9 = vld [vmem:[#allocation194_spill] sm:$0xff]  ;;  %v10180_v5 = vld [vmem:[#allocation199_spill] sm:$0xff] }
 0x2d7   : > { %v4933_v20 = vrot.slane %v4367_v40, 3  ;;  %v4935_v50 = vrot.slane %v4369_v46, 2  ;;  %v4937_v55 = vrot.slane %v4371_v10, 1  ;;  %v3620_v13 = vrot.slane %v7730_v51, 3  ;;  %v10181_v40 = vld [vmem:[#allocation200_spill] sm:$0xff] }
 0x2d8   : > { %v4926_v15 = vsel %vm4821_vm4, %v4925_v28, %v4357_v0  ;;  %v3622_v52 = vrot.slane %v7730_v51, 4  ;;  %v3624_v33 = vrot.slane %v7730_v51, 5  ;;  %v3626_v56 = vrot.slane %v7730_v51, 6  ;;  %v10182_v10 = vld [vmem:[#allocation204_spill] sm:$0xff] }
 0x2d9   : > { %v4928_v8 = vsel %vm4824_vm5, %v4927_v44, %v4926_v15  ;;  %v3628_v37 = vrot.slane %v7730_v51, 7  ;;  %v10176_v34 = vrot.slane %v7730_v51, 1  ;;  %v10178_v26 = vrot.slane %v7730_v51, 2  ;;  %v10183_v44 = vld [vmem:[#allocation205_spill] sm:$0xff]  ;;  %v10184_v15 = vld [vmem:[#allocation119_spill] sm:$0xff] }
 0x2da   : > { %v4930_v11 = vsel %vm4827_vm6, %v4929_v6, %v4928_v8  ;;  %v4110_v39 = vadd.f32 %v3620_v13, %v10179_v9  ;;  %v4112_v63 = vadd.f32 %v3622_v52, %v10180_v5  ;;  %v4114_v53 = vadd.f32 %v3624_v33, %v10181_v40 }
 0x2db   : > { %v4106_v22 = vadd.f32 %v10176_v34, %v10175_v60  ;;  %v4108_v0 = vadd.f32 %v10178_v26, %v10177_v12  ;;  %v4932_v32 = vsel %vm4830_vm7, %v4931_v2, %v4930_v11  ;;  %v4116_v28 = vadd.f32 %v3626_v56, %v10182_v10 }
 0x2dc   : > { %v4934_v46 = vsel %vm4833_vm8, %v4933_v20, %v4932_v32  ;;  %v4118_v6 = vadd.f32 %v3628_v37, %v10183_v44  ;;  %v4372_v8 = vadd.f32 %v8174_v14, %v10184_v15  ;;  %v4378_v13 = vadd.f32 %v8174_v14, %v4110_v39  ;;  %v10186_v44 = vld [vmem:[#allocation188_spill] sm:$0xff] }
 0x2dd   : > { %v4936_v51 = vsel %vm4836_vm9, %v4935_v50, %v4934_v46  ;;  %v4374_v60 = vadd.f32 %v8174_v14, %v4106_v22  ;;  %v4376_v2 = vadd.f32 %v8174_v14, %v4108_v0  ;;  %v4380_v33 = vadd.f32 %v8174_v14, %v4112_v63  ;;  %v10185_v0 = vld [vmem:[#allocation54_spill] sm:$0xff] }
 0x2de   : > { %v4938_v52 = vsel %vm4839_vm10, %v4937_v55, %v4936_v51  ;;  %v4382_v20 = vadd.f32 %v8174_v14, %v4114_v53  ;;  %v4384_v56 = vadd.f32 %v8174_v14, %v4116_v28  ;;  %v4386_v11 = vadd.f32 %v8174_v14, %v4118_v6 }
 0x2df   : > { %5342 = vxpose.xlu1.b32.cont [4/16] (narrow) %v4938_v52, 32  ;;  %v4939_v37 = vrot.slane %v4374_v60, 7  ;;  %v4941_v34 = vrot.slane %v4376_v2, 6  ;;  %v4943_v50 = vrot.slane %v4378_v13, 5  ;;  %v4945_v12 = vrot.slane %v4380_v33, 4  ;;  %v10190_v52 = vld [vmem:[#allocation196_spill] sm:$0xff] }
 0x2e0   : > { %v4947_v22 = vrot.slane %v4382_v20, 3  ;;  %v4949_v26 = vrot.slane %v4384_v56, 2  ;;  %v2490_v32 = vrot.slane %v10185_v0, 4  ;;  %v4951_v55 = vrot.slane %v4386_v11, 1  ;;  %v10191_v20 = vld [vmem:[#allocation201_spill] sm:$0xff] }
 0x2e1   : > { %v4940_v9 = vsel %vm4821_vm4, %v4939_v37, %v4372_v8  ;;  %v3621_v39 = vrot.slane %v7793_v17, 3  ;;  %v3623_v5 = vrot.slane %v7793_v17, 4  ;;  %v3625_v53 = vrot.slane %v7793_v17, 5  ;;  %v10188_v8 = vld [vmem:[#allocation107_spill] sm:$0xff] }
 0x2e2   : > { %v4942_v63 = vsel %vm4824_vm5, %v4941_v34, %v4940_v9  ;;  %v2491_v40 = vmax.f32 %v10185_v0, %v2490_v32  ;;  %v3627_v46 = vrot.slane %v7793_v17, 6  ;;  %v3629_v28 = vrot.slane %v7793_v17, 7  ;;  %v10192_v37 = vld [vmem:[#allocation111_spill] sm:$0xff]  ;;  %v10194_v32 = vld [vmem:[#allocation213_spill] sm:$0xff] }
 0x2e3   : > { %v4944_v10 = vsel %vm4827_vm6, %v4943_v50, %v4942_v63  ;;  %v10187_v6 = vrot.slane %v7793_v17, 1  ;;  %v10189_v51 = vrot.slane %v7793_v17, 2  ;;  %v4111_v33 = vadd.f32 %v3621_v39, %v10190_v52  ;;  %v10193_v50 = vld [vmem:[#allocation121_spill] sm:$0xff] }
 0x2e4   : > { %v4946_v2 = vsel %vm4830_vm7, %v4945_v12, %v4944_v10  ;;  %v2492_v13 = vrot.slane %v2491_v40, 2  ;;  %v4113_v56 = vadd.f32 %v3623_v5, %v10191_v20  ;;  %v4115_v34 = vadd.f32 %v3625_v53, %v10192_v37  ;;  %v10197_v20 = vld [vmem:[#allocation33_spill] sm:$0xff] }
 0x2e5   : > { %v4107_v15 = vadd.f32 %v10187_v6, %v10186_v44  ;;  %v4109_v60 = vadd.f32 %v10189_v51, %v10188_v8  ;;  %v4948_v11 = vsel %vm4833_vm8, %v4947_v22, %v4946_v2  ;;  %v4117_v0 = vadd.f32 %v3627_v46, %v10193_v50 }
 0x2e6   : > { %v4119_v9 = vadd.f32 %v3629_v28, %v10194_v32  ;;  %v10195_v63 = vrot.slane %v8440_v18, 1  ;;  %v4950_v12 = vsel %vm4836_vm9, %v4949_v26, %v4948_v11  ;;  %v2493_v10 = vmax.f32 %v2491_v40, %v2492_v13  ;;  %v10198_v11 = vld [vmem:[#allocation206_spill] sm:$0xff] }
 0x2e7   : > { %v4375_v39 = vadd.f32 %v8202_v49, %v4107_v15  ;;  %v4952_v5 = vsel %vm4839_vm10, %v4951_v55, %v4950_v12  ;;  %v4377_v22 = vadd.f32 %v8202_v49, %v4109_v60  ;;  %v4379_v53 = vadd.f32 %v8202_v49, %v4111_v33  ;;  %v10200_v12 = vld [vmem:[#allocation11_spill] sm:$0xff] }
 0x2e8   : > { %v8577_v17 = vmax.f32 %v8440_v18, %v10195_v63  ;;  %v4381_v46 = vadd.f32 %v8202_v49, %v4113_v56  ;;  %5311 = vxpose.xlu0.b32.cont [5/16] %v4952_v5, 128  ;;  %v2494_v28 = vrot.slane %v2493_v10, 1  ;;  %v4383_v44 = vadd.f32 %v8202_v49, %v4115_v34  ;;  %v10199_v34 = vld [vmem:[#allocation96_spill] sm:$0xff] }
 0x2e9   : > { %v4385_v18 = vadd.f32 %v8202_v49, %v4117_v0  ;;  %v4387_v6 = vadd.f32 %v8202_v49, %v4119_v9  ;;  %v10196_v26 = vrot.slane %v8451_v38, 1  ;;  %v4373_v55 = vadd.f32 %v8202_v49, %v8161_v29 }
 0x2ea   : > { %v4953_v15 = vrot.slane %v4375_v39, 7  ;;  %v4955_v8 = vrot.slane %v4377_v22, 6  ;;  %v2495_v51 = vmax.f32 %v2493_v10, %v2494_v28  ;;  %v4957_v60 = vrot.slane %v4379_v53, 5  ;;  %v10201_v10 = vld [vmem:[#allocation74_spill] sm:$0xff] }
 0x2eb   : > { %v8591_v40 = vmax.f32 %v8451_v38, %v10196_v26  ;;  %v4959_v2 = vrot.slane %v4381_v46, 4  ;;  %v4961_v13 = vrot.slane %v4383_v44, 3  ;;  %v4963_v33 = vrot.slane %v4385_v18, 2  ;;  %v10203_v46 = vld [vmem:[#allocation207_spill] sm:$0xff]  ;;  %v10215_v53 = vld [vmem:[#allocation222_spill] sm:$0xff] }
 0x2ec   : > { %v4954_v52 = vsel %vm4821_vm4, %v4953_v15, %v4373_v55  ;;  %v2496_v56 = vsel %vm1663_vm2, %v10197_v20, -inf  ;;  %v2503_v37 = vrot.slane %v10198_v11, 4  ;;  %v4168_v38 = vadd.f32 %v10199_v34, %v2495_v51  ;;  %v10205_v51 = vld [vmem:[#allocation235_spill] sm:$0xff] }
 0x2ed   : > { %v4956_v50 = vsel %vm4824_vm5, %v4955_v8, %v4954_v52  ;;  %v4965_v0 = vrot.slane %v4387_v6, 1  ;;  %v2497_v29 = vrot.slane %v2496_v56, 4  ;;  %v3672_v63 = vrot.slane %v10199_v34, 1 }
 0x2ee   : > { %v4958_v32 = vsel %vm4827_vm6, %v4957_v60, %v4956_v50  ;;  %v2504_v9 = vmax.f32 %v10198_v11, %v2503_v37  ;;  %v8606_v39 = vadd.f32 %v10201_v10, %v10200_v12  ;;  %v2509_v28 = vsel %vm1663_vm2, %v10203_v46, -inf  ;;  %v10207_v11 = vld [vmem:[#allocation208_spill] sm:$0xff]  ;;  %v10277_v10 = vld [vmem:[#allocation26_spill] sm:$0xff] }
 0x2ef   : > { %v4960_v5 = vsel %vm4830_vm7, %v4959_v2, %v4958_v32  ;;  %v2498_v22 = vmax.f32 %v2496_v56, %v2497_v29  ;;  %v2510_v26 = vrot.slane %v2509_v28, 4  ;;  %v8615_v55 = vadd.f32 %v8174_v14, %v4168_v38  ;;  %v10206_v56 = vld [vmem:[#allocation14_spill] sm:$0xff] }
 0x2f0   : > { %10202 = vst [vmem:[#allocation49_spill] sm:$0xff] %v8606_v39  ;;  %v4962_v44 = vsel %vm4833_vm8, %v4961_v13, %v4960_v5  ;;  %v2505_v18 = vrot.slane %v2504_v9, 2  ;;  %v3673_v60 = vrot.slane %v10205_v51, 1  ;;  %v8622_v37 = vadd.f32 %v10207_v11, %v10206_v56  ;;  %v10209_v5 = vld [vmem:[#allocation216_spill] sm:$0xff]  ;;  %v10214_v56 = vld [vmem:[#allocation221_spill] sm:$0xff] }
 0x2f1   : > { %10204 = vst [vmem:[#allocation51_spill] sm:$0xff] %v8615_v55  ;;  %v4964_v15 = vsel %vm4836_vm9, %v4963_v33, %v4962_v44  ;;  %v2499_v8 = vrot.slane %v2498_v22, 2  ;;  %v2511_v20 = vmax.f32 %v2509_v28, %v2510_v26  ;;  %v3634_v50 = vrot.slane %v7822_v59, 3  ;;  %v10211_v44 = vld [vmem:[#allocation217_spill] sm:$0xff]  ;;  %v10213_v26 = vld [vmem:[#allocation218_spill] sm:$0xff] }
 0x2f2   : > { %v4966_v2 = vsel %vm4839_vm10, %v4965_v0, %v4964_v15  ;;  %v2506_v52 = vmax.f32 %v2504_v9, %v2505_v18  ;;  %10208 = vst [vmem:[#allocation62_spill] sm:$0xff] %v8622_v37  ;;  %v3636_v38 = vrot.slane %v7822_v59, 4  ;;  %v3638_v29 = vrot.slane %v7822_v59, 5  ;;  %v10216_v55 = vld [vmem:[#allocation225_spill] sm:$0xff] }
 0x2f3   : > { %5343 = vxpose.xlu1.b32.cont [5/16] (narrow) %v4966_v2, 32  ;;  %v2500_v13 = vmax.f32 %v2498_v22, %v2499_v8  ;;  %v2512_v32 = vrot.slane %v2511_v20, 2  ;;  %v3640_v12 = vrot.slane %v7822_v59, 6  ;;  %v3642_v0 = vrot.slane %v7822_v59, 7 }
 0x2f4   : > { %v2507_v33 = vrot.slane %v2506_v52, 1  ;;  %v10210_v46 = vrot.slane %v7822_v59, 1  ;;  %v10212_v22 = vrot.slane %v7822_v59, 2  ;;  %v4126_v15 = vadd.f32 %v3634_v50, %v10213_v26 }
 0x2f5   : > { %v2501_v9 = vrot.slane %v2500_v13, 1  ;;  %v2513_v2 = vmax.f32 %v2511_v20, %v2512_v32  ;;  %v4128_v6 = vadd.f32 %v3636_v38, %v10214_v56  ;;  %v4130_v37 = vadd.f32 %v3638_v29, %v10215_v53 }
 0x2f6   : > { %v4122_v28 = vadd.f32 %v10210_v46, %v10209_v5  ;;  %v4124_v18 = vadd.f32 %v10212_v22, %v10211_v44  ;;  %v2508_v8 = vmax.f32 %v2506_v52, %v2507_v33  ;;  %v4132_v24 = vadd.f32 %v3640_v12, %v10216_v55 }
 0x2f7   : > { %v2502_v39 = vmax.f32 %v2500_v13, %v2501_v9  ;;  %v4134_v31 = vadd.f32 %v3642_v0, %v10217_v21  ;;  %v2514_v46 = vrot.slane %v2513_v2, 1  ;;  %v4394_v20 = vadd.f32 %v8174_v14, %v4126_v15 }
 0x2f8   : > { %v4170_v5 = vadd.f32 %v3672_v63, %v2508_v8  ;;  %v4390_v59 = vadd.f32 %v8174_v14, %v4122_v28  ;;  %v4392_v44 = vadd.f32 %v8174_v14, %v4124_v18  ;;  %v4396_v50 = vadd.f32 %v8174_v14, %v4128_v6  ;;  %v10218_v8 = vld [vmem:[#allocation55_spill] sm:$0xff] }
 0x2f9   : > { %v4169_v52 = vadd.f32 %v10205_v51, %v2502_v39  ;;  %v4398_v53 = vadd.f32 %v8174_v14, %v4130_v37  ;;  %v2515_v13 = vmax.f32 %v2513_v2, %v2514_v46  ;;  %v4400_v55 = vadd.f32 %v8174_v14, %v4132_v24 }
 0x2fa   : > { %v4402_v21 = vadd.f32 %v8174_v14, %v4134_v31  ;;  %v8651_v63 = vadd.f32 %v8174_v14, %v4170_v5  ;;  %v4388_v29 = vadd.f32 %v8174_v14, %v8209_v23  ;;  %v4967_v39 = vrot.slane %v4390_v59, 7  ;;  %v10220_v59 = vld [vmem:[#allocation60_spill] sm:$0xff] }
 0x2fb   : > { %v4969_v33 = vrot.slane %v4392_v44, 6  ;;  %v8656_v32 = vadd.f32 %v8202_v49, %v4169_v52  ;;  %v4171_v6 = vadd.f32 %v3673_v60, %v2515_v13  ;;  %v4971_v37 = vrot.slane %v4394_v20, 5  ;;  %v10222_v20 = vld [vmem:[#allocation135_spill] sm:$0xff] }
 0x2fc   : > { %v4973_v12 = vrot.slane %v4396_v50, 4  ;;  %v4968_v0 = vsel %vm4821_vm4, %v4967_v39, %v4388_v29  ;;  %v4975_v9 = vrot.slane %v4398_v53, 3  ;;  %v4977_v24 = vrot.slane %v4400_v55, 2  ;;  %v10223_v13 = vld [vmem:[#allocation223_spill] sm:$0xff] }
 0x2fd   : > { %v3635_v31 = vrot.slane %v7836_v41, 3  ;;  %v4970_v28 = vsel %vm4824_vm5, %v4969_v33, %v4968_v0  ;;  %v4979_v22 = vrot.slane %v4402_v21, 1  ;;  %v3637_v18 = vrot.slane %v7836_v41, 4  ;;  %v10224_v21 = vld [vmem:[#allocation144_spill] sm:$0xff]  ;;  %v10225_v39 = vld [vmem:[#allocation163_spill] sm:$0xff] }
 0x2fe   : > { %v3639_v23 = vrot.slane %v7836_v41, 5  ;;  %v4972_v26 = vsel %vm4827_vm6, %v4971_v37, %v4970_v28  ;;  %v3641_v15 = vrot.slane %v7836_v41, 6  ;;  %v3643_v60 = vrot.slane %v7836_v41, 7 }
 0x2ff   : > { %v10219_v2 = vrot.slane %v7836_v41, 1  ;;  %v8670_v5 = vadd.f32 %v8202_v49, %v4171_v6  ;;  %v4974_v46 = vsel %vm4830_vm7, %v4973_v12, %v4972_v26  ;;  %v10221_v44 = vrot.slane %v7836_v41, 2  ;;  %v10226_v6 = vld [vmem:[#allocation168_spill] sm:$0xff] }
 0x300   : > { %v4127_v50 = vadd.f32 %v3635_v31, %v10222_v20  ;;  %v4976_v53 = vsel %vm4833_vm8, %v4975_v9, %v4974_v46  ;;  %v4129_v55 = vadd.f32 %v3637_v18, %v10223_v13  ;;  %v4131_v29 = vadd.f32 %v3639_v23, %v10224_v21  ;;  %v10227_v20 = vld [vmem:[#allocation58_spill] sm:$0xff] }
 0x301   : > { %v4123_v56 = vadd.f32 %v10219_v2, %v10218_v8  ;;  %v4125_v52 = vadd.f32 %v10221_v44, %v10220_v59  ;;  %v4133_v33 = vadd.f32 %v3641_v15, %v10225_v39  ;;  %v4978_v37 = vsel %vm4836_vm9, %v4977_v24, %v4976_v53 }
 0x302   : > { %v4135_v0 = vadd.f32 %v3643_v60, %v10226_v6  ;;  %v4389_v12 = vadd.f32 %v8202_v49, %v8237_v57  ;;  %v4980_v28 = vsel %vm4839_vm10, %v4979_v22, %v4978_v37  ;;  %v4395_v9 = vadd.f32 %v8202_v49, %v4127_v50  ;;  %v10228_v37 = vld [vmem:[#allocation151_spill] sm:$0xff] }
 0x303   : > { %v4391_v41 = vadd.f32 %v8202_v49, %v4123_v56  ;;  %v4393_v31 = vadd.f32 %v8202_v49, %v4125_v52  ;;  %v4397_v18 = vadd.f32 %v8202_v49, %v4129_v55  ;;  %5312 = vxpose.xlu0.b32.cont [6/16] %v4980_v28, 128  ;;  %v4399_v23 = vadd.f32 %v8202_v49, %v4131_v29 }
 0x304   : > { %v4401_v24 = vadd.f32 %v8202_v49, %v4133_v33  ;;  %v4403_v26 = vadd.f32 %v8202_v49, %v4135_v0  ;;  %v5051_v57 = vrot.slane %v8651_v63, 7  ;;  %v4985_v22 = vrot.slane %v4395_v9, 5  ;;  %v10232_v9 = vld [vmem:[#allocation228_spill] sm:$0xff] }
 0x305   : > { %v4981_v15 = vrot.slane %v4391_v41, 7  ;;  %v4983_v8 = vrot.slane %v4393_v31, 6  ;;  %v4987_v56 = vrot.slane %v4397_v18, 4  ;;  %v4989_v46 = vrot.slane %v4399_v23, 3  ;;  %v10233_v23 = vld [vmem:[#allocation231_spill] sm:$0xff] }
 0x306   : > { %v4991_v59 = vrot.slane %v4401_v24, 2  ;;  %v4993_v52 = vrot.slane %v4403_v26, 1  ;;  %v8699_v50 = vadd.f32 %v8192_v42, %v10227_v20  ;;  %v3648_v53 = vrot.slane %v7875_v35, 3  ;;  %v10234_v26 = vld [vmem:[#allocation175_spill] sm:$0xff] }
 0x307   : > { %v4982_v2 = vsel %vm4821_vm4, %v4981_v15, %v4389_v12  ;;  %v3650_v55 = vrot.slane %v7875_v35, 4  ;;  %v3652_v21 = vrot.slane %v7875_v35, 5  ;;  %v3654_v29 = vrot.slane %v7875_v35, 6  ;;  %v10230_v12 = vld [vmem:[#allocation159_spill] sm:$0xff] }
 0x308   : > { %v4984_v44 = vsel %vm4824_vm5, %v4983_v8, %v4982_v2  ;;  %v3656_v33 = vrot.slane %v7875_v35, 7  ;;  %v10229_v6 = vrot.slane %v7875_v35, 1  ;;  %v10231_v41 = vrot.slane %v7875_v35, 2  ;;  %v10235_v2 = vld [vmem:[#allocation53_spill] sm:$0xff] }
 0x309   : > { %v4986_v13 = vsel %vm4827_vm6, %v4985_v22, %v4984_v44  ;;  %v4142_v18 = vadd.f32 %v3648_v53, %v10232_v9  ;;  %v4144_v24 = vadd.f32 %v3650_v55, %v10233_v23  ;;  %v4146_v15 = vadd.f32 %v3652_v21, %v10234_v26  ;;  %v10236_v44 = vld [vmem:[#allocation234_spill] sm:$0xff] }
 0x30a   : > { %v4988_v39 = vsel %vm4830_vm7, %v4987_v56, %v4986_v13  ;;  %v4138_v0 = vadd.f32 %v10229_v6, %v10228_v37  ;;  %v4140_v28 = vadd.f32 %v10231_v41, %v10230_v12  ;;  %v4148_v56 = vadd.f32 %v3654_v29, %v10235_v2 }
 0x30b   : > { %v4990_v31 = vsel %vm4833_vm8, %v4989_v46, %v4988_v39  ;;  %v4150_v20 = vadd.f32 %v3656_v33, %v10236_v44  ;;  %v4410_v53 = vadd.f32 %v8174_v14, %v4142_v18  ;;  %v4412_v55 = vadd.f32 %v8174_v14, %v4144_v24 }
 0x30c   : > { %v4992_v8 = vsel %vm4836_vm9, %v4991_v59, %v4990_v31  ;;  %v4406_v35 = vadd.f32 %v8174_v14, %v4138_v0  ;;  %v4408_v46 = vadd.f32 %v8174_v14, %v4140_v28  ;;  %v4414_v21 = vadd.f32 %v8174_v14, %v4146_v15 }
 0x30d   : > { %v4994_v13 = vsel %vm4839_vm10, %v4993_v52, %v4992_v8  ;;  %v4416_v59 = vadd.f32 %v8174_v14, %v4148_v56  ;;  %v4418_v39 = vadd.f32 %v8174_v14, %v4150_v20  ;;  %v4404_v29 = vadd.f32 %v8174_v14, %v8320_v25  ;;  %v10237_v25 = vld [vmem:[#allocation59_spill] sm:$0xff] }
 0x30e   : > { %5344 = vxpose.xlu1.b32.cont [6/16] (narrow) %v4994_v13, 32  ;;  %v4995_v33 = vrot.slane %v4406_v35, 7  ;;  %v4997_v52 = vrot.slane %v4408_v46, 6  ;;  %v2516_v37 = vrot.slane %v8225_v61, 4  ;;  %v4999_v0 = vrot.slane %v4410_v53, 5  ;;  %v10238_v35 = vld [vmem:[#allocation77_spill] sm:$0xff] }
 0x30f   : > { %v5001_v12 = vrot.slane %v4412_v55, 4  ;;  %v5003_v41 = vrot.slane %v4414_v21, 3  ;;  %v5005_v31 = vrot.slane %v4416_v59, 2  ;;  %v5007_v9 = vrot.slane %v4418_v39, 1  ;;  %v10240_v59 = vld [vmem:[#allocation169_spill] sm:$0xff] }
 0x310   : > { %v4996_v28 = vsel %vm4821_vm4, %v4995_v33, %v4404_v29  ;;  %v2517_v18 = vmax.f32 %v8225_v61, %v2516_v37  ;;  %v3674_v24 = vrot.slane %v10199_v34, 2  ;;  %v8740_v26 = vadd.f32 %v8231_v3, %v10237_v25  ;;  %v10242_v33 = vld [vmem:[#allocation93_spill] sm:$0xff]  ;;  %v10245_v25 = vld [vmem:[#allocation104_spill] sm:$0xff] }
 0x311   : > { %v4998_v23 = vsel %vm4824_vm5, %v4997_v52, %v4996_v28  ;;  %v3649_v15 = vrot.slane %v7909_v7, 3  ;;  %v3651_v56 = vrot.slane %v7909_v7, 4  ;;  %v3653_v44 = vrot.slane %v7909_v7, 5  ;;  %v10244_v28 = vld [vmem:[#allocation94_spill] sm:$0xff] }
 0x312   : > { %v5000_v8 = vsel %vm4827_vm6, %v4999_v0, %v4998_v23  ;;  %v2518_v2 = vrot.slane %v2517_v18, 2  ;;  %v3655_v61 = vrot.slane %v7909_v7, 6  ;;  %v3657_v13 = vrot.slane %v7909_v7, 7  ;;  %v10243_v0 = vld [vmem:[#allocation172_spill] sm:$0xff] }
 0x313   : > { %v5002_v20 = vsel %vm4830_vm7, %v5001_v12, %v5000_v8  ;;  %v10239_v46 = vrot.slane %v7909_v7, 1  ;;  %v10241_v39 = vrot.slane %v7909_v7, 2  ;;  %v4143_v52 = vadd.f32 %v3649_v15, %v10242_v33 }
 0x314   : > { %v5004_v55 = vsel %vm4833_vm8, %v5003_v41, %v5002_v20  ;;  %v2519_v21 = vmax.f32 %v2517_v18, %v2518_v2  ;;  %v4145_v12 = vadd.f32 %v3651_v56, %v10243_v0  ;;  %v4147_v23 = vadd.f32 %v3653_v44, %v10244_v28  ;;  %v10246_v18 = vld [vmem:[#allocation237_spill] sm:$0xff] }
 0x315   : > { %v4139_v53 = vadd.f32 %v10239_v46, %v10238_v35  ;;  %v4141_v29 = vadd.f32 %v10241_v39, %v10240_v59  ;;  %v5006_v37 = vsel %vm4836_vm9, %v5005_v31, %v5004_v55  ;;  %v4149_v8 = vadd.f32 %v3655_v61, %v10245_v25 }
 0x316   : > { %v5008_v6 = vsel %vm4839_vm10, %v5007_v9, %v5006_v37  ;;  %v2520_v35 = vrot.slane %v2519_v21, 1  ;;  %v4151_v2 = vadd.f32 %v3657_v13, %v10246_v18  ;;  %v4411_v31 = vadd.f32 %v8202_v49, %v4143_v52 }
 0x317   : > { %5313 = vxpose.xlu0.b32.cont [7/16] %v5008_v6, 128  ;;  %v4407_v7 = vadd.f32 %v8202_v49, %v4139_v53  ;;  %v4409_v15 = vadd.f32 %v8202_v49, %v4141_v29  ;;  %v4413_v56 = vadd.f32 %v8202_v49, %v4145_v12  ;;  %v4415_v44 = vadd.f32 %v8202_v49, %v4147_v23 }
 0x318   : > { %v2521_v20 = vmax.f32 %v2519_v21, %v2520_v35  ;;  %v4417_v61 = vadd.f32 %v8202_v49, %v4149_v8  ;;  %v4419_v9 = vadd.f32 %v8202_v49, %v4151_v2  ;;  %v4405_v6 = vadd.f32 %v8202_v49, %v8363_v16  ;;  %v10247_v2 = vld [vmem:[#allocation113_spill] sm:$0xff] }
 0x319   : > { %v5009_v13 = vrot.slane %v4407_v7, 7  ;;  %v5011_v53 = vrot.slane %v4409_v15, 6  ;;  %v5013_v59 = vrot.slane %v4411_v31, 5  ;;  %v5015_v39 = vrot.slane %v4413_v56, 4 }
 0x31a   : > { %v4172_v55 = vadd.f32 %v3674_v24, %v2521_v20  ;;  %v5017_v29 = vrot.slane %v4415_v44, 3  ;;  %v5019_v21 = vrot.slane %v4417_v61, 2  ;;  %v2522_v52 = vsel %vm1663_vm2, %v8269_v48, -inf }
 0x31b   : > { %v5010_v33 = vsel %vm4821_vm4, %v5009_v13, %v4405_v6  ;;  %v2529_v37 = vrot.slane %v8275_v45, 4  ;;  %v5021_v16 = vrot.slane %v4419_v9, 1  ;;  %v2523_v28 = vrot.slane %v2522_v52, 4 }
 0x31c   : > { %v8779_v0 = vadd.f32 %v8174_v14, %v4172_v55  ;;  %v5012_v12 = vsel %vm4824_vm5, %v5011_v53, %v5010_v33  ;;  %v3675_v23 = vrot.slane %v10205_v51, 2  ;;  %v3676_v8 = vrot.slane %v10199_v34, 3  ;;  %v10248_v55 = vld [vmem:[#allocation115_spill] sm:$0xff] }
 0x31d   : > { %v5014_v24 = vsel %vm4827_vm6, %v5013_v59, %v5012_v12  ;;  %v2530_v25 = vmax.f32 %v8275_v45, %v2529_v37  ;;  %v2524_v48 = vmax.f32 %v2522_v52, %v2523_v28  ;;  %v8790_v7 = vadd.f32 %v8277_v1, %v10247_v2  ;;  %v10251_v2 = vld [vmem:[#allocation212_spill] sm:$0xff] }
 0x31e   : > { %v5016_v35 = vsel %vm4830_vm7, %v5015_v39, %v5014_v24  ;;  %v2535_v20 = vsel %vm1663_vm2, %v8281_v36, -inf  ;;  %v3677_v53 = vrot.slane %v10205_v51, 3  ;;  %v8802_v59 = vadd.f32 %v8283_v4, %v10248_v55  ;;  %v10249_v24 = vld [vmem:[#allocation210_spill] sm:$0xff] }
 0x31f   : > { %v5018_v15 = vsel %vm4833_vm8, %v5017_v29, %v5016_v35  ;;  %v2531_v31 = vrot.slane %v2530_v25, 2  ;;  %v2525_v61 = vrot.slane %v2524_v48, 2  ;;  %v2536_v9 = vrot.slane %v2535_v20, 4 }
 0x320   : > { %v5020_v44 = vsel %vm4836_vm9, %v5019_v21, %v5018_v15  ;;  %v3662_v36 = vrot.slane %v10135_v27, 3  ;;  %v3664_v33 = vrot.slane %v10135_v27, 4  ;;  %v3666_v21 = vrot.slane %v10135_v27, 5 }
 0x321   : > { %v5022_v6 = vsel %vm4839_vm10, %v5021_v16, %v5020_v44  ;;  %v2532_v13 = vmax.f32 %v2530_v25, %v2531_v31  ;;  %v2526_v39 = vmax.f32 %v2524_v48, %v2525_v61  ;;  %v2537_v29 = vmax.f32 %v2535_v20, %v2536_v9  ;;  %v10253_v20 = vld [vmem:[#allocation8_spill] sm:$0xff] }
 0x322   : > { %5345 = vxpose.xlu1.b32.cont [7/16] (narrow) %v5022_v6, 32  ;;  %v3668_v37 = vrot.slane %v10135_v27, 6  ;;  %v3670_v12 = vrot.slane %v10135_v27, 7  ;;  %v10250_v25 = vrot.slane %v10135_v27, 1  ;;  %v10252_v48 = vrot.slane %v10135_v27, 2  ;;  %v10254_v9 = vld [vmem:[#allocation16_spill] sm:$0xff] }
 0x323   : > { %v2533_v52 = vrot.slane %v2532_v13, 1  ;;  %v2527_v16 = vrot.slane %v2526_v39, 1  ;;  %v2538_v28 = vrot.slane %v2537_v29, 2  ;;  %v4158_v44 = vadd.f32 %v3662_v36, %v10253_v20  ;;  %v10255_v20 = vld [vmem:[#allocation160_spill] sm:$0xff] }
 0x324   : > { %v4154_v35 = vadd.f32 %v10250_v25, %v10249_v24  ;;  %v4156_v15 = vadd.f32 %v10252_v48, %v10251_v2  ;;  %v4160_v61 = vadd.f32 %v3664_v33, %v8222_v30  ;;  %v4162_v6 = vadd.f32 %v3666_v21, %v10254_v9 }
 0x325   : > { %v2534_v31 = vmax.f32 %v2532_v13, %v2533_v52  ;;  %v2528_v55 = vmax.f32 %v2526_v39, %v2527_v16  ;;  %v2539_v56 = vmax.f32 %v2537_v29, %v2538_v28  ;;  %v4164_v18 = vadd.f32 %v3668_v37, %v8399_v47 }
 0x326   : > { %v4166_v46 = vadd.f32 %v3670_v12, %v8464_v58  ;;  %v4420_v24 = vadd.f32 %v8174_v14, %v8408_v54  ;;  %v4422_v27 = vadd.f32 %v8174_v14, %v4154_v35  ;;  %v4424_v13 = vadd.f32 %v8174_v14, %v4156_v15 }
 0x327   : > { %v4174_v41 = vadd.f32 %v3676_v8, %v2534_v31  ;;  %v4173_v52 = vadd.f32 %v3675_v23, %v2528_v55  ;;  %v2540_v36 = vrot.slane %v2539_v56, 1  ;;  %v4426_v30 = vadd.f32 %v8174_v14, %v4158_v44  ;;  %v10274_v31 = vld [vmem:[#allocation66_spill] sm:$0xff] }
 0x328   : > { %v4428_v33 = vadd.f32 %v8174_v14, %v4160_v61  ;;  %v4430_v47 = vadd.f32 %v8174_v14, %v4162_v6  ;;  %v4432_v58 = vadd.f32 %v8174_v14, %v4164_v18  ;;  %v4434_v8 = vadd.f32 %v8174_v14, %v4166_v46 }
 0x329   : > { %v8827_v39 = vadd.f32 %v8174_v14, %v4174_v41  ;;  %v8833_v54 = vadd.f32 %v8202_v49, %v4173_v52  ;;  %v2541_v29 = vmax.f32 %v2539_v56, %v2540_v36  ;;  %v5023_v21 = vrot.slane %v4422_v27, 7  ;;  %v10256_v52 = vld [vmem:[#allocation134_spill] sm:$0xff] }
 0x32a   : > { %v5025_v23 = vrot.slane %v4424_v13, 6  ;;  %v5027_v41 = vrot.slane %v4426_v30, 5  ;;  %v5029_v35 = vrot.slane %v4428_v33, 4  ;;  %v5031_v18 = vrot.slane %v4430_v47, 3  ;;  %v10258_v47 = vld [vmem:[#allocation180_spill] sm:$0xff] }
 0x32b   : > { %v4175_v28 = vadd.f32 %v3677_v53, %v2541_v29  ;;  %v5024_v25 = vsel %vm4821_vm4, %v5023_v21, %v4420_v24  ;;  %v5033_v48 = vrot.slane %v4432_v58, 2  ;;  %v5035_v56 = vrot.slane %v4434_v8, 1  ;;  %v10260_v29 = vld [vmem:[#allocation10_spill] sm:$0xff] }
 0x32c   : > { %v5026_v2 = vsel %vm4824_vm5, %v5025_v23, %v5024_v25  ;;  %v8845_v44 = vadd.f32 %v8347_v62, %v10255_v20  ;;  %v3663_v53 = vrot.slane %v10139_v43, 3  ;;  %v3665_v9 = vrot.slane %v10139_v43, 4  ;;  %v10261_v23 = vld [vmem:[#allocation13_spill] sm:$0xff] }
 0x32d   : > { %v5028_v15 = vsel %vm4827_vm6, %v5027_v41, %v5026_v2  ;;  %v3667_v6 = vrot.slane %v10139_v43, 5  ;;  %v3669_v55 = vrot.slane %v10139_v43, 6  ;;  %v8853_v24 = vadd.f32 %v8202_v49, %v4175_v28 }
 0x32e   : > { %v5030_v61 = vsel %vm4830_vm7, %v5029_v35, %v5028_v15  ;;  %v3671_v13 = vrot.slane %v10139_v43, 7  ;;  %v10257_v36 = vrot.slane %v10139_v43, 1  ;;  %v10259_v58 = vrot.slane %v10139_v43, 2 }
 0x32f   : > { %v5032_v27 = vsel %vm4833_vm8, %v5031_v18, %v5030_v61  ;;  %v4159_v21 = vadd.f32 %v3663_v53, %v10260_v29  ;;  %v4161_v41 = vadd.f32 %v3665_v9, %v10261_v23  ;;  %v4163_v25 = vadd.f32 %v3667_v6, %v8315_v19  ;;  %v10263_v6 = vld [vmem:[#allocation19_spill] sm:$0xff] }
 0x330   : > { %v4155_v30 = vadd.f32 %v10257_v36, %v10256_v52  ;;  %v5034_v33 = vsel %vm4836_vm9, %v5033_v48, %v5032_v27  ;;  %v4157_v8 = vadd.f32 %v10259_v58, %v10258_v47  ;;  %v4165_v35 = vadd.f32 %v3669_v55, %v8577_v17  ;;  %v10262_v17 = vld [vmem:[#allocation24_spill] sm:$0xff]  ;;  %v10264_v58 = vld [vmem:[#allocation22_spill] sm:$0xff]  ;;  %v10282_v27 = vld [vmem:[#allocation39_spill] sm:$0xff] }
 0x331   : > { %v5036_v28 = vsel %vm4839_vm10, %v5035_v56, %v5034_v33  ;;  %v4167_v18 = vadd.f32 %v3671_v13, %v8591_v40  ;;  %v4427_v15 = vadd.f32 %v8202_v49, %v4159_v21  ;;  %v4429_v20 = vadd.f32 %v8202_v49, %v4161_v41 }
 0x332   : > { %5314 = vxpose.xlu0.b32.cont [8/16] %v5036_v28, 128  ;;  %v4423_v48 = vadd.f32 %v8202_v49, %v4155_v30  ;;  %v4425_v43 = vadd.f32 %v8202_v49, %v4157_v8  ;;  %v4431_v53 = vadd.f32 %v8202_v49, %v4163_v25  ;;  %v4433_v56 = vadd.f32 %v8202_v49, %v4165_v35 }
 0x333   : > { %v4435_v19 = vadd.f32 %v8202_v49, %v4167_v18  ;;  %v4421_v40 = vadd.f32 %v8202_v49, %v10262_v17  ;;  %v2542_v55 = vrot.slane %v10263_v6, 4  ;;  %v5041_v13 = vrot.slane %v4427_v15, 5  ;;  %v10265_v18 = vld [vmem:[#allocation162_spill] sm:$0xff] }
 0x334   : > { %v5037_v61 = vrot.slane %v4423_v48, 7  ;;  %v5039_v9 = vrot.slane %v4425_v43, 6  ;;  %v5043_v52 = vrot.slane %v4429_v20, 4  ;;  %v5045_v36 = vrot.slane %v4431_v53, 3  ;;  %v10266_v48 = vld [vmem:[#allocation27_spill] sm:$0xff] }
 0x335   : > { %v5047_v33 = vrot.slane %v4433_v56, 2  ;;  %v2543_v47 = vmax.f32 %v10263_v6, %v2542_v55  ;;  %v2548_v8 = vsel %vm1663_vm2, %v10264_v58, -inf  ;;  %v5049_v21 = vrot.slane %v4435_v19, 1  ;;  %v10267_v56 = vld [vmem:[#allocation182_spill] sm:$0xff]  ;;  %v10269_v58 = vld [vmem:[#allocation9_spill] sm:$0xff] }
 0x336   : > { %v5038_v30 = vsel %vm4821_vm4, %v5037_v61, %v4421_v40  ;;  %v3678_v23 = vrot.slane %v10199_v34, 4  ;;  %v2549_v41 = vrot.slane %v2548_v8, 4  ;;  %v3679_v35 = vrot.slane %v10205_v51, 4 }
 0x337   : > { %v5040_v29 = vsel %vm4824_vm5, %v5039_v9, %v5038_v30  ;;  %v2544_v25 = vrot.slane %v2543_v47, 2  ;;  %v8892_v43 = vadd.f32 %v10266_v48, %v10265_v18  ;;  %v2555_v17 = vrot.slane %v10267_v56, 4  ;;  %v10268_v30 = vld [vmem:[#allocation110_spill] sm:$0xff] }
 0x338   : > { %v5042_v28 = vsel %vm4827_vm6, %v5041_v13, %v5040_v29  ;;  %v2550_v20 = vmax.f32 %v2548_v8, %v2549_v41  ;;  %v3680_v9 = vrot.slane %v10199_v34, 5 }
 0x339   : > { %v5044_v15 = vsel %vm4830_vm7, %v5043_v52, %v5042_v28  ;;  %v2545_v40 = vmax.f32 %v2543_v47, %v2544_v25  ;;  %v2556_v13 = vmax.f32 %v10267_v56, %v2555_v17  ;;  %v8904_v52 = vadd.f32 %v10269_v58, %v10268_v30  ;;  %v10271_v17 = vld [vmem:[#allocation202_spill] sm:$0xff] }
 0x33a   : > { %v5046_v19 = vsel %vm4833_vm8, %v5045_v36, %v5044_v15  ;;  %v2551_v55 = vrot.slane %v2550_v20, 2  ;;  %v10270_v36 = vld [vmem:[#allocation12_spill] sm:$0xff]  ;;  %v3681_v56 = vrot.slane %v10205_v51, 5 }
 0x33b   : > { %v5048_v6 = vsel %vm4836_vm9, %v5047_v33, %v5046_v19  ;;  %v2546_v29 = vrot.slane %v2545_v40, 1  ;;  %v2561_v47 = vsel %vm1663_vm2, %v10270_v36, -inf  ;;  %v2557_v25 = vrot.slane %v2556_v13, 2  ;;  %v10272_v19 = vld [vmem:[#allocation15_spill] sm:$0xff] }
 0x33c   : > { %v5050_v8 = vsel %vm4839_vm10, %v5049_v21, %v5048_v6  ;;  %v2552_v28 = vmax.f32 %v2550_v20, %v2551_v55  ;;  %v2562_v18 = vrot.slane %v2561_v47, 4  ;;  %v8914_v30 = vadd.f32 %v10272_v19, %v10271_v17  ;;  %v10273_v21 = vld [vmem:[#allocation18_spill] sm:$0xff]  ;;  %v10275_v17 = vld [vmem:[#allocation20_spill] sm:$0xff] }
 0x33d   : > { %5346 = vxpose.xlu1.b32.cont [8/16] (narrow) %v5050_v8, 32  ;;  %v2547_v15 = vmax.f32 %v2545_v40, %v2546_v29  ;;  %v2568_v6 = vrot.slane %v10273_v21, 4  ;;  %v2558_v41 = vmax.f32 %v2556_v13, %v2557_v25  ;;  %v3682_v40 = vrot.slane %v10199_v34, 6  ;;  %v10276_v25 = vld [vmem:[#allocation23_spill] sm:$0xff] }
 0x33e   : > { %v2553_v61 = vrot.slane %v2552_v28, 1  ;;  %v2563_v53 = vmax.f32 %v2561_v47, %v2562_v18  ;;  %v8923_v16 = vadd.f32 %v10275_v17, %v10274_v31  ;;  %v3683_v36 = vrot.slane %v10205_v51, 6 }
 0x33f   : > { %v4176_v8 = vadd.f32 %v3678_v23, %v2547_v15  ;;  %v2569_v55 = vmax.f32 %v10273_v21, %v2568_v6  ;;  %v2559_v33 = vrot.slane %v2558_v41, 1  ;;  %v2574_v23 = vsel %vm1663_vm2, %v10276_v25, -inf  ;;  %v10278_v25 = vld [vmem:[#allocation145_spill] sm:$0xff] }
 0x340   : > { %v2554_v29 = vmax.f32 %v2552_v28, %v2553_v61  ;;  %v2564_v2 = vrot.slane %v2563_v53, 2  ;;  %v2575_v6 = vrot.slane %v2574_v23, 4  ;;  %v2587_v28 = vsel %vm1663_vm2, %v10282_v27, -inf  ;;  %v10285_v27 = vld [vmem:[#allocation185_spill] sm:$0xff] }
 0x341   : > { %v4444_v12 = vadd.f32 %v8174_v14, %v4176_v8  ;;  %v2570_v13 = vrot.slane %v2569_v55, 2  ;;  %v2560_v15 = vmax.f32 %v2558_v41, %v2559_v33  ;;  %v2588_v60 = vrot.slane %v2587_v28, 4 }
 0x342   : > { %v4177_v18 = vadd.f32 %v3679_v35, %v2554_v29  ;;  %v2565_v21 = vmax.f32 %v2563_v53, %v2564_v2  ;;  %v2576_v38 = vmax.f32 %v2574_v23, %v2575_v6  ;;  %v8937_v35 = vadd.f32 %v10277_v10, %v10278_v25  ;;  %v10279_v2 = vld [vmem:[#allocation28_spill] sm:$0xff] }
 0x343   : > { %v5057_v20 = vrot.slane %v4444_v12, 4  ;;  %v2571_v61 = vmax.f32 %v2569_v55, %v2570_v13  ;;  %v4178_v8 = vadd.f32 %v3680_v9, %v2560_v15  ;;  %v2581_v12 = vrot.slane %v10279_v2, 4  ;;  %v10280_v55 = vld [vmem:[#allocation34_spill] sm:$0xff] }
 0x344   : > { %v8932_v31 = vadd.f32 %v8202_v49, %v4177_v18  ;;  %v2566_v22 = vrot.slane %v2565_v21, 1  ;;  %v2577_v41 = vrot.slane %v2576_v38, 2  ;;  %v10281_v18 = vld [vmem:[#allocation232_spill] sm:$0xff] }
 0x345   : > { %v2572_v47 = vrot.slane %v2571_v61, 1  ;;  %v2582_v23 = vmax.f32 %v10279_v2, %v2581_v12  ;;  %v8946_v15 = vadd.f32 %v10280_v55, %v10281_v18  ;;  %v3772_v2 = vrot.slane %v10280_v55, 2  ;;  %v10286_v18 = vld [vmem:[#allocation187_spill] sm:$0xff] }
 0x346   : > { %v2567_v53 = vmax.f32 %v2565_v21, %v2566_v22  ;;  %v5071_v13 = vrot.slane %v8932_v31, 4  ;;  %v2578_v25 = vmax.f32 %v2576_v38, %v2577_v41  ;;  %v10283_v22 = vld [vmem:[#allocation43_spill] sm:$0xff]  ;;  %v10284_v38 = vld [vmem:[#allocation178_spill] sm:$0xff] }
 0x347   : > { %v2573_v9 = vmax.f32 %v2571_v61, %v2572_v47  ;;  %v3771_v21 = vrot.slane %v10283_v22, 1  ;;  %v2583_v33 = vrot.slane %v2582_v23, 2  ;;  %v3773_v29 = vrot.slane %v10283_v22, 2 }
 0x348   : > { %v4179_v6 = vadd.f32 %v3681_v56, %v2567_v53  ;;  %v4446_v47 = vadd.f32 %v8174_v14, %v4178_v8  ;;  %v2579_v31 = vrot.slane %v2578_v25, 1  ;;  %v2589_v56 = vmax.f32 %v2587_v28, %v2588_v60  ;;  %v10287_v60 = vld [vmem:[#allocation51_spill] sm:$0xff] }
 0x349   : > { %v4180_v46 = vadd.f32 %v3682_v40, %v2573_v9  ;;  %v2584_v12 = vmax.f32 %v2582_v23, %v2583_v33  ;;  %v8957_v53 = vadd.f32 %v10283_v22, %v10284_v38  ;;  %v8960_v41 = vadd.f32 %v3771_v21, %v10285_v27 }
 0x34a   : > { %v4447_v61 = vadd.f32 %v8202_v49, %v4179_v6  ;;  %v2580_v40 = vmax.f32 %v2578_v25, %v2579_v31  ;;  %v8964_v37 = vadd.f32 %v3773_v29, %v10286_v18  ;;  %v2590_v45 = vrot.slane %v2589_v56, 2 }
 0x34b   : > { %v4448_v8 = vadd.f32 %v8174_v14, %v4180_v46  ;;  %v2585_v6 = vrot.slane %v2584_v12, 1  ;;  %v3684_v33 = vrot.slane %v10199_v34, 7  ;;  %v5052_v28 = vsel %vm4821_vm4, %v5051_v57, %v10287_v60 }
 0x34c   : > { %v4181_v23 = vadd.f32 %v3683_v36, %v2580_v40  ;;  %v10288_v21 = vrot.slane %v8779_v0, 6  ;;  %v5059_v31 = vrot.slane %v4446_v47, 3  ;;  %v2591_v27 = vmax.f32 %v2589_v56, %v2590_v45 }
 0x34d   : > { %v5061_v38 = vrot.slane %v4448_v8, 2  ;;  %v2586_v29 = vmax.f32 %v2584_v12, %v2585_v6  ;;  %v10289_v46 = vrot.slane %v8827_v39, 5  ;;  %v3685_v34 = vrot.slane %v10205_v51, 7  ;;  %v10293_v6 = vld [vmem:[#allocation74_spill] sm:$0xff] }
 0x34e   : > { %v5054_v25 = vsel %vm4824_vm5, %v10288_v21, %v5052_v28  ;;  %v4449_v63 = vadd.f32 %v8202_v49, %v4181_v23  ;;  %v10290_v57 = vrot.slane %v8670_v5, 7  ;;  %v5073_v36 = vrot.slane %v4447_v61, 3 }
 0x34f   : > { %v5056_v18 = vsel %vm4827_vm6, %v10289_v46, %v5054_v25  ;;  %v2592_v47 = vrot.slane %v2591_v27, 1  ;;  %v4182_v40 = vadd.f32 %v3684_v33, %v2586_v29  ;;  %v10291_v39 = vrot.slane %v8833_v54, 6 }
 0x350   : > { %v5058_v9 = vsel %vm4830_vm7, %v5057_v20, %v5056_v18  ;;  %v5066_v0 = vsel %vm4821_vm4, %v10290_v57, %v8656_v32  ;;  %v10292_v20 = vrot.slane %v8853_v24, 5  ;;  %v5075_v8 = vrot.slane %v4449_v63, 2  ;;  %v10298_v18 = vld [vmem:[#allocation30_spill] sm:$0xff]  ;;  %v10299_v57 = vld [vmem:[#allocation36_spill] sm:$0xff] }
 0x351   : > { %v5060_v45 = vsel %vm4833_vm8, %v5059_v31, %v5058_v9  ;;  %v5068_v12 = vsel %vm4824_vm5, %v10291_v39, %v5066_v0  ;;  %v3690_v5 = vrot.slane %v10293_v6, 3  ;;  %v2593_v60 = vmax.f32 %v2591_v27, %v2592_v47  ;;  %v10294_v31 = vld [vmem:[#allocation17_spill] sm:$0xff] }
 0x352   : > { %v5062_v51 = vsel %vm4836_vm9, %v5061_v38, %v5060_v45  ;;  %v5070_v56 = vsel %vm4827_vm6, %v10292_v20, %v5068_v12  ;;  %v4450_v32 = vadd.f32 %v8174_v14, %v4182_v40  ;;  %v3692_v9 = vrot.slane %v10293_v6, 4  ;;  %v10296_v27 = vld [vmem:[#allocation25_spill] sm:$0xff]  ;;  %v10301_v45 = vld [vmem:[#allocation46_spill] sm:$0xff]  ;;  %v10302_v12 = vld [vmem:[#allocation48_spill] sm:$0xff] }
 0x353   : > { %v5072_v61 = vsel %vm4830_vm7, %v5071_v13, %v5070_v56  ;;  %v3694_v33 = vrot.slane %v10293_v6, 5  ;;  %v3696_v28 = vrot.slane %v10293_v6, 6  ;;  %v3698_v24 = vrot.slane %v10293_v6, 7 }
 0x354   : > { %v5074_v54 = vsel %vm4833_vm8, %v5073_v36, %v5072_v61  ;;  %v5063_v23 = vrot.slane %v4450_v32, 1  ;;  %v4183_v21 = vadd.f32 %v3685_v34, %v2593_v60  ;;  %v10295_v38 = vrot.slane %v10293_v6, 1  ;;  %v10300_v36 = vld [vmem:[#allocation38_spill] sm:$0xff] }
 0x355   : > { %v5076_v25 = vsel %vm4836_vm9, %v5075_v8, %v5074_v54  ;;  %v10297_v13 = vrot.slane %v10293_v6, 2  ;;  %v4190_v63 = vadd.f32 %v3690_v5, %v10298_v18  ;;  %v4192_v0 = vadd.f32 %v3692_v9, %v10299_v57  ;;  %v10303_v9 = vld [vmem:[#allocation49_spill] sm:$0xff] }
 0x356   : > { %v4186_v29 = vadd.f32 %v10295_v38, %v10294_v31  ;;  %v4194_v47 = vadd.f32 %v3694_v33, %v10300_v36  ;;  %v5064_v40 = vsel %vm4839_vm10, %v5063_v23, %v5062_v51  ;;  %v4451_v34 = vadd.f32 %v8202_v49, %v4183_v21  ;;  %v10304_v36 = vld [vmem:[#allocation21_spill] sm:$0xff] }
 0x357   : > { %v4188_v46 = vadd.f32 %v10297_v13, %v10296_v27  ;;  %v4196_v39 = vadd.f32 %v3696_v28, %v10301_v45  ;;  %v4198_v20 = vadd.f32 %v3698_v24, %v10302_v12  ;;  %v3777_v56 = vrot.slane %v10283_v22, 4  ;;  %5315 = vxpose.xlu0.b32.cont [9/16] %v5064_v40, 128  ;;  %v10308_v12 = vld [vmem:[#allocation32_spill] sm:$0xff] }
 0x358   : > { %v4454_v8 = vadd.f32 %v8174_v14, %v4186_v29  ;;  %v4458_v5 = vadd.f32 %v8174_v14, %v4190_v63  ;;  %v5077_v60 = vrot.slane %v4451_v34, 1  ;;  %v4460_v32 = vadd.f32 %v8174_v14, %v4192_v0  ;;  %v10306_v34 = vld [vmem:[#allocation29_spill] sm:$0xff] }
 0x359   : > { %v4456_v6 = vadd.f32 %v8174_v14, %v4188_v46  ;;  %v4462_v51 = vadd.f32 %v8174_v14, %v4194_v47  ;;  %v4464_v61 = vadd.f32 %v8174_v14, %v4196_v39  ;;  %v4452_v54 = vadd.f32 %v8174_v14, %v10303_v9 }
 0x35a   : > { %v4466_v33 = vadd.f32 %v8174_v14, %v4198_v20  ;;  %v5079_v28 = vrot.slane %v4454_v8, 7  ;;  %v5078_v23 = vsel %vm4839_vm10, %v5077_v60, %v5076_v25  ;;  %v5083_v21 = vrot.slane %v4458_v5, 5  ;;  %v10310_v60 = vld [vmem:[#allocation40_spill] sm:$0xff] }
 0x35b   : > { %v5081_v24 = vrot.slane %v4456_v6, 6  ;;  %v5085_v31 = vrot.slane %v4460_v32, 4  ;;  %v5087_v38 = vrot.slane %v4462_v51, 3  ;;  %5347 = vxpose.xlu1.b32.cont [9/16] (narrow) %v5078_v23, 32  ;;  %v5089_v27 = vrot.slane %v4464_v61, 2  ;;  %v10309_v6 = vld [vmem:[#allocation37_spill] sm:$0xff] }
 0x35c   : > { %v5080_v29 = vsel %vm4821_vm4, %v5079_v28, %v4452_v54  ;;  %v3691_v13 = vrot.slane %v10207_v11, 3  ;;  %v3693_v46 = vrot.slane %v10207_v11, 4  ;;  %v3695_v63 = vrot.slane %v10207_v11, 5  ;;  %v10311_v51 = vld [vmem:[#allocation47_spill] sm:$0xff]  ;;  %v10312_v28 = vld [vmem:[#allocation50_spill] sm:$0xff] }
 0x35d   : > { %v5082_v18 = vsel %vm4824_vm5, %v5081_v24, %v5080_v29  ;;  %v3697_v57 = vrot.slane %v10207_v11, 6  ;;  %v3699_v0 = vrot.slane %v10207_v11, 7  ;;  %v10305_v47 = vrot.slane %v10207_v11, 1 }
 0x35e   : > { %v5084_v25 = vsel %vm4827_vm6, %v5083_v21, %v5082_v18  ;;  %v10307_v45 = vrot.slane %v10207_v11, 2  ;;  %v4191_v20 = vadd.f32 %v3691_v13, %v10308_v12  ;;  %v4193_v5 = vadd.f32 %v3693_v46, %v10309_v6  ;;  %v10313_v46 = vld [vmem:[#allocation62_spill] sm:$0xff]  ;;  %v10314_v6 = vld [vmem:[#allocation61_spill] sm:$0xff] }
 0x35f   : > { %v4187_v40 = vadd.f32 %v10305_v47, %v10304_v36  ;;  %v5086_v8 = vsel %vm4830_vm7, %v5085_v31, %v5084_v25  ;;  %v4195_v32 = vadd.f32 %v3695_v63, %v10310_v60  ;;  %v4197_v61 = vadd.f32 %v3697_v57, %v10311_v51 }
 0x360   : > { %v4189_v39 = vadd.f32 %v10307_v45, %v10306_v34  ;;  %v5088_v9 = vsel %vm4833_vm8, %v5087_v38, %v5086_v8  ;;  %v5091_v54 = vrot.slane %v4466_v33, 1  ;;  %v4199_v24 = vadd.f32 %v3699_v0, %v10312_v28 }
 0x361   : > { %v4455_v23 = vadd.f32 %v8202_v49, %v4187_v40  ;;  %v5090_v11 = vsel %vm4836_vm9, %v5089_v27, %v5088_v9  ;;  %v4459_v29 = vadd.f32 %v8202_v49, %v4191_v20  ;;  %v4461_v31 = vadd.f32 %v8202_v49, %v4193_v5 }
 0x362   : > { %v4457_v21 = vadd.f32 %v8202_v49, %v4189_v39  ;;  %v5092_v13 = vsel %vm4839_vm10, %v5091_v54, %v5090_v11  ;;  %v4453_v18 = vadd.f32 %v8202_v49, %v10313_v46  ;;  %v4463_v38 = vadd.f32 %v8202_v49, %v4195_v32  ;;  %v10316_v32 = vld [vmem:[#allocation70_spill] sm:$0xff]  ;;  %v10318_v54 = vld [vmem:[#allocation73_spill] sm:$0xff] }
 0x363   : > { %v4465_v33 = vadd.f32 %v8202_v49, %v4197_v61  ;;  %5316 = vxpose.xlu0.b32.cont [10/16] %v5092_v13, 128  ;;  %v4467_v63 = vadd.f32 %v8202_v49, %v4199_v24  ;;  %v5093_v57 = vrot.slane %v4455_v23, 7  ;;  %v5097_v0 = vrot.slane %v4459_v29, 5  ;;  %v10319_v24 = vld [vmem:[#allocation84_spill] sm:$0xff]  ;;  %v10320_v11 = vld [vmem:[#allocation89_spill] sm:$0xff]  ;;  %v10321_v13 = vld [vmem:[#allocation98_spill] sm:$0xff] }
 0x364   : > { %v5095_v27 = vrot.slane %v4457_v21, 6  ;;  %v5099_v25 = vrot.slane %v4461_v31, 4  ;;  %v5101_v36 = vrot.slane %v4463_v38, 3  ;;  %v3704_v40 = vrot.slane %v8192_v42, 3 }
 0x365   : > { %v5103_v47 = vrot.slane %v4465_v33, 2  ;;  %v5094_v34 = vsel %vm4821_vm4, %v5093_v57, %v4453_v18  ;;  %v3706_v45 = vrot.slane %v8192_v42, 4  ;;  %v3708_v39 = vrot.slane %v8192_v42, 5  ;;  %v10322_v18 = vld [vmem:[#allocation102_spill] sm:$0xff] }
 0x366   : > { %v3710_v12 = vrot.slane %v8192_v42, 6  ;;  %v5096_v20 = vsel %vm4824_vm5, %v5095_v27, %v5094_v34  ;;  %v3712_v8 = vrot.slane %v8192_v42, 7  ;;  %v10315_v5 = vrot.slane %v8192_v42, 1 }
 0x367   : > { %v10317_v51 = vrot.slane %v8192_v42, 2  ;;  %v5098_v9 = vsel %vm4827_vm6, %v5097_v0, %v5096_v20  ;;  %v4206_v28 = vadd.f32 %v3704_v40, %v10318_v54  ;;  %v4208_v23 = vadd.f32 %v3706_v45, %v10319_v24 }
 0x368   : > { %v4202_v60 = vadd.f32 %v10315_v5, %v10314_v6  ;;  %v4210_v21 = vadd.f32 %v3708_v39, %v10320_v11  ;;  %v5100_v29 = vsel %vm4830_vm7, %v5099_v25, %v5098_v9  ;;  %v5105_v31 = vrot.slane %v4467_v63, 1  ;;  %v10325_v11 = vld [vmem:[#allocation72_spill] sm:$0xff] }
 0x369   : > { %v4204_v61 = vadd.f32 %v10317_v51, %v10316_v32  ;;  %v4212_v46 = vadd.f32 %v3710_v12, %v10321_v13  ;;  %v4214_v38 = vadd.f32 %v3712_v8, %v10322_v18  ;;  %v5102_v33 = vsel %vm4833_vm8, %v5101_v36, %v5100_v29  ;;  %v10328_v18 = vld [vmem:[#allocation87_spill] sm:$0xff] }
 0x36a   : > { %v4470_v42 = vadd.f32 %v8174_v14, %v4202_v60  ;;  %v4474_v27 = vadd.f32 %v8174_v14, %v4206_v28  ;;  %v5104_v0 = vsel %vm4836_vm9, %v5103_v47, %v5102_v33  ;;  %v4476_v40 = vadd.f32 %v8174_v14, %v4208_v23  ;;  %v10323_v28 = vld [vmem:[#allocation64_spill] sm:$0xff]  ;;  %v10329_v33 = vld [vmem:[#allocation91_spill] sm:$0xff] }
 0x36b   : > { %v4472_v57 = vadd.f32 %v8174_v14, %v4204_v61  ;;  %v4478_v34 = vadd.f32 %v8174_v14, %v4210_v21  ;;  %v4480_v63 = vadd.f32 %v8174_v14, %v4212_v46  ;;  %v5106_v25 = vsel %vm4839_vm10, %v5105_v31, %v5104_v0  ;;  %v10327_v31 = vld [vmem:[#allocation75_spill] sm:$0xff] }
 0x36c   : > { %v4468_v45 = vadd.f32 %v8174_v14, %v8699_v50  ;;  %v5107_v36 = vrot.slane %v4470_v42, 7  ;;  %5348 = vxpose.xlu1.b32.cont [10/16] (narrow) %v5106_v25, 32  ;;  %v4482_v12 = vadd.f32 %v8174_v14, %v4214_v38  ;;  %v5111_v20 = vrot.slane %v4474_v27, 5 }
 0x36d   : > { %v5109_v39 = vrot.slane %v4472_v57, 6  ;;  %v5113_v8 = vrot.slane %v4476_v40, 4  ;;  %v5115_v6 = vrot.slane %v4478_v34, 3  ;;  %v5117_v5 = vrot.slane %v4480_v63, 2  ;;  %v10330_v57 = vld [vmem:[#allocation100_spill] sm:$0xff]  ;;  %v10331_v34 = vld [vmem:[#allocation105_spill] sm:$0xff] }
 0x36e   : > { %v5108_v47 = vsel %vm4821_vm4, %v5107_v36, %v4468_v45  ;;  %v3705_v60 = vrot.slane %v8231_v3, 3  ;;  %v3707_v32 = vrot.slane %v8231_v3, 4  ;;  %v3709_v61 = vrot.slane %v8231_v3, 5 }
 0x36f   : > { %v5110_v51 = vsel %vm4824_vm5, %v5109_v39, %v5108_v47  ;;  %v3711_v50 = vrot.slane %v8231_v3, 6  ;;  %v3713_v9 = vrot.slane %v8231_v3, 7  ;;  %v10324_v24 = vrot.slane %v8231_v3, 1 }
 0x370   : > { %v5112_v54 = vsel %vm4827_vm6, %v5111_v20, %v5110_v51  ;;  %v10326_v21 = vrot.slane %v8231_v3, 2  ;;  %v4207_v13 = vadd.f32 %v3705_v60, %v10327_v31  ;;  %v4209_v38 = vadd.f32 %v3707_v32, %v10328_v18 }
 0x371   : > { %v4203_v23 = vadd.f32 %v10324_v24, %v10323_v28  ;;  %v5114_v46 = vsel %vm4830_vm7, %v5113_v8, %v5112_v54  ;;  %v4211_v42 = vadd.f32 %v3709_v61, %v10329_v33  ;;  %v4213_v27 = vadd.f32 %v3711_v50, %v10330_v57  ;;  %v10336_v33 = vld [vmem:[#allocation130_spill] sm:$0xff]  ;;  %v10337_v57 = vld [vmem:[#allocation137_spill] sm:$0xff] }
 0x372   : > { %v4205_v29 = vadd.f32 %v10326_v21, %v10325_v11  ;;  %v5116_v0 = vsel %vm4833_vm8, %v5115_v6, %v5114_v46  ;;  %v5119_v40 = vrot.slane %v4482_v12, 1  ;;  %v4215_v63 = vadd.f32 %v3713_v9, %v10331_v34  ;;  %v10332_v21 = vld [vmem:[#allocation116_spill] sm:$0xff] }
 0x373   : > { %v4471_v25 = vadd.f32 %v8202_v49, %v4203_v23  ;;  %v5118_v3 = vsel %vm4836_vm9, %v5117_v5, %v5116_v0  ;;  %v4475_v36 = vadd.f32 %v8202_v49, %v4207_v13  ;;  %v4477_v39 = vadd.f32 %v8202_v49, %v4209_v38  ;;  %v10334_v13 = vld [vmem:[#allocation125_spill] sm:$0xff]  ;;  %v10338_v0 = vld [vmem:[#allocation140_spill] sm:$0xff] }
 0x374   : > { %v4473_v45 = vadd.f32 %v8202_v49, %v4205_v29  ;;  %v5120_v20 = vsel %vm4839_vm10, %v5119_v40, %v5118_v3  ;;  %v4469_v8 = vadd.f32 %v8202_v49, %v8740_v26  ;;  %v4479_v6 = vadd.f32 %v8202_v49, %v4211_v42 }
 0x375   : > { %v4481_v12 = vadd.f32 %v8202_v49, %v4213_v27  ;;  %5317 = vxpose.xlu0.b32.cont [11/16] %v5120_v20, 128  ;;  %v4483_v47 = vadd.f32 %v8202_v49, %v4215_v63  ;;  %v5121_v60 = vrot.slane %v4471_v25, 7  ;;  %v5125_v32 = vrot.slane %v4475_v36, 5  ;;  %v10339_v25 = vld [vmem:[#allocation150_spill] sm:$0xff] }
 0x376   : > { %v5123_v5 = vrot.slane %v4473_v45, 6  ;;  %v5127_v51 = vrot.slane %v4477_v39, 4  ;;  %v5129_v61 = vrot.slane %v4479_v6, 3  ;;  %v3718_v9 = vrot.slane %v8277_v1, 3  ;;  %v10340_v45 = vld [vmem:[#allocation154_spill] sm:$0xff] }
 0x377   : > { %v5131_v50 = vrot.slane %v4481_v12, 2  ;;  %v5122_v54 = vsel %vm4821_vm4, %v5121_v60, %v4469_v8  ;;  %v3720_v28 = vrot.slane %v8277_v1, 4  ;;  %v3722_v26 = vrot.slane %v8277_v1, 5 }
 0x378   : > { %v3724_v24 = vrot.slane %v8277_v1, 6  ;;  %v5124_v23 = vsel %vm4824_vm5, %v5123_v5, %v5122_v54  ;;  %v3726_v11 = vrot.slane %v8277_v1, 7  ;;  %v10333_v29 = vrot.slane %v8277_v1, 1 }
 0x379   : > { %v10335_v46 = vrot.slane %v8277_v1, 2  ;;  %v5126_v38 = vsel %vm4827_vm6, %v5125_v32, %v5124_v23  ;;  %v4222_v42 = vadd.f32 %v3718_v9, %v10336_v33  ;;  %v4224_v27 = vadd.f32 %v3720_v28, %v10337_v57  ;;  %v10343_v33 = vld [vmem:[#allocation128_spill] sm:$0xff] }
 0x37a   : > { %v4218_v31 = vadd.f32 %v10333_v29, %v10332_v21  ;;  %v4226_v40 = vadd.f32 %v3722_v26, %v10338_v0  ;;  %v5128_v34 = vsel %vm4830_vm7, %v5127_v51, %v5126_v38  ;;  %v5133_v63 = vrot.slane %v4483_v47, 1 }
 0x37b   : > { %v4220_v18 = vadd.f32 %v10335_v46, %v10334_v13  ;;  %v4228_v3 = vadd.f32 %v3724_v24, %v10339_v25  ;;  %v4230_v36 = vadd.f32 %v3726_v11, %v10340_v45  ;;  %v5130_v39 = vsel %vm4833_vm8, %v5129_v61, %v5128_v34  ;;  %v10341_v46 = vld [vmem:[#allocation45_spill] sm:$0xff]  ;;  %v10346_v34 = vld [vmem:[#allocation139_spill] sm:$0xff]  ;;  %v10347_v25 = vld [vmem:[#allocation142_spill] sm:$0xff] }
 0x37c   : > { %v4486_v1 = vadd.f32 %v8174_v14, %v4218_v31  ;;  %v4490_v8 = vadd.f32 %v8174_v14, %v4222_v42  ;;  %v5132_v6 = vsel %vm4836_vm9, %v5131_v50, %v5130_v39  ;;  %v4492_v12 = vadd.f32 %v8174_v14, %v4224_v27  ;;  %v10345_v27 = vld [vmem:[#allocation132_spill] sm:$0xff]  ;;  %v10348_v45 = vld [vmem:[#allocation153_spill] sm:$0xff] }
 0x37d   : > { %v4488_v20 = vadd.f32 %v8174_v14, %v4220_v18  ;;  %v4494_v60 = vadd.f32 %v8174_v14, %v4226_v40  ;;  %v4496_v47 = vadd.f32 %v8174_v14, %v4228_v3  ;;  %v5134_v5 = vsel %vm4839_vm10, %v5133_v63, %v5132_v6 }
 0x37e   : > { %v4484_v32 = vadd.f32 %v8174_v14, %v8790_v7  ;;  %v5135_v51 = vrot.slane %v4486_v1, 7  ;;  %5349 = vxpose.xlu1.b32.cont [11/16] (narrow) %v5134_v5, 32  ;;  %v4498_v9 = vadd.f32 %v8174_v14, %v4230_v36  ;;  %v5139_v54 = vrot.slane %v4490_v8, 5 }
 0x37f   : > { %v5137_v61 = vrot.slane %v4488_v20, 6  ;;  %v5141_v28 = vrot.slane %v4492_v12, 4  ;;  %v5143_v26 = vrot.slane %v4494_v60, 3  ;;  %v5145_v24 = vrot.slane %v4496_v47, 2  ;;  %v10349_v20 = vld [vmem:[#allocation156_spill] sm:$0xff] }
 0x380   : > { %v5136_v50 = vsel %vm4821_vm4, %v5135_v51, %v4484_v32  ;;  %v3719_v23 = vrot.slane %v8283_v4, 3  ;;  %v3721_v11 = vrot.slane %v8283_v4, 4  ;;  %v3723_v29 = vrot.slane %v8283_v4, 5 }
 0x381   : > { %v5138_v21 = vsel %vm4824_vm5, %v5137_v61, %v5136_v50  ;;  %v3725_v7 = vrot.slane %v8283_v4, 6  ;;  %v3727_v31 = vrot.slane %v8283_v4, 7  ;;  %v10342_v18 = vrot.slane %v8283_v4, 1 }
 0x382   : > { %v5140_v13 = vsel %vm4827_vm6, %v5139_v54, %v5138_v21  ;;  %v10344_v42 = vrot.slane %v8283_v4, 2  ;;  %v4223_v0 = vadd.f32 %v3719_v23, %v10345_v27  ;;  %v4225_v63 = vadd.f32 %v3721_v11, %v10346_v34  ;;  %v10355_v34 = vld [vmem:[#allocation186_spill] sm:$0xff] }
 0x383   : > { %v4219_v38 = vadd.f32 %v10342_v18, %v10341_v46  ;;  %v5142_v40 = vsel %vm4830_vm7, %v5141_v28, %v5140_v13  ;;  %v4227_v3 = vadd.f32 %v3723_v29, %v10347_v25  ;;  %v4229_v36 = vadd.f32 %v3725_v7, %v10348_v45  ;;  %v10350_v46 = vld [vmem:[#allocation164_spill] sm:$0xff]  ;;  %v10356_v25 = vld [vmem:[#allocation191_spill] sm:$0xff] }
 0x384   : > { %v4221_v57 = vadd.f32 %v10344_v42, %v10343_v33  ;;  %v5144_v39 = vsel %vm4833_vm8, %v5143_v26, %v5142_v40  ;;  %v5147_v1 = vrot.slane %v4498_v9, 1  ;;  %v4231_v8 = vadd.f32 %v3727_v31, %v10349_v20  ;;  %v10352_v33 = vld [vmem:[#allocation174_spill] sm:$0xff] }
 0x385   : > { %v4487_v6 = vadd.f32 %v8202_v49, %v4219_v38  ;;  %v5146_v4 = vsel %vm4836_vm9, %v5145_v24, %v5144_v39  ;;  %v4491_v60 = vadd.f32 %v8202_v49, %v4223_v0  ;;  %v4493_v47 = vadd.f32 %v8202_v49, %v4225_v63  ;;  %v10354_v0 = vld [vmem:[#allocation179_spill] sm:$0xff]  ;;  %v10358_v20 = vld [vmem:[#allocation198_spill] sm:$0xff] }
 0x386   : > { %v4489_v12 = vadd.f32 %v8202_v49, %v4221_v57  ;;  %v5148_v5 = vsel %vm4839_vm10, %v5147_v1, %v5146_v4  ;;  %v4485_v32 = vadd.f32 %v8202_v49, %v8802_v59  ;;  %v4495_v51 = vadd.f32 %v8202_v49, %v4227_v3  ;;  %v10357_v39 = vld [vmem:[#allocation195_spill] sm:$0xff] }
 0x387   : > { %v4497_v61 = vadd.f32 %v8202_v49, %v4229_v36  ;;  %5318 = vxpose.xlu0.b32.cont [12/16] %v5148_v5, 128  ;;  %v4499_v9 = vadd.f32 %v8202_v49, %v4231_v8  ;;  %v5149_v54 = vrot.slane %v4487_v6, 7  ;;  %v5153_v26 = vrot.slane %v4491_v60, 5 }
 0x388   : > { %v5151_v28 = vrot.slane %v4489_v12, 6  ;;  %v5155_v50 = vrot.slane %v4493_v47, 4  ;;  %v5157_v24 = vrot.slane %v4495_v51, 3  ;;  %v3732_v11 = vrot.slane %v8347_v62, 3 }
 0x389   : > { %v5159_v23 = vrot.slane %v4497_v61, 2  ;;  %v5150_v21 = vsel %vm4821_vm4, %v5149_v54, %v4485_v32  ;;  %v3734_v29 = vrot.slane %v8347_v62, 4  ;;  %v3736_v59 = vrot.slane %v8347_v62, 5 }
 0x38a   : > { %v3738_v7 = vrot.slane %v8347_v62, 6  ;;  %v5152_v31 = vsel %vm4824_vm5, %v5151_v28, %v5150_v21  ;;  %v3740_v13 = vrot.slane %v8347_v62, 7  ;;  %v10351_v18 = vrot.slane %v8347_v62, 1 }
 0x38b   : > { %v10353_v42 = vrot.slane %v8347_v62, 2  ;;  %v5154_v27 = vsel %vm4827_vm6, %v5153_v26, %v5152_v31  ;;  %v4238_v40 = vadd.f32 %v3732_v11, %v10354_v0  ;;  %v4240_v63 = vadd.f32 %v3734_v29, %v10355_v34  ;;  %v10364_v34 = vld [vmem:[#allocation189_spill] sm:$0xff] }
 0x38c   : > { %v4234_v38 = vadd.f32 %v10351_v18, %v10350_v46  ;;  %v4242_v3 = vadd.f32 %v3736_v59, %v10356_v25  ;;  %v5156_v45 = vsel %vm4830_vm7, %v5155_v50, %v5154_v27  ;;  %v5161_v36 = vrot.slane %v4499_v9, 1  ;;  %v10359_v46 = vld [vmem:[#allocation166_spill] sm:$0xff]  ;;  %v10363_v27 = vld [vmem:[#allocation88_spill] sm:$0xff]  ;;  %v10365_v25 = vld [vmem:[#allocation193_spill] sm:$0xff] }
 0x38d   : > { %v4236_v57 = vadd.f32 %v10353_v42, %v10352_v33  ;;  %v4244_v1 = vadd.f32 %v3738_v7, %v10357_v39  ;;  %v4246_v8 = vadd.f32 %v3740_v13, %v10358_v20  ;;  %v5158_v6 = vsel %vm4833_vm8, %v5157_v24, %v5156_v45  ;;  %v10361_v33 = vld [vmem:[#allocation177_spill] sm:$0xff] }
 0x38e   : > { %v4502_v62 = vadd.f32 %v8174_v14, %v4234_v38  ;;  %v4506_v12 = vadd.f32 %v8174_v14, %v4238_v40  ;;  %v5160_v60 = vsel %vm4836_vm9, %v5159_v23, %v5158_v6  ;;  %v4508_v47 = vadd.f32 %v8174_v14, %v4240_v63  ;;  %v10366_v45 = vld [vmem:[#allocation197_spill] sm:$0xff] }
 0x38f   : > { %v4504_v4 = vadd.f32 %v8174_v14, %v4236_v57  ;;  %v4510_v5 = vadd.f32 %v8174_v14, %v4242_v3  ;;  %v4512_v32 = vadd.f32 %v8174_v14, %v4244_v1  ;;  %v5162_v51 = vsel %vm4839_vm10, %v5161_v36, %v5160_v60  ;;  %v10367_v20 = vld [vmem:[#allocation109_spill] sm:$0xff] }
 0x390   : > { %v4500_v61 = vadd.f32 %v8174_v14, %v8845_v44  ;;  %v5163_v9 = vrot.slane %v4502_v62, 7  ;;  %5350 = vxpose.xlu1.b32.cont [12/16] (narrow) %v5162_v51, 32  ;;  %v4514_v28 = vadd.f32 %v8174_v14, %v4246_v8  ;;  %v5167_v26 = vrot.slane %v4506_v12, 5 }
 0x391   : > { %v5165_v54 = vrot.slane %v4504_v4, 6  ;;  %v5169_v50 = vrot.slane %v4508_v47, 4  ;;  %v5171_v24 = vrot.slane %v4510_v5, 3  ;;  %v5173_v11 = vrot.slane %v4512_v32, 2 }
 0x392   : > { %v5164_v23 = vsel %vm4821_vm4, %v5163_v9, %v4500_v61  ;;  %v3733_v21 = vrot.slane %v10266_v48, 3  ;;  %v3735_v29 = vrot.slane %v10266_v48, 4  ;;  %v3737_v7 = vrot.slane %v10266_v48, 5 }
 0x393   : > { %v5166_v59 = vsel %vm4824_vm5, %v5165_v54, %v5164_v23  ;;  %v3739_v44 = vrot.slane %v10266_v48, 6  ;;  %v3741_v31 = vrot.slane %v10266_v48, 7  ;;  %v10360_v18 = vrot.slane %v10266_v48, 1 }
 0x394   : > { %v5168_v13 = vsel %vm4827_vm6, %v5167_v26, %v5166_v59  ;;  %v10362_v42 = vrot.slane %v10266_v48, 2  ;;  %v4239_v0 = vadd.f32 %v3733_v21, %v10363_v27  ;;  %v4241_v63 = vadd.f32 %v3735_v29, %v10364_v34 }
 0x395   : > { %v4235_v38 = vadd.f32 %v10360_v18, %v10359_v46  ;;  %v5170_v40 = vsel %vm4830_vm7, %v5169_v50, %v5168_v13  ;;  %v4243_v3 = vadd.f32 %v3737_v7, %v10365_v25  ;;  %v4245_v36 = vadd.f32 %v3739_v44, %v10366_v45  ;;  %v10368_v7 = vld [vmem:[#allocation203_spill] sm:$0xff]  ;;  %v10370_v13 = vld [vmem:[#allocation122_spill] sm:$0xff]  ;;  %v10376_v45 = vld [vmem:[#allocation220_spill] sm:$0xff] }
 0x396   : > { %v4237_v57 = vadd.f32 %v10362_v42, %v10361_v33  ;;  %v5172_v39 = vsel %vm4833_vm8, %v5171_v24, %v5170_v40  ;;  %v5175_v1 = vrot.slane %v4514_v28, 1  ;;  %v4247_v8 = vadd.f32 %v3741_v31, %v10367_v20  ;;  %v10372_v33 = vld [vmem:[#allocation215_spill] sm:$0xff] }
 0x397   : > { %v4503_v6 = vadd.f32 %v8202_v49, %v4235_v38  ;;  %v5174_v48 = vsel %vm4836_vm9, %v5173_v11, %v5172_v39  ;;  %v4507_v4 = vadd.f32 %v8202_v49, %v4239_v0  ;;  %v4509_v12 = vadd.f32 %v8202_v49, %v4241_v63  ;;  %v10374_v0 = vld [vmem:[#allocation129_spill] sm:$0xff]  ;;  %v10375_v25 = vld [vmem:[#allocation63_spill] sm:$0xff] }
 0x398   : > { %v4505_v62 = vadd.f32 %v8202_v49, %v4237_v57  ;;  %v5176_v60 = vsel %vm4839_vm10, %v5175_v1, %v5174_v48  ;;  %v4501_v47 = vadd.f32 %v8202_v49, %v8892_v43  ;;  %v4511_v5 = vadd.f32 %v8202_v49, %v4243_v3  ;;  %v10373_v57 = vld [vmem:[#allocation146_spill] sm:$0xff] }
 0x399   : > { %v4513_v32 = vadd.f32 %v8202_v49, %v4245_v36  ;;  %5319 = vxpose.xlu0.b32.cont [13/16] %v5176_v60, 128  ;;  %v4515_v51 = vadd.f32 %v8202_v49, %v4247_v8  ;;  %v5177_v61 = vrot.slane %v4503_v6, 7  ;;  %v5181_v54 = vrot.slane %v4507_v4, 5 }
 0x39a   : > { %v5179_v9 = vrot.slane %v4505_v62, 6  ;;  %v5183_v28 = vrot.slane %v4509_v12, 4  ;;  %v5185_v26 = vrot.slane %v4511_v5, 3  ;;  %v3746_v24 = vrot.slane %v10269_v58, 3 }
 0x39b   : > { %v5187_v50 = vrot.slane %v4513_v32, 2  ;;  %v5178_v23 = vsel %vm4821_vm4, %v5177_v61, %v4501_v47  ;;  %v3748_v11 = vrot.slane %v10269_v58, 4  ;;  %v3750_v43 = vrot.slane %v10269_v58, 5 }
 0x39c   : > { %v3752_v21 = vrot.slane %v10269_v58, 6  ;;  %v5180_v29 = vsel %vm4824_vm5, %v5179_v9, %v5178_v23  ;;  %v3754_v59 = vrot.slane %v10269_v58, 7  ;;  %v10369_v44 = vrot.slane %v10269_v58, 1 }
 0x39d   : > { %v10371_v46 = vrot.slane %v10269_v58, 2  ;;  %v5182_v38 = vsel %vm4827_vm6, %v5181_v54, %v5180_v29  ;;  %v4254_v42 = vadd.f32 %v3746_v24, %v10372_v33  ;;  %v4256_v27 = vadd.f32 %v3748_v11, %v10373_v57  ;;  %v10383_v33 = vld [vmem:[#allocation56_spill] sm:$0xff]  ;;  %v10384_v57 = vld [vmem:[#allocation219_spill] sm:$0xff] }
 0x39e   : > { %v4250_v31 = vadd.f32 %v10369_v44, %v10368_v7  ;;  %v4258_v40 = vadd.f32 %v3750_v43, %v10374_v0  ;;  %v5184_v34 = vsel %vm4830_vm7, %v5183_v28, %v5182_v38  ;;  %v5189_v63 = vrot.slane %v4515_v51, 1  ;;  %v10377_v43 = vld [vmem:[#allocation112_spill] sm:$0xff] }
 0x39f   : > { %v4252_v18 = vadd.f32 %v10371_v46, %v10370_v13  ;;  %v4260_v3 = vadd.f32 %v3752_v21, %v10375_v25  ;;  %v4262_v36 = vadd.f32 %v3754_v59, %v10376_v45  ;;  %v5186_v39 = vsel %vm4833_vm8, %v5185_v26, %v5184_v34  ;;  %v10379_v59 = vld [vmem:[#allocation214_spill] sm:$0xff]  ;;  %v10385_v34 = vld [vmem:[#allocation136_spill] sm:$0xff] }
 0x3a0   : > { %v4518_v58 = vadd.f32 %v8174_v14, %v4250_v31  ;;  %v4522_v20 = vadd.f32 %v8174_v14, %v4254_v42  ;;  %v5188_v8 = vsel %vm4836_vm9, %v5187_v50, %v5186_v39  ;;  %v4524_v6 = vadd.f32 %v8174_v14, %v4256_v27  ;;  %v10381_v31 = vld [vmem:[#allocation123_spill] sm:$0xff] }
 0x3a1   : > { %v4520_v1 = vadd.f32 %v8174_v14, %v4252_v18  ;;  %v4526_v48 = vadd.f32 %v8174_v14, %v4258_v40  ;;  %v4528_v62 = vadd.f32 %v8174_v14, %v4260_v3  ;;  %v5190_v4 = vsel %vm4839_vm10, %v5189_v63, %v5188_v8  ;;  %v10382_v18 = vld [vmem:[#allocation126_spill] sm:$0xff] }
 0x3a2   : > { %v4516_v12 = vadd.f32 %v8174_v14, %v8904_v52  ;;  %v5191_v60 = vrot.slane %v4518_v58, 7  ;;  %5351 = vxpose.xlu1.b32.cont [13/16] (narrow) %v5190_v4, 32  ;;  %v4530_v5 = vadd.f32 %v8174_v14, %v4262_v36  ;;  %v5195_v32 = vrot.slane %v4522_v20, 5 }
 0x3a3   : > { %v5193_v47 = vrot.slane %v4520_v1, 6  ;;  %v5197_v51 = vrot.slane %v4524_v6, 4  ;;  %v5199_v61 = vrot.slane %v4526_v48, 3  ;;  %v5201_v54 = vrot.slane %v4528_v62, 2 }
 0x3a4   : > { %v5192_v9 = vsel %vm4821_vm4, %v5191_v60, %v4516_v12  ;;  %v3747_v28 = vrot.slane %v10272_v19, 3  ;;  %v3749_v26 = vrot.slane %v10272_v19, 4  ;;  %v3751_v24 = vrot.slane %v10272_v19, 5 }
 0x3a5   : > { %v5194_v50 = vsel %vm4824_vm5, %v5193_v47, %v5192_v9  ;;  %v3753_v52 = vrot.slane %v10272_v19, 6  ;;  %v3755_v23 = vrot.slane %v10272_v19, 7  ;;  %v10378_v21 = vrot.slane %v10272_v19, 1 }
 0x3a6   : > { %v5196_v11 = vsel %vm4827_vm6, %v5195_v32, %v5194_v50  ;;  %v10380_v7 = vrot.slane %v10272_v19, 2  ;;  %v4255_v13 = vadd.f32 %v3747_v28, %v10381_v31  ;;  %v4257_v38 = vadd.f32 %v3749_v26, %v10382_v18  ;;  %v10388_v50 = vld [vmem:[#allocation81_spill] sm:$0xff]  ;;  %v10394_v18 = vld [vmem:[#allocation230_spill] sm:$0xff] }
 0x3a7   : > { %v4251_v29 = vadd.f32 %v10378_v21, %v10377_v43  ;;  %v5198_v46 = vsel %vm4830_vm7, %v5197_v51, %v5196_v11  ;;  %v4259_v42 = vadd.f32 %v3751_v24, %v10383_v33  ;;  %v4261_v27 = vadd.f32 %v3753_v52, %v10384_v57  ;;  %v10390_v11 = vld [vmem:[#allocation68_spill] sm:$0xff]  ;;  %v10391_v21 = vld [vmem:[#allocation83_spill] sm:$0xff] }
 0x3a8   : > { %v4253_v44 = vadd.f32 %v10380_v7, %v10379_v59  ;;  %v5200_v0 = vsel %vm4833_vm8, %v5199_v61, %v5198_v46  ;;  %v5203_v40 = vrot.slane %v4530_v5, 1  ;;  %v4263_v63 = vadd.f32 %v3755_v23, %v10385_v34  ;;  %v10392_v59 = vld [vmem:[#allocation80_spill] sm:$0xff] }
 0x3a9   : > { %v4519_v25 = vadd.f32 %v8202_v49, %v4251_v29  ;;  %v5202_v19 = vsel %vm4836_vm9, %v5201_v54, %v5200_v0  ;;  %v4523_v45 = vadd.f32 %v8202_v49, %v4255_v13  ;;  %v4525_v36 = vadd.f32 %v8202_v49, %v4257_v38  ;;  %v10386_v54 = vld [vmem:[#allocation224_spill] sm:$0xff]  ;;  %v10393_v13 = vld [vmem:[#allocation229_spill] sm:$0xff] }
 0x3aa   : > { %v4521_v3 = vadd.f32 %v8202_v49, %v4253_v44  ;;  %v5204_v39 = vsel %vm4839_vm10, %v5203_v40, %v5202_v19  ;;  %v4517_v58 = vadd.f32 %v8202_v49, %v8914_v30  ;;  %v4527_v1 = vadd.f32 %v8202_v49, %v4259_v42 }
 0x3ab   : > { %v4529_v20 = vadd.f32 %v8202_v49, %v4261_v27  ;;  %5320 = vxpose.xlu0.b32.cont [14/16] %v5204_v39, 128  ;;  %v4531_v8 = vadd.f32 %v8202_v49, %v4263_v63  ;;  %v5205_v6 = vrot.slane %v4519_v25, 7  ;;  %v5209_v62 = vrot.slane %v4523_v45, 5 }
 0x3ac   : > { %v5207_v48 = vrot.slane %v4521_v3, 6  ;;  %v5211_v4 = vrot.slane %v4525_v36, 4  ;;  %v5213_v12 = vrot.slane %v4527_v1, 3  ;;  %v3760_v47 = vrot.slane %v10275_v17, 3 }
 0x3ad   : > { %v5215_v60 = vrot.slane %v4529_v20, 2  ;;  %v5206_v5 = vsel %vm4821_vm4, %v5205_v6, %v4517_v58  ;;  %v3762_v32 = vrot.slane %v10275_v17, 4  ;;  %v3764_v30 = vrot.slane %v10275_v17, 5 }
 0x3ae   : > { %v3766_v51 = vrot.slane %v10275_v17, 6  ;;  %v5208_v61 = vsel %vm4824_vm5, %v5207_v48, %v5206_v5  ;;  %v3768_v9 = vrot.slane %v10275_v17, 7  ;;  %v10387_v28 = vrot.slane %v10275_v17, 1 }
 0x3af   : > { %v10389_v24 = vrot.slane %v10275_v17, 2  ;;  %v5210_v23 = vsel %vm4827_vm6, %v5209_v62, %v5208_v61  ;;  %v4270_v43 = vadd.f32 %v3760_v47, %v10390_v11  ;;  %v4272_v29 = vadd.f32 %v3762_v32, %v10391_v21  ;;  %v10397_v32 = vld [vmem:[#allocation67_spill] sm:$0xff]  ;;  %v10399_v61 = vld [vmem:[#allocation148_spill] sm:$0xff] }
 0x3b0   : > { %v4266_v26 = vadd.f32 %v10387_v28, %v10386_v54  ;;  %v4274_v7 = vadd.f32 %v3764_v30, %v10392_v59  ;;  %v5212_v44 = vsel %vm4830_vm7, %v5211_v4, %v5210_v23  ;;  %v5217_v31 = vrot.slane %v4531_v8, 1  ;;  %v10400_v28 = vld [vmem:[#allocation79_spill] sm:$0xff] }
 0x3b1   : > { %v4268_v52 = vadd.f32 %v10389_v24, %v10388_v50  ;;  %v4276_v46 = vadd.f32 %v3766_v51, %v10393_v13  ;;  %v4278_v38 = vadd.f32 %v3768_v9, %v10394_v18  ;;  %v5214_v33 = vsel %vm4833_vm8, %v5213_v12, %v5212_v44  ;;  %v10401_v50 = vld [vmem:[#allocation227_spill] sm:$0xff] }
 0x3b2   : > { %v4534_v17 = vadd.f32 %v8174_v14, %v4266_v26  ;;  %v4538_v57 = vadd.f32 %v8174_v14, %v4270_v43  ;;  %v5216_v27 = vsel %vm4836_vm9, %v5215_v60, %v5214_v33  ;;  %v4540_v0 = vadd.f32 %v8174_v14, %v4272_v29  ;;  %v10395_v60 = vld [vmem:[#allocation147_spill] sm:$0xff] }
 0x3b3   : > { %v4536_v42 = vadd.f32 %v8174_v14, %v4268_v52  ;;  %v4542_v40 = vadd.f32 %v8174_v14, %v4274_v7  ;;  %v4544_v34 = vadd.f32 %v8174_v14, %v4276_v46  ;;  %v5218_v63 = vsel %vm4839_vm10, %v5217_v31, %v5216_v27  ;;  %v10402_v52 = vld [vmem:[#allocation85_spill] sm:$0xff]  ;;  %v10403_v21 = vld [vmem:[#allocation171_spill] sm:$0xff] }
 0x3b4   : > { %v4532_v25 = vadd.f32 %v8174_v14, %v8923_v16  ;;  %v5219_v19 = vrot.slane %v4534_v17, 7  ;;  %5352 = vxpose.xlu1.b32.cont [14/16] (narrow) %v5218_v63, 32  ;;  %v4546_v45 = vadd.f32 %v8174_v14, %v4278_v38  ;;  %v5223_v36 = vrot.slane %v4538_v57, 5 }
 0x3b5   : > { %v5221_v3 = vrot.slane %v4536_v42, 6  ;;  %v5225_v39 = vrot.slane %v4540_v0, 4  ;;  %v5227_v58 = vrot.slane %v4542_v40, 3  ;;  %v5229_v20 = vrot.slane %v4544_v34, 2 }
 0x3b6   : > { %v5220_v1 = vsel %vm4821_vm4, %v5219_v19, %v4532_v25  ;;  %v3761_v8 = vrot.slane %v10277_v10, 3  ;;  %v3763_v6 = vrot.slane %v10277_v10, 4  ;;  %v3765_v62 = vrot.slane %v10277_v10, 5 }
 0x3b7   : > { %v5222_v48 = vsel %vm4824_vm5, %v5221_v3, %v5220_v1  ;;  %v3767_v16 = vrot.slane %v10277_v10, 6  ;;  %v3769_v4 = vrot.slane %v10277_v10, 7  ;;  %v10396_v47 = vrot.slane %v10277_v10, 1  ;;  %v10406_v1 = vld [vmem:[#allocation184_spill] sm:$0xff] }
 0x3b8   : > { %v5224_v12 = vsel %vm4827_vm6, %v5223_v36, %v5222_v48  ;;  %v10398_v30 = vrot.slane %v10277_v10, 2  ;;  %v4271_v9 = vadd.f32 %v3761_v8, %v10399_v61  ;;  %v4273_v26 = vadd.f32 %v3763_v6, %v10400_v28  ;;  %v10404_v36 = vld [vmem:[#allocation95_spill] sm:$0xff]  ;;  %v10407_v6 = vld [vmem:[#allocation190_spill] sm:$0xff] }
 0x3b9   : > { %v4267_v5 = vadd.f32 %v10396_v47, %v10395_v60  ;;  %v5226_v54 = vsel %vm4830_vm7, %v5225_v39, %v5224_v12  ;;  %v4275_v24 = vadd.f32 %v3765_v62, %v10401_v50  ;;  %v4277_v23 = vadd.f32 %v3767_v16, %v10402_v52  ;;  %v10408_v62 = vld [vmem:[#allocation101_spill] sm:$0xff] }
 0x3ba   : > { %v4269_v51 = vadd.f32 %v10398_v30, %v10397_v32  ;;  %v5228_v11 = vsel %vm4833_vm8, %v5227_v58, %v5226_v54  ;;  %v5231_v43 = vrot.slane %v4546_v45, 1  ;;  %v4279_v29 = vadd.f32 %v3769_v4, %v10403_v21  ;;  %v10409_v4 = vld [vmem:[#allocation236_spill] sm:$0xff]  ;;  %v10411_v30 = vld [vmem:[#allocation42_spill] sm:$0xff] }
 0x3bb   : > { %v4535_v59 = vadd.f32 %v8202_v49, %v4267_v5  ;;  %v5230_v10 = vsel %vm4836_vm9, %v5229_v20, %v5228_v11  ;;  %v4539_v44 = vadd.f32 %v8202_v49, %v4271_v9  ;;  %v4541_v31 = vadd.f32 %v8202_v49, %v4273_v26  ;;  %v10410_v5 = vld [vmem:[#allocation239_spill] sm:$0xff] }
 0x3bc   : > { %v4537_v7 = vadd.f32 %v8202_v49, %v4269_v51  ;;  %v5232_v13 = vsel %vm4839_vm10, %v5231_v43, %v5230_v10  ;;  %v4533_v46 = vadd.f32 %v8202_v49, %v8937_v35  ;;  %v4543_v18 = vadd.f32 %v8202_v49, %v4275_v24 }
 0x3bd   : > { %v4545_v38 = vadd.f32 %v8202_v49, %v4277_v23  ;;  %5321 = vxpose.xlu0.b32.cont [15/16] %v5232_v13, 128  ;;  %v4547_v33 = vadd.f32 %v8202_v49, %v4279_v29  ;;  %v5233_v17 = vrot.slane %v4535_v59, 7  ;;  %v5237_v57 = vrot.slane %v4539_v44, 5 }
 0x3be   : > { %v5235_v42 = vrot.slane %v4537_v7, 6  ;;  %v5239_v27 = vrot.slane %v4541_v31, 4  ;;  %v5241_v0 = vrot.slane %v4543_v18, 3  ;;  %v3774_v34 = vrot.slane %v10280_v55, 3 }
 0x3bf   : > { %v5243_v40 = vrot.slane %v4545_v38, 2  ;;  %v5234_v63 = vsel %vm4821_vm4, %v5233_v17, %v4533_v46  ;;  %v3776_v25 = vrot.slane %v10280_v55, 4  ;;  %v3778_v35 = vrot.slane %v10280_v55, 5 }
 0x3c0   : > { %v3780_v19 = vrot.slane %v10280_v55, 6  ;;  %v5236_v3 = vsel %vm4824_vm5, %v5235_v42, %v5234_v63  ;;  %v3782_v45 = vrot.slane %v10280_v55, 7  ;;  %v10405_v39 = vrot.slane %v10280_v55, 1  ;;  %v10415_v42 = vld [vmem:[#allocation238_spill] sm:$0xff]  ;;  %v10417_v63 = vld [vmem:[#allocation240_spill] sm:$0xff] }
 0x3c1   : > { %v4284_v20 = vadd.f32 %v3772_v2, %v10406_v1  ;;  %v5238_v8 = vsel %vm4827_vm6, %v5237_v57, %v5236_v3  ;;  %v4286_v48 = vadd.f32 %v3774_v34, %v10407_v6  ;;  %v4288_v16 = vadd.f32 %v3776_v25, %v10408_v62 }
 0x3c2   : > { %v4282_v58 = vadd.f32 %v10405_v39, %v10404_v36  ;;  %v4290_v12 = vadd.f32 %v3778_v35, %v10409_v4  ;;  %v5240_v60 = vsel %vm4830_vm7, %v5239_v27, %v5238_v8  ;;  %v5245_v47 = vrot.slane %v4547_v33, 1  ;;  %v10414_v33 = vld [vmem:[#allocation233_spill] sm:$0xff]  ;;  %v10416_v27 = vld [vmem:[#allocation31_spill] sm:$0xff] }
 0x3c3   : > { %v4292_v32 = vadd.f32 %v3780_v19, %v10410_v5  ;;  %v4294_v51 = vadd.f32 %v3782_v45, %v10411_v30  ;;  %v5242_v61 = vsel %vm4833_vm8, %v5241_v0, %v5240_v60  ;;  %v4552_v2 = vadd.f32 %v8174_v14, %v4284_v20 }
 0x3c4   : > { %v4550_v55 = vadd.f32 %v8174_v14, %v4282_v58  ;;  %v4554_v9 = vadd.f32 %v8174_v14, %v4286_v48  ;;  %v5244_v54 = vsel %vm4836_vm9, %v5243_v40, %v5242_v61  ;;  %v4556_v28 = vadd.f32 %v8174_v14, %v4288_v16 }
 0x3c5   : > { %v4558_v26 = vadd.f32 %v8174_v14, %v4290_v12  ;;  %v4560_v50 = vadd.f32 %v8174_v14, %v4292_v32  ;;  %v5246_v24 = vsel %vm4839_vm10, %v5245_v47, %v5244_v54  ;;  %v4548_v52 = vadd.f32 %v8174_v14, %v8946_v15  ;;  %v10412_v15 = vld [vmem:[#allocation120_spill] sm:$0xff] }
 0x3c6   : > { %v5247_v23 = vrot.slane %v4550_v55, 7  ;;  %v5249_v11 = vrot.slane %v4552_v2, 6  ;;  %5353 = vxpose.xlu1.b32.cont [15/16] (narrow) %v5246_v24, 32  ;;  %v4562_v43 = vadd.f32 %v8174_v14, %v4294_v51  ;;  %v5251_v21 = vrot.slane %v4554_v9, 5 }
 0x3c7   : > { %v5253_v29 = vrot.slane %v4556_v28, 4  ;;  %v5255_v59 = vrot.slane %v4558_v26, 3  ;;  %v5257_v7 = vrot.slane %v4560_v50, 2  ;;  %v3779_v44 = vrot.slane %v10283_v22, 5 }
 0x3c8   : > { %v5248_v10 = vsel %vm4821_vm4, %v5247_v23, %v4548_v52  ;;  %v3781_v31 = vrot.slane %v10283_v22, 6  ;;  %v3783_v46 = vrot.slane %v10283_v22, 7  ;;  %v10413_v18 = vrot.slane %v10283_v22, 3 }
 0x3c9   : > { %v5250_v13 = vsel %vm4824_vm5, %v5249_v11, %v5248_v10  ;;  %v4289_v14 = vadd.f32 %v3777_v56, %v10414_v33  ;;  %v4291_v57 = vadd.f32 %v3779_v44, %v10415_v42  ;;  %v4551_v40 = vadd.f32 %v8202_v49, %v8960_v41 }
 0x3ca   : > { %v4287_v38 = vadd.f32 %v10413_v18, %v10412_v15  ;;  %v5252_v17 = vsel %vm4827_vm6, %v5251_v21, %v5250_v13  ;;  %v4293_v0 = vadd.f32 %v3781_v31, %v10416_v27  ;;  %v4295_v25 = vadd.f32 %v3783_v46, %v10417_v63 }
 0x3cb   : > { %v5254_v34 = vsel %vm4830_vm7, %v5253_v29, %v5252_v17  ;;  %v4553_v35 = vadd.f32 %v8202_v49, %v8964_v37  ;;  %v4549_v22 = vadd.f32 %v8202_v49, %v8957_v53  ;;  %v5259_v3 = vrot.slane %v4562_v43, 1 }
 0x3cc   : > { %v4555_v19 = vadd.f32 %v8202_v49, %v4287_v38  ;;  %v5256_v56 = vsel %vm4833_vm8, %v5255_v59, %v5254_v34  ;;  %v4557_v45 = vadd.f32 %v8202_v49, %v4289_v14  ;;  %v4559_v41 = vadd.f32 %v8202_v49, %v4291_v57 }
 0x3cd   : > { %v5258_v36 = vsel %vm4836_vm9, %v5257_v7, %v5256_v56  ;;  %v5261_v39 = vrot.slane %v4551_v40, 7  ;;  %v5263_v58 = vrot.slane %v4553_v35, 6  ;;  %v4561_v37 = vadd.f32 %v8202_v49, %v4293_v0 }
 0x3ce   : > { %v5260_v1 = vsel %vm4839_vm10, %v5259_v3, %v5258_v36  ;;  %v4563_v20 = vadd.f32 %v8202_v49, %v4295_v25  ;;  %v5265_v8 = vrot.slane %v4555_v19, 5  ;;  %v5267_v48 = vrot.slane %v4557_v45, 4 }
 0x3cf   : > { %5322 = vxpose.xlu0.b32.end [16/16] %v5260_v1, 128  ;;  %v5262_v53 = vsel %vm4821_vm4, %v5261_v39, %v4549_v22  ;;  %v5269_v16 = vrot.slane %v4559_v41, 3  ;;  %v5271_v12 = vrot.slane %v4561_v37, 2 }
 0x3d0   : > { %v5264_v6 = vsel %vm4824_vm5, %v5263_v58, %v5262_v53  ;;  %v5273_v47 = vrot.slane %v4563_v20, 1 }
 0x3d1   : > { %v5266_v62 = vsel %vm4827_vm6, %v5265_v8, %v5264_v6 }
 0x3d2   : > { %v5268_v4 = vsel %vm4830_vm7, %v5267_v48, %v5266_v62 }
 0x3d3   : > { %v5270_v60 = vsel %vm4833_vm8, %v5269_v16, %v5268_v4 }
 0x3d4   : > { %v5272_v5 = vsel %vm4836_vm9, %v5271_v12, %v5270_v60 }
 0x3d5   : > { %v5274_v32 = vsel %vm4839_vm10, %v5273_v47, %v5272_v5 }
 0x3d6   : > { %5354 = vxpose.xlu1.b32.end [16/16] (narrow) %v5274_v32, 32 }
 0x413   : > { %v5323_v49 = vpop.trf.xlu0 }
 0x414   : > { %v5783_v28 = vmul.f32 -1.442695, %v5323_v49 }
 0x417   : > { %v5324_v30 = vpop.trf.xlu0 }
 0x418   : > { %v5784_v24 = vmul.f32 -1.442695, %v5324_v30 }
 0x41a   : > { %v5355_v40 = vpop.trf.xlu1 }
 0x41b   : > { %v5325_v51 = vpop.trf.xlu0 }
 0x41c   : > { %v5785_v11 = vmul.f32 -1.442695, %v5325_v51 }
 0x41e   : > { %v5356_v41 = vpop.trf.xlu1 }
 0x41f   : > { %v5326_v61 = vpop.trf.xlu0 }
 0x420   : > { %v5786_v29 = vmul.f32 -1.442695, %v5326_v61 }
 0x422   : > { %v5357_v12 = vpop.trf.xlu1 }
 0x423   : > { %v5327_v55 = vpop.trf.xlu0 }
 0x424   : > { %v5787_v54 = vmul.f32 -1.442695, %v5327_v55 }
 0x426   : > { %5953 = vpow2.f32 %v5787_v54 }
 0x427   : > { %v5328_v2 = vpop.trf.xlu0  ;;  %5955 = vpow2.f32 %v5783_v28  ;;  %v5358_v28 = vpop.trf.xlu1 }
 0x428   : > { %v5788_v50 = vmul.f32 -1.442695, %v5328_v2 }
 0x42a   : > { %5957 = vpow2.f32 %v5788_v50 }
 0x42b   : > { %v5329_v9 = vpop.trf.xlu0  ;;  %5959 = vpow2.f32 %v5784_v24 }
 0x42c   : > { %v5789_v23 = vmul.f32 -1.442695, %v5329_v9 }
 0x42e   : > { %5961 = vpow2.f32 %v5789_v23 }
 0x42f   : > { %v5330_v26 = vpop.trf.xlu0  ;;  %5963 = vpow2.f32 %v5785_v11 }
 0x430   : > { %v5790_v21 = vmul.f32 -1.442695, %v5330_v26  ;;  %v5954_v59 = vpop.eup %5953 }
 0x431   : > { %v5956_v7 = vpop.eup %5955  ;;  %v5407_v31 = vadd.f32 1.0, %v5954_v59 }
 0x432   : > { %5965 = vpow2.f32 %v5790_v21  ;;  %v5383_v46 = vadd.f32 1.0, %v5956_v7 }
 0x433   : > { %v5331_v52 = vpop.trf.xlu0  ;;  %5967 = vpow2.f32 %v5786_v29 }
 0x434   : > { %v5791_v44 = vmul.f32 -1.442695, %v5331_v52  ;;  %v5958_v13 = vpop.eup %5957 }
 0x435   : > { %v5960_v18 = vpop.eup %5959  ;;  %v5408_v33 = vadd.f32 1.0, %v5958_v13 }
 0x436   : > { %5969 = vpow2.f32 %v5791_v44  ;;  %v5384_v17 = vadd.f32 1.0, %v5960_v18 }
 0x437   : > { %v5332_v43 = vpop.trf.xlu0  ;;  %5971 = vrcp.f32 %v5407_v31 }
 0x438   : > { %v5792_v38 = vmul.f32 -1.442695, %v5332_v43  ;;  %v5962_v14 = vpop.eup %5961  ;;  %5973 = vrcp.f32 %v5383_v46 }
 0x439   : > { %v5964_v57 = vpop.eup %5963  ;;  %v5409_v0 = vadd.f32 1.0, %v5962_v14 }
 0x43a   : > { %v5385_v63 = vadd.f32 1.0, %v5964_v57 }
 0x43b   : > { %v5333_v10 = vpop.trf.xlu0 }
 0x43c   : > { %v5793_v27 = vmul.f32 -1.442695, %v5333_v10  ;;  %v5966_v34 = vpop.eup %5965 }
 0x43d   : > { %v5968_v35 = vpop.eup %5967  ;;  %v5410_v22 = vadd.f32 1.0, %v5966_v34 }
 0x43e   : > { %v5386_v3 = vadd.f32 1.0, %v5968_v35 }
 0x43f   : > { %v5334_v15 = vpop.trf.xlu0 }
 0x440   : > { %v5794_v19 = vmul.f32 -1.442695, %v5334_v15  ;;  %v5970_v56 = vpop.eup %5969 }
 0x441   : > { %v5972_v36 = vpop.eup %5971  ;;  %v5431_v1 = vadd.f32 1.0, %v5970_v56 }
 0x442   : > { %v5974_v39 = vpop.eup %5973  ;;  %v5447_v20 = vmul.f32 %v5972_v36, %v5355_v40 }
 0x443   : > { %v5335_v42 = vpop.trf.xlu0 }
 0x444   : > { %5975 = vtanh.f32 %v5335_v42 }
 0x445   : > { %5977 = vpow2.f32 %v5792_v38 }
 0x446   : > { %5979 = vrcp.f32 %v5408_v33 }
 0x447   : > { %5981 = vrcp.f32 %v5384_v17  ;;  %v5336_v25 = vpop.trf.xlu0 }
 0x448   : > { %5983 = vtanh.f32 %v5336_v25 }
 0x449   : > { %5985 = vpow2.f32 %v5793_v27 }
 0x44a   : > { %5987 = vrcp.f32 %v5409_v0 }
 0x44b   : > { %5989 = vrcp.f32 %v5385_v63  ;;  %v5337_v45 = vpop.trf.xlu0 }
 0x44c   : > { %5991 = vtanh.f32 %v5337_v45 }
 0x44d   : > { %5993 = vpow2.f32 %v5794_v19 }
 0x44e   : > { %v5976_v58 = vpop.eup %5975  ;;  %5995 = vrcp.f32 %v5410_v22 }
 0x44f   : > { %v5978_v37 = vpop.eup %5977  ;;  %5997 = vrcp.f32 %v5386_v3  ;;  %v5451_v53 = vmul.f32 %v5976_v58, %v5974_v39  ;;  %v5338_v8 = vpop.trf.xlu0 }
 0x450   : > { %v5980_v6 = vpop.eup %5979  ;;  %5999 = vtanh.f32 %v5338_v8  ;;  %v5432_v4 = vadd.f32 1.0, %v5978_v37 }
 0x451   : > { %v5982_v48 = vpop.eup %5981  ;;  %v5455_v62 = vadd.f32 %v5451_v53, %v5447_v20  ;;  %6001 = vrcp.f32 %v5431_v1  ;;  %v5448_v47 = vmul.f32 %v5980_v6, %v5356_v41 }
 0x452   : > { %v5984_v16 = vpop.eup %5983 }
 0x453   : > { %v5986_v60 = vpop.eup %5985  ;;  %6003 = vtanh.f32 %v5455_v62  ;;  %5467 = vst [vmem:[%s9453_s14] sm:$0xff] %v5455_v62  ;;  %v5452_v5 = vmul.f32 %v5984_v16, %v5982_v48 }
 0x454   : > { %v5988_v32 = vpop.eup %5987  ;;  %6005 = vrcp.f32 %v5432_v4  ;;  %v5433_v61 = vadd.f32 1.0, %v5986_v60 }
 0x455   : > { %v5990_v49 = vpop.eup %5989  ;;  %v5456_v30 = vadd.f32 %v5452_v5, %v5448_v47  ;;  %v5449_v2 = vmul.f32 %v5988_v32, %v5357_v12 }
 0x456   : > { %v5992_v51 = vpop.eup %5991 }
 0x457   : > { %v5994_v55 = vpop.eup %5993  ;;  %6007 = vtanh.f32 %v5456_v30  ;;  %5468 = vst [vmem:[%s9453_s14 + $0x8] sm:$0xff] %v5456_v30  ;;  %v5453_v9 = vmul.f32 %v5992_v51, %v5990_v49 }
 0x458   : > { %v5996_v54 = vpop.eup %5995  ;;  %6009 = vrcp.f32 %v5433_v61  ;;  %v5434_v52 = vadd.f32 1.0, %v5994_v55 }
 0x459   : > { %v5998_v26 = vpop.eup %5997  ;;  %v5457_v50 = vadd.f32 %v5453_v9, %v5449_v2  ;;  %v5450_v23 = vmul.f32 %v5996_v54, %v5358_v28 }
 0x45a   : > { %v6000_v24 = vpop.eup %5999 }
 0x45b   : > { %6011 = vtanh.f32 %v5457_v50  ;;  %5469 = vst [vmem:[%s9453_s14 + $0x10] sm:$0xff] %v5457_v50  ;;  %v5454_v11 = vmul.f32 %v6000_v24, %v5998_v26  ;;  %v6002_v43 = vpop.eup %6001 }
 0x45c   : > { %6013 = vrcp.f32 %v5434_v52 }
 0x45d   : > { %v6004_v21 = vpop.eup %6003  ;;  %v5458_v29 = vadd.f32 %v5454_v11, %v5450_v23 }
 0x45e   : > { %v5463_v59 = vmul.f32 %v6004_v21, %v6002_v43  ;;  %v6006_v10 = vpop.eup %6005 }
 0x45f   : > { %6015 = vtanh.f32 %v5458_v29  ;;  %5470 = vst [vmem:[%s9453_s14 + $0x18] sm:$0xff] %v5458_v29 }
 0x460   : > { %5471 = vst [vmem:[%s9472_s26] sm:$0xff] %v5463_v59 }
 0x461   : > { %6030 = shalt.err (!%p6027_p3)
}
 0x462   : > { %s6031_s29 = scalar_lea.hbm %s9465_s20, 512  ;;  %s6035_s18 = scalar_lea.hbm %s9565_s6, 1024 }
 0x463   : > { %p6032_p4 = scmp.ne.s32.totalorder %s9465_s20, %s6031_s29  ;;  %p6036_p9 = scmp.lt.u32.totalorder %s9465_s20, %s9565_s6 }
 0x464   : > { %p6037_p10 = scmp.lt.u32.totalorder %s6035_s18, %s6031_s29  ;;  %p6039_p12 = scmp.lt.u32.totalorder %s6031_s29, %s9465_s20 }
 0x465   : > { %p6033_p7 = pnand %p6032_p4, %p6191_p5 }
 0x466   : > { %p6038_p11 = por %p6037_p10, %p6036_p9 }
 0x467   : > { %p6034_p8 = pneg %p6033_p7 }
 0x468   : > { %p6040_p13 = por %p6039_p12, %p6038_p11 }
 0x46a   : > { %p6041_p0 = pnand %p6040_p13, %p6034_p8 }
 0x46c   : > { %6044 = shalt.err (!%p6041_p0)
}
 0x46d   : > { %s6115_s9 = smov 128   ;;  %s6116_s11 = smov 8   ;;  %v6008_v7 = vpop.eup %6007 }
 0x46e   : > { %5818 = dma.vmem_to_hbm [thread:$0]  (%p6191_p5), %s9467_s16, 512, %s9465_s20, %s5481_s28, %s6115_s9, %s6115_s9, %s6116_s11   ;;  %v5464_v44 = vmul.f32 %v6008_v7, %v6006_v10  ;;  %v6010_v31 = vpop.eup %6009 }
 0x46f   : > { %v6012_v13 = vpop.eup %6011  ;;  %s5494_s17 = sshll.u32 %s9472_s26, 4  ;;  %s9510_s14 = scalar_lea.hbm %s9564_s5, %s5805_s15  ;;  %s9512_s17 = int_to_ptr.vmem [resolvable:$true] %s5494_s17 }
 0x470   : > { %5472 = vst [vmem:[%s9472_s26 + $0x8] sm:$0xff] %v5464_v44  ;;  %v5465_v46 = vmul.f32 %v6012_v13, %v6010_v31  ;;  %v6014_v15 = vpop.eup %6013  ;;  %s5476_s16 = scalar_lea.sflag [#allocation3], %s9448_s12  ;;  %s6045_s20 = scalar_lea.vmem %s9512_s17, 512 }
 0x471   : > { %v6016_v18 = vpop.eup %6015  ;;  %p6046_p1 = scmp.ne.s32.totalorder %s9512_s17, %s6045_s20  ;;  %s6117_s28 = smov [#allocation2]  }
 0x472   : > { %5473 = vst [vmem:[%s9472_s26 + $0x10] sm:$0xff] %v5465_v46  ;;  %v5466_v38 = vmul.f32 %v6016_v18, %v6014_v15  ;;  %s6049_s18 = sshll.u32 %s6117_s28, 4  ;;  %s6050_s18 = int_to_ptr.vmem [resolvable:$false] %s6049_s18 }
 0x473   : > { %p6047_p2 = pnand %p6046_p1, %p6191_p5  ;;  %s6051_s25 = scalar_lea.vmem %s6050_s18, 1024 }
 0x474   : > { %5474 = vst [vmem:[%s9472_s26 + $0x18] sm:$0xff] %v5466_v38  ;;  %p6052_p4 = scmp.lt.s32.totalorder %s9512_s17, %s6050_s18  ;;  %p6053_p7 = scmp.lt.s32.totalorder %s6051_s25, %s6045_s20 }
 0x475   : > { %p6048_p3 = pneg %p6047_p2 }
 0x476   : > { %p6054_p8 = por %p6053_p7, %p6052_p4 }
 0x478   : > { %p6055_p9 = pnand %p6054_p8, %p6048_p3 }
 0x47a   : > { %6058 = shalt.err (!%p6055_p9)
}
 0x47b   : > { %s6059_s15 = scalar_lea.hbm %s9510_s14, 512  ;;  %s6063_s10 = scalar_lea.hbm %s9564_s5, 1024 }
 0x47c   : > { %p6060_p10 = scmp.ne.s32.totalorder %s9510_s14, %s6059_s15  ;;  %p6064_p13 = scmp.lt.u32.totalorder %s9510_s14, %s9564_s5 }
 0x47d   : > { %p6065_p0 = scmp.lt.u32.totalorder %s6063_s10, %s6059_s15  ;;  %p6067_p2 = scmp.lt.u32.totalorder %s6059_s15, %s9510_s14 }
 0x47e   : > { %p6061_p11 = pnand %p6060_p10, %p6191_p5 }
 0x47f   : > { %p6066_p1 = por %p6065_p0, %p6064_p13 }
 0x480   : > { %p6062_p12 = pneg %p6061_p11 }
 0x481   : > { %p6068_p3 = por %p6067_p2, %p6066_p1 }
 0x483   : > { %p6069_p4 = pnand %p6068_p3, %p6062_p12 }
 0x485   : > { %6072 = shalt.err (!%p6069_p4)
}
 0x486   : > { %5817 = dma.vmem_to_hbm [thread:$0]  (%p6191_p5), %s9512_s17, 512, %s9510_s14, %s5476_s16, %s6115_s9, %s6115_s9, %s6116_s11  }
 0x487 PF: > { %p5828_p7 = scmp.ge.s32.totalorder %s6111_s24, 2  ;;  %s5525_s20 = sand.u32 1, %s6099_s21  }
 0x488   : > { %s5526_s28 = scalar_lea.sflag [#allocation3], %s5525_s20 }
 0x489   : > { %p5822_p8 = pnand %p5828_p7, %p6195_p6 }
 0x48b   : > { %6090 = dma.done.wait (!%p5822_p8), %s5526_s28, 512  }
 0x48c   : > { %6092 = vsyncadd (!%p5822_p8), %s5526_s28, 4294966784  ;;  %s5535_s7 = scalar_lea.sflag [#allocation5], %s5525_s20 }
 0x48d   : > { %6094 = dma.done.wait (!%p5822_p8), %s5535_s7, 512  }
 0x48e   : > { %6096 = vsyncadd (!%p5822_p8), %s5535_s7, 4294966784  ;;  %p20_p5 = scmp.ge.s32.totalorder %s6178_s27, 4   ;;  %s10418_s21 = smov %s6103_s22 }
 0x48f   : > { %s10419_s22 = smov %s6107_s23  ;;  %s10420_s23 = smov %s6189_s30 }
 0x490   : > { %s10421_s24 = smov %s6178_s27  ;;  %22 = sbr.rel (!%p20_p5) target bundleno = 5 (0x5), region = 95 }
 0x497   :  { %5540 = vsyncpa [#allocation3], 1 }
 0x498   :  { %5542 = vsyncpa [#allocation3 + $0x1], 1 }
 0x499   :  { %5543 = vsyncpa [#allocation5], 1 }
 0x49a   :  { %5545 = vsyncpa [#allocation5 + $0x1], 1 }

</bundles_post_ra>
